<compile_context>
chip_gen: v7x
topology: tpu7x:2x2x1
jax: 0.10.0
libtpu: 0.0.40
codegen_flags: <defaults>
</compile_context>

<pallas_src>
import jax
import jax.numpy as jnp
from jax import lax
from jax.experimental import pallas as pl
from jax.experimental.pallas import tpu as pltpu

F32 = jnp.float32
BF16 = jnp.bfloat16
VMEM_LIMIT = 32 * 1024 * 1024


def _round_up(x, m):
    return ((x + m - 1) // m) * m


def _row_tiles(rows, target):
    """Pick a row tile. Single full-dim block when small, otherwise `target` (mult of 8)."""
    if rows <= target:
        return rows, rows, 1
    rp = _round_up(rows, target)
    return target, rp, rp // target


# ----------------------------------------------------------------------------
# Kernel 1: GEMM (1x1 conv / im2col fallback) with fused per-channel moments
# ----------------------------------------------------------------------------
def _gemm_moments_kernel(a_ref, w_ref, o_ref, s_ref, ss_ref):
    # bf16 MXU inputs, f32 accumulation.
    y = jnp.dot(a_ref[...].astype(BF16), w_ref[...],
                preferred_element_type=jnp.float32)
    o_ref[...] = y
    # per-row-block partial sums (reduced over blocks in tiny XLA glue) -> grid stays
    # 'parallel' so both v7x TensorCores can run different row blocks.
    s_ref[...] = jnp.sum(y, axis=0, keepdims=True)[None]
    ss_ref[...] = jnp.sum(y * y, axis=0, keepdims=True)[None]


def gemm_moments(a, w_bf16):
    """a: [M, K] f32, w: [K, N] bf16 -> (y [M, N] f32, sums [G, N], sumsq [G, N])."""
    M, K = a.shape
    Nc = w_bf16.shape[1]
    TM, Mp, G = _row_tiles(M, 256)
    if Mp != M:
        a = jnp.pad(a, ((0, Mp - M), (0, 0)))     # zero rows: sums unaffected
    y, s, ss = pl.pallas_call(
        _gemm_moments_kernel,
        out_shape=(jax.ShapeDtypeStruct((Mp, Nc), F32),
                   jax.ShapeDtypeStruct((G, 1, Nc), F32),
                   jax.ShapeDtypeStruct((G, 1, Nc), F32)),
        grid=(G,),
        in_specs=[pl.BlockSpec((TM, K), lambda i: (i, 0)),
                  pl.BlockSpec((K, Nc), lambda i: (0, 0))],
        out_specs=(pl.BlockSpec((TM, Nc), lambda i: (i, 0)),
                   pl.BlockSpec((1, 1, Nc), lambda i: (i, 0, 0)),
                   pl.BlockSpec((1, 1, Nc), lambda i: (i, 0, 0))),
        compiler_params=pltpu.CompilerParams(
            dimension_semantics=("parallel",),
            vmem_limit_bytes=VMEM_LIMIT),
    )(a, w_bf16)
    if Mp != M:
        y = y[:M]
    return y, s[:, 0, :], ss[:, 0, :]


# ----------------------------------------------------------------------------
# Kernel 2: 3x3 stride-1 conv, taps read directly from VMEM-resident padded input
# (no im2col in HBM), fused per-channel moments. One grid step per batch image.
# ----------------------------------------------------------------------------
def _make_conv3x3_kernel(Ho, Wo, Wp):
    RW = Ho * Wp  # output rows including the 2 out-of-range columns per image row

    def kernel(x_ref, w_ref, o_ref, s_ref, ss_ref, acc_ref):
        # x_ref: [1, (Ho+3)*Wp, C] f32 (padded, flattened); w_ref: [3,3,C,Cout] bf16
        acc_ref[...] = jnp.zeros_like(acc_ref)
        for di in range(3):
            for dj in range(3):
                off = di * Wp + dj                       # static tap offset
                a = x_ref[0, off:off + RW, :].astype(BF16)
                acc_ref[...] += jnp.dot(a, w_ref[di, dj],
                                        preferred_element_type=jnp.float32)
        y = acc_ref[...]
        o_ref[...] = y[None]
        # mask the Wp-Wo garbage columns out of the BN statistics
        col = lax.broadcasted_iota(jnp.int32, (RW, 1), 0) % Wp
        valid = (col < Wo).astype(jnp.float32)
        yv = y * valid
        s_ref[...] = jnp.sum(yv, axis=0, keepdims=True)[None]
        ss_ref[...] = jnp.sum(yv * y, axis=0, keepdims=True)[None]

    return kernel


def conv3x3_s1_moments(x, w_bf16):
    """x: [N,H,W,C] f32, w: [3,3,C,Cout] bf16 (stride 1, pad 1).
    Returns y_wide [N, H*(W+2), Cout] (2 garbage cols per row), sums/sumsq [N, Cout]."""
    N, H, W, C = x.shape
    Cout = w_bf16.shape[-1]
    Wp = W + 2
    # pad H by (1, 2): one extra bottom row keeps every tap's contiguous slab in bounds
    xp = jnp.pad(x, ((0, 0), (1, 2), (1, 1), (0, 0)))
    xf = xp.reshape(N, (H + 3) * Wp, C)                 # free, row-major reinterpret
    RW = H * Wp
    y, s, ss = pl.pallas_call(
        _make_conv3x3_kernel(H, W, Wp),
        out_shape=(jax.ShapeDtypeStruct((N, RW, Cout), F32),
                   jax.ShapeDtypeStruct((N, 1, Cout), F32),
                   jax.ShapeDtypeStruct((N, 1, Cout), F32)),
        grid=(N,),
        in_specs=[pl.BlockSpec((1, (H + 3) * Wp, C), lambda n: (n, 0, 0)),
                  pl.BlockSpec((3, 3, C, Cout), lambda n: (0, 0, 0, 0))],
        out_specs=(pl.BlockSpec((1, RW, Cout), lambda n: (n, 0, 0)),
                   pl.BlockSpec((1, 1, Cout), lambda n: (n, 0, 0)),
                   pl.BlockSpec((1, 1, Cout), lambda n: (n, 0, 0))),
        scratch_shapes=[pltpu.VMEM((RW, Cout), jnp.float32)],
        compiler_params=pltpu.CompilerParams(
            dimension_semantics=("parallel",),
            vmem_limit_bytes=VMEM_LIMIT),
    )(xf, w_bf16)
    return y, s[:, 0, :], ss[:, 0, :]


# ----------------------------------------------------------------------------
# Kernel 3: lane-dense BN normalize + optional residual add + optional ReLU
# ----------------------------------------------------------------------------
def _bn_act_kernel_factory(act, has_res):
    if has_res:
        def kernel(x_ref, r_ref, sc_ref, sh_ref, o_ref):
            y = x_ref[...] * sc_ref[...] + sh_ref[...] + r_ref[...]
            if act:
                y = jnp.maximum(y, 0.0)
            o_ref[...] = y
    else:
        def kernel(x_ref, sc_ref, sh_ref, o_ref):
            y = x_ref[...] * sc_ref[...] + sh_ref[...]
            if act:
                y = jnp.maximum(y, 0.0)
            o_ref[...] = y
    return kernel


def bn_act(x, scale, shift, act, residual=None):
    """x: [R, L] lane-dense slab; scale/shift: [L] (channel vectors tiled by caller)."""
    R, L = x.shape
    TR, Rp, G = _row_tiles(R, 512)
    if Rp != R:
        x = jnp.pad(x, ((0, Rp - R), (0, 0)))
        if residual is not None:
            residual = jnp.pad(residual, ((0, Rp - R), (0, 0)))
    sc = scale.reshape(1, L)
    sh = shift.reshape(1, L)
    args = [x]
    in_specs = [pl.BlockSpec((TR, L), lambda i: (i, 0))]
    if residual is not None:
        args.append(residual)
        in_specs.append(pl.BlockSpec((TR, L), lambda i: (i, 0)))
    args += [sc, sh]
    in_specs += [pl.BlockSpec((1, L), lambda i: (0, 0)),
                 pl.BlockSpec((1, L), lambda i: (0, 0))]
    out = pl.pallas_call(
        _bn_act_kernel_factory(act, residual is not None),
        out_shape=jax.ShapeDtypeStruct((Rp, L), F32),
        grid=(G,),
        in_specs=in_specs,
        out_specs=pl.BlockSpec((TR, L), lambda i: (i, 0)),
        compiler_params=pltpu.CompilerParams(
            dimension_semantics=("parallel",),
            vmem_limit_bytes=VMEM_LIMIT),
    )(*args)
    return out[:R] if Rp != R else out


# ----------------------------------------------------------------------------
# Glue: BN affine from fused moments, CBR wrappers, Bottleneck forward
# ----------------------------------------------------------------------------
def _bn_affine(sums, sumsqs, count, gamma, beta, eps=1e-5):
    """Training-mode BatchNorm (batch stats, biased variance), folded to scale/shift."""
    s = jnp.sum(sums, axis=0)
    ss = jnp.sum(sumsqs, axis=0)
    mean = s / count
    var = jnp.maximum(ss / count - mean * mean, 0.0)   # clamp f32 cancellation
    scale = gamma * lax.rsqrt(var + eps)
    shift = beta - mean * scale
    return scale, shift


def cbr_1x1(x, p, stride=1, act=True, residual=None):
    """1x1 conv (+BN(+residual)(+ReLU)).  x: [N,H,W,Cin] NHWC."""
    if stride != 1:
        x = x[:, ::stride, ::stride, :]
    N, H, W, Cin = x.shape
    w = p["w"]                       # [Cin, Cout] bf16
    Cout = w.shape[-1]
    y, s, ss = gemm_moments(x.reshape(N * H * W, Cin), w)
    scale, shift = _bn_affine(s, ss, N * H * W, p["gamma"], p["beta"])
    r = residual.reshape(N * H, W * Cout) if residual is not None else None
    o = bn_act(y.reshape(N * H, W * Cout),
               jnp.tile(scale, W), jnp.tile(shift, W), act=act, residual=r)
    return o.reshape(N, H, W, Cout)


def _conv3x3_im2col(x, w, stride):
    # TODO(synk): stride>1 could also avoid im2col via a parity-split (space-to-depth)
    # input layout; fall back to glue im2col for the strided case (not hit in the test).
    N, H, W, C = x.shape
    Cout = w.shape[-1]
    Ho = (H + 2 - 3) // stride + 1
    Wo = (W + 2 - 3) // stride + 1
    xp = jnp.pad(x, ((0, 0), (1, 1), (1, 1), (0, 0)))
    cols = [xp[:, i:i + stride * Ho:stride, j:j + stride * Wo:stride, :]
            for i in range(3) for j in range(3)]
    a = jnp.concatenate(cols, axis=-1).reshape(N * Ho * Wo, 9 * C)
    y, s, ss = gemm_moments(a, w.reshape(9 * C, Cout))
    return y, s, ss, Ho, Wo


def cbr_3x3(x, p, stride=1, act=True):
    """3x3 conv, pad 1 (+BN(+ReLU)).  x: [N,H,W,Cin] NHWC."""
    N, H, W, Cin = x.shape
    w = p["w"]                       # [3,3,Cin,Cout] bf16
    Cout = w.shape[-1]
    if stride == 1:
        Wp = W + 2
        y_wide, s, ss = conv3x3_s1_moments(x, w)
        scale, shift = _bn_affine(s, ss, N * H * W, p["gamma"], p["beta"])
        o = bn_act(y_wide.reshape(N * H, Wp * Cout),
                   jnp.tile(scale, Wp), jnp.tile(shift, Wp), act=act)
        # drop the 2 out-of-range columns carried through the lane-dense slab
        return o.reshape(N, H, Wp, Cout)[:, :, :W, :]
    y, s, ss, Ho, Wo = _conv3x3_im2col(x, w, stride)
    scale, shift = _bn_affine(s, ss, N * Ho * Wo, p["gamma"], p["beta"])
    o = bn_act(y.reshape(N * Ho, Wo * Cout),
               jnp.tile(scale, Wo), jnp.tile(shift, Wo), act=act)
    return o.reshape(N, Ho, Wo, Cout)


def bottleneck_forward(params, x_nchw, stride=1):
    x = jnp.transpose(x_nchw, (0, 2, 3, 1)).astype(F32)      # NCHW -> NHWC
    # shortcut: 1x1 conv + BN, NO ReLU (or identity when shapes already match)
    if "shortcut" in params:
        residual = cbr_1x1(x, params["shortcut"], stride=stride, act=False)
    else:
        residual = x
    y = cbr_1x1(x, params["conv1"], stride=1, act=True)
    y = cbr_3x3(y, params["conv2"], stride=stride, act=True)
    # conv3's CBR has act=False; the module applies ReLU AFTER the residual add, so the
    # fused elementwise kernel does bn3 -> +residual -> ReLU in one pass.
    y = cbr_1x1(y, params["conv3"], stride=1, act=True, residual=residual)
    return jnp.transpose(y, (0, 3, 1, 2))                    # NHWC -> NCHW


# ----------------------------------------------------------------------------
# Deterministic parameter init (shapes mirror the PyTorch Bottleneck)
# ----------------------------------------------------------------------------
def init_bottleneck(key, in_channels, out_channels, stride=1, expansion=4):
    c_out = out_channels * expansion
    ks = jax.random.split(key, 4)

    def cbr_params(k, ksize, ci, co):
        fan_in = ksize * ksize * ci
        w = jax.random.normal(k, (ksize, ksize, ci, co), F32) * (2.0 / fan_in) ** 0.5
        if ksize == 1:
            w = w.reshape(ci, co)
        # NOTE: the reference Conv2d has bias=True, but the bias is exactly cancelled by
        # the training-mode BatchNorm mean subtraction, so it is dropped (dead work).
        return dict(w=w.astype(BF16),                 # bf16 MXU inputs, f32 accumulate
                    gamma=jnp.ones((co,), F32),       # BN affine defaults (weight=1,bias=0)
                    beta=jnp.zeros((co,), F32))

    p = dict(conv1=cbr_params(ks[0], 1, in_channels, in_channels),
             conv2=cbr_params(ks[1], 3, in_channels, in_channels),
             conv3=cbr_params(ks[2], 1, in_channels, c_out))
    if in_channels != c_out or stride != 1:
        p["shortcut"] = cbr_params(ks[3], 1, in_channels, c_out)
    return p


if __name__ == "__main__":
    key = jax.random.PRNGKey(0)
    kp, kx = jax.random.split(key)
    in_ch, out_ch, stride = 32, 16, 1          # Bottleneck(32, 16) -> 64 output channels
    params = init_bottleneck(kp, in_ch, out_ch, stride)
    x = jax.random.normal(kx, (2, in_ch, 16, 16), F32)   # NCHW, like the torch module
    fwd = jax.jit(lambda p, xx: bottleneck_forward(p, xx, stride=stride))
    out = fwd(params, x)
    jax.block_until_ready(out)
    assert out.shape == (2, out_ch * 4, 16, 16) and out.dtype == jnp.float32
    assert bool(jnp.all(jnp.isfinite(out)))
    assert bool(jnp.all(out >= 0.0))           # final ReLU
    print("KERNEL_OK")
</pallas_src>

<mosaic_0001>
module attributes {stable_mosaic.version = 11 : i64} {
  func.func @_gemm_moments_kernel(%arg0: i32, %arg1: memref<256x32xf32, #tpu.memory_space<vmem>>, %arg2: memref<32x32xbf16, #tpu.memory_space<vmem>>, %arg3: memref<256x32xf32, #tpu.memory_space<vmem>>, %arg4: memref<1x1x32xf32, #tpu.memory_space<vmem>>, %arg5: memref<1x1x32xf32, #tpu.memory_space<vmem>>) attributes {dimension_semantics = [#tpu.dimension_semantics<parallel>], iteration_bounds = array<i64: 2>, scalar_prefetch = 0 : i64, scratch_operands = 0 : i64, tpu.core_type = #tpu.core_type<tc>, window_params = [{transform_indices = @transform_0, window_bounds = array<i64: 256, 32>}, {pipeline_mode = #tpu.pipeline_mode<synchronous>, transform_indices = @transform_1, window_bounds = array<i64: 32, 32>}, {transform_indices = @transform_2, window_bounds = array<i64: 256, 32>}, {transform_indices = @transform_3, window_bounds = array<i64: 1, 1, 32>}, {transform_indices = @transform_4, window_bounds = array<i64: 1, 1, 32>}]} {
    %c0 = arith.constant 0 : index
    %c0_0 = arith.constant 0 : index
    %0 = vector.load %arg1[%c0, %c0_0] : memref<256x32xf32, #tpu.memory_space<vmem>>, vector<256x32xf32>
    %1 = arith.truncf %0 : vector<256x32xf32> to vector<256x32xbf16>
    %c0_1 = arith.constant 0 : index
    %c0_2 = arith.constant 0 : index
    %2 = vector.load %arg2[%c0_1, %c0_2] : memref<32x32xbf16, #tpu.memory_space<vmem>>, vector<32x32xbf16>
    %cst = arith.constant dense<0.000000e+00> : vector<256x32xf32>
    %3 = tpu.matmul %1, %2, %cst {dimension_numbers = #tpu.dot_dimension_numbers<[1], [0], [0], [1], [0, 0, 1, 1], [], []>} : vector<256x32xbf16>, vector<32x32xbf16>, vector<256x32xf32> -> vector<256x32xf32>
    %c0_3 = arith.constant 0 : index
    %c0_4 = arith.constant 0 : index
    %4 = vector.load %arg3[%c0_3, %c0_4] : memref<256x32xf32, #tpu.memory_space<vmem>>, vector<256x32xf32>
    tpu.vector_store %arg3[%c0_3, %c0_4], %3 {strides = array<i32>} : memref<256x32xf32, #tpu.memory_space<vmem>>, vector<256x32xf32>,
    %cst_5 = arith.constant dense<0.000000e+00> : vector<32xf32>
    %5 = vector.multi_reduction <add>, %3, %cst_5 [0] : vector<256x32xf32> to vector<32xf32>
    %6 = vector.shape_cast %5 : vector<32xf32> to vector<1x32xf32>
    %7 = vector.shape_cast %6 : vector<1x32xf32> to vector<1x1x32xf32>
    %c0_6 = arith.constant 0 : index
    %c0_7 = arith.constant 0 : index
    %c0_8 = arith.constant 0 : index
    %8 = vector.load %arg4[%c0_6, %c0_7, %c0_8] : memref<1x1x32xf32, #tpu.memory_space<vmem>>, vector<1x1x32xf32>
    tpu.vector_store %arg4[%c0_6, %c0_7, %c0_8], %7 {strides = array<i32>} : memref<1x1x32xf32, #tpu.memory_space<vmem>>, vector<1x1x32xf32>,
    %9 = arith.mulf %3, %3 : vector<256x32xf32>
    %cst_9 = arith.constant dense<0.000000e+00> : vector<32xf32>
    %10 = vector.multi_reduction <add>, %9, %cst_9 [0] : vector<256x32xf32> to vector<32xf32>
    %11 = vector.shape_cast %10 : vector<32xf32> to vector<1x32xf32>
    %12 = vector.shape_cast %11 : vector<1x32xf32> to vector<1x1x32xf32>
    %c0_10 = arith.constant 0 : index
    %c0_11 = arith.constant 0 : index
    %c0_12 = arith.constant 0 : index
    %13 = vector.load %arg5[%c0_10, %c0_11, %c0_12] : memref<1x1x32xf32, #tpu.memory_space<vmem>>, vector<1x1x32xf32>
    tpu.vector_store %arg5[%c0_10, %c0_11, %c0_12], %12 {strides = array<i32>} : memref<1x1x32xf32, #tpu.memory_space<vmem>>, vector<1x1x32xf32>,
    return
  }
  func.func @transform_0(%arg0: i32) -> (i32, i32) {
    %c0_i32 = arith.constant 0 : i32
    %c0_i32_0 = arith.constant 0 : i32
    return %arg0, %c0_i32 : i32, i32
  }
  func.func @transform_1(%arg0: i32) -> (i32, i32) {
    %c0_i32 = arith.constant 0 : i32
    %c0_i32_0 = arith.constant 0 : i32
    %c0_i32_1 = arith.constant 0 : i32
    return %c0_i32, %c0_i32_0 : i32, i32
  }
  func.func @transform_2(%arg0: i32) -> (i32, i32) {
    %c0_i32 = arith.constant 0 : i32
    %c0_i32_0 = arith.constant 0 : i32
    return %arg0, %c0_i32 : i32, i32
  }
  func.func @transform_3(%arg0: i32) -> (i32, i32, i32) {
    %c0_i32 = arith.constant 0 : i32
    %c0_i32_0 = arith.constant 0 : i32
    %c0_i32_1 = arith.constant 0 : i32
    return %arg0, %c0_i32, %c0_i32_0 : i32, i32, i32
  }
  func.func @transform_4(%arg0: i32) -> (i32, i32, i32) {
    %c0_i32 = arith.constant 0 : i32
    %c0_i32_0 = arith.constant 0 : i32
    %c0_i32_1 = arith.constant 0 : i32
    return %arg0, %c0_i32, %c0_i32_0 : i32, i32, i32
  }
}

module attributes {stable_mosaic.version = 11 : i64} {
  func.func @kernel(%arg0: i32, %arg1: memref<32x512xf32, #tpu.memory_space<vmem>>, %arg2: memref<1x512xf32, #tpu.memory_space<vmem>>, %arg3: memref<1x512xf32, #tpu.memory_space<vmem>>, %arg4: memref<32x512xf32, #tpu.memory_space<vmem>>) attributes {dimension_semantics = [#tpu.dimension_semantics<parallel>], iteration_bounds = array<i64: 1>, scalar_prefetch = 0 : i64, scratch_operands = 0 : i64, tpu.core_type = #tpu.core_type<tc>, window_params = [{transform_indices = @transform_0, window_bounds = array<i64: 32, 512>}, {pipeline_mode = #tpu.pipeline_mode<synchronous>, transform_indices = @transform_1, window_bounds = array<i64: 1, 512>}, {pipeline_mode = #tpu.pipeline_mode<synchronous>, transform_indices = @transform_2, window_bounds = array<i64: 1, 512>}, {transform_indices = @transform_3, window_bounds = array<i64: 32, 512>}]} {
    %c0 = arith.constant 0 : index
    %c0_0 = arith.constant 0 : index
    %0 = vector.load %arg1[%c0, %c0_0] : memref<32x512xf32, #tpu.memory_space<vmem>>, vector<32x512xf32>
    %c0_1 = arith.constant 0 : index
    %c0_2 = arith.constant 0 : index
    %1 = vector.load %arg2[%c0_1, %c0_2] : memref<1x512xf32, #tpu.memory_space<vmem>>, vector<1x512xf32>
    %2 = vector.broadcast %1 : vector<1x512xf32> to vector<32x512xf32>
    %3 = arith.mulf %0, %2 : vector<32x512xf32>
    %c0_3 = arith.constant 0 : index
    %c0_4 = arith.constant 0 : index
    %4 = vector.load %arg3[%c0_3, %c0_4] : memref<1x512xf32, #tpu.memory_space<vmem>>, vector<1x512xf32>
    %5 = vector.broadcast %4 : vector<1x512xf32> to vector<32x512xf32>
    %6 = arith.addf %3, %5 : vector<32x512xf32>
    %cst = arith.constant 0.000000e+00 : f32
    %7 = vector.broadcast %cst : f32 to vector<32x512xf32>
    %8 = arith.maximumf %6, %7 : vector<32x512xf32>
    %c0_5 = arith.constant 0 : index
    %c0_6 = arith.constant 0 : index
    %9 = vector.load %arg4[%c0_5, %c0_6] : memref<32x512xf32, #tpu.memory_space<vmem>>, vector<32x512xf32>
    tpu.vector_store %arg4[%c0_5, %c0_6], %8 {strides = array<i32>} : memref<32x512xf32, #tpu.memory_space<vmem>>, vector<32x512xf32>,
    return
  }
  func.func @transform_0(%arg0: i32) -> (i32, i32) {
    %c0_i32 = arith.constant 0 : i32
    %c0_i32_0 = arith.constant 0 : i32
    return %arg0, %c0_i32 : i32, i32
  }
  func.func @transform_1(%arg0: i32) -> (i32, i32) {
    %c0_i32 = arith.constant 0 : i32
    %c0_i32_0 = arith.constant 0 : i32
    %c0_i32_1 = arith.constant 0 : i32
    return %c0_i32, %c0_i32_0 : i32, i32
  }
  func.func @transform_2(%arg0: i32) -> (i32, i32) {
    %c0_i32 = arith.constant 0 : i32
    %c0_i32_0 = arith.constant 0 : i32
    %c0_i32_1 = arith.constant 0 : i32
    return %c0_i32, %c0_i32_0 : i32, i32
  }
  func.func @transform_3(%arg0: i32) -> (i32, i32) {
    %c0_i32 = arith.constant 0 : i32
    %c0_i32_0 = arith.constant 0 : i32
    return %arg0, %c0_i32 : i32, i32
  }
}

module attributes {stable_mosaic.version = 11 : i64} {
  func.func @kernel(%arg0: i32, %arg1: memref<1x342x32xf32, #tpu.memory_space<vmem>>, %arg2: memref<3x3x32x32xbf16, #tpu.memory_space<vmem>>, %arg3: memref<1x288x32xf32, #tpu.memory_space<vmem>>, %arg4: memref<1x1x32xf32, #tpu.memory_space<vmem>>, %arg5: memref<1x1x32xf32, #tpu.memory_space<vmem>>, %arg6: memref<288x32xf32, #tpu.memory_space<vmem>>) attributes {dimension_semantics = [#tpu.dimension_semantics<parallel>], iteration_bounds = array<i64: 2>, scalar_prefetch = 0 : i64, scratch_operands = 1 : i64, tpu.core_type = #tpu.core_type<tc>, window_params = [{transform_indices = @transform_0, window_bounds = array<i64: 1, 342, 32>}, {pipeline_mode = #tpu.pipeline_mode<synchronous>, transform_indices = @transform_1, window_bounds = array<i64: 3, 3, 32, 32>}, {transform_indices = @transform_2, window_bounds = array<i64: 1, 288, 32>}, {transform_indices = @transform_3, window_bounds = array<i64: 1, 1, 32>}, {transform_indices = @transform_4, window_bounds = array<i64: 1, 1, 32>}]} {
    %cst = arith.constant 0.000000e+00 : f32
    %0 = vector.broadcast %cst : f32 to vector<288x32xf32>
    %c0 = arith.constant 0 : index
    %c0_0 = arith.constant 0 : index
    %1 = vector.load %arg6[%c0, %c0_0] : memref<288x32xf32, #tpu.memory_space<vmem>>, vector<288x32xf32>
    tpu.vector_store %arg6[%c0, %c0_0], %0 {strides = array<i32>} : memref<288x32xf32, #tpu.memory_space<vmem>>, vector<288x32xf32>,
    %c0_1 = arith.constant 0 : index
    %c0_2 = arith.constant 0 : index
    %c0_3 = arith.constant 0 : index
    %2 = vector.load %arg1[%c0_1, %c0_2, %c0_3] : memref<1x342x32xf32, #tpu.memory_space<vmem>>, vector<1x288x32xf32>
    %3 = vector.shape_cast %2 : vector<1x288x32xf32> to vector<288x32xf32>
    %4 = arith.truncf %3 : vector<288x32xf32> to vector<288x32xbf16>
    %c0_4 = arith.constant 0 : index
    %c0_5 = arith.constant 0 : index
    %5 = vector.load %arg6[%c0_4, %c0_5] : memref<288x32xf32, #tpu.memory_space<vmem>>, vector<288x32xf32>
    %c0_6 = arith.constant 0 : index
    %c0_7 = arith.constant 0 : index
    %c0_8 = arith.constant 0 : index
    %c0_9 = arith.constant 0 : index
    %6 = vector.load %arg2[%c0_6, %c0_7, %c0_8, %c0_9] : memref<3x3x32x32xbf16, #tpu.memory_space<vmem>>, vector<1x1x32x32xbf16>
    %7 = vector.shape_cast %6 : vector<1x1x32x32xbf16> to vector<32x32xbf16>
    %cst_10 = arith.constant dense<0.000000e+00> : vector<288x32xf32>
    %8 = tpu.matmul %4, %7, %cst_10 {dimension_numbers = #tpu.dot_dimension_numbers<[1], [0], [0], [1], [0, 0, 1, 1], [], []>} : vector<288x32xbf16>, vector<32x32xbf16>, vector<288x32xf32> -> vector<288x32xf32>
    %9 = arith.addf %5, %8 : vector<288x32xf32>
    %c0_11 = arith.constant 0 : index
    %c0_12 = arith.constant 0 : index
    %10 = vector.load %arg6[%c0_11, %c0_12] : memref<288x32xf32, #tpu.memory_space<vmem>>, vector<288x32xf32>
    tpu.vector_store %arg6[%c0_11, %c0_12], %9 {strides = array<i32>} : memref<288x32xf32, #tpu.memory_space<vmem>>, vector<288x32xf32>,
    %c0_13 = arith.constant 0 : index
    %c1 = arith.constant 1 : index
    %c0_14 = arith.constant 0 : index
    %11 = vector.load %arg1[%c0_13, %c1, %c0_14] : memref<1x342x32xf32, #tpu.memory_space<vmem>>, vector<1x288x32xf32>
    %12 = vector.shape_cast %11 : vector<1x288x32xf32> to vector<288x32xf32>
    %13 = arith.truncf %12 : vector<288x32xf32> to vector<288x32xbf16>
    %c0_15 = arith.constant 0 : index
    %c0_16 = arith.constant 0 : index
    %14 = vector.load %arg6[%c0_15, %c0_16] : memref<288x32xf32, #tpu.memory_space<vmem>>, vector<288x32xf32>
    %c0_17 = arith.constant 0 : index
    %c1_18 = arith.constant 1 : index
    %c0_19 = arith.constant 0 : index
    %c0_20 = arith.constant 0 : index
    %15 = vector.load %arg2[%c0_17, %c1_18, %c0_19, %c0_20] : memref<3x3x32x32xbf16, #tpu.memory_space<vmem>>, vector<1x1x32x32xbf16>
    %16 = vector.shape_cast %15 : vector<1x1x32x32xbf16> to vector<32x32xbf16>
    %cst_21 = arith.constant dense<0.000000e+00> : vector<288x32xf32>
    %17 = tpu.matmul %13, %16, %cst_21 {dimension_numbers = #tpu.dot_dimension_numbers<[1], [0], [0], [1], [0, 0, 1, 1], [], []>} : vector<288x32xbf16>, vector<32x32xbf16>, vector<288x32xf32> -> vector<288x32xf32>
    %18 = arith.addf %14, %17 : vector<288x32xf32>
    %c0_22 = arith.constant 0 : index
    %c0_23 = arith.constant 0 : index
    %19 = vector.load %arg6[%c0_22, %c0_23] : memref<288x32xf32, #tpu.memory_space<vmem>>, vector<288x32xf32>
    tpu.vector_store %arg6[%c0_22, %c0_23], %18 {strides = array<i32>} : memref<288x32xf32, #tpu.memory_space<vmem>>, vector<288x32xf32>,
    %c0_24 = arith.constant 0 : index
    %c2 = arith.constant 2 : index
    %c0_25 = arith.constant 0 : index
    %20 = vector.load %arg1[%c0_24, %c2, %c0_25] : memref<1x342x32xf32, #tpu.memory_space<vmem>>, vector<1x288x32xf32>
    %21 = vector.shape_cast %20 : vector<1x288x32xf32> to vector<288x32xf32>
    %22 = arith.truncf %21 : vector<288x32xf32> to vector<288x32xbf16>
    %c0_26 = arith.constant 0 : index
    %c0_27 = arith.constant 0 : index
    %23 = vector.load %arg6[%c0_26, %c0_27] : memref<288x32xf32, #tpu.memory_space<vmem>>, vector<288x32xf32>
    %c0_28 = arith.constant 0 : index
    %c2_29 = arith.constant 2 : index
    %c0_30 = arith.constant 0 : index
    %c0_31 = arith.constant 0 : index
    %24 = vector.load %arg2[%c0_28, %c2_29, %c0_30, %c0_31] : memref<3x3x32x32xbf16, #tpu.memory_space<vmem>>, vector<1x1x32x32xbf16>
    %25 = vector.shape_cast %24 : vector<1x1x32x32xbf16> to vector<32x32xbf16>
    %cst_32 = arith.constant dense<0.000000e+00> : vector<288x32xf32>
    %26 = tpu.matmul %22, %25, %cst_32 {dimension_numbers = #tpu.dot_dimension_numbers<[1], [0], [0], [1], [0, 0, 1, 1], [], []>} : vector<288x32xbf16>, vector<32x32xbf16>, vector<288x32xf32> -> vector<288x32xf32>
    %27 = arith.addf %23, %26 : vector<288x32xf32>
    %c0_33 = arith.constant 0 : index
    %c0_34 = arith.constant 0 : index
    %28 = vector.load %arg6[%c0_33, %c0_34] : memref<288x32xf32, #tpu.memory_space<vmem>>, vector<288x32xf32>
    tpu.vector_store %arg6[%c0_33, %c0_34], %27 {strides = array<i32>} : memref<288x32xf32, #tpu.memory_space<vmem>>, vector<288x32xf32>,
    %c0_35 = arith.constant 0 : index
    %c18 = arith.constant 18 : index
    %c0_36 = arith.constant 0 : index
    %29 = vector.load %arg1[%c0_35, %c18, %c0_36] : memref<1x342x32xf32, #tpu.memory_space<vmem>>, vector<1x288x32xf32>
    %30 = vector.shape_cast %29 : vector<1x288x32xf32> to vector<288x32xf32>
    %31 = arith.truncf %30 : vector<288x32xf32> to vector<288x32xbf16>
    %c0_37 = arith.constant 0 : index
    %c0_38 = arith.constant 0 : index
    %32 = vector.load %arg6[%c0_37, %c0_38] : memref<288x32xf32, #tpu.memory_space<vmem>>, vector<288x32xf32>
    %c1_39 = arith.constant 1 : index
    %c0_40 = arith.constant 0 : index
    %c0_41 = arith.constant 0 : index
    %c0_42 = arith.constant 0 : index
    %33 = vector.load %arg2[%c1_39, %c0_40, %c0_41, %c0_42] : memref<3x3x32x32xbf16, #tpu.memory_space<vmem>>, vector<1x1x32x32xbf16>
    %34 = vector.shape_cast %33 : vector<1x1x32x32xbf16> to vector<32x32xbf16>
    %cst_43 = arith.constant dense<0.000000e+00> : vector<288x32xf32>
    %35 = tpu.matmul %31, %34, %cst_43 {dimension_numbers = #tpu.dot_dimension_numbers<[1], [0], [0], [1], [0, 0, 1, 1], [], []>} : vector<288x32xbf16>, vector<32x32xbf16>, vector<288x32xf32> -> vector<288x32xf32>
    %36 = arith.addf %32, %35 : vector<288x32xf32>
    %c0_44 = arith.constant 0 : index
    %c0_45 = arith.constant 0 : index
    %37 = vector.load %arg6[%c0_44, %c0_45] : memref<288x32xf32, #tpu.memory_space<vmem>>, vector<288x32xf32>
    tpu.vector_store %arg6[%c0_44, %c0_45], %36 {strides = array<i32>} : memref<288x32xf32, #tpu.memory_space<vmem>>, vector<288x32xf32>,
    %c0_46 = arith.constant 0 : index
    %c19 = arith.constant 19 : index
    %c0_47 = arith.constant 0 : index
    %38 = vector.load %arg1[%c0_46, %c19, %c0_47] : memref<1x342x32xf32, #tpu.memory_space<vmem>>, vector<1x288x32xf32>
    %39 = vector.shape_cast %38 : vector<1x288x32xf32> to vector<288x32xf32>
    %40 = arith.truncf %39 : vector<288x32xf32> to vector<288x32xbf16>
    %c0_48 = arith.constant 0 : index
    %c0_49 = arith.constant 0 : index
    %41 = vector.load %arg6[%c0_48, %c0_49] : memref<288x32xf32, #tpu.memory_space<vmem>>, vector<288x32xf32>
    %c1_50 = arith.constant 1 : index
    %c1_51 = arith.constant 1 : index
    %c0_52 = arith.constant 0 : index
    %c0_53 = arith.constant 0 : index
    %42 = vector.load %arg2[%c1_50, %c1_51, %c0_52, %c0_53] : memref<3x3x32x32xbf16, #tpu.memory_space<vmem>>, vector<1x1x32x32xbf16>
    %43 = vector.shape_cast %42 : vector<1x1x32x32xbf16> to vector<32x32xbf16>
    %cst_54 = arith.constant dense<0.000000e+00> : vector<288x32xf32>
    %44 = tpu.matmul %40, %43, %cst_54 {dimension_numbers = #tpu.dot_dimension_numbers<[1], [0], [0], [1], [0, 0, 1, 1], [], []>} : vector<288x32xbf16>, vector<32x32xbf16>, vector<288x32xf32> -> vector<288x32xf32>
    %45 = arith.addf %41, %44 : vector<288x32xf32>
    %c0_55 = arith.constant 0 : index
    %c0_56 = arith.constant 0 : index
    %46 = vector.load %arg6[%c0_55, %c0_56] : memref<288x32xf32, #tpu.memory_space<vmem>>, vector<288x32xf32>
    tpu.vector_store %arg6[%c0_55, %c0_56], %45 {strides = array<i32>} : memref<288x32xf32, #tpu.memory_space<vmem>>, vector<288x32xf32>,
    %c0_57 = arith.constant 0 : index
    %c20 = arith.constant 20 : index
    %c0_58 = arith.constant 0 : index
    %47 = vector.load %arg1[%c0_57, %c20, %c0_58] : memref<1x342x32xf32, #tpu.memory_space<vmem>>, vector<1x288x32xf32>
    %48 = vector.shape_cast %47 : vector<1x288x32xf32> to vector<288x32xf32>
    %49 = arith.truncf %48 : vector<288x32xf32> to vector<288x32xbf16>
    %c0_59 = arith.constant 0 : index
    %c0_60 = arith.constant 0 : index
    %50 = vector.load %arg6[%c0_59, %c0_60] : memref<288x32xf32, #tpu.memory_space<vmem>>, vector<288x32xf32>
    %c1_61 = arith.constant 1 : index
    %c2_62 = arith.constant 2 : index
    %c0_63 = arith.constant 0 : index
    %c0_64 = arith.constant 0 : index
    %51 = vector.load %arg2[%c1_61, %c2_62, %c0_63, %c0_64] : memref<3x3x32x32xbf16, #tpu.memory_space<vmem>>, vector<1x1x32x32xbf16>
    %52 = vector.shape_cast %51 : vector<1x1x32x32xbf16> to vector<32x32xbf16>
    %cst_65 = arith.constant dense<0.000000e+00> : vector<288x32xf32>
    %53 = tpu.matmul %49, %52, %cst_65 {dimension_numbers = #tpu.dot_dimension_numbers<[1], [0], [0], [1], [0, 0, 1, 1], [], []>} : vector<288x32xbf16>, vector<32x32xbf16>, vector<288x32xf32> -> vector<288x32xf32>
    %54 = arith.addf %50, %53 : vector<288x32xf32>
    %c0_66 = arith.constant 0 : index
    %c0_67 = arith.constant 0 : index
    %55 = vector.load %arg6[%c0_66, %c0_67] : memref<288x32xf32, #tpu.memory_space<vmem>>, vector<288x32xf32>
    tpu.vector_store %arg6[%c0_66, %c0_67], %54 {strides = array<i32>} : memref<288x32xf32, #tpu.memory_space<vmem>>, vector<288x32xf32>,
    %c0_68 = arith.constant 0 : index
    %c36 = arith.constant 36 : index
    %c0_69 = arith.constant 0 : index
    %56 = vector.load %arg1[%c0_68, %c36, %c0_69] : memref<1x342x32xf32, #tpu.memory_space<vmem>>, vector<1x288x32xf32>
    %57 = vector.shape_cast %56 : vector<1x288x32xf32> to vector<288x32xf32>
    %58 = arith.truncf %57 : vector<288x32xf32> to vector<288x32xbf16>
    %c0_70 = arith.constant 0 : index
    %c0_71 = arith.constant 0 : index
    %59 = vector.load %arg6[%c0_70, %c0_71] : memref<288x32xf32, #tpu.memory_space<vmem>>, vector<288x32xf32>
    %c2_72 = arith.constant 2 : index
    %c0_73 = arith.constant 0 : index
    %c0_74 = arith.constant 0 : index
    %c0_75 = arith.constant 0 : index
    %60 = vector.load %arg2[%c2_72, %c0_73, %c0_74, %c0_75] : memref<3x3x32x32xbf16, #tpu.memory_space<vmem>>, vector<1x1x32x32xbf16>
    %61 = vector.shape_cast %60 : vector<1x1x32x32xbf16> to vector<32x32xbf16>
    %cst_76 = arith.constant dense<0.000000e+00> : vector<288x32xf32>
    %62 = tpu.matmul %58, %61, %cst_76 {dimension_numbers = #tpu.dot_dimension_numbers<[1], [0], [0], [1], [0, 0, 1, 1], [], []>} : vector<288x32xbf16>, vector<32x32xbf16>, vector<288x32xf32> -> vector<288x32xf32>
    %63 = arith.addf %59, %62 : vector<288x32xf32>
    %c0_77 = arith.constant 0 : index
    %c0_78 = arith.constant 0 : index
    %64 = vector.load %arg6[%c0_77, %c0_78] : memref<288x32xf32, #tpu.memory_space<vmem>>, vector<288x32xf32>
    tpu.vector_store %arg6[%c0_77, %c0_78], %63 {strides = array<i32>} : memref<288x32xf32, #tpu.memory_space<vmem>>, vector<288x32xf32>,
    %c0_79 = arith.constant 0 : index
    %c37 = arith.constant 37 : index
    %c0_80 = arith.constant 0 : index
    %65 = vector.load %arg1[%c0_79, %c37, %c0_80] : memref<1x342x32xf32, #tpu.memory_space<vmem>>, vector<1x288x32xf32>
    %66 = vector.shape_cast %65 : vector<1x288x32xf32> to vector<288x32xf32>
    %67 = arith.truncf %66 : vector<288x32xf32> to vector<288x32xbf16>
    %c0_81 = arith.constant 0 : index
    %c0_82 = arith.constant 0 : index
    %68 = vector.load %arg6[%c0_81, %c0_82] : memref<288x32xf32, #tpu.memory_space<vmem>>, vector<288x32xf32>
    %c2_83 = arith.constant 2 : index
    %c1_84 = arith.constant 1 : index
    %c0_85 = arith.constant 0 : index
    %c0_86 = arith.constant 0 : index
    %69 = vector.load %arg2[%c2_83, %c1_84, %c0_85, %c0_86] : memref<3x3x32x32xbf16, #tpu.memory_space<vmem>>, vector<1x1x32x32xbf16>
    %70 = vector.shape_cast %69 : vector<1x1x32x32xbf16> to vector<32x32xbf16>
    %cst_87 = arith.constant dense<0.000000e+00> : vector<288x32xf32>
    %71 = tpu.matmul %67, %70, %cst_87 {dimension_numbers = #tpu.dot_dimension_numbers<[1], [0], [0], [1], [0, 0, 1, 1], [], []>} : vector<288x32xbf16>, vector<32x32xbf16>, vector<288x32xf32> -> vector<288x32xf32>
    %72 = arith.addf %68, %71 : vector<288x32xf32>
    %c0_88 = arith.constant 0 : index
    %c0_89 = arith.constant 0 : index
    %73 = vector.load %arg6[%c0_88, %c0_89] : memref<288x32xf32, #tpu.memory_space<vmem>>, vector<288x32xf32>
    tpu.vector_store %arg6[%c0_88, %c0_89], %72 {strides = array<i32>} : memref<288x32xf32, #tpu.memory_space<vmem>>, vector<288x32xf32>,
    %c0_90 = arith.constant 0 : index
    %c38 = arith.constant 38 : index
    %c0_91 = arith.constant 0 : index
    %74 = vector.load %arg1[%c0_90, %c38, %c0_91] : memref<1x342x32xf32, #tpu.memory_space<vmem>>, vector<1x288x32xf32>
    %75 = vector.shape_cast %74 : vector<1x288x32xf32> to vector<288x32xf32>
    %76 = arith.truncf %75 : vector<288x32xf32> to vector<288x32xbf16>
    %c0_92 = arith.constant 0 : index
    %c0_93 = arith.constant 0 : index
    %77 = vector.load %arg6[%c0_92, %c0_93] : memref<288x32xf32, #tpu.memory_space<vmem>>, vector<288x32xf32>
    %c2_94 = arith.constant 2 : index
    %c2_95 = arith.constant 2 : index
    %c0_96 = arith.constant 0 : index
    %c0_97 = arith.constant 0 : index
    %78 = vector.load %arg2[%c2_94, %c2_95, %c0_96, %c0_97] : memref<3x3x32x32xbf16, #tpu.memory_space<vmem>>, vector<1x1x32x32xbf16>
    %79 = vector.shape_cast %78 : vector<1x1x32x32xbf16> to vector<32x32xbf16>
    %cst_98 = arith.constant dense<0.000000e+00> : vector<288x32xf32>
    %80 = tpu.matmul %76, %79, %cst_98 {dimension_numbers = #tpu.dot_dimension_numbers<[1], [0], [0], [1], [0, 0, 1, 1], [], []>} : vector<288x32xbf16>, vector<32x32xbf16>, vector<288x32xf32> -> vector<288x32xf32>
    %81 = arith.addf %77, %80 : vector<288x32xf32>
    %c0_99 = arith.constant 0 : index
    %c0_100 = arith.constant 0 : index
    %82 = vector.load %arg6[%c0_99, %c0_100] : memref<288x32xf32, #tpu.memory_space<vmem>>, vector<288x32xf32>
    tpu.vector_store %arg6[%c0_99, %c0_100], %81 {strides = array<i32>} : memref<288x32xf32, #tpu.memory_space<vmem>>, vector<288x32xf32>,
    %c0_101 = arith.constant 0 : index
    %c0_102 = arith.constant 0 : index
    %83 = vector.load %arg6[%c0_101, %c0_102] : memref<288x32xf32, #tpu.memory_space<vmem>>, vector<288x32xf32>
    %84 = vector.shape_cast %83 : vector<288x32xf32> to vector<1x288x32xf32>
    %c0_103 = arith.constant 0 : index
    %c0_104 = arith.constant 0 : index
    %c0_105 = arith.constant 0 : index
    %85 = vector.load %arg3[%c0_103, %c0_104, %c0_105] : memref<1x288x32xf32, #tpu.memory_space<vmem>>, vector<1x288x32xf32>
    tpu.vector_store %arg3[%c0_103, %c0_104, %c0_105], %84 {strides = array<i32>} : memref<1x288x32xf32, #tpu.memory_space<vmem>>, vector<1x288x32xf32>,
    %86 = tpu.iota {dimensions = array<i32: 0>} : vector<288x1xi32>
    %c18_i32 = arith.constant 18 : i32
    %c0_i32 = arith.constant 0 : i32
    %87 = arith.cmpi eq, %c18_i32, %c0_i32 : i32
    %c1_i32 = arith.constant 1 : i32
    %88 = arith.select %87, %c1_i32, %c18_i32 : i32
    %89 = vector.broadcast %88 : i32 to vector<288x1xi32>
    %90 = arith.remsi %86, %89 : vector<288x1xi32>
    %c0_i32_106 = arith.constant 0 : i32
    %91 = vector.broadcast %c0_i32_106 : i32 to vector<288x1xi32>
    %92 = arith.cmpi ne, %90, %91 : vector<288x1xi32>
    %c0_i32_107 = arith.constant 0 : i32
    %93 = vector.broadcast %c0_i32_107 : i32 to vector<288x1xi32>
    %94 = arith.cmpi slt, %90, %93 : vector<288x1xi32>
    %c0_i32_108 = arith.constant 0 : i32
    %95 = arith.cmpi slt, %88, %c0_i32_108 : i32
    %96 = vector.broadcast %95 : i1 to vector<288x1xi1>
    %97 = vector.broadcast %96 : vector<288x1xi1> to vector<288x1xi1>
    %98 = arith.xori %94, %97 : vector<288x1xi1>
    %99 = arith.andi %98, %92 : vector<288x1xi1>
    %100 = vector.broadcast %88 : i32 to vector<288x1xi32>
    %101 = arith.addi %90, %100 : vector<288x1xi32>
    %102 = arith.select %99, %101, %90 : vector<288x1xi1>, vector<288x1xi32>
    %c16_i32 = arith.constant 16 : i32
    %103 = vector.broadcast %c16_i32 : i32 to vector<288x1xi32>
    %104 = arith.cmpi slt, %102, %103 : vector<288x1xi32>
    %105 = arith.extui %104 : vector<288x1xi1> to vector<288x1xi32>
    %106 = arith.sitofp %105 : vector<288x1xi32> to vector<288x1xf32>
    %107 = vector.broadcast %106 : vector<288x1xf32> to vector<288x32xf32>
    %108 = arith.mulf %83, %107 : vector<288x32xf32>
    %cst_109 = arith.constant dense<0.000000e+00> : vector<32xf32>
    %109 = vector.multi_reduction <add>, %108, %cst_109 [0] : vector<288x32xf32> to vector<32xf32>
    %110 = vector.shape_cast %109 : vector<32xf32> to vector<1x32xf32>
    %111 = vector.shape_cast %110 : vector<1x32xf32> to vector<1x1x32xf32>
    %c0_110 = arith.constant 0 : index
    %c0_111 = arith.constant 0 : index
    %c0_112 = arith.constant 0 : index
    %112 = vector.load %arg4[%c0_110, %c0_111, %c0_112] : memref<1x1x32xf32, #tpu.memory_space<vmem>>, vector<1x1x32xf32>
    tpu.vector_store %arg4[%c0_110, %c0_111, %c0_112], %111 {strides = array<i32>} : memref<1x1x32xf32, #tpu.memory_space<vmem>>, vector<1x1x32xf32>,
    %113 = arith.mulf %108, %83 : vector<288x32xf32>
    %cst_113 = arith.constant dense<0.000000e+00> : vector<32xf32>
    %114 = vector.multi_reduction <add>, %113, %cst_113 [0] : vector<288x32xf32> to vector<32xf32>
    %115 = vector.shape_cast %114 : vector<32xf32> to vector<1x32xf32>
    %116 = vector.shape_cast %115 : vector<1x32xf32> to vector<1x1x32xf32>
    %c0_114 = arith.constant 0 : index
    %c0_115 = arith.constant 0 : index
    %c0_116 = arith.constant 0 : index
    %117 = vector.load %arg5[%c0_114, %c0_115, %c0_116] : memref<1x1x32xf32, #tpu.memory_space<vmem>>, vector<1x1x32xf32>
    tpu.vector_store %arg5[%c0_114, %c0_115, %c0_116], %116 {strides = array<i32>} : memref<1x1x32xf32, #tpu.memory_space<vmem>>, vector<1x1x32xf32>,
    return
  }
  func.func @transform_0(%arg0: i32) -> (i32, i32, i32) {
    %c0_i32 = arith.constant 0 : i32
    %c0_i32_0 = arith.constant 0 : i32
    %c0_i32_1 = arith.constant 0 : i32
    return %arg0, %c0_i32, %c0_i32_0 : i32, i32, i32
  }
  func.func @transform_1(%arg0: i32) -> (i32, i32, i32, i32) {
    %c0_i32 = arith.constant 0 : i32
    %c0_i32_0 = arith.constant 0 : i32
    %c0_i32_1 = arith.constant 0 : i32
    %c0_i32_2 = arith.constant 0 : i32
    %c0_i32_3 = arith.constant 0 : i32
    return %c0_i32, %c0_i32_0, %c0_i32_1, %c0_i32_2 : i32, i32, i32, i32
  }
  func.func @transform_2(%arg0: i32) -> (i32, i32, i32) {
    %c0_i32 = arith.constant 0 : i32
    %c0_i32_0 = arith.constant 0 : i32
    %c0_i32_1 = arith.constant 0 : i32
    return %arg0, %c0_i32, %c0_i32_0 : i32, i32, i32
  }
  func.func @transform_3(%arg0: i32) -> (i32, i32, i32) {
    %c0_i32 = arith.constant 0 : i32
    %c0_i32_0 = arith.constant 0 : i32
    %c0_i32_1 = arith.constant 0 : i32
    return %arg0, %c0_i32, %c0_i32_0 : i32, i32, i32
  }
  func.func @transform_4(%arg0: i32) -> (i32, i32, i32) {
    %c0_i32 = arith.constant 0 : i32
    %c0_i32_0 = arith.constant 0 : i32
    %c0_i32_1 = arith.constant 0 : i32
    return %arg0, %c0_i32, %c0_i32_0 : i32, i32, i32
  }
}

module attributes {stable_mosaic.version = 11 : i64} {
  func.func @kernel(%arg0: i32, %arg1: memref<32x576xf32, #tpu.memory_space<vmem>>, %arg2: memref<1x576xf32, #tpu.memory_space<vmem>>, %arg3: memref<1x576xf32, #tpu.memory_space<vmem>>, %arg4: memref<32x576xf32, #tpu.memory_space<vmem>>) attributes {dimension_semantics = [#tpu.dimension_semantics<parallel>], iteration_bounds = array<i64: 1>, scalar_prefetch = 0 : i64, scratch_operands = 0 : i64, tpu.core_type = #tpu.core_type<tc>, window_params = [{transform_indices = @transform_0, window_bounds = array<i64: 32, 576>}, {pipeline_mode = #tpu.pipeline_mode<synchronous>, transform_indices = @transform_1, window_bounds = array<i64: 1, 576>}, {pipeline_mode = #tpu.pipeline_mode<synchronous>, transform_indices = @transform_2, window_bounds = array<i64: 1, 576>}, {transform_indices = @transform_3, window_bounds = array<i64: 32, 576>}]} {
    %c0 = arith.constant 0 : index
    %c0_0 = arith.constant 0 : index
    %0 = vector.load %arg1[%c0, %c0_0] : memref<32x576xf32, #tpu.memory_space<vmem>>, vector<32x576xf32>
    %c0_1 = arith.constant 0 : index
    %c0_2 = arith.constant 0 : index
    %1 = vector.load %arg2[%c0_1, %c0_2] : memref<1x576xf32, #tpu.memory_space<vmem>>, vector<1x576xf32>
    %2 = vector.broadcast %1 : vector<1x576xf32> to vector<32x576xf32>
    %3 = arith.mulf %0, %2 : vector<32x576xf32>
    %c0_3 = arith.constant 0 : index
    %c0_4 = arith.constant 0 : index
    %4 = vector.load %arg3[%c0_3, %c0_4] : memref<1x576xf32, #tpu.memory_space<vmem>>, vector<1x576xf32>
    %5 = vector.broadcast %4 : vector<1x576xf32> to vector<32x576xf32>
    %6 = arith.addf %3, %5 : vector<32x576xf32>
    %cst = arith.constant 0.000000e+00 : f32
    %7 = vector.broadcast %cst : f32 to vector<32x576xf32>
    %8 = arith.maximumf %6, %7 : vector<32x576xf32>
    %c0_5 = arith.constant 0 : index
    %c0_6 = arith.constant 0 : index
    %9 = vector.load %arg4[%c0_5, %c0_6] : memref<32x576xf32, #tpu.memory_space<vmem>>, vector<32x576xf32>
    tpu.vector_store %arg4[%c0_5, %c0_6], %8 {strides = array<i32>} : memref<32x576xf32, #tpu.memory_space<vmem>>, vector<32x576xf32>,
    return
  }
  func.func @transform_0(%arg0: i32) -> (i32, i32) {
    %c0_i32 = arith.constant 0 : i32
    %c0_i32_0 = arith.constant 0 : i32
    return %arg0, %c0_i32 : i32, i32
  }
  func.func @transform_1(%arg0: i32) -> (i32, i32) {
    %c0_i32 = arith.constant 0 : i32
    %c0_i32_0 = arith.constant 0 : i32
    %c0_i32_1 = arith.constant 0 : i32
    return %c0_i32, %c0_i32_0 : i32, i32
  }
  func.func @transform_2(%arg0: i32) -> (i32, i32) {
    %c0_i32 = arith.constant 0 : i32
    %c0_i32_0 = arith.constant 0 : i32
    %c0_i32_1 = arith.constant 0 : i32
    return %c0_i32, %c0_i32_0 : i32, i32
  }
  func.func @transform_3(%arg0: i32) -> (i32, i32) {
    %c0_i32 = arith.constant 0 : i32
    %c0_i32_0 = arith.constant 0 : i32
    return %arg0, %c0_i32 : i32, i32
  }
}

module attributes {stable_mosaic.version = 11 : i64} {
  func.func @_gemm_moments_kernel(%arg0: i32, %arg1: memref<256x32xf32, #tpu.memory_space<vmem>>, %arg2: memref<32x64xbf16, #tpu.memory_space<vmem>>, %arg3: memref<256x64xf32, #tpu.memory_space<vmem>>, %arg4: memref<1x1x64xf32, #tpu.memory_space<vmem>>, %arg5: memref<1x1x64xf32, #tpu.memory_space<vmem>>) attributes {dimension_semantics = [#tpu.dimension_semantics<parallel>], iteration_bounds = array<i64: 2>, scalar_prefetch = 0 : i64, scratch_operands = 0 : i64, tpu.core_type = #tpu.core_type<tc>, window_params = [{transform_indices = @transform_0, window_bounds = array<i64: 256, 32>}, {pipeline_mode = #tpu.pipeline_mode<synchronous>, transform_indices = @transform_1, window_bounds = array<i64: 32, 64>}, {transform_indices = @transform_2, window_bounds = array<i64: 256, 64>}, {transform_indices = @transform_3, window_bounds = array<i64: 1, 1, 64>}, {transform_indices = @transform_4, window_bounds = array<i64: 1, 1, 64>}]} {
    %c0 = arith.constant 0 : index
    %c0_0 = arith.constant 0 : index
    %0 = vector.load %arg1[%c0, %c0_0] : memref<256x32xf32, #tpu.memory_space<vmem>>, vector<256x32xf32>
    %1 = arith.truncf %0 : vector<256x32xf32> to vector<256x32xbf16>
    %c0_1 = arith.constant 0 : index
    %c0_2 = arith.constant 0 : index
    %2 = vector.load %arg2[%c0_1, %c0_2] : memref<32x64xbf16, #tpu.memory_space<vmem>>, vector<32x64xbf16>
    %cst = arith.constant dense<0.000000e+00> : vector<256x64xf32>
    %3 = tpu.matmul %1, %2, %cst {dimension_numbers = #tpu.dot_dimension_numbers<[1], [0], [0], [1], [0, 0, 1, 1], [], []>} : vector<256x32xbf16>, vector<32x64xbf16>, vector<256x64xf32> -> vector<256x64xf32>
    %c0_3 = arith.constant 0 : index
    %c0_4 = arith.constant 0 : index
    %4 = vector.load %arg3[%c0_3, %c0_4] : memref<256x64xf32, #tpu.memory_space<vmem>>, vector<256x64xf32>
    tpu.vector_store %arg3[%c0_3, %c0_4], %3 {strides = array<i32>} : memref<256x64xf32, #tpu.memory_space<vmem>>, vector<256x64xf32>,
    %cst_5 = arith.constant dense<0.000000e+00> : vector<64xf32>
    %5 = vector.multi_reduction <add>, %3, %cst_5 [0] : vector<256x64xf32> to vector<64xf32>
    %6 = vector.shape_cast %5 : vector<64xf32> to vector<1x64xf32>
    %7 = vector.shape_cast %6 : vector<1x64xf32> to vector<1x1x64xf32>
    %c0_6 = arith.constant 0 : index
    %c0_7 = arith.constant 0 : index
    %c0_8 = arith.constant 0 : index
    %8 = vector.load %arg4[%c0_6, %c0_7, %c0_8] : memref<1x1x64xf32, #tpu.memory_space<vmem>>, vector<1x1x64xf32>
    tpu.vector_store %arg4[%c0_6, %c0_7, %c0_8], %7 {strides = array<i32>} : memref<1x1x64xf32, #tpu.memory_space<vmem>>, vector<1x1x64xf32>,
    %9 = arith.mulf %3, %3 : vector<256x64xf32>
    %cst_9 = arith.constant dense<0.000000e+00> : vector<64xf32>
    %10 = vector.multi_reduction <add>, %9, %cst_9 [0] : vector<256x64xf32> to vector<64xf32>
    %11 = vector.shape_cast %10 : vector<64xf32> to vector<1x64xf32>
    %12 = vector.shape_cast %11 : vector<1x64xf32> to vector<1x1x64xf32>
    %c0_10 = arith.constant 0 : index
    %c0_11 = arith.constant 0 : index
    %c0_12 = arith.constant 0 : index
    %13 = vector.load %arg5[%c0_10, %c0_11, %c0_12] : memref<1x1x64xf32, #tpu.memory_space<vmem>>, vector<1x1x64xf32>
    tpu.vector_store %arg5[%c0_10, %c0_11, %c0_12], %12 {strides = array<i32>} : memref<1x1x64xf32, #tpu.memory_space<vmem>>, vector<1x1x64xf32>,
    return
  }
  func.func @transform_0(%arg0: i32) -> (i32, i32) {
    %c0_i32 = arith.constant 0 : i32
    %c0_i32_0 = arith.constant 0 : i32
    return %arg0, %c0_i32 : i32, i32
  }
  func.func @transform_1(%arg0: i32) -> (i32, i32) {
    %c0_i32 = arith.constant 0 : i32
    %c0_i32_0 = arith.constant 0 : i32
    %c0_i32_1 = arith.constant 0 : i32
    return %c0_i32, %c0_i32_0 : i32, i32
  }
  func.func @transform_2(%arg0: i32) -> (i32, i32) {
    %c0_i32 = arith.constant 0 : i32
    %c0_i32_0 = arith.constant 0 : i32
    return %arg0, %c0_i32 : i32, i32
  }
  func.func @transform_3(%arg0: i32) -> (i32, i32, i32) {
    %c0_i32 = arith.constant 0 : i32
    %c0_i32_0 = arith.constant 0 : i32
    %c0_i32_1 = arith.constant 0 : i32
    return %arg0, %c0_i32, %c0_i32_0 : i32, i32, i32
  }
  func.func @transform_4(%arg0: i32) -> (i32, i32, i32) {
    %c0_i32 = arith.constant 0 : i32
    %c0_i32_0 = arith.constant 0 : i32
    %c0_i32_1 = arith.constant 0 : i32
    return %arg0, %c0_i32, %c0_i32_0 : i32, i32, i32
  }
}

module attributes {stable_mosaic.version = 11 : i64} {
  func.func @kernel(%arg0: i32, %arg1: memref<32x1024xf32, #tpu.memory_space<vmem>>, %arg2: memref<1x1024xf32, #tpu.memory_space<vmem>>, %arg3: memref<1x1024xf32, #tpu.memory_space<vmem>>, %arg4: memref<32x1024xf32, #tpu.memory_space<vmem>>) attributes {dimension_semantics = [#tpu.dimension_semantics<parallel>], iteration_bounds = array<i64: 1>, scalar_prefetch = 0 : i64, scratch_operands = 0 : i64, tpu.core_type = #tpu.core_type<tc>, window_params = [{transform_indices = @transform_0, window_bounds = array<i64: 32, 1024>}, {pipeline_mode = #tpu.pipeline_mode<synchronous>, transform_indices = @transform_1, window_bounds = array<i64: 1, 1024>}, {pipeline_mode = #tpu.pipeline_mode<synchronous>, transform_indices = @transform_2, window_bounds = array<i64: 1, 1024>}, {transform_indices = @transform_3, window_bounds = array<i64: 32, 1024>}]} {
    %c0 = arith.constant 0 : index
    %c0_0 = arith.constant 0 : index
    %0 = vector.load %arg1[%c0, %c0_0] : memref<32x1024xf32, #tpu.memory_space<vmem>>, vector<32x1024xf32>
    %c0_1 = arith.constant 0 : index
    %c0_2 = arith.constant 0 : index
    %1 = vector.load %arg2[%c0_1, %c0_2] : memref<1x1024xf32, #tpu.memory_space<vmem>>, vector<1x1024xf32>
    %2 = vector.broadcast %1 : vector<1x1024xf32> to vector<32x1024xf32>
    %3 = arith.mulf %0, %2 : vector<32x1024xf32>
    %c0_3 = arith.constant 0 : index
    %c0_4 = arith.constant 0 : index
    %4 = vector.load %arg3[%c0_3, %c0_4] : memref<1x1024xf32, #tpu.memory_space<vmem>>, vector<1x1024xf32>
    %5 = vector.broadcast %4 : vector<1x1024xf32> to vector<32x1024xf32>
    %6 = arith.addf %3, %5 : vector<32x1024xf32>
    %c0_5 = arith.constant 0 : index
    %c0_6 = arith.constant 0 : index
    %7 = vector.load %arg4[%c0_5, %c0_6] : memref<32x1024xf32, #tpu.memory_space<vmem>>, vector<32x1024xf32>
    tpu.vector_store %arg4[%c0_5, %c0_6], %6 {strides = array<i32>} : memref<32x1024xf32, #tpu.memory_space<vmem>>, vector<32x1024xf32>,
    return
  }
  func.func @transform_0(%arg0: i32) -> (i32, i32) {
    %c0_i32 = arith.constant 0 : i32
    %c0_i32_0 = arith.constant 0 : i32
    return %arg0, %c0_i32 : i32, i32
  }
  func.func @transform_1(%arg0: i32) -> (i32, i32) {
    %c0_i32 = arith.constant 0 : i32
    %c0_i32_0 = arith.constant 0 : i32
    %c0_i32_1 = arith.constant 0 : i32
    return %c0_i32, %c0_i32_0 : i32, i32
  }
  func.func @transform_2(%arg0: i32) -> (i32, i32) {
    %c0_i32 = arith.constant 0 : i32
    %c0_i32_0 = arith.constant 0 : i32
    %c0_i32_1 = arith.constant 0 : i32
    return %c0_i32, %c0_i32_0 : i32, i32
  }
  func.func @transform_3(%arg0: i32) -> (i32, i32) {
    %c0_i32 = arith.constant 0 : i32
    %c0_i32_0 = arith.constant 0 : i32
    return %arg0, %c0_i32 : i32, i32
  }
}

module attributes {stable_mosaic.version = 11 : i64} {
  func.func @kernel(%arg0: i32, %arg1: memref<32x1024xf32, #tpu.memory_space<vmem>>, %arg2: memref<32x1024xf32, #tpu.memory_space<vmem>>, %arg3: memref<1x1024xf32, #tpu.memory_space<vmem>>, %arg4: memref<1x1024xf32, #tpu.memory_space<vmem>>, %arg5: memref<32x1024xf32, #tpu.memory_space<vmem>>) attributes {dimension_semantics = [#tpu.dimension_semantics<parallel>], iteration_bounds = array<i64: 1>, scalar_prefetch = 0 : i64, scratch_operands = 0 : i64, tpu.core_type = #tpu.core_type<tc>, window_params = [{transform_indices = @transform_0, window_bounds = array<i64: 32, 1024>}, {transform_indices = @transform_1, window_bounds = array<i64: 32, 1024>}, {pipeline_mode = #tpu.pipeline_mode<synchronous>, transform_indices = @transform_2, window_bounds = array<i64: 1, 1024>}, {pipeline_mode = #tpu.pipeline_mode<synchronous>, transform_indices = @transform_3, window_bounds = array<i64: 1, 1024>}, {transform_indices = @transform_4, window_bounds = array<i64: 32, 1024>}]} {
    %c0 = arith.constant 0 : index
    %c0_0 = arith.constant 0 : index
    %0 = vector.load %arg1[%c0, %c0_0] : memref<32x1024xf32, #tpu.memory_space<vmem>>, vector<32x1024xf32>
    %c0_1 = arith.constant 0 : index
    %c0_2 = arith.constant 0 : index
    %1 = vector.load %arg3[%c0_1, %c0_2] : memref<1x1024xf32, #tpu.memory_space<vmem>>, vector<1x1024xf32>
    %2 = vector.broadcast %1 : vector<1x1024xf32> to vector<32x1024xf32>
    %3 = arith.mulf %0, %2 : vector<32x1024xf32>
    %c0_3 = arith.constant 0 : index
    %c0_4 = arith.constant 0 : index
    %4 = vector.load %arg4[%c0_3, %c0_4] : memref<1x1024xf32, #tpu.memory_space<vmem>>, vector<1x1024xf32>
    %5 = vector.broadcast %4 : vector<1x1024xf32> to vector<32x1024xf32>
    %6 = arith.addf %3, %5 : vector<32x1024xf32>
    %c0_5 = arith.constant 0 : index
    %c0_6 = arith.constant 0 : index
    %7 = vector.load %arg2[%c0_5, %c0_6] : memref<32x1024xf32, #tpu.memory_space<vmem>>, vector<32x1024xf32>
    %8 = arith.addf %6, %7 : vector<32x1024xf32>
    %cst = arith.constant 0.000000e+00 : f32
    %9 = vector.broadcast %cst : f32 to vector<32x1024xf32>
    %10 = arith.maximumf %8, %9 : vector<32x1024xf32>
    %c0_7 = arith.constant 0 : index
    %c0_8 = arith.constant 0 : index
    %11 = vector.load %arg5[%c0_7, %c0_8] : memref<32x1024xf32, #tpu.memory_space<vmem>>, vector<32x1024xf32>
    tpu.vector_store %arg5[%c0_7, %c0_8], %10 {strides = array<i32>} : memref<32x1024xf32, #tpu.memory_space<vmem>>, vector<32x1024xf32>,
    return
  }
  func.func @transform_0(%arg0: i32) -> (i32, i32) {
    %c0_i32 = arith.constant 0 : i32
    %c0_i32_0 = arith.constant 0 : i32
    return %arg0, %c0_i32 : i32, i32
  }
  func.func @transform_1(%arg0: i32) -> (i32, i32) {
    %c0_i32 = arith.constant 0 : i32
    %c0_i32_0 = arith.constant 0 : i32
    return %arg0, %c0_i32 : i32, i32
  }
  func.func @transform_2(%arg0: i32) -> (i32, i32) {
    %c0_i32 = arith.constant 0 : i32
    %c0_i32_0 = arith.constant 0 : i32
    %c0_i32_1 = arith.constant 0 : i32
    return %c0_i32, %c0_i32_0 : i32, i32
  }
  func.func @transform_3(%arg0: i32) -> (i32, i32) {
    %c0_i32 = arith.constant 0 : i32
    %c0_i32_0 = arith.constant 0 : i32
    %c0_i32_1 = arith.constant 0 : i32
    return %c0_i32, %c0_i32_0 : i32, i32
  }
  func.func @transform_4(%arg0: i32) -> (i32, i32) {
    %c0_i32 = arith.constant 0 : i32
    %c0_i32_0 = arith.constant 0 : i32
    return %arg0, %c0_i32 : i32, i32
  }
}

</mosaic_0001>

<bundles_post_ra>
// kernel: tile.53
= control target key start
LH: loop header
LB: loop body
LE: loop exit
PB: predicated region body
PF: predicated region fallthrough
CT: control target
= control target key end

     0   :  { %s28_s0 = inlined_call_operand.vmem [shape: f32[32], index: 0, kind: input, shape index: {}]   ;;  %s29_s1 = inlined_call_operand.vmem [shape: f32[16,32], index: 1, kind: output, shape index: {}]  }
   0x1   :  { %v4_v0 = vld [vmem:[%s28_s0] ss:$0 sm:$0xff] }
   0x2   :  { %5 = vst [vmem:[%s29_s1] sm:$0xff] %v4_v0  ;;  %8 = vst [vmem:[%s29_s1 + $0x8] sm:$0xff] %v4_v0 }

// kernel: tile.58
= control target key start
LH: loop header
LB: loop body
LE: loop exit
PB: predicated region body
PF: predicated region fallthrough
CT: control target
= control target key end

     0   :  { %s57_s8 = smov 96   ;;  %vm3_vm0 = vcmask 261120   ;;  %s59_s15 = smov 64   ;;  %vm9_vm1 = vcmask 1048320   ;;  %vm15_vm2 = vcmask 785920   ;;  %vm21_vm3 = vcmask 523520   ;;  %s94_s0 = inlined_call_operand.vmem [shape: f32[16,32], index: 0, kind: input, shape index: {}]   ;;  %s95_s1 = inlined_call_operand.vmem [shape: f32[1,512], index: 1, kind: output, shape index: {}]  }
   0x1   :  { %v48_v0 = vld [vmem:[%s94_s0 + $0x3] ss:$4 sm:$0xf]   ;;  %v49_v1 = vld [vmem:[%s94_s0 + $0x2] ss:$4 sm:$0xf]  }
   0x2   :  { %7 = vrot.lane.b32.xlu0 %v48_v0, %s57_s8  ;;  %v50_v2 = vld [vmem:[%s94_s0 + $0x1] ss:$4 sm:$0xf]   ;;  %v2_v3 = vld [vmem:[%s94_s0] ss:$4 sm:$0xf]  }
   0x3   :  { %s58_s0 = smov 32   ;;  %4 = vst.msk [vmem:[#allocation0] ss:$8 sm:$0xf] %vm3_vm0, %v2_v3  }
   0x4   :  { %19 = vrot.lane.b32.xlu1 %v50_v2, %s58_s0 }
   0x6   :  { %13 = vrot.lane.b32.xlu0 %v49_v1, %s59_s15 }
  0x74   :  { %v8_v4 = vpop.permute.xlu0 %7  }
  0x75   :  { %10 = vst.msk [vmem:[#allocation0] ss:$8 sm:$0xf] %vm9_vm1, %v8_v4  }
  0x76   :  { %v20_v5 = vpop.permute.xlu1 %19  }
  0x78   :  { %v14_v6 = vpop.permute.xlu0 %13  }
  0x79   :  { %16 = vst.msk [vmem:[#allocation0] ss:$8 sm:$0xf] %vm15_vm2, %v14_v6  }
  0x7a   :  { %22 = vst.msk [vmem:[#allocation0] ss:$8 sm:$0xf] %vm21_vm3, %v20_v5  }
  0x81   :  { %v26_v7 = vld [vmem:[#allocation0] sm:$0x1]  ;;  %v30_v8 = vld [vmem:[#allocation0 + $0x8] sm:$0x1]  ;;  %v35_v9 = vld [vmem:[#allocation0 + $0x10] sm:$0x1] }
  0x82   :  { %28 = vst [vmem:[%s95_s1] sm:$0x1] %v26_v7  ;;  %51 = vst [vmem:[%s95_s1 + $0x1] sm:$0x1] %v30_v8  ;;  %v41_v10 = vld [vmem:[#allocation0 + $0x18] sm:$0x1] }
  0x83   :  { %52 = vst [vmem:[%s95_s1 + $0x2] sm:$0x1] %v35_v9  ;;  %53 = vst [vmem:[%s95_s1 + $0x3] sm:$0x1] %v41_v10 }

// kernel: _lambda_.10
= control target key start
LH: loop header
LB: loop body
LE: loop exit
PB: predicated region body
PF: predicated region fallthrough
CT: control target
= control target key end

     0   :  { %10 = vsyncpa [#allocation3], 0  ;;  %s1458_s0 = inlined_call_operand.hbm [shape: f32[512,32], index: 0, kind: input, shape index: {}]   ;;  %s1459_s1 = inlined_call_operand.vmem [shape: bf16[32,32], index: 1, kind: input, shape index: {}]   ;;  %s1460_s2 = inlined_call_operand.vmem [shape: f32[512,32], index: 2, kind: output, shape index: {0}]   ;;  %s1461_s3 = inlined_call_operand.vmem [shape: f32[2,1,32], index: 3, kind: output, shape index: {1}]   ;;  %s1462_s4 = inlined_call_operand.vmem [shape: f32[2,1,32], index: 4, kind: output, shape index: {2}]  }
   0x1   :  { %12 = vsyncpa [#allocation3 + $0x1], 0  ;;  %s1061_s15 = smov 0   ;;  %s1063_s16 = smov 0  }
   0x2   :  { %s1065_s17 = smov 0   ;;  %s1067_s18 = smov 0  }
   0x3 LB: > { %s1080_s19 = sadd.s32 4294967295, %s1031_s18   ;;  %s1083_s20 = sadd.s32 1, %s1031_s18   ;;  %s1031_s18 = sphi %s1067_s18, %s1469_s18   ;;  %s1027_s17 = sphi %s1065_s17, %s1468_s17   ;;  %s1023_s16 = sphi %s1063_s16, %s1467_s16   ;;  %s1019_s15 = sphi %s1061_s15, %s1466_s15  }
   0x4   : > { %s22_s21 = ssub.s32 %s1031_s18, %s1083_s20  ;;  %s25_s22 = sadd.s32 1, %s1027_s17 }
   0x5   : > { %p23_p0 = scmp.eq.s32.totalorder %s22_s21, 0  ;;  %p32_p1 = scmp.ne.s32.totalorder %s1027_s17, %s1023_s16 }
   0x6   : > { %p33_p2 = scmp.eq.s32.totalorder %s1031_s18, 0  ;;  %p38_p3 = scmp.ne.s32.totalorder %s1023_s16, %s1019_s15 }
   0x7   : > { %s1093_s23 = scalar_select %p23_p0, %s1027_s17, %s25_s22  }
   0x8   : > { %p34_p4 = por %p33_p2, %p32_p1  ;;  %p39_p5 = scmp.eq.s32.totalorder %s1080_s19, 0 }
   0x9   : > { %p930_p6 = scmp.lt.s32.totalorder %s1031_s18, 2  ;;  %s164_s25 = sand.u32 1, %s1027_s17  }
   0xa   : > { %p1097_p7 = por %p39_p5, %p38_p3  ;;  %s838_s26 = sshll.u32 %s164_s25, 8 }
   0xb   : > { %s865_s27 = sshll.u32 %s1031_s18, 12  ;;  %s168_s5 = scalar_lea.vmem [#allocation2], %s838_s26 }
   0xc   : > { %s1106_s30 = scalar_lea.hbm %s1458_s0, %s865_s27  ;;  %s175_s6 = sshll.u32 %s168_s5, 4  ;;  %s1108_s6 = int_to_ptr.vmem [resolvable:$true] %s175_s6 }
   0xd   : > { %p1110_p8 = pnand %p930_p6, %p34_p4  ;;  %s1115_s8 = scalar_lea.sflag [#allocation3], %s164_s25 }
   0xe   : > { %s967_s9 = scalar_lea.hbm %s1106_s30, 4096  ;;  %s972_s12 = scalar_lea.hbm %s1458_s0, 8192 }
   0xf   : > { %p968_p10 = scmp.ne.s32.totalorder %s1106_s30, %s967_s9  ;;  %p969_p11 = pneg %p1110_p8 }
  0x10   : > { %p973_p0 = scmp.lt.u32.totalorder %s1106_s30, %s1458_s0  ;;  %p974_p1 = scmp.lt.u32.totalorder %s972_s12, %s967_s9 }
  0x11   : > { %p970_p12 = pnand %p969_p11, %p968_p10  ;;  %p976_p3 = scmp.lt.u32.totalorder %s967_s9, %s1106_s30 }
  0x12   : > { %p975_p2 = por %p974_p1, %p973_p0 }
  0x13   : > { %p971_p13 = pneg %p970_p12 }
  0x14   : > { %p977_p4 = por %p976_p3, %p975_p2 }
  0x16   : > { %p978_p5 = pnand %p977_p4, %p971_p13 }
  0x18   : > { %981 = shalt.err (!%p978_p5)
}
  0x19   : > { %s982_s15 = scalar_lea.vmem %s1108_s6, 4096  ;;  %s1033_s21 = smov [#allocation2]  }
  0x1a   : > { %p983_p6 = scmp.ne.s32.totalorder %s1108_s6, %s982_s15  ;;  %s987_s22 = sshll.u32 %s1033_s21, 4  ;;  %s988_s22 = int_to_ptr.vmem [resolvable:$false] %s987_s22 }
  0x1b   : > { %s989_s25 = scalar_lea.vmem %s988_s22, 8192  ;;  %p990_p9 = scmp.lt.s32.totalorder %s1108_s6, %s988_s22 }
  0x1c   : > { %p985_p10 = pnand %p983_p6, %p969_p11  ;;  %p991_p0 = scmp.lt.s32.totalorder %s989_s25, %s982_s15 }
  0x1e   : > { %p986_p12 = pneg %p985_p10  ;;  %p992_p1 = por %p991_p0, %p990_p9 }
  0x20   : > { %p993_p2 = pnand %p992_p1, %p986_p12 }
  0x22   : > { %996 = shalt.err (!%p993_p2)
}
  0x23   : > { %s1034_s26 = smov 128   ;;  %s1035_s27 = smov 8  }
  0x24   : > { %929 = dma.hbm_to_vmem [thread:$0]  (!%p1110_p8), %s1106_s30, 4096, %s1108_s6, %s1115_s8, %s1034_s26, %s1034_s26, %s1035_s27  }
  0x25   : > { %p183_p11 = scmp.lt.s32.totalorder %s1031_s18, 3  ;;  %p1465_p13 = scmp.ge.s32.totalorder %s1031_s18, 1 }
  0x27   : > { %p184_p3 = pnand %p1465_p13, %p183_p11 }
  0x28   : > { %s189_s28 = sand.u32 (!%p184_p3), 1, %s1023_s16  }
  0x29   : > { %187 = sbr.rel (%p184_p3) target bundleno = 351 (0x15f), region = 28  ;;  %s842_s29 = sshll.u32 (!%p184_p3), %s189_s28, 8 }
  0x2a   : > { %s190_s5 = scalar_lea.sflag (!%p184_p3), [#allocation3], %s189_s28  ;;  %s1147_s9 = scalar_lea.vmem (!%p184_p3), [#allocation2], %s842_s29 }
  0x30   : > { %1014 = dma.done.wait (%p1097_p7), %s190_s5, 4096  }
  0x31   : > { %1016 = vsyncadd (%p1097_p7), %s190_s5, 4294963200  ;;  %v965_v0 = vld [vmem:[%s1459_s1] sm:$0xff]   ;;  %v966_v1 = vld [vmem:[%s1459_s1 + $0x8] sm:$0xff]   ;;  %vm302_vm0 = vcmask 261120   ;;  %s843_s24 = sshll.u32 %s1080_s19, 5  ;;  %p231_p8 = scmp.lt.s32.totalorder %s1080_s19, 1 }
  0x32   : > { %884 = vmatprep.subr.bf16.mxu0 %v965_v0  ;;  %v238_v2 = vld [vmem:[%s1147_s9] sm:$0xff]  ;;  %v239_v3 = vld [vmem:[%s1147_s9 + $0x8] sm:$0xff]  ;;  %920 = vmatprep.subr.bf16.mxu1 %v965_v0  ;;  %v240_v5 = vld [vmem:[%s1147_s9 + $0x10] sm:$0xff]  ;;  %p226_p7 = scmp.lt.s32.totalorder %s843_s24, 63  ;;  %vm613_vm1 = vcmask 253952  }
  0x33   : > { %885 = vmatpush3.bf16.msra.mxu0 %v965_v0  ;;  %v270_v4 = vpack.c.bf16 %v239_v3, %v238_v2  ;;  %v241_v6 = vld [vmem:[%s1147_s9 + $0x18] sm:$0xff]  ;;  %922 = vmatpush3.bf16.msra.mxu1 %v965_v0  ;;  %v242_v7 = vld [vmem:[%s1147_s9 + $0x20] sm:$0xff]  ;;  %v243_v8 = vld [vmem:[%s1147_s9 + $0x28] sm:$0xff]  ;;  %s1473_s19 = smov (!%p231_p8, %s1080_s19), 1 }
  0x34   : > { %886 = vmatprep.subr.bf16.mxu0 %v966_v1  ;;  %921 = vmatprep.subr.bf16.mxu1 %v966_v1  ;;  %v271_v9 = vpack.c.bf16 %v241_v6, %v240_v5  ;;  %v272_v10 = vpack.c.bf16 %v243_v8, %v242_v7  ;;  %v254_v11 = vld [vmem:[%s1147_s9 + $0x80] sm:$0xff]  ;;  %v255_v12 = vld [vmem:[%s1147_s9 + $0x88] sm:$0xff]  ;;  %v256_v14 = vld [vmem:[%s1147_s9 + $0x90] sm:$0xff]  ;;  %s1471_s24 = smov (!%p226_p7, %s843_s24), 63  ;;  %s233_s15 = scalar_lea.vmem %s1461_s3, %s1473_s19 }
  0x35   : > { %888 = vmatprep.mubr.msk.bf16.mxu0 %vm302_vm0, %v270_v4  ;;  %v278_v13 = vpack.c.bf16 %v255_v12, %v254_v11  ;;  %v257_v15 = vld [vmem:[%s1147_s9 + $0x98] sm:$0xff]  ;;  %v258_v16 = vld [vmem:[%s1147_s9 + $0xa0] sm:$0xff]  ;;  %v259_v18 = vld [vmem:[%s1147_s9 + $0xa8] sm:$0xff]  ;;  %s844_s6 = sshll.u32 %s1471_s24, 3  ;;  %s236_s25 = scalar_lea.vmem %s1462_s4, %s1473_s19 }
  0x36   : > { %v279_v17 = vpack.c.bf16 %v257_v15, %v256_v14  ;;  %v280_v19 = vpack.c.bf16 %v259_v18, %v258_v16  ;;  %v244_v20 = vld [vmem:[%s1147_s9 + $0x30] sm:$0xff]  ;;  %v245_v21 = vld [vmem:[%s1147_s9 + $0x38] sm:$0xff]  ;;  %v246_v22 = vld [vmem:[%s1147_s9 + $0x40] sm:$0xff]  ;;  %s1211_s12 = scalar_lea.vmem %s1460_s2, %s844_s6 }
  0x37   : > { %887 = vmatpush3.bf16.msra.mxu0 %v966_v1  ;;  %923 = vmatpush3.bf16.msra.mxu1 %v966_v1  ;;  %v247_v23 = vld [vmem:[%s1147_s9 + $0x48] sm:$0xff]  ;;  %v260_v24 = vld [vmem:[%s1147_s9 + $0xb0] sm:$0xff]  ;;  %v261_v25 = vld [vmem:[%s1147_s9 + $0xb8] sm:$0xff]  ;;  %v273_v28 = vpack.c.bf16 %v245_v21, %v244_v20 }
  0x38   : > { %904 = vmatprep.mubr.msk.bf16.mxu1 %vm302_vm0, %v278_v13  ;;  %v262_v26 = vld [vmem:[%s1147_s9 + $0xc0] sm:$0xff]  ;;  %v263_v27 = vld [vmem:[%s1147_s9 + $0xc8] sm:$0xff]  ;;  %v274_v29 = vpack.c.bf16 %v247_v23, %v246_v22  ;;  %v281_v30 = vpack.c.bf16 %v261_v25, %v260_v24  ;;  %v248_v32 = vld [vmem:[%s1147_s9 + $0x50] sm:$0xff] }
  0x39   : > { %v282_v31 = vpack.c.bf16 %v263_v27, %v262_v26  ;;  %v249_v33 = vld [vmem:[%s1147_s9 + $0x58] sm:$0xff]  ;;  %v250_v34 = vld [vmem:[%s1147_s9 + $0x60] sm:$0xff]  ;;  %v251_v35 = vld [vmem:[%s1147_s9 + $0x68] sm:$0xff] }
  0x3a   : > { %889 = vmatmul.mubr.msk.bf16.vlgmr.msra.gmra.mrb[0].mxu0 %vm302_vm0, %v271_v9  ;;  %905 = vmatmul.mubr.msk.bf16.vlgmr.msra.gmra.mrb[0].mxu1 %vm302_vm0, %v279_v17  ;;  %v264_v36 = vld [vmem:[%s1147_s9 + $0xd0] sm:$0xff]  ;;  %v265_v37 = vld [vmem:[%s1147_s9 + $0xd8] sm:$0xff]  ;;  %v266_v38 = vld [vmem:[%s1147_s9 + $0xe0] sm:$0xff]  ;;  %v275_v40 = vpack.c.bf16 %v249_v33, %v248_v32  ;;  %v276_v41 = vpack.c.bf16 %v251_v35, %v250_v34 }
  0x3b   : > { %892 = vmatprep.mubr.msk.bf16.mxu0 %vm302_vm0, %v272_v10  ;;  %908 = vmatprep.mubr.msk.bf16.mxu1 %vm302_vm0, %v280_v19  ;;  %v267_v39 = vld [vmem:[%s1147_s9 + $0xe8] sm:$0xff]  ;;  %v283_v42 = vpack.c.bf16 %v265_v37, %v264_v36  ;;  %v252_v44 = vld [vmem:[%s1147_s9 + $0x70] sm:$0xff]  ;;  %v253_v45 = vld [vmem:[%s1147_s9 + $0x78] sm:$0xff] }
  0x3c   : > { %v284_v43 = vpack.c.bf16 %v267_v39, %v266_v38  ;;  %v268_v46 = vld [vmem:[%s1147_s9 + $0xf0] sm:$0xff]  ;;  %v269_v47 = vld [vmem:[%s1147_s9 + $0xf8] sm:$0xff]  ;;  %v277_v48 = vpack.c.bf16 %v253_v45, %v252_v44 }
  0x3d   : > { %v285_v49 = vpack.c.bf16 %v269_v47, %v268_v46 }
  0x42   : > { %893 = vmatmul.mubr.msk.bf16.gmra.mrb[4].mxu0 %vm302_vm0, %v273_v28  ;;  %909 = vmatmul.mubr.msk.bf16.gmra.mrb[4].mxu1 %vm302_vm0, %v281_v30 }
  0x43   : > { %896 = vmatprep.mubr.msk.bf16.mxu0 %vm302_vm0, %v274_v29  ;;  %912 = vmatprep.mubr.msk.bf16.mxu1 %vm302_vm0, %v282_v31 }
  0x4a   : > { %897 = vmatmul.mubr.msk.bf16.gmra.mrb[8].mxu0 %vm302_vm0, %v275_v40  ;;  %913 = vmatmul.mubr.msk.bf16.gmra.mrb[8].mxu1 %vm302_vm0, %v283_v42 }
  0x4b   : > { %900 = vmatprep.mubr.msk.bf16.mxu0 %vm302_vm0, %v276_v41  ;;  %916 = vmatprep.mubr.msk.bf16.mxu1 %vm302_vm0, %v284_v43 }
  0x52   : > { %901 = vmatmul.mubr.msk.bf16.gmra.mrb[12].mxu0 %vm302_vm0, %v277_v48  ;;  %917 = vmatmul.mubr.msk.bf16.gmra.mrb[12].mxu1 %vm302_vm0, %v285_v49 }
 0x10d   : > { %v890_v50 = vpop.f32.mrb[0].mxu0  ;;  %v1215_v52 = vpop.f32.mrb[0].mxu1 }
 0x10e   : > { %514 = vst.msk [vmem:[%s1211_s12 + $0x10] sm:$0xff] %vm302_vm0, %v890_v50  ;;  %v385_v51 = vpop.f32.mrb[1].mxu0  ;;  %530 = vst.msk [vmem:[%s1211_s12 + $0x90] sm:$0xff] %vm302_vm0, %v1215_v52  ;;  %v1222_v55 = vpop.f32.mrb[1].mxu1  ;;  %v617_v58 = vmul.f32 %v890_v50, %v890_v50  ;;  %v547_v0 = vsel %vm302_vm0, %v890_v50, 0.0 }
 0x10f   : > { %512 = vst.msk [vmem:[%s1211_s12] sm:$0xff] %vm302_vm0, %v385_v51  ;;  %v615_v53 = vmul.f32 %v385_v51, %v385_v51  ;;  %v891_v54 = vpop.f32.mrb[2].mxu0  ;;  %528 = vst.msk [vmem:[%s1211_s12 + $0x80] sm:$0xff] %vm302_vm0, %v1222_v55  ;;  %v1229_v57 = vpop.f32.mrb[2].mxu1  ;;  %v544_v59 = vsel %vm302_vm0, %v385_v51, 0.0 }
 0x110   : > { %515 = vst.msk [vmem:[%s1211_s12 + $0x18] sm:$0xff] %vm302_vm0, %v891_v54  ;;  %v388_v56 = vpop.f32.mrb[3].mxu0  ;;  %531 = vst.msk [vmem:[%s1211_s12 + $0x98] sm:$0xff] %vm302_vm0, %v1229_v57  ;;  %v1238_v62 = vpop.f32.mrb[3].mxu1  ;;  %v618_v2 = vmul.f32 %v891_v54, %v891_v54  ;;  %v650_v6 = vsel %vm302_vm0, %v617_v58, 0.0  ;;  %v549_v7 = vsel %vm302_vm0, %v891_v54, 0.0 }
 0x111   : > { %513 = vst.msk [vmem:[%s1211_s12 + $0x8] sm:$0xff] %vm302_vm0, %v388_v56  ;;  %v545_v60 = vsel %vm302_vm0, %v388_v56, 0.0  ;;  %v616_v61 = vmul.f32 %v388_v56, %v388_v56  ;;  %529 = vst.msk [vmem:[%s1211_s12 + $0x88] sm:$0xff] %vm302_vm0, %v1238_v62  ;;  %v647_v1 = vsel %vm302_vm0, %v615_v53, 0.0 }
 0x112   : > { %v546_v63 = vadd.f32 %v545_v60, %v544_v59  ;;  %v652_v13 = vsel %vm302_vm0, %v618_v2, 0.0 }
 0x113   : > { %v648_v3 = vsel %vm302_vm0, %v616_v61, 0.0 }
 0x114   : > { %v548_v4 = vadd.f32 %v547_v0, %v546_v63  ;;  %v649_v5 = vadd.f32 %v648_v3, %v647_v1 }
 0x115   : > { %v894_v8 = vpop.f32.mrb[4].mxu0  ;;  %v1250_v12 = vpop.f32.mrb[4].mxu1 }
 0x116   : > { %v651_v9 = vadd.f32 %v650_v6, %v649_v5  ;;  %518 = vst.msk [vmem:[%s1211_s12 + $0x30] sm:$0xff] %vm302_vm0, %v894_v8  ;;  %v401_v10 = vpop.f32.mrb[5].mxu0  ;;  %v550_v11 = vadd.f32 %v549_v7, %v548_v4  ;;  %534 = vst.msk [vmem:[%s1211_s12 + $0xb0] sm:$0xff] %vm302_vm0, %v1250_v12  ;;  %v1259_v17 = vpop.f32.mrb[5].mxu1  ;;  %v621_v22 = vmul.f32 %v894_v8, %v894_v8  ;;  %v555_v29 = vsel %vm302_vm0, %v894_v8, 0.0 }
 0x117   : > { %516 = vst.msk [vmem:[%s1211_s12 + $0x20] sm:$0xff] %vm302_vm0, %v401_v10  ;;  %v551_v14 = vsel %vm302_vm0, %v401_v10, 0.0  ;;  %v619_v15 = vmul.f32 %v401_v10, %v401_v10  ;;  %v895_v16 = vpop.f32.mrb[6].mxu0  ;;  %532 = vst.msk [vmem:[%s1211_s12 + $0xa0] sm:$0xff] %vm302_vm0, %v1259_v17  ;;  %v1266_v21 = vpop.f32.mrb[6].mxu1 }
 0x118   : > { %v552_v18 = vadd.f32 %v551_v14, %v550_v11  ;;  %v653_v19 = vadd.f32 %v652_v13, %v651_v9  ;;  %519 = vst.msk [vmem:[%s1211_s12 + $0x38] sm:$0xff] %vm302_vm0, %v895_v16  ;;  %v404_v20 = vpop.f32.mrb[7].mxu0  ;;  %535 = vst.msk [vmem:[%s1211_s12 + $0xb8] sm:$0xff] %vm302_vm0, %v1266_v21  ;;  %v1275_v26 = vpop.f32.mrb[7].mxu1  ;;  %v622_v30 = vmul.f32 %v895_v16, %v895_v16  ;;  %v658_v34 = vsel %vm302_vm0, %v621_v22, 0.0 }
 0x119   : > { %v654_v23 = vsel %vm302_vm0, %v619_v15, 0.0  ;;  %517 = vst.msk [vmem:[%s1211_s12 + $0x28] sm:$0xff] %vm302_vm0, %v404_v20  ;;  %v553_v24 = vsel %vm302_vm0, %v404_v20, 0.0  ;;  %v620_v25 = vmul.f32 %v404_v20, %v404_v20  ;;  %533 = vst.msk [vmem:[%s1211_s12 + $0xa8] sm:$0xff] %vm302_vm0, %v1275_v26  ;;  %v557_v35 = vsel %vm302_vm0, %v895_v16, 0.0 }
 0x11a   : > { %v655_v27 = vadd.f32 %v654_v23, %v653_v19  ;;  %v554_v28 = vadd.f32 %v553_v24, %v552_v18  ;;  %v660_v41 = vsel %vm302_vm0, %v622_v30, 0.0 }
 0x11b   : > { %v656_v31 = vsel %vm302_vm0, %v620_v25, 0.0 }
 0x11c   : > { %v556_v32 = vadd.f32 %v555_v29, %v554_v28  ;;  %v657_v33 = vadd.f32 %v656_v31, %v655_v27 }
 0x11d   : > { %v898_v36 = vpop.f32.mrb[8].mxu0  ;;  %v1286_v40 = vpop.f32.mrb[8].mxu1 }
 0x11e   : > { %v659_v37 = vadd.f32 %v658_v34, %v657_v33  ;;  %522 = vst.msk [vmem:[%s1211_s12 + $0x50] sm:$0xff] %vm302_vm0, %v898_v36  ;;  %v417_v38 = vpop.f32.mrb[9].mxu0  ;;  %v558_v39 = vadd.f32 %v557_v35, %v556_v32  ;;  %538 = vst.msk [vmem:[%s1211_s12 + $0xd0] sm:$0xff] %vm302_vm0, %v1286_v40  ;;  %v1295_v45 = vpop.f32.mrb[9].mxu1  ;;  %v625_v50 = vmul.f32 %v898_v36, %v898_v36  ;;  %v563_v60 = vsel %vm302_vm0, %v898_v36, 0.0 }
 0x11f   : > { %520 = vst.msk [vmem:[%s1211_s12 + $0x40] sm:$0xff] %vm302_vm0, %v417_v38  ;;  %v559_v42 = vsel %vm302_vm0, %v417_v38, 0.0  ;;  %v623_v43 = vmul.f32 %v417_v38, %v417_v38  ;;  %v899_v44 = vpop.f32.mrb[10].mxu0  ;;  %536 = vst.msk [vmem:[%s1211_s12 + $0xc0] sm:$0xff] %vm302_vm0, %v1295_v45  ;;  %v1302_v49 = vpop.f32.mrb[10].mxu1  ;;  %v631_v32 = vmul.f32 %v1222_v55, %v1222_v55 }
 0x120   : > { %v560_v46 = vadd.f32 %v559_v42, %v558_v39  ;;  %v661_v47 = vadd.f32 %v660_v41, %v659_v37  ;;  %523 = vst.msk [vmem:[%s1211_s12 + $0x58] sm:$0xff] %vm302_vm0, %v899_v44  ;;  %v420_v48 = vpop.f32.mrb[11].mxu0  ;;  %539 = vst.msk [vmem:[%s1211_s12 + $0xd8] sm:$0xff] %vm302_vm0, %v1302_v49  ;;  %v1311_v56 = vpop.f32.mrb[11].mxu1  ;;  %v626_v61 = vmul.f32 %v899_v44, %v899_v44  ;;  %v666_v2 = vsel %vm302_vm0, %v625_v50, 0.0 }
 0x121   : > { %v662_v51 = vsel %vm302_vm0, %v623_v43, 0.0  ;;  %521 = vst.msk [vmem:[%s1211_s12 + $0x48] sm:$0xff] %vm302_vm0, %v420_v48  ;;  %v561_v53 = vsel %vm302_vm0, %v420_v48, 0.0  ;;  %v624_v54 = vmul.f32 %v420_v48, %v420_v48  ;;  %537 = vst.msk [vmem:[%s1211_s12 + $0xc8] sm:$0xff] %vm302_vm0, %v1311_v56  ;;  %v565_v3 = vsel %vm302_vm0, %v899_v44, 0.0 }
 0x122   : > { %v663_v58 = vadd.f32 %v662_v51, %v661_v47  ;;  %v562_v59 = vadd.f32 %v561_v53, %v560_v46  ;;  %v668_v9 = vsel %vm302_vm0, %v626_v61, 0.0  ;;  %v575_v37 = vsel %vm302_vm0, %v1222_v55, 0.0 }
 0x123   : > { %v664_v63 = vsel %vm302_vm0, %v624_v54, 0.0  ;;  %v678_v42 = vsel %vm302_vm0, %v631_v32, 0.0  ;;  %v632_v43 = vmul.f32 %v1238_v62, %v1238_v62  ;;  %v633_v47 = vmul.f32 %v1215_v52, %v1215_v52 }
 0x124   : > { %v564_v0 = vadd.f32 %v563_v60, %v562_v59  ;;  %v665_v1 = vadd.f32 %v664_v63, %v663_v58  ;;  %v577_v48 = vsel %vm302_vm0, %v1238_v62, 0.0  ;;  %v579_v55 = vsel %vm302_vm0, %v1215_v52, 0.0 }
 0x125   : > { %v902_v4 = vpop.f32.mrb[12].mxu0  ;;  %v1322_v8 = vpop.f32.mrb[12].mxu1  ;;  %v634_v53 = vmul.f32 %v1229_v57, %v1229_v57  ;;  %v680_v54 = vsel %vm302_vm0, %v632_v43, 0.0  ;;  %v635_v58 = vmul.f32 %v1259_v17, %v1259_v17  ;;  %v682_v61 = vsel %vm302_vm0, %v633_v47, 0.0 }
 0x126   : > { %v667_v5 = vadd.f32 %v666_v2, %v665_v1  ;;  %526 = vst.msk [vmem:[%s1211_s12 + $0x70] sm:$0xff] %vm302_vm0, %v902_v4  ;;  %v433_v6 = vpop.f32.mrb[13].mxu0  ;;  %v566_v7 = vadd.f32 %v565_v3, %v564_v0  ;;  %542 = vst.msk [vmem:[%s1211_s12 + $0xf0] sm:$0xff] %vm302_vm0, %v1322_v8  ;;  %v1331_v14 = vpop.f32.mrb[13].mxu1  ;;  %v629_v20 = vmul.f32 %v902_v4, %v902_v4  ;;  %v571_v29 = vsel %vm302_vm0, %v902_v4, 0.0 }
 0x127   : > { %524 = vst.msk [vmem:[%s1211_s12 + $0x60] sm:$0xff] %vm302_vm0, %v433_v6  ;;  %v567_v10 = vsel %vm302_vm0, %v433_v6, 0.0  ;;  %v627_v11 = vmul.f32 %v433_v6, %v433_v6  ;;  %v903_v13 = vpop.f32.mrb[14].mxu0  ;;  %540 = vst.msk [vmem:[%s1211_s12 + $0xe0] sm:$0xff] %vm302_vm0, %v1331_v14  ;;  %v1338_v19 = vpop.f32.mrb[14].mxu1  ;;  %v581_v62 = vsel %vm302_vm0, %v1229_v57, 0.0  ;;  %v636_v3 = vmul.f32 %v1275_v26, %v1275_v26 }
 0x128   : > { %v568_v15 = vadd.f32 %v567_v10, %v566_v7  ;;  %v669_v16 = vadd.f32 %v668_v9, %v667_v5  ;;  %527 = vst.msk [vmem:[%s1211_s12 + $0x78] sm:$0xff] %vm302_vm0, %v903_v13  ;;  %v436_v18 = vpop.f32.mrb[15].mxu0  ;;  %543 = vst.msk [vmem:[%s1211_s12 + $0xf8] sm:$0xff] %vm302_vm0, %v1338_v19  ;;  %v1347_v25 = vpop.f32.mrb[15].mxu1  ;;  %v630_v30 = vmul.f32 %v903_v13, %v903_v13  ;;  %v674_v35 = vsel %vm302_vm0, %v629_v20, 0.0 }
 0x129   : > { %v670_v22 = vsel %vm302_vm0, %v627_v11, 0.0  ;;  %525 = vst.msk [vmem:[%s1211_s12 + $0x68] sm:$0xff] %vm302_vm0, %v436_v18  ;;  %v569_v23 = vsel %vm302_vm0, %v436_v18, 0.0  ;;  %v628_v24 = vmul.f32 %v436_v18, %v436_v18  ;;  %541 = vst.msk [vmem:[%s1211_s12 + $0xe8] sm:$0xff] %vm302_vm0, %v1347_v25  ;;  %v573_v36 = vsel %vm302_vm0, %v903_v13, 0.0 }
 0x12a   : > { %v671_v27 = vadd.f32 %v670_v22, %v669_v16  ;;  %v570_v28 = vadd.f32 %v569_v23, %v568_v15  ;;  %v676_v41 = vsel %vm302_vm0, %v630_v30, 0.0  ;;  %v583_v63 = vsel %vm302_vm0, %v1259_v17, 0.0 }
 0x12b   : > { %v672_v31 = vsel %vm302_vm0, %v628_v24, 0.0  ;;  %v684_v1 = vsel %vm302_vm0, %v634_v53, 0.0  ;;  %v686_v2 = vsel %vm302_vm0, %v635_v58, 0.0  ;;  %v637_v6 = vmul.f32 %v1250_v12, %v1250_v12 }
 0x12c   : > { %v572_v33 = vadd.f32 %v571_v29, %v570_v28  ;;  %v673_v34 = vadd.f32 %v672_v31, %v671_v27  ;;  %v585_v57 = vsel %vm302_vm0, %v1275_v26, 0.0  ;;  %v587_v17 = vsel %vm302_vm0, %v1250_v12, 0.0 }
 0x12d   : > { %v638_v10 = vmul.f32 %v1266_v21, %v1266_v21  ;;  %v688_v11 = vsel %vm302_vm0, %v636_v3, 0.0  ;;  %v639_v13 = vmul.f32 %v1295_v45, %v1295_v45  ;;  %v690_v18 = vsel %vm302_vm0, %v637_v6, 0.0 }
 0x12e   : > { %v675_v38 = vadd.f32 %v674_v35, %v673_v34  ;;  %v574_v39 = vadd.f32 %v573_v36, %v572_v33  ;;  %v589_v26 = vsel %vm302_vm0, %v1266_v21, 0.0  ;;  %v591_v20 = vsel %vm302_vm0, %v1295_v45, 0.0 }
 0x12f   : > { %v692_v23 = vsel %vm302_vm0, %v638_v10, 0.0  ;;  %v694_v24 = vsel %vm302_vm0, %v639_v13, 0.0  ;;  %v640_v27 = vmul.f32 %v1311_v56, %v1311_v56  ;;  %v641_v30 = vmul.f32 %v1286_v40, %v1286_v40 }
 0x130   : > { %v576_v44 = vadd.f32 %v575_v37, %v574_v39  ;;  %v677_v46 = vadd.f32 %v676_v41, %v675_v38  ;;  %v593_v21 = vsel %vm302_vm0, %v1311_v56, 0.0  ;;  %v595_v45 = vsel %vm302_vm0, %v1286_v40, 0.0 }
 0x131   : > { %v642_v33 = vmul.f32 %v1302_v49, %v1302_v49  ;;  %v696_v34 = vsel %vm302_vm0, %v640_v27, 0.0  ;;  %v643_v35 = vmul.f32 %v1331_v14, %v1331_v14  ;;  %v698_v38 = vsel %vm302_vm0, %v641_v30, 0.0 }
 0x132   : > { %v679_v50 = vadd.f32 %v678_v42, %v677_v46  ;;  %v578_v51 = vadd.f32 %v577_v48, %v576_v44  ;;  %v597_v56 = vsel %vm302_vm0, %v1302_v49, 0.0  ;;  %v599_v39 = vsel %vm302_vm0, %v1331_v14, 0.0 }
 0x133   : > { %v700_v42 = vsel %vm302_vm0, %v642_v33, 0.0  ;;  %v702_v43 = vsel %vm302_vm0, %v643_v35, 0.0  ;;  %v644_v44 = vmul.f32 %v1347_v25, %v1347_v25  ;;  %v645_v48 = vmul.f32 %v1322_v8, %v1322_v8 }
 0x134   : > { %v580_v59 = vadd.f32 %v579_v55, %v578_v51  ;;  %v681_v60 = vadd.f32 %v680_v54, %v679_v50  ;;  %v601_v49 = vsel %vm302_vm0, %v1347_v25, 0.0  ;;  %v603_v51 = vsel %vm302_vm0, %v1322_v8, 0.0 }
 0x135   : > { %v646_v55 = vmul.f32 %v1338_v19, %v1338_v19  ;;  %v704_v53 = vsel %vm302_vm0, %v644_v44, 0.0 }
 0x136   : > { %v683_v0 = vadd.f32 %v682_v61, %v681_v60  ;;  %v582_v52 = vadd.f32 %v581_v62, %v580_v59  ;;  %v706_v59 = vsel %vm302_vm0, %v645_v48, 0.0  ;;  %v605_v60 = vsel %vm302_vm0, %v1338_v19, 0.0 }
 0x137   : > { %v708_v62 = vsel %vm302_vm0, %v646_v55, 0.0 }
 0x138   : > { %v584_v4 = vadd.f32 %v583_v63, %v582_v52  ;;  %v685_v5 = vadd.f32 %v684_v1, %v683_v0 }
 0x13a   : > { %v687_v7 = vadd.f32 %v686_v2, %v685_v5  ;;  %v586_v9 = vadd.f32 %v585_v57, %v584_v4 }
 0x13c   : > { %v588_v15 = vadd.f32 %v587_v17, %v586_v9  ;;  %v689_v16 = vadd.f32 %v688_v11, %v687_v7 }
 0x13e   : > { %v691_v22 = vadd.f32 %v690_v18, %v689_v16  ;;  %v590_v12 = vadd.f32 %v589_v26, %v588_v15 }
 0x140   : > { %v592_v28 = vadd.f32 %v591_v20, %v590_v12  ;;  %v693_v29 = vadd.f32 %v692_v23, %v691_v22 }
 0x142   : > { %v695_v31 = vadd.f32 %v694_v24, %v693_v29  ;;  %v594_v32 = vadd.f32 %v593_v21, %v592_v28 }
 0x144   : > { %v596_v36 = vadd.f32 %v595_v45, %v594_v32  ;;  %v697_v37 = vadd.f32 %v696_v34, %v695_v31 }
 0x146   : > { %v699_v41 = vadd.f32 %v698_v38, %v697_v37  ;;  %v598_v40 = vadd.f32 %v597_v56, %v596_v36 }
 0x148   : > { %v600_v46 = vadd.f32 %v599_v39, %v598_v40  ;;  %v701_v47 = vadd.f32 %v700_v42, %v699_v41 }
 0x14a   : > { %v703_v50 = vadd.f32 %v702_v43, %v701_v47  ;;  %v602_v14 = vadd.f32 %v601_v49, %v600_v46 }
 0x14c   : > { %v604_v54 = vadd.f32 %v603_v51, %v602_v14  ;;  %v705_v58 = vadd.f32 %v704_v53, %v703_v50 }
 0x14e   : > { %v606_v61 = vadd.f32 %v605_v60, %v604_v54  ;;  %v707_v25 = vadd.f32 %v706_v59, %v705_v58 }
 0x150   : > { %v607_v63 = vrot.slane %v606_v61, 4  ;;  %v709_v0 = vadd.f32 %v708_v62, %v707_v25 }
 0x152   : > { %v608_v8 = vadd.f32 %v607_v63, %v606_v61  ;;  %v710_v52 = vrot.slane %v709_v0, 4 }
 0x154   : > { %v609_v1 = vrot.slane %v608_v8, 2  ;;  %v711_v2 = vadd.f32 %v710_v52, %v709_v0 }
 0x156   : > { %v610_v3 = vadd.f32 %v609_v1, %v608_v8  ;;  %v712_v4 = vrot.slane %v711_v2, 2 }
 0x158   : > { %v611_v5 = vrot.slane %v610_v3, 1  ;;  %v713_v6 = vadd.f32 %v712_v4, %v711_v2 }
 0x15a   : > { %v612_v19 = vadd.f32 %v611_v5, %v610_v3  ;;  %v714_v57 = vrot.slane %v713_v6, 1 }
 0x15c   : > { %614 = vst.msk [vmem:[%s233_s15] sm:$0x1] %vm613_vm1, %v612_v19  ;;  %v715_v7 = vadd.f32 %v714_v57, %v713_v6 }
 0x15e   : > { %716 = vst.msk [vmem:[%s236_s25] sm:$0x1] %vm613_vm1, %v715_v7 }
 0x15f PF: > { %p15_p9 = scmp.ge.s32.totalorder %s1083_s20, 4   ;;  %s1466_s15 = smov %s1023_s16 }
 0x160   : > { %s1467_s16 = smov %s1027_s17  ;;  %s1468_s17 = smov %s1093_s23 }
 0x161   : > { %s1469_s18 = smov %s1083_s20  ;;  %17 = sbr.rel (!%p15_p9) target bundleno = 3 (0x3), region = 92 }
 0x168   :  { %763 = vsyncpa [#allocation3], 1 }
 0x169   :  { %765 = vsyncpa [#allocation3 + $0x1], 1 }

// kernel: _lambda_.11
= control target key start
LH: loop header
LB: loop body
LE: loop exit
PB: predicated region body
PF: predicated region fallthrough
CT: control target
= control target key end

     0   :  { %v32_v0 = vlaneseq  ;;  %s270_s1 = inlined_call_operand.vmem [shape: f32[1,512], index: 1, kind: input, shape index: {}]   ;;  %s271_s2 = inlined_call_operand.vmem [shape: f32[1,512], index: 2, kind: input, shape index: {}]   ;;  %s272_s0 = inlined_call_operand.vmem [shape: f32[32,512], index: 0, kind: input, shape index: {}]   ;;  %s273_s3 = inlined_call_operand.vmem [shape: f32[32,512], index: 3, kind: output, shape index: {}]  }
   0x1   :  { %v30_v2 = vld [vmem:[%s270_s1] sm:$0xf]  ;;  %v15_v6 = vld [vmem:[%s272_s0 + $0x8] sm:$0xff]  ;;  %v16_v10 = vld [vmem:[%s272_s0 + $0x10] sm:$0xff] }
   0x2   :  { %v33_v1 = vshrl.u32 %v32_v0, 7  ;;  %v68_v3 = vld [vmem:[%s271_s2] sm:$0xf]  ;;  %v19_v12 = vld [vmem:[%s272_s0 + $0x28] sm:$0xff]  ;;  %v17_v17 = vld [vmem:[%s272_s0 + $0x18] sm:$0xff] }
   0x3   :  { %v14_v4 = vld [vmem:[%s272_s0] sm:$0xff]  ;;  %v20_v18 = vld [vmem:[%s272_s0 + $0x30] sm:$0xff]  ;;  %v21_v19 = vld [vmem:[%s272_s0 + $0x38] sm:$0xff] }
   0x4   :  { %v34_v5 = vsub.s32 0, %v33_v1  ;;  %v38_v7 = vsub.s32 1, %v33_v1  ;;  %v42_v8 = vsub.s32 2, %v33_v1  ;;  %v46_v9 = vsub.s32 3, %v33_v1  ;;  %v18_v11 = vld [vmem:[%s272_s0 + $0x20] sm:$0xff]  ;;  %v23_v37 = vld [vmem:[%s272_s0 + $0x48] sm:$0xff] }
   0x5   :  { %v22_v36 = vld [vmem:[%s272_s0 + $0x40] sm:$0xff]  ;;  %v24_v38 = vld [vmem:[%s272_s0 + $0x50] sm:$0xff]  ;;  %v25_v43 = vld [vmem:[%s272_s0 + $0x58] sm:$0xff] }
   0x6   :  { %v35_v13 = vrot.slane %v30_v2, %v34_v5  ;;  %v183_v14 = vrot.slane %v68_v3, %v34_v5  ;;  %v39_v15 = vrot.slane %v30_v2, %v38_v7  ;;  %v77_v16 = vrot.slane %v68_v3, %v38_v7  ;;  %v26_v44 = vld [vmem:[%s272_s0 + $0x60] sm:$0xff]  ;;  %v27_v45 = vld [vmem:[%s272_s0 + $0x68] sm:$0xff]  ;;  %v28_v50 = vld [vmem:[%s272_s0 + $0x70] sm:$0xff] }
   0x7   :  { %v43_v20 = vrot.slane %v30_v2, %v42_v8  ;;  %v81_v21 = vrot.slane %v68_v3, %v42_v8  ;;  %v47_v22 = vrot.slane %v30_v2, %v46_v9  ;;  %v85_v23 = vrot.slane %v68_v3, %v46_v9  ;;  %v29_v51 = vld [vmem:[%s272_s0 + $0x78] sm:$0xff] }
   0x8   :  { %v52_v24 = vmul.f32 %v35_v13, %v14_v4  ;;  %v53_v25 = vmul.f32 %v39_v15, %v15_v6  ;;  %v56_v26 = vmul.f32 %v35_v13, %v18_v11  ;;  %v57_v27 = vmul.f32 %v39_v15, %v19_v12 }
   0x9   :  { %v54_v28 = vmul.f32 %v43_v20, %v16_v10  ;;  %v55_v29 = vmul.f32 %v47_v22, %v17_v17  ;;  %v58_v30 = vmul.f32 %v43_v20, %v20_v18  ;;  %v59_v31 = vmul.f32 %v47_v22, %v21_v19 }
   0xa   :  { %v90_v32 = vadd.f32 %v183_v14, %v52_v24  ;;  %v91_v33 = vadd.f32 %v77_v16, %v53_v25  ;;  %v94_v34 = vadd.f32 %v183_v14, %v56_v26  ;;  %v95_v35 = vadd.f32 %v77_v16, %v57_v27 }
   0xb   :  { %v92_v39 = vadd.f32 %v81_v21, %v54_v28  ;;  %v93_v40 = vadd.f32 %v85_v23, %v55_v29  ;;  %v96_v41 = vadd.f32 %v81_v21, %v58_v30  ;;  %v97_v42 = vadd.f32 %v85_v23, %v59_v31 }
   0xc   :  { %v106_v46 = vmax.f32 %v90_v32, 0.0  ;;  %v107_v47 = vmax.f32 %v91_v33, 0.0  ;;  %v110_v48 = vmax.f32 %v94_v34, 0.0  ;;  %v111_v49 = vmax.f32 %v95_v35, 0.0 }
   0xd   :  { %v108_v52 = vmax.f32 %v92_v39, 0.0  ;;  %v109_v53 = vmax.f32 %v93_v40, 0.0  ;;  %v112_v54 = vmax.f32 %v96_v41, 0.0  ;;  %v113_v55 = vmax.f32 %v97_v42, 0.0 }
   0xe   :  { %122 = vst [vmem:[%s273_s3] sm:$0xff] %v106_v46  ;;  %123 = vst [vmem:[%s273_s3 + $0x8] sm:$0xff] %v107_v47  ;;  %v60_v56 = vmul.f32 %v35_v13, %v22_v36  ;;  %v61_v57 = vmul.f32 %v39_v15, %v23_v37  ;;  %v62_v58 = vmul.f32 %v43_v20, %v24_v38 }
   0xf   :  { %126 = vst [vmem:[%s273_s3 + $0x20] sm:$0xff] %v110_v48  ;;  %127 = vst [vmem:[%s273_s3 + $0x28] sm:$0xff] %v111_v49  ;;  %v63_v59 = vmul.f32 %v47_v22, %v25_v43  ;;  %v64_v60 = vmul.f32 %v35_v13, %v26_v44  ;;  %v65_v61 = vmul.f32 %v39_v15, %v27_v45 }
  0x10   :  { %124 = vst [vmem:[%s273_s3 + $0x10] sm:$0xff] %v108_v52  ;;  %125 = vst [vmem:[%s273_s3 + $0x18] sm:$0xff] %v109_v53  ;;  %v66_v62 = vmul.f32 %v43_v20, %v28_v50  ;;  %v67_v63 = vmul.f32 %v47_v22, %v29_v51  ;;  %v98_v0 = vadd.f32 %v183_v14, %v60_v56 }
  0x11   :  { %128 = vst [vmem:[%s273_s3 + $0x30] sm:$0xff] %v112_v54  ;;  %129 = vst [vmem:[%s273_s3 + $0x38] sm:$0xff] %v113_v55  ;;  %v99_v1 = vadd.f32 %v77_v16, %v61_v57  ;;  %v100_v2 = vadd.f32 %v81_v21, %v62_v58  ;;  %v101_v3 = vadd.f32 %v85_v23, %v63_v59 }
  0x12   :  { %v102_v4 = vadd.f32 %v183_v14, %v64_v60  ;;  %v103_v5 = vadd.f32 %v77_v16, %v65_v61  ;;  %v104_v6 = vadd.f32 %v81_v21, %v66_v62  ;;  %v105_v7 = vadd.f32 %v85_v23, %v67_v63 }
  0x13   :  { %v114_v8 = vmax.f32 %v98_v0, 0.0  ;;  %v115_v9 = vmax.f32 %v99_v1, 0.0  ;;  %v116_v10 = vmax.f32 %v100_v2, 0.0  ;;  %v117_v11 = vmax.f32 %v101_v3, 0.0 }
  0x14   :  { %v118_v12 = vmax.f32 %v102_v4, 0.0  ;;  %v119_v17 = vmax.f32 %v103_v5, 0.0  ;;  %v120_v13 = vmax.f32 %v104_v6, 0.0  ;;  %v121_v15 = vmax.f32 %v105_v7, 0.0 }
  0x15   :  { %130 = vst [vmem:[%s273_s3 + $0x40] sm:$0xff] %v114_v8  ;;  %131 = vst [vmem:[%s273_s3 + $0x48] sm:$0xff] %v115_v9 }
  0x16   :  { %132 = vst [vmem:[%s273_s3 + $0x50] sm:$0xff] %v116_v10  ;;  %133 = vst [vmem:[%s273_s3 + $0x58] sm:$0xff] %v117_v11 }
  0x17   :  { %134 = vst [vmem:[%s273_s3 + $0x60] sm:$0xff] %v118_v12  ;;  %135 = vst [vmem:[%s273_s3 + $0x68] sm:$0xff] %v119_v17 }
  0x18   :  { %136 = vst [vmem:[%s273_s3 + $0x70] sm:$0xff] %v120_v13  ;;  %137 = vst [vmem:[%s273_s3 + $0x78] sm:$0xff] %v121_v15 }

// kernel: tile.63
= control target key start
LH: loop header
LB: loop body
LE: loop exit
PB: predicated region body
PF: predicated region fallthrough
CT: control target
= control target key end

     0   :  { %s34_s0 = inlined_call_operand.vmem [shape: f32[32], index: 0, kind: input, shape index: {}]   ;;  %s35_s1 = inlined_call_operand.vmem [shape: f32[18,32], index: 1, kind: output, shape index: {}]  }
   0x1   :  { %v4_v0 = vld [vmem:[%s34_s0] ss:$0 sm:$0xff] }
   0x2   :  { %5 = vst [vmem:[%s35_s1] sm:$0xff] %v4_v0  ;;  %10 = vst [vmem:[%s35_s1 + $0x8] sm:$0xff] %v4_v0 }
   0x3   :  { %11 = vst [vmem:[%s35_s1 + $0x10] sm:$0xff] %v4_v0 }

// kernel: tile.68
= control target key start
LH: loop header
LB: loop body
LE: loop exit
PB: predicated region body
PF: predicated region fallthrough
CT: control target
= control target key end

     0   :  { %s69_s8 = smov 96   ;;  %vm3_vm0 = vcmask 261120   ;;  %s71_s15 = smov 64   ;;  %vm11_vm1 = vcmask 1048320   ;;  %vm23_vm2 = vcmask 523520   ;;  %vm17_vm3 = vcmask 785920   ;;  %s109_s0 = inlined_call_operand.vmem [shape: f32[18,32], index: 0, kind: input, shape index: {}]   ;;  %s110_s1 = inlined_call_operand.vmem [shape: f32[1,576], index: 1, kind: output, shape index: {}]  }
   0x1   :  { %v59_v0 = vld [vmem:[%s109_s0 + $0x3] ss:$4 sm:$0xf]   ;;  %v60_v1 = vld [vmem:[%s109_s0 + $0x2] ss:$4 sm:$0xf]  }
   0x2   :  { %9 = vrot.lane.b32.xlu0 %v59_v0, %s69_s8  ;;  %v61_v2 = vld [vmem:[%s109_s0 + $0x1] ss:$4 sm:$0x1f]   ;;  %v2_v3 = vld [vmem:[%s109_s0] ss:$4 sm:$0x1f]  }
   0x3   :  { %s70_s0 = smov 32   ;;  %4 = vst.msk [vmem:[#allocation0] ss:$8 sm:$0xf] %vm3_vm0, %v2_v3   ;;  %6 = vst.msk [vmem:[#allocation0 + $0x1c] sm:$0x10] %vm3_vm0, %v2_v3  }
   0x4   :  { %21 = vrot.lane.b32.xlu1 %v61_v2, %s70_s0 }
   0x6   :  { %15 = vrot.lane.b32.xlu0 %v60_v1, %s71_s15 }
  0x74   :  { %v10_v4 = vpop.permute.xlu0 %9  }
  0x75   :  { %12 = vst.msk [vmem:[#allocation0] ss:$8 sm:$0xf] %vm11_vm1, %v10_v4  }
  0x76   :  { %v22_v5 = vpop.permute.xlu1 %21  }
  0x77   :  { %26 = vst.msk [vmem:[#allocation0 + $0x1c] sm:$0x10] %vm23_vm2, %v22_v5  }
  0x78   :  { %v16_v6 = vpop.permute.xlu0 %15  }
  0x79   :  { %18 = vst.msk [vmem:[#allocation0] ss:$8 sm:$0xf] %vm17_vm3, %v16_v6  }
  0x7a   :  { %24 = vst.msk [vmem:[#allocation0] ss:$8 sm:$0xf] %vm23_vm2, %v22_v5  }
  0x7e   :  { %v51_v7 = vld [vmem:[#allocation0 + $0x20] sm:$0x1] }
  0x7f   :  { %65 = vst [vmem:[%s110_s1 + $0x4] sm:$0x1] %v51_v7 }
  0x81   :  { %v30_v8 = vld [vmem:[#allocation0] sm:$0x1]  ;;  %v34_v9 = vld [vmem:[#allocation0 + $0x8] sm:$0x1]  ;;  %v39_v10 = vld [vmem:[#allocation0 + $0x10] sm:$0x1] }
  0x82   :  { %32 = vst [vmem:[%s110_s1] sm:$0x1] %v30_v8  ;;  %62 = vst [vmem:[%s110_s1 + $0x1] sm:$0x1] %v34_v9  ;;  %v45_v11 = vld [vmem:[#allocation0 + $0x18] sm:$0x1] }
  0x83   :  { %63 = vst [vmem:[%s110_s1 + $0x2] sm:$0x1] %v39_v10  ;;  %64 = vst [vmem:[%s110_s1 + $0x3] sm:$0x1] %v45_v11 }

// kernel: _lambda_.13
= control target key start
LH: loop header
LB: loop body
LE: loop exit
PB: predicated region body
PF: predicated region fallthrough
CT: control target
= control target key end

     0   :  { %v36_v0 = vlaneseq  ;;  %vm152_vm0 = vcmask 523264   ;;  %s383_s1 = inlined_call_operand.vmem [shape: f32[1,576], index: 1, kind: input, shape index: {}]   ;;  %s384_s2 = inlined_call_operand.vmem [shape: f32[1,576], index: 2, kind: input, shape index: {}]   ;;  %s385_s0 = inlined_call_operand.vmem [shape: f32[32,576], index: 0, kind: input, shape index: {}]   ;;  %s386_s3 = inlined_call_operand.vmem [shape: f32[32,576], index: 3, kind: output, shape index: {}]  }
   0x1   :  { %v34_v2 = vld [vmem:[%s383_s1] sm:$0x1f]  ;;  %v15_v9 = vld [vmem:[%s385_s0 + $0x8] sm:$0xff]  ;;  %v16_v10 = vld [vmem:[%s385_s0 + $0x10] sm:$0xff] }
   0x2   :  { %v37_v1 = vshrl.u32 %v36_v0, 7  ;;  %v81_v3 = vld [vmem:[%s384_s2] sm:$0x1f]  ;;  %v17_v16 = vld [vmem:[%s385_s0 + $0x18] sm:$0xff]  ;;  %v19_v17 = vld [vmem:[%s385_s0 + $0x28] sm:$0xff] }
   0x3   :  { %v14_v8 = vld [vmem:[%s385_s0] sm:$0xff]  ;;  %v20_v18 = vld [vmem:[%s385_s0 + $0x30] sm:$0xff]  ;;  %v21_v24 = vld [vmem:[%s385_s0 + $0x38] sm:$0xff] }
   0x4   :  { %v38_v4 = vsub.s32 0, %v37_v1  ;;  %v42_v5 = vsub.s32 1, %v37_v1  ;;  %v46_v6 = vsub.s32 2, %v37_v1  ;;  %v50_v7 = vsub.s32 3, %v37_v1  ;;  %v18_v23 = vld [vmem:[%s385_s0 + $0x20] sm:$0xff]  ;;  %v23_v42 = vld [vmem:[%s385_s0 + $0x48] sm:$0xff] }
   0x5   :  { %v54_v11 = vsub.s32 4, %v37_v1  ;;  %v22_v41 = vld [vmem:[%s385_s0 + $0x40] sm:$0xff]  ;;  %v24_v43 = vld [vmem:[%s385_s0 + $0x50] sm:$0xff]  ;;  %v25_v48 = vld [vmem:[%s385_s0 + $0x58] sm:$0xff] }
   0x6   :  { %v208_v12 = vrot.slane %v34_v2, %v38_v4  ;;  %v210_v13 = vrot.slane %v81_v3, %v38_v4  ;;  %v212_v14 = vrot.slane %v34_v2, %v42_v5  ;;  %v214_v15 = vrot.slane %v81_v3, %v42_v5  ;;  %v26_v49 = vld [vmem:[%s385_s0 + $0x60] sm:$0xff]  ;;  %v27_v50 = vld [vmem:[%s385_s0 + $0x68] sm:$0xff]  ;;  %v28_v55 = vld [vmem:[%s385_s0 + $0x70] sm:$0xff] }
   0x7   :  { %v225_v19 = vrot.slane %v34_v2, %v46_v6  ;;  %v227_v20 = vrot.slane %v81_v3, %v46_v6  ;;  %v229_v21 = vrot.slane %v34_v2, %v50_v7  ;;  %v231_v22 = vrot.slane %v81_v3, %v50_v7  ;;  %v29_v56 = vld [vmem:[%s385_s0 + $0x78] sm:$0xff] }
   0x8   :  { %v61_v25 = vmul.f32 %v208_v12, %v14_v8  ;;  %v62_v26 = vmul.f32 %v212_v14, %v15_v9  ;;  %v241_v27 = vrot.slane %v34_v2, %v54_v11  ;;  %v243_v28 = vrot.slane %v81_v3, %v54_v11  ;;  %v30_v9 = vld [vmem:[%s385_s0 + $0x80] sm:$0xff] }
   0x9   :  { %v63_v29 = vmul.f32 %v225_v19, %v16_v10  ;;  %v64_v30 = vmul.f32 %v229_v21, %v17_v16  ;;  %v66_v31 = vmul.f32 %v208_v12, %v19_v17  ;;  %v67_v32 = vmul.f32 %v212_v14, %v20_v18  ;;  %v31_v10 = vld [vmem:[%s385_s0 + $0x88] sm:$0xff]  ;;  %v32_v18 = vld [vmem:[%s385_s0 + $0x90] sm:$0xff] }
   0xa   :  { %v108_v33 = vadd.f32 %v210_v13, %v61_v25  ;;  %v109_v34 = vadd.f32 %v214_v15, %v62_v26  ;;  %v65_v35 = vmul.f32 %v241_v27, %v18_v23  ;;  %v68_v36 = vmul.f32 %v225_v19, %v21_v24  ;;  %v33_v23 = vld [vmem:[%s385_s0 + $0x98] sm:$0xff] }
   0xb   :  { %v110_v37 = vadd.f32 %v227_v20, %v63_v29  ;;  %v111_v38 = vadd.f32 %v231_v22, %v64_v30  ;;  %v113_v39 = vadd.f32 %v210_v13, %v66_v31  ;;  %v114_v40 = vadd.f32 %v214_v15, %v67_v32 }
   0xc   :  { %v128_v44 = vmax.f32 %v108_v33, 0.0  ;;  %v129_v45 = vmax.f32 %v109_v34, 0.0  ;;  %v112_v46 = vadd.f32 %v243_v28, %v65_v35  ;;  %v115_v47 = vadd.f32 %v227_v20, %v68_v36 }
   0xd   :  { %v130_v51 = vmax.f32 %v110_v37, 0.0  ;;  %v131_v52 = vmax.f32 %v111_v38, 0.0  ;;  %v133_v53 = vmax.f32 %v113_v39, 0.0  ;;  %v134_v54 = vmax.f32 %v114_v40, 0.0 }
   0xe   :  { %148 = vst [vmem:[%s386_s3] sm:$0xff] %v128_v44  ;;  %149 = vst [vmem:[%s386_s3 + $0x8] sm:$0xff] %v129_v45  ;;  %v132_v57 = vmax.f32 %v112_v46, 0.0  ;;  %v135_v58 = vmax.f32 %v115_v47, 0.0  ;;  %v69_v59 = vmul.f32 %v229_v21, %v22_v41  ;;  %v70_v60 = vmul.f32 %v241_v27, %v23_v42 }
   0xf   :  { %150 = vst [vmem:[%s386_s3 + $0x10] sm:$0xff] %v130_v51  ;;  %151 = vst [vmem:[%s386_s3 + $0x18] sm:$0xff] %v131_v52  ;;  %v71_v61 = vmul.f32 %v208_v12, %v24_v43  ;;  %v72_v62 = vmul.f32 %v212_v14, %v25_v48  ;;  %v73_v63 = vmul.f32 %v225_v19, %v26_v49 }
  0x10   :  { %154 = vst [vmem:[%s386_s3 + $0x28] sm:$0xff] %v133_v53  ;;  %155 = vst [vmem:[%s386_s3 + $0x30] sm:$0xff] %v134_v54  ;;  %v74_v0 = vmul.f32 %v229_v21, %v27_v50  ;;  %v116_v1 = vadd.f32 %v231_v22, %v69_v59  ;;  %v117_v2 = vadd.f32 %v243_v28, %v70_v60 }
  0x11   :  { %153 = vst.msk [vmem:[%s386_s3 + $0x20] sm:$0xff] %vm152_vm0, %v132_v57  ;;  %156 = vst [vmem:[%s386_s3 + $0x38] sm:$0xff] %v135_v58  ;;  %v75_v3 = vmul.f32 %v241_v27, %v28_v55  ;;  %v76_v4 = vmul.f32 %v208_v12, %v29_v56  ;;  %v118_v5 = vadd.f32 %v210_v13, %v71_v61 }
  0x12   :  { %v119_v6 = vadd.f32 %v214_v15, %v72_v62  ;;  %v120_v7 = vadd.f32 %v227_v20, %v73_v63  ;;  %v121_v8 = vadd.f32 %v231_v22, %v74_v0  ;;  %v136_v11 = vmax.f32 %v116_v1, 0.0 }
  0x13   :  { %v137_v16 = vmax.f32 %v117_v2, 0.0  ;;  %v122_v12 = vadd.f32 %v243_v28, %v75_v3  ;;  %v123_v17 = vadd.f32 %v210_v13, %v76_v4  ;;  %v138_v24 = vmax.f32 %v118_v5, 0.0 }
  0x14   :  { %v139_v25 = vmax.f32 %v119_v6, 0.0  ;;  %v140_v26 = vmax.f32 %v120_v7, 0.0  ;;  %v141_v29 = vmax.f32 %v121_v8, 0.0  ;;  %157 = vst [vmem:[%s386_s3 + $0x40] sm:$0xff] %v136_v11  ;;  %v77_v31 = vmul.f32 %v212_v14, %v30_v9 }
  0x15   :  { %158 = vst.msk [vmem:[%s386_s3 + $0x48] sm:$0xff] %vm152_vm0, %v137_v16  ;;  %v142_v13 = vmax.f32 %v122_v12, 0.0  ;;  %v143_v30 = vmax.f32 %v123_v17, 0.0  ;;  %v78_v32 = vmul.f32 %v225_v19, %v31_v10  ;;  %159 = vst [vmem:[%s386_s3 + $0x50] sm:$0xff] %v138_v24  ;;  %v79_v14 = vmul.f32 %v229_v21, %v32_v18 }
  0x16   :  { %160 = vst [vmem:[%s386_s3 + $0x58] sm:$0xff] %v139_v25  ;;  %161 = vst [vmem:[%s386_s3 + $0x60] sm:$0xff] %v140_v26  ;;  %v80_v19 = vmul.f32 %v241_v27, %v33_v23  ;;  %v124_v33 = vadd.f32 %v214_v15, %v77_v31 }
  0x17   :  { %162 = vst [vmem:[%s386_s3 + $0x68] sm:$0xff] %v141_v29  ;;  %163 = vst.msk [vmem:[%s386_s3 + $0x70] sm:$0xff] %vm152_vm0, %v142_v13  ;;  %v125_v34 = vadd.f32 %v227_v20, %v78_v32  ;;  %v126_v35 = vadd.f32 %v231_v22, %v79_v14 }
  0x18   :  { %164 = vst [vmem:[%s386_s3 + $0x78] sm:$0xff] %v143_v30  ;;  %v127_v36 = vadd.f32 %v243_v28, %v80_v19  ;;  %v144_v21 = vmax.f32 %v124_v33, 0.0 }
  0x19   :  { %v145_v37 = vmax.f32 %v125_v34, 0.0  ;;  %v146_v27 = vmax.f32 %v126_v35, 0.0 }
  0x1a   :  { %v147_v38 = vmax.f32 %v127_v36, 0.0  ;;  %165 = vst [vmem:[%s386_s3 + $0x80] sm:$0xff] %v144_v21 }
  0x1b   :  { %166 = vst [vmem:[%s386_s3 + $0x88] sm:$0xff] %v145_v37  ;;  %167 = vst [vmem:[%s386_s3 + $0x90] sm:$0xff] %v146_v27 }
  0x1c   :  { %168 = vst.msk [vmem:[%s386_s3 + $0x98] sm:$0xff] %vm152_vm0, %v147_v38 }

// kernel: tile.73
= control target key start
LH: loop header
LB: loop body
LE: loop exit
PB: predicated region body
PF: predicated region fallthrough
CT: control target
= control target key end

     0   :  { %s28_s0 = inlined_call_operand.vmem [shape: f32[64], index: 0, kind: input, shape index: {}]   ;;  %s29_s1 = inlined_call_operand.vmem [shape: f32[16,64], index: 1, kind: output, shape index: {}]  }
   0x1   :  { %v4_v0 = vld [vmem:[%s28_s0] ss:$0 sm:$0xff] }
   0x2   :  { %5 = vst [vmem:[%s29_s1] sm:$0xff] %v4_v0  ;;  %8 = vst [vmem:[%s29_s1 + $0x8] sm:$0xff] %v4_v0 }

// kernel: tile.78
= control target key start
LH: loop header
LB: loop body
LE: loop exit
PB: predicated region body
PF: predicated region fallthrough
CT: control target
= control target key end

     0   :  { %vm3_vm0 = vcmask 523264   ;;  %vm10_vm1 = vcmask 1048064   ;;  %s116_s0 = inlined_call_operand.vmem [shape: f32[16,64], index: 0, kind: input, shape index: {}]   ;;  %s117_s1 = inlined_call_operand.vmem [shape: f32[1,1024], index: 1, kind: output, shape index: {}]  }
   0x1   :  { %v66_v0 = vld [vmem:[%s116_s0 + $0x1] ss:$2 sm:$0xff]   ;;  %v2_v1 = vld [vmem:[%s116_s0] ss:$2 sm:$0xff]   ;;  %s75_s0 = smov 64  }
   0x2   :  { %8 = vrot.lane.b32.xlu0 %v66_v0, %s75_s0  ;;  %4 = vst.msk [vmem:[#allocation0] ss:$8 sm:$0xf] %vm3_vm0, %v2_v1   ;;  %5 = vst.msk [vmem:[#allocation0] ss:$8 sm:$0xf0] %vm3_vm0, %v2_v1  }
  0x74   :  { %v9_v2 = vpop.permute.xlu0 %8  }
  0x75   :  { %11 = vst.msk [vmem:[#allocation0] ss:$8 sm:$0xf] %vm10_vm1, %v9_v2   ;;  %12 = vst.msk [vmem:[#allocation0] ss:$8 sm:$0xf0] %vm10_vm1, %v9_v2  }
  0x7c   :  { %v16_v3 = vld [vmem:[#allocation0] sm:$0x1]  ;;  %v20_v4 = vld [vmem:[#allocation0 + $0x8] sm:$0x1]  ;;  %v25_v5 = vld [vmem:[#allocation0 + $0x10] sm:$0x1] }
  0x7d   :  { %18 = vst [vmem:[%s117_s1] sm:$0x1] %v16_v3  ;;  %67 = vst [vmem:[%s117_s1 + $0x1] sm:$0x1] %v20_v4  ;;  %v31_v6 = vld [vmem:[#allocation0 + $0x18] sm:$0x1] }
  0x7e   :  { %68 = vst [vmem:[%s117_s1 + $0x2] sm:$0x1] %v25_v5  ;;  %v37_v7 = vld [vmem:[#allocation0 + $0x20] sm:$0x1]  ;;  %v43_v8 = vld [vmem:[#allocation0 + $0x28] sm:$0x1] }
  0x7f   :  { %69 = vst [vmem:[%s117_s1 + $0x3] sm:$0x1] %v31_v6  ;;  %70 = vst [vmem:[%s117_s1 + $0x4] sm:$0x1] %v37_v7  ;;  %v49_v9 = vld [vmem:[#allocation0 + $0x30] sm:$0x1] }
  0x80   :  { %71 = vst [vmem:[%s117_s1 + $0x5] sm:$0x1] %v43_v8  ;;  %v55_v10 = vld [vmem:[#allocation0 + $0x38] sm:$0x1]  ;;  %72 = vst [vmem:[%s117_s1 + $0x6] sm:$0x1] %v49_v9 }
  0x81   :  { %73 = vst [vmem:[%s117_s1 + $0x7] sm:$0x1] %v55_v10 }

// kernel: _lambda_.14
= control target key start
LH: loop header
LB: loop body
LE: loop exit
PB: predicated region body
PF: predicated region fallthrough
CT: control target
= control target key end

     0   :  { %s935_s15 = smov 0   ;;  %s1255_s0 = inlined_call_operand.vmem [shape: f32[512,32], index: 0, kind: input, shape index: {}]   ;;  %s1256_s1 = inlined_call_operand.vmem [shape: bf16[32,64], index: 1, kind: input, shape index: {}]   ;;  %s1257_s2 = inlined_call_operand.vmem [shape: f32[512,64], index: 2, kind: output, shape index: {0}]   ;;  %s1258_s3 = inlined_call_operand.vmem [shape: f32[2,1,64], index: 3, kind: output, shape index: {1}]   ;;  %s1259_s4 = inlined_call_operand.vmem [shape: f32[2,1,64], index: 4, kind: output, shape index: {2}]  }
   0x1 LB: > { %s941_s16 = sadd.s32 4294967295, %s908_s15   ;;  %p809_p0 = scmp.ge.s32.totalorder %s908_s15, 1  ;;  %s908_s15 = sphi %s935_s15, %s15_s15  }
   0x2   : > { %p168_p1 = scmp.lt.s32.totalorder %s908_s15, 3 }
   0x4   : > { %p169_p2 = pnand %p809_p0, %p168_p1 }
   0x5   : > { %v900_v0 = vld [vmem:[%s1256_s1] sm:$0xff] (!%p169_p2)   ;;  %s810_s19 = sshll.u32 (!%p169_p2), %s941_s16, 5  ;;  %v901_v1 = vld [vmem:[%s1256_s1 + $0x8] sm:$0xff] (!%p169_p2)   ;;  %vm283_vm0 = vcmask (!%p169_p2), 261120   ;;  %vm493_vm1 = vcmask (!%p169_p2), 523264   ;;  %p212_p4 = scmp.lt.s32.totalorder (!%p169_p2), %s941_s16, 1 }
   0x6   : > { %172 = sbr.rel (%p169_p2) target bundleno = 313 (0x139), region = 28  ;;  %p201_p3 = scmp.lt.s32.totalorder (!%p169_p2), %s810_s19, 63  ;;  %852 = vmatprep.subr.bf16.mxu0 (!%p169_p2), %v900_v0  ;;  %888 = vmatprep.subr.bf16.mxu1 (!%p169_p2), %v900_v0  ;;  %vm595_vm2 = vcmask (!%p169_p2), 516096  }
   0x7   : > { %853 = vmatpush3.bf16.msra.mxu0 (!%p169_p2), %v900_v0  ;;  %890 = vmatpush3.bf16.msra.mxu1 (!%p169_p2), %v900_v0 }
   0x8   : > { %854 = vmatprep.subr.bf16.mxu0 (!%p169_p2), %v901_v1  ;;  %889 = vmatprep.subr.bf16.mxu1 (!%p169_p2), %v901_v1 }
   0xb   : > { %855 = vmatpush3.bf16.msra.mxu0 (!%p169_p2), %v901_v1  ;;  %891 = vmatpush3.bf16.msra.mxu1 (!%p169_p2), %v901_v1 }
   0xd   : > { %s1261_s19 = smov (!%p201_p3, %s810_s19), 63  ;;  %s1263_s16 = smov (!%p212_p4, %s941_s16), 1 }
   0xe   : > { %s811_s22 = sshll.u32 %s1261_s19, 3  ;;  %s214_s5 = scalar_lea.vmem %s1258_s3, %s1263_s16 }
   0xf   : > { %s960_s25 = scalar_lea.vmem %s1255_s0, %s811_s22  ;;  %s1015_s28 = scalar_lea.vmem %s1257_s2, %s811_s22 }
  0x10   : > { %v219_v2 = vld [vmem:[%s960_s25] sm:$0xff]  ;;  %v220_v3 = vld [vmem:[%s960_s25 + $0x8] sm:$0xff]  ;;  %v221_v4 = vld [vmem:[%s960_s25 + $0x10] sm:$0xff]  ;;  %s217_s8 = scalar_lea.vmem %s1259_s4, %s1263_s16 }
  0x11   : > { %v251_v5 = vpack.c.bf16 %v220_v3, %v219_v2  ;;  %v222_v6 = vld [vmem:[%s960_s25 + $0x18] sm:$0xff]  ;;  %v223_v7 = vld [vmem:[%s960_s25 + $0x20] sm:$0xff]  ;;  %v224_v8 = vld [vmem:[%s960_s25 + $0x28] sm:$0xff] }
  0x12   : > { %v252_v9 = vpack.c.bf16 %v222_v6, %v221_v4  ;;  %v253_v10 = vpack.c.bf16 %v224_v8, %v223_v7  ;;  %v225_v11 = vld [vmem:[%s960_s25 + $0x30] sm:$0xff]  ;;  %v226_v12 = vld [vmem:[%s960_s25 + $0x38] sm:$0xff]  ;;  %v227_v13 = vld [vmem:[%s960_s25 + $0x40] sm:$0xff] }
  0x13   : > { %856 = vmatprep.mubr.msk.bf16.mxu0 %vm283_vm0, %v251_v5  ;;  %v228_v14 = vld [vmem:[%s960_s25 + $0x48] sm:$0xff]  ;;  %v235_v15 = vld [vmem:[%s960_s25 + $0x80] sm:$0xff]  ;;  %v237_v18 = vld [vmem:[%s960_s25 + $0x90] sm:$0xff]  ;;  %v254_v23 = vpack.c.bf16 %v226_v12, %v225_v11 }
  0x14   : > { %857 = vmatmul.mubr.msk.bf16.vlgmr.msra.gmra.mrb[0].mxu0 %vm283_vm0, %v252_v9  ;;  %v236_v16 = vld [vmem:[%s960_s25 + $0x88] sm:$0xff]  ;;  %v238_v19 = vld [vmem:[%s960_s25 + $0x98] sm:$0xff]  ;;  %v239_v20 = vld [vmem:[%s960_s25 + $0xa0] sm:$0xff]  ;;  %v255_v25 = vpack.c.bf16 %v228_v14, %v227_v13 }
  0x15   : > { %860 = vmatprep.mubr.msk.bf16.mxu0 %vm283_vm0, %v253_v10  ;;  %v259_v17 = vpack.c.bf16 %v236_v16, %v235_v15  ;;  %v260_v21 = vpack.c.bf16 %v238_v19, %v237_v18  ;;  %v240_v22 = vld [vmem:[%s960_s25 + $0xa8] sm:$0xff]  ;;  %v241_v26 = vld [vmem:[%s960_s25 + $0xb0] sm:$0xff]  ;;  %v242_v27 = vld [vmem:[%s960_s25 + $0xb8] sm:$0xff] }
  0x16   : > { %v261_v24 = vpack.c.bf16 %v240_v22, %v239_v20  ;;  %v243_v28 = vld [vmem:[%s960_s25 + $0xc0] sm:$0xff]  ;;  %v244_v29 = vld [vmem:[%s960_s25 + $0xc8] sm:$0xff]  ;;  %v229_v30 = vld [vmem:[%s960_s25 + $0x50] sm:$0xff]  ;;  %v262_v32 = vpack.c.bf16 %v242_v27, %v241_v26 }
  0x17   : > { %872 = vmatprep.mubr.msk.bf16.mxu1 %vm283_vm0, %v259_v17  ;;  %v230_v31 = vld [vmem:[%s960_s25 + $0x58] sm:$0xff]  ;;  %v231_v33 = vld [vmem:[%s960_s25 + $0x60] sm:$0xff]  ;;  %v232_v34 = vld [vmem:[%s960_s25 + $0x68] sm:$0xff]  ;;  %v263_v35 = vpack.c.bf16 %v244_v29, %v243_v28 }
  0x18   : > { %873 = vmatmul.mubr.msk.bf16.vlgmr.msra.gmra.mrb[0].mxu1 %vm283_vm0, %v260_v21  ;;  %v256_v36 = vpack.c.bf16 %v230_v31, %v229_v30  ;;  %v257_v37 = vpack.c.bf16 %v232_v34, %v231_v33  ;;  %v245_v38 = vld [vmem:[%s960_s25 + $0xd0] sm:$0xff]  ;;  %v246_v39 = vld [vmem:[%s960_s25 + $0xd8] sm:$0xff]  ;;  %v247_v40 = vld [vmem:[%s960_s25 + $0xe0] sm:$0xff] }
  0x19   : > { %876 = vmatprep.mubr.msk.bf16.mxu1 %vm283_vm0, %v261_v24  ;;  %v248_v41 = vld [vmem:[%s960_s25 + $0xe8] sm:$0xff]  ;;  %v233_v42 = vld [vmem:[%s960_s25 + $0x70] sm:$0xff]  ;;  %v234_v43 = vld [vmem:[%s960_s25 + $0x78] sm:$0xff]  ;;  %v264_v44 = vpack.c.bf16 %v246_v39, %v245_v38 }
  0x1a   : > { %v265_v45 = vpack.c.bf16 %v248_v41, %v247_v40  ;;  %v258_v46 = vpack.c.bf16 %v234_v43, %v233_v42  ;;  %v249_v47 = vld [vmem:[%s960_s25 + $0xf0] sm:$0xff]  ;;  %v250_v48 = vld [vmem:[%s960_s25 + $0xf8] sm:$0xff] }
  0x1b   : > { %v266_v49 = vpack.c.bf16 %v250_v48, %v249_v47 }
  0x1c   : > { %861 = vmatmul.mubr.msk.bf16.gmra.mrb[4].mxu0 %vm283_vm0, %v254_v23 }
  0x1d   : > { %864 = vmatprep.mubr.msk.bf16.mxu0 %vm283_vm0, %v255_v25 }
  0x20   : > { %877 = vmatmul.mubr.msk.bf16.gmra.mrb[4].mxu1 %vm283_vm0, %v262_v32 }
  0x21   : > { %880 = vmatprep.mubr.msk.bf16.mxu1 %vm283_vm0, %v263_v35 }
  0x24   : > { %865 = vmatmul.mubr.msk.bf16.gmra.mrb[8].mxu0 %vm283_vm0, %v256_v36 }
  0x25   : > { %868 = vmatprep.mubr.msk.bf16.mxu0 %vm283_vm0, %v257_v37 }
  0x28   : > { %881 = vmatmul.mubr.msk.bf16.gmra.mrb[8].mxu1 %vm283_vm0, %v264_v44 }
  0x29   : > { %884 = vmatprep.mubr.msk.bf16.mxu1 %vm283_vm0, %v265_v45 }
  0x2c   : > { %869 = vmatmul.mubr.msk.bf16.gmra.mrb[12].mxu0 %vm283_vm0, %v258_v46 }
  0x30   : > { %885 = vmatmul.mubr.msk.bf16.gmra.mrb[12].mxu1 %vm283_vm0, %v266_v49 }
  0xe7   : > { %v858_v50 = vpop.f32.mrb[0].mxu0 }
  0xe8   : > { %496 = vst.msk [vmem:[%s1015_s28 + $0x10] sm:$0xff] %vm493_vm1, %v858_v50  ;;  %v366_v51 = vpop.f32.mrb[1].mxu0  ;;  %v599_v55 = vmul.f32 %v858_v50, %v858_v50  ;;  %v529_v61 = vsel %vm493_vm1, %v858_v50, 0.0 }
  0xe9   : > { %494 = vst.msk [vmem:[%s1015_s28] sm:$0xff] %vm493_vm1, %v366_v51  ;;  %v597_v52 = vmul.f32 %v366_v51, %v366_v51  ;;  %v859_v53 = vpop.f32.mrb[2].mxu0  ;;  %v526_v56 = vsel %vm493_vm1, %v366_v51, 0.0 }
  0xea   : > { %497 = vst.msk [vmem:[%s1015_s28 + $0x18] sm:$0xff] %vm493_vm1, %v859_v53  ;;  %v369_v54 = vpop.f32.mrb[3].mxu0  ;;  %v600_v63 = vmul.f32 %v859_v53, %v859_v53  ;;  %v632_v5 = vsel %vm493_vm1, %v599_v55, 0.0  ;;  %v531_v6 = vsel %vm493_vm1, %v859_v53, 0.0 }
  0xeb   : > { %495 = vst.msk [vmem:[%s1015_s28 + $0x8] sm:$0xff] %vm493_vm1, %v369_v54  ;;  %v527_v57 = vsel %vm493_vm1, %v369_v54, 0.0  ;;  %v598_v58 = vmul.f32 %v369_v54, %v369_v54  ;;  %v1027_v60 = vpop.f32.mrb[0].mxu1  ;;  %v629_v62 = vsel %vm493_vm1, %v597_v52, 0.0 }
  0xec   : > { %v528_v59 = vadd.f32 %v527_v57, %v526_v56  ;;  %512 = vst.msk [vmem:[%s1015_s28 + $0x90] sm:$0xff] %vm493_vm1, %v1027_v60  ;;  %v1035_v1 = vpop.f32.mrb[1].mxu1  ;;  %v634_v12 = vsel %vm493_vm1, %v600_v63, 0.0 }
  0xed   : > { %v630_v0 = vsel %vm493_vm1, %v598_v58, 0.0  ;;  %510 = vst.msk [vmem:[%s1015_s28 + $0x80] sm:$0xff] %vm493_vm1, %v1035_v1  ;;  %v1040_v4 = vpop.f32.mrb[2].mxu1 }
  0xee   : > { %v530_v2 = vadd.f32 %v529_v61, %v528_v59  ;;  %v631_v3 = vadd.f32 %v630_v0, %v629_v62  ;;  %513 = vst.msk [vmem:[%s1015_s28 + $0x98] sm:$0xff] %vm493_vm1, %v1040_v4  ;;  %v1047_v8 = vpop.f32.mrb[3].mxu1 }
  0xef   : > { %v862_v7 = vpop.f32.mrb[4].mxu0  ;;  %511 = vst.msk [vmem:[%s1015_s28 + $0x88] sm:$0xff] %vm493_vm1, %v1047_v8 }
  0xf0   : > { %v633_v9 = vadd.f32 %v632_v5, %v631_v3  ;;  %500 = vst.msk [vmem:[%s1015_s28 + $0x30] sm:$0xff] %vm493_vm1, %v862_v7  ;;  %v382_v10 = vpop.f32.mrb[5].mxu0  ;;  %v532_v11 = vadd.f32 %v531_v6, %v530_v2  ;;  %v603_v19 = vmul.f32 %v862_v7, %v862_v7  ;;  %v537_v26 = vsel %vm493_vm1, %v862_v7, 0.0 }
  0xf1   : > { %498 = vst.msk [vmem:[%s1015_s28 + $0x20] sm:$0xff] %vm493_vm1, %v382_v10  ;;  %v533_v13 = vsel %vm493_vm1, %v382_v10, 0.0  ;;  %v601_v14 = vmul.f32 %v382_v10, %v382_v10  ;;  %v863_v15 = vpop.f32.mrb[6].mxu0 }
  0xf2   : > { %v534_v16 = vadd.f32 %v533_v13, %v532_v11  ;;  %v635_v17 = vadd.f32 %v634_v12, %v633_v9  ;;  %501 = vst.msk [vmem:[%s1015_s28 + $0x38] sm:$0xff] %vm493_vm1, %v863_v15  ;;  %v385_v18 = vpop.f32.mrb[7].mxu0  ;;  %v604_v27 = vmul.f32 %v863_v15, %v863_v15  ;;  %v640_v33 = vsel %vm493_vm1, %v603_v19, 0.0 }
  0xf3   : > { %v636_v20 = vsel %vm493_vm1, %v601_v14, 0.0  ;;  %499 = vst.msk [vmem:[%s1015_s28 + $0x28] sm:$0xff] %vm493_vm1, %v385_v18  ;;  %v535_v21 = vsel %vm493_vm1, %v385_v18, 0.0  ;;  %v602_v22 = vmul.f32 %v385_v18, %v385_v18  ;;  %v1064_v25 = vpop.f32.mrb[4].mxu1  ;;  %v539_v34 = vsel %vm493_vm1, %v863_v15, 0.0 }
  0xf4   : > { %v637_v23 = vadd.f32 %v636_v20, %v635_v17  ;;  %v536_v24 = vadd.f32 %v535_v21, %v534_v16  ;;  %516 = vst.msk [vmem:[%s1015_s28 + $0xb0] sm:$0xff] %vm493_vm1, %v1064_v25  ;;  %v1071_v29 = vpop.f32.mrb[5].mxu1  ;;  %v642_v40 = vsel %vm493_vm1, %v604_v27, 0.0 }
  0xf5   : > { %v638_v28 = vsel %vm493_vm1, %v602_v22, 0.0  ;;  %514 = vst.msk [vmem:[%s1015_s28 + $0xa0] sm:$0xff] %vm493_vm1, %v1071_v29  ;;  %v1076_v32 = vpop.f32.mrb[6].mxu1 }
  0xf6   : > { %v538_v30 = vadd.f32 %v537_v26, %v536_v24  ;;  %v639_v31 = vadd.f32 %v638_v28, %v637_v23  ;;  %517 = vst.msk [vmem:[%s1015_s28 + $0xb8] sm:$0xff] %vm493_vm1, %v1076_v32  ;;  %v1083_v36 = vpop.f32.mrb[7].mxu1  ;;  %v613_v26 = vmul.f32 %v1035_v1, %v1035_v1 }
  0xf7   : > { %v866_v35 = vpop.f32.mrb[8].mxu0  ;;  %515 = vst.msk [vmem:[%s1015_s28 + $0xa8] sm:$0xff] %vm493_vm1, %v1083_v36 }
  0xf8   : > { %v641_v37 = vadd.f32 %v640_v33, %v639_v31  ;;  %504 = vst.msk [vmem:[%s1015_s28 + $0x50] sm:$0xff] %vm493_vm1, %v866_v35  ;;  %v398_v38 = vpop.f32.mrb[9].mxu0  ;;  %v540_v39 = vadd.f32 %v539_v34, %v538_v30  ;;  %v607_v47 = vmul.f32 %v866_v35, %v866_v35  ;;  %v545_v54 = vsel %vm493_vm1, %v866_v35, 0.0 }
  0xf9   : > { %502 = vst.msk [vmem:[%s1015_s28 + $0x40] sm:$0xff] %vm493_vm1, %v398_v38  ;;  %v541_v41 = vsel %vm493_vm1, %v398_v38, 0.0  ;;  %v605_v42 = vmul.f32 %v398_v38, %v398_v38  ;;  %v867_v43 = vpop.f32.mrb[10].mxu0  ;;  %v557_v35 = vsel %vm493_vm1, %v1035_v1, 0.0  ;;  %v614_v1 = vmul.f32 %v1047_v8, %v1047_v8 }
  0xfa   : > { %v542_v44 = vadd.f32 %v541_v41, %v540_v39  ;;  %v643_v45 = vadd.f32 %v642_v40, %v641_v37  ;;  %505 = vst.msk [vmem:[%s1015_s28 + $0x58] sm:$0xff] %vm493_vm1, %v867_v43  ;;  %v401_v46 = vpop.f32.mrb[11].mxu0  ;;  %v608_v55 = vmul.f32 %v867_v43, %v867_v43  ;;  %v648_v62 = vsel %vm493_vm1, %v607_v47, 0.0 }
  0xfb   : > { %v644_v48 = vsel %vm493_vm1, %v605_v42, 0.0  ;;  %503 = vst.msk [vmem:[%s1015_s28 + $0x48] sm:$0xff] %vm493_vm1, %v401_v46  ;;  %v543_v49 = vsel %vm493_vm1, %v401_v46, 0.0  ;;  %v606_v50 = vmul.f32 %v401_v46, %v401_v46  ;;  %v1100_v53 = vpop.f32.mrb[8].mxu1  ;;  %v547_v63 = vsel %vm493_vm1, %v867_v43, 0.0 }
  0xfc   : > { %v645_v51 = vadd.f32 %v644_v48, %v643_v45  ;;  %v544_v52 = vadd.f32 %v543_v49, %v542_v44  ;;  %520 = vst.msk [vmem:[%s1015_s28 + $0xd0] sm:$0xff] %vm493_vm1, %v1100_v53  ;;  %v1107_v57 = vpop.f32.mrb[9].mxu1  ;;  %v650_v7 = vsel %vm493_vm1, %v608_v55, 0.0  ;;  %v660_v42 = vsel %vm493_vm1, %v613_v26, 0.0 }
  0xfd   : > { %v646_v56 = vsel %vm493_vm1, %v606_v50, 0.0  ;;  %518 = vst.msk [vmem:[%s1015_s28 + $0xc0] sm:$0xff] %vm493_vm1, %v1107_v57  ;;  %v1112_v61 = vpop.f32.mrb[10].mxu1  ;;  %v615_v46 = vmul.f32 %v1027_v60, %v1027_v60  ;;  %v559_v47 = vsel %vm493_vm1, %v1047_v8, 0.0  ;;  %v561_v50 = vsel %vm493_vm1, %v1027_v60, 0.0 }
  0xfe   : > { %v546_v58 = vadd.f32 %v545_v54, %v544_v52  ;;  %v647_v59 = vadd.f32 %v646_v56, %v645_v51  ;;  %521 = vst.msk [vmem:[%s1015_s28 + $0xd8] sm:$0xff] %vm493_vm1, %v1112_v61  ;;  %v1119_v2 = vpop.f32.mrb[11].mxu1  ;;  %v616_v51 = vmul.f32 %v1040_v4, %v1040_v4  ;;  %v662_v52 = vsel %vm493_vm1, %v614_v1, 0.0 }
  0xff   : > { %v870_v0 = vpop.f32.mrb[12].mxu0  ;;  %519 = vst.msk [vmem:[%s1015_s28 + $0xc8] sm:$0xff] %vm493_vm1, %v1119_v2  ;;  %v617_v54 = vmul.f32 %v1071_v29, %v1071_v29  ;;  %v563_v8 = vsel %vm493_vm1, %v1040_v4, 0.0  ;;  %v567_v4 = vsel %vm493_vm1, %v1083_v36, 0.0  ;;  %v623_v26 = vmul.f32 %v1100_v53, %v1100_v53 }
 0x100   : > { %v649_v3 = vadd.f32 %v648_v62, %v647_v59  ;;  %508 = vst.msk [vmem:[%s1015_s28 + $0x70] sm:$0xff] %vm493_vm1, %v870_v0  ;;  %v414_v5 = vpop.f32.mrb[13].mxu0  ;;  %v548_v6 = vadd.f32 %v547_v63, %v546_v58  ;;  %v611_v15 = vmul.f32 %v870_v0, %v870_v0  ;;  %v553_v22 = vsel %vm493_vm1, %v870_v0, 0.0 }
 0x101   : > { %506 = vst.msk [vmem:[%s1015_s28 + $0x60] sm:$0xff] %vm493_vm1, %v414_v5  ;;  %v549_v9 = vsel %vm493_vm1, %v414_v5, 0.0  ;;  %v609_v10 = vmul.f32 %v414_v5, %v414_v5  ;;  %v871_v11 = vpop.f32.mrb[14].mxu0  ;;  %v664_v58 = vsel %vm493_vm1, %v615_v46, 0.0  ;;  %v565_v59 = vsel %vm493_vm1, %v1071_v29, 0.0 }
 0x102   : > { %v550_v12 = vadd.f32 %v549_v9, %v548_v6  ;;  %v651_v13 = vadd.f32 %v650_v7, %v649_v3  ;;  %509 = vst.msk [vmem:[%s1015_s28 + $0x78] sm:$0xff] %vm493_vm1, %v871_v11  ;;  %v417_v14 = vpop.f32.mrb[15].mxu0  ;;  %v612_v23 = vmul.f32 %v871_v11, %v871_v11  ;;  %v656_v33 = vsel %vm493_vm1, %v611_v15, 0.0 }
 0x103   : > { %v652_v16 = vsel %vm493_vm1, %v609_v10, 0.0  ;;  %507 = vst.msk [vmem:[%s1015_s28 + $0x68] sm:$0xff] %vm493_vm1, %v417_v14  ;;  %v551_v17 = vsel %vm493_vm1, %v417_v14, 0.0  ;;  %v610_v18 = vmul.f32 %v417_v14, %v417_v14  ;;  %v1136_v21 = vpop.f32.mrb[12].mxu1  ;;  %v555_v34 = vsel %vm493_vm1, %v871_v11, 0.0 }
 0x104   : > { %v653_v19 = vadd.f32 %v652_v16, %v651_v13  ;;  %v552_v20 = vadd.f32 %v551_v17, %v550_v12  ;;  %524 = vst.msk [vmem:[%s1015_s28 + $0xf0] sm:$0xff] %vm493_vm1, %v1136_v21  ;;  %v1145_v27 = vpop.f32.mrb[13].mxu1  ;;  %v658_v41 = vsel %vm493_vm1, %v612_v23, 0.0  ;;  %v666_v63 = vsel %vm493_vm1, %v616_v51, 0.0 }
 0x105   : > { %v654_v24 = vsel %vm493_vm1, %v610_v18, 0.0  ;;  %522 = vst.msk [vmem:[%s1015_s28 + $0xe0] sm:$0xff] %vm493_vm1, %v1145_v27  ;;  %v1150_v31 = vpop.f32.mrb[14].mxu1  ;;  %v668_v0 = vsel %vm493_vm1, %v617_v54, 0.0  ;;  %v618_v3 = vmul.f32 %v1083_v36, %v1083_v36  ;;  %v619_v7 = vmul.f32 %v1064_v25, %v1064_v25 }
 0x106   : > { %v554_v28 = vadd.f32 %v553_v22, %v552_v20  ;;  %v655_v30 = vadd.f32 %v654_v24, %v653_v19  ;;  %525 = vst.msk [vmem:[%s1015_s28 + $0xf8] sm:$0xff] %vm493_vm1, %v1150_v31  ;;  %v628_v37 = vmul.f32 %v1150_v31, %v1150_v31  ;;  %v1161_v38 = vpop.f32.mrb[15].mxu1  ;;  %v569_v29 = vsel %vm493_vm1, %v1064_v25, 0.0 }
 0x107   : > { %523 = vst.msk [vmem:[%s1015_s28 + $0xe8] sm:$0xff] %vm493_vm1, %v1161_v38  ;;  %v620_v11 = vmul.f32 %v1076_v32, %v1076_v32  ;;  %v670_v12 = vsel %vm493_vm1, %v618_v3, 0.0  ;;  %v621_v13 = vmul.f32 %v1107_v57, %v1107_v57  ;;  %v672_v16 = vsel %vm493_vm1, %v619_v7, 0.0 }
 0x108   : > { %v657_v39 = vadd.f32 %v656_v33, %v655_v30  ;;  %v556_v40 = vadd.f32 %v555_v34, %v554_v28  ;;  %v1171_v43 = vsel %vm493_vm1, %v628_v37, 0.0  ;;  %v571_v36 = vsel %vm493_vm1, %v1076_v32, 0.0 }
 0x109   : > { %v573_v17 = vsel %vm493_vm1, %v1107_v57, 0.0  ;;  %v674_v19 = vsel %vm493_vm1, %v620_v11, 0.0  ;;  %v676_v20 = vsel %vm493_vm1, %v621_v13, 0.0  ;;  %v622_v22 = vmul.f32 %v1119_v2, %v1119_v2 }
 0x10a   : > { %v558_v44 = vadd.f32 %v557_v35, %v556_v40  ;;  %v659_v45 = vadd.f32 %v658_v41, %v657_v39  ;;  %v575_v32 = vsel %vm493_vm1, %v1119_v2, 0.0  ;;  %v577_v57 = vsel %vm493_vm1, %v1100_v53, 0.0 }
 0x10b   : > { %v624_v33 = vmul.f32 %v1112_v61, %v1112_v61  ;;  %v678_v34 = vsel %vm493_vm1, %v622_v22, 0.0  ;;  %v625_v35 = vmul.f32 %v1145_v27, %v1145_v27  ;;  %v680_v40 = vsel %vm493_vm1, %v623_v26, 0.0 }
 0x10c   : > { %v661_v48 = vadd.f32 %v660_v42, %v659_v45  ;;  %v560_v49 = vadd.f32 %v559_v47, %v558_v44  ;;  %v579_v2 = vsel %vm493_vm1, %v1112_v61, 0.0  ;;  %v581_v41 = vsel %vm493_vm1, %v1145_v27, 0.0 }
 0x10d   : > { %v682_v1 = vsel %vm493_vm1, %v624_v33, 0.0  ;;  %v684_v44 = vsel %vm493_vm1, %v625_v35, 0.0  ;;  %v626_v45 = vmul.f32 %v1161_v38, %v1161_v38  ;;  %v583_v61 = vsel %vm493_vm1, %v1161_v38, 0.0 }
 0x10e   : > { %v562_v55 = vadd.f32 %v561_v50, %v560_v49  ;;  %v663_v56 = vadd.f32 %v662_v52, %v661_v48  ;;  %v627_v48 = vmul.f32 %v1136_v21, %v1136_v21  ;;  %v585_v50 = vsel %vm493_vm1, %v1136_v21, 0.0 }
 0x10f   : > { %v686_v51 = vsel %vm493_vm1, %v626_v45, 0.0 }
 0x110   : > { %v665_v62 = vadd.f32 %v664_v58, %v663_v56  ;;  %v564_v60 = vadd.f32 %v563_v8, %v562_v55  ;;  %v688_v55 = vsel %vm493_vm1, %v627_v48, 0.0  ;;  %v587_v56 = vsel %vm493_vm1, %v1150_v31, 0.0 }
 0x112   : > { %v566_v5 = vadd.f32 %v565_v59, %v564_v60  ;;  %v667_v6 = vadd.f32 %v666_v63, %v665_v62 }
 0x114   : > { %v669_v9 = vadd.f32 %v668_v0, %v667_v6  ;;  %v568_v10 = vadd.f32 %v567_v4, %v566_v5 }
 0x116   : > { %v570_v14 = vadd.f32 %v569_v29, %v568_v10  ;;  %v671_v15 = vadd.f32 %v670_v12, %v669_v9 }
 0x118   : > { %v673_v18 = vadd.f32 %v672_v16, %v671_v15  ;;  %v572_v25 = vadd.f32 %v571_v36, %v570_v14 }
 0x11a   : > { %v574_v23 = vadd.f32 %v573_v17, %v572_v25  ;;  %v675_v24 = vadd.f32 %v674_v19, %v673_v18 }
 0x11c   : > { %v677_v28 = vadd.f32 %v676_v20, %v675_v24  ;;  %v576_v30 = vadd.f32 %v575_v32, %v574_v23 }
 0x11e   : > { %v578_v37 = vadd.f32 %v577_v57, %v576_v30  ;;  %v679_v39 = vadd.f32 %v678_v34, %v677_v28 }
 0x120   : > { %v681_v42 = vadd.f32 %v680_v40, %v679_v39  ;;  %v580_v53 = vadd.f32 %v579_v2, %v578_v37 }
 0x122   : > { %v582_v46 = vadd.f32 %v581_v41, %v580_v53  ;;  %v683_v47 = vadd.f32 %v682_v1, %v681_v42 }
 0x124   : > { %v685_v49 = vadd.f32 %v684_v44, %v683_v47  ;;  %v584_v27 = vadd.f32 %v583_v61, %v582_v46 }
 0x126   : > { %v586_v52 = vadd.f32 %v585_v50, %v584_v27  ;;  %v687_v54 = vadd.f32 %v686_v51, %v685_v49 }
 0x128   : > { %v588_v58 = vadd.f32 %v587_v56, %v586_v52  ;;  %v689_v8 = vadd.f32 %v688_v55, %v687_v54 }
 0x12a   : > { %v589_v59 = vrot.slane %v588_v58, 4  ;;  %v691_v38 = vadd.f32 %v1171_v43, %v689_v8 }
 0x12c   : > { %v590_v62 = vadd.f32 %v589_v59, %v588_v58  ;;  %v692_v60 = vrot.slane %v691_v38, 4 }
 0x12e   : > { %v591_v63 = vrot.slane %v590_v62, 2  ;;  %v693_v0 = vadd.f32 %v692_v60, %v691_v38 }
 0x130   : > { %v592_v21 = vadd.f32 %v591_v63, %v590_v62  ;;  %v694_v3 = vrot.slane %v693_v0, 2 }
 0x132   : > { %v593_v5 = vrot.slane %v592_v21, 1  ;;  %v695_v6 = vadd.f32 %v694_v3, %v693_v0 }
 0x134   : > { %v594_v31 = vadd.f32 %v593_v5, %v592_v21  ;;  %v696_v7 = vrot.slane %v695_v6, 1 }
 0x136   : > { %596 = vst.msk [vmem:[%s214_s5] sm:$0x1] %vm595_vm2, %v594_v31  ;;  %v697_v43 = vadd.f32 %v696_v7, %v695_v6 }
 0x138   : > { %698 = vst.msk [vmem:[%s217_s8] sm:$0x1] %vm595_vm2, %v697_v43 }
 0x139 PF: > { %s15_s15 = sadd.s32 1, %s908_s15  }
 0x13a   : > { %p12_p5 = scmp.ge.s32.totalorder %s15_s15, 4  }
 0x13c   :  { %14 = sbr.rel (!%p12_p5) target bundleno = 1 (0x1), region = 82 }

// kernel: _lambda_.9
= control target key start
LH: loop header
LB: loop body
LE: loop exit
PB: predicated region body
PF: predicated region fallthrough
CT: control target
= control target key end

     0   :  { %v48_v0 = vlaneseq  ;;  %s544_s1 = inlined_call_operand.vmem [shape: f32[1,1024], index: 1, kind: input, shape index: {}]   ;;  %s545_s2 = inlined_call_operand.vmem [shape: f32[1,1024], index: 2, kind: input, shape index: {}]   ;;  %s546_s0 = inlined_call_operand.vmem [shape: f32[32,1024], index: 0, kind: input, shape index: {}]   ;;  %s547_s3 = inlined_call_operand.vmem [shape: f32[32,1024], index: 3, kind: output, shape index: {}]  }
   0x1   :  { %v46_v2 = vld [vmem:[%s544_s1] sm:$0xff]  ;;  %v15_v9 = vld [vmem:[%s546_s0 + $0x8] sm:$0xff]  ;;  %v16_v18 = vld [vmem:[%s546_s0 + $0x10] sm:$0xff] }
   0x2   :  { %v49_v1 = vshrl.u32 %v48_v0, 7  ;;  %v120_v3 = vld [vmem:[%s545_s2] sm:$0xff]  ;;  %v17_v19 = vld [vmem:[%s546_s0 + $0x18] sm:$0xff]  ;;  %v19_v29 = vld [vmem:[%s546_s0 + $0x28] sm:$0xff] }
   0x3   :  { %v14_v8 = vld [vmem:[%s546_s0] sm:$0xff]  ;;  %v20_v34 = vld [vmem:[%s546_s0 + $0x30] sm:$0xff]  ;;  %v23_v40 = vld [vmem:[%s546_s0 + $0x48] sm:$0xff] }
   0x4   :  { %v50_v4 = vsub.s32 0, %v49_v1  ;;  %v54_v5 = vsub.s32 1, %v49_v1  ;;  %v58_v6 = vsub.s32 2, %v49_v1  ;;  %v62_v7 = vsub.s32 3, %v49_v1  ;;  %v18_v24 = vld [vmem:[%s546_s0 + $0x20] sm:$0xff]  ;;  %v24_v41 = vld [vmem:[%s546_s0 + $0x50] sm:$0xff] }
   0x5   :  { %v66_v10 = vsub.s32 4, %v49_v1  ;;  %v70_v11 = vsub.s32 5, %v49_v1  ;;  %v74_v12 = vsub.s32 6, %v49_v1  ;;  %v78_v13 = vsub.s32 7, %v49_v1  ;;  %v22_v39 = vld [vmem:[%s546_s0 + $0x40] sm:$0xff]  ;;  %v21_v46 = vld [vmem:[%s546_s0 + $0x38] sm:$0xff] }
   0x6   :  { %v262_v14 = vrot.slane %v46_v2, %v50_v4  ;;  %v264_v15 = vrot.slane %v120_v3, %v50_v4  ;;  %v266_v16 = vrot.slane %v46_v2, %v54_v5  ;;  %v268_v17 = vrot.slane %v120_v3, %v54_v5  ;;  %v25_v47 = vld [vmem:[%s546_s0 + $0x58] sm:$0xff]  ;;  %v26_v48 = vld [vmem:[%s546_s0 + $0x60] sm:$0xff]  ;;  %v27_v53 = vld [vmem:[%s546_s0 + $0x68] sm:$0xff] }
   0x7   :  { %v276_v20 = vrot.slane %v46_v2, %v58_v6  ;;  %v278_v21 = vrot.slane %v120_v3, %v58_v6  ;;  %v280_v22 = vrot.slane %v46_v2, %v62_v7  ;;  %v282_v23 = vrot.slane %v120_v3, %v62_v7  ;;  %v28_v58 = vld [vmem:[%s546_s0 + $0x70] sm:$0xff]  ;;  %v29_v63 = vld [vmem:[%s546_s0 + $0x78] sm:$0xff]  ;;  %v30_v0 = vld [vmem:[%s546_s0 + $0x80] sm:$0xff] }
   0x8   :  { %v88_v25 = vmul.f32 %v262_v14, %v14_v8  ;;  %v89_v26 = vmul.f32 %v266_v16, %v15_v9  ;;  %v289_v27 = vrot.slane %v46_v2, %v66_v10  ;;  %v291_v28 = vrot.slane %v120_v3, %v66_v10  ;;  %v31_v1 = vld [vmem:[%s546_s0 + $0x88] sm:$0xff]  ;;  %v32_v6 = vld [vmem:[%s546_s0 + $0x90] sm:$0xff]  ;;  %v33_v7 = vld [vmem:[%s546_s0 + $0x98] sm:$0xff] }
   0x9   :  { %v90_v30 = vmul.f32 %v276_v20, %v16_v18  ;;  %v91_v31 = vmul.f32 %v280_v22, %v17_v19  ;;  %v298_v32 = vrot.slane %v46_v2, %v70_v11  ;;  %v300_v33 = vrot.slane %v120_v3, %v70_v11  ;;  %v34_v8 = vld [vmem:[%s546_s0 + $0xa0] sm:$0xff] }
   0xa   :  { %v162_v35 = vadd.f32 %v264_v15, %v88_v25  ;;  %v163_v36 = vadd.f32 %v268_v17, %v89_v26  ;;  %v92_v37 = vmul.f32 %v289_v27, %v18_v24  ;;  %v308_v38 = vrot.slane %v46_v2, %v74_v12  ;;  %v36_v26 = vld [vmem:[%s546_s0 + $0xb0] sm:$0xff] }
   0xb   :  { %v164_v42 = vadd.f32 %v278_v21, %v90_v30  ;;  %v165_v43 = vadd.f32 %v282_v23, %v91_v31  ;;  %v93_v44 = vmul.f32 %v298_v32, %v19_v29  ;;  %v322_v45 = vrot.slane %v120_v3, %v74_v12 }
   0xc   :  { %194 = vst [vmem:[%s547_s3] sm:$0xff] %v162_v35  ;;  %195 = vst [vmem:[%s547_s3 + $0x8] sm:$0xff] %v163_v36  ;;  %v166_v49 = vadd.f32 %v291_v28, %v92_v37  ;;  %v94_v50 = vmul.f32 %v308_v38, %v20_v34  ;;  %v341_v51 = vrot.slane %v46_v2, %v78_v13  ;;  %v37_v35 = vld [vmem:[%s546_s0 + $0xb8] sm:$0xff]  ;;  %v38_v36 = vld [vmem:[%s546_s0 + $0xc0] sm:$0xff] }
   0xd   :  { %v343_v52 = vrot.slane %v120_v3, %v78_v13  ;;  %196 = vst [vmem:[%s547_s3 + $0x10] sm:$0xff] %v164_v42  ;;  %197 = vst [vmem:[%s547_s3 + $0x18] sm:$0xff] %v165_v43  ;;  %v167_v54 = vadd.f32 %v300_v33, %v93_v44  ;;  %v96_v55 = vmul.f32 %v262_v14, %v22_v39  ;;  %v35_v13 = vld [vmem:[%s546_s0 + $0xa8] sm:$0xff]  ;;  %v40_v43 = vld [vmem:[%s546_s0 + $0xd0] sm:$0xff] }
   0xe   :  { %v97_v56 = vmul.f32 %v266_v16, %v23_v40  ;;  %v98_v57 = vmul.f32 %v276_v20, %v24_v41  ;;  %198 = vst [vmem:[%s547_s3 + $0x20] sm:$0xff] %v166_v49  ;;  %v168_v59 = vadd.f32 %v322_v45, %v94_v50  ;;  %v95_v60 = vmul.f32 %v341_v51, %v21_v46  ;;  %v39_v37 = vld [vmem:[%s546_s0 + $0xc8] sm:$0xff]  ;;  %v41_v44 = vld [vmem:[%s546_s0 + $0xd8] sm:$0xff]  ;;  %v42_v46 = vld [vmem:[%s546_s0 + $0xe0] sm:$0xff] }
   0xf   :  { %v99_v61 = vmul.f32 %v280_v22, %v25_v47  ;;  %v100_v62 = vmul.f32 %v289_v27, %v26_v48  ;;  %199 = vst [vmem:[%s547_s3 + $0x28] sm:$0xff] %v167_v54  ;;  %v170_v2 = vadd.f32 %v264_v15, %v96_v55  ;;  %v101_v5 = vmul.f32 %v298_v32, %v27_v53  ;;  %v43_v53 = vld [vmem:[%s546_s0 + $0xe8] sm:$0xff] }
  0x10   :  { %v171_v3 = vadd.f32 %v268_v17, %v97_v56  ;;  %v172_v4 = vadd.f32 %v278_v21, %v98_v57  ;;  %200 = vst [vmem:[%s547_s3 + $0x30] sm:$0xff] %v168_v59  ;;  %v169_v9 = vadd.f32 %v343_v52, %v95_v60  ;;  %v102_v12 = vmul.f32 %v308_v38, %v28_v58  ;;  %v44_v58 = vld [vmem:[%s546_s0 + $0xf0] sm:$0xff] }
  0x11   :  { %v173_v10 = vadd.f32 %v282_v23, %v99_v61  ;;  %v174_v11 = vadd.f32 %v291_v28, %v100_v62  ;;  %202 = vst [vmem:[%s547_s3 + $0x40] sm:$0xff] %v170_v2  ;;  %v175_v18 = vadd.f32 %v300_v33, %v101_v5  ;;  %v103_v19 = vmul.f32 %v341_v51, %v29_v63  ;;  %v45_v61 = vld [vmem:[%s546_s0 + $0xf8] sm:$0xff] }
  0x12   :  { %203 = vst [vmem:[%s547_s3 + $0x48] sm:$0xff] %v171_v3  ;;  %204 = vst [vmem:[%s547_s3 + $0x50] sm:$0xff] %v172_v4  ;;  %v104_v24 = vmul.f32 %v262_v14, %v30_v0  ;;  %v105_v25 = vmul.f32 %v266_v16, %v31_v1  ;;  %v176_v29 = vadd.f32 %v322_v45, %v102_v12 }
  0x13   :  { %201 = vst [vmem:[%s547_s3 + $0x38] sm:$0xff] %v169_v9  ;;  %205 = vst [vmem:[%s547_s3 + $0x58] sm:$0xff] %v173_v10  ;;  %v106_v30 = vmul.f32 %v276_v20, %v32_v6  ;;  %v107_v31 = vmul.f32 %v280_v22, %v33_v7  ;;  %v108_v34 = vmul.f32 %v289_v27, %v34_v8 }
  0x14   :  { %206 = vst [vmem:[%s547_s3 + $0x60] sm:$0xff] %v174_v11  ;;  %207 = vst [vmem:[%s547_s3 + $0x68] sm:$0xff] %v175_v18  ;;  %v177_v39 = vadd.f32 %v343_v52, %v103_v19  ;;  %v178_v40 = vadd.f32 %v264_v15, %v104_v24  ;;  %v179_v41 = vadd.f32 %v268_v17, %v105_v25 }
  0x15   :  { %v109_v42 = vmul.f32 %v298_v32, %v35_v13  ;;  %208 = vst [vmem:[%s547_s3 + $0x70] sm:$0xff] %v176_v29  ;;  %v180_v47 = vadd.f32 %v278_v21, %v106_v30  ;;  %v181_v48 = vadd.f32 %v282_v23, %v107_v31  ;;  %v182_v49 = vadd.f32 %v291_v28, %v108_v34 }
  0x16   :  { %v110_v50 = vmul.f32 %v308_v38, %v36_v26  ;;  %209 = vst [vmem:[%s547_s3 + $0x78] sm:$0xff] %v177_v39  ;;  %210 = vst [vmem:[%s547_s3 + $0x80] sm:$0xff] %v178_v40  ;;  %v111_v55 = vmul.f32 %v341_v51, %v37_v35  ;;  %v112_v56 = vmul.f32 %v262_v14, %v38_v36 }
  0x17   :  { %211 = vst [vmem:[%s547_s3 + $0x88] sm:$0xff] %v179_v41  ;;  %v183_v54 = vadd.f32 %v300_v33, %v109_v42  ;;  %v113_v57 = vmul.f32 %v266_v16, %v39_v37  ;;  %212 = vst [vmem:[%s547_s3 + $0x90] sm:$0xff] %v180_v47  ;;  %v114_v16 = vmul.f32 %v276_v20, %v40_v43 }
  0x18   :  { %213 = vst [vmem:[%s547_s3 + $0x98] sm:$0xff] %v181_v48  ;;  %214 = vst [vmem:[%s547_s3 + $0xa0] sm:$0xff] %v182_v49  ;;  %v184_v14 = vadd.f32 %v322_v45, %v110_v50  ;;  %v115_v59 = vmul.f32 %v280_v22, %v41_v44  ;;  %v116_v60 = vmul.f32 %v289_v27, %v42_v46 }
  0x19   :  { %215 = vst [vmem:[%s547_s3 + $0xa8] sm:$0xff] %v183_v54  ;;  %v185_v62 = vadd.f32 %v343_v52, %v111_v55  ;;  %v186_v63 = vadd.f32 %v264_v15, %v112_v56  ;;  %v187_v0 = vadd.f32 %v268_v17, %v113_v57  ;;  %v117_v20 = vmul.f32 %v298_v32, %v43_v53 }
  0x1a   :  { %216 = vst [vmem:[%s547_s3 + $0xb0] sm:$0xff] %v184_v14  ;;  %v188_v22 = vadd.f32 %v278_v21, %v114_v16  ;;  %v189_v27 = vadd.f32 %v282_v23, %v115_v59  ;;  %v190_v1 = vadd.f32 %v291_v28, %v116_v60  ;;  %v118_v2 = vmul.f32 %v308_v38, %v44_v58 }
  0x1b   :  { %217 = vst [vmem:[%s547_s3 + $0xb8] sm:$0xff] %v185_v62  ;;  %218 = vst [vmem:[%s547_s3 + $0xc0] sm:$0xff] %v186_v63  ;;  %v191_v15 = vadd.f32 %v300_v33, %v117_v20  ;;  %v119_v17 = vmul.f32 %v341_v51, %v45_v61 }
  0x1c   :  { %219 = vst [vmem:[%s547_s3 + $0xc8] sm:$0xff] %v187_v0  ;;  %220 = vst [vmem:[%s547_s3 + $0xd0] sm:$0xff] %v188_v22  ;;  %v192_v21 = vadd.f32 %v322_v45, %v118_v2 }
  0x1d   :  { %221 = vst [vmem:[%s547_s3 + $0xd8] sm:$0xff] %v189_v27  ;;  %222 = vst [vmem:[%s547_s3 + $0xe0] sm:$0xff] %v190_v1  ;;  %v193_v23 = vadd.f32 %v343_v52, %v119_v17 }
  0x1e   :  { %223 = vst [vmem:[%s547_s3 + $0xe8] sm:$0xff] %v191_v15  ;;  %224 = vst [vmem:[%s547_s3 + $0xf0] sm:$0xff] %v192_v21 }
  0x1f   :  { %225 = vst [vmem:[%s547_s3 + $0xf8] sm:$0xff] %v193_v23 }

// kernel: _lambda_.15
= control target key start
LH: loop header
LB: loop body
LE: loop exit
PB: predicated region body
PF: predicated region fallthrough
CT: control target
= control target key end

     0   :  { %v51_v0 = vlaneseq  ;;  %s774_s2 = inlined_call_operand.vmem [shape: f32[1,1024], index: 2, kind: input, shape index: {}]   ;;  %s775_s3 = inlined_call_operand.vmem [shape: f32[1,1024], index: 3, kind: input, shape index: {}]   ;;  %s776_s0 = inlined_call_operand.vmem [shape: f32[32,1024], index: 0, kind: input, shape index: {}]   ;;  %s777_s1 = inlined_call_operand.vmem [shape: f32[32,1024], index: 1, kind: input, shape index: {}]   ;;  %s778_s4 = inlined_call_operand.vmem [shape: f32[32,1024], index: 4, kind: output, shape index: {}]  }
   0x1   :  { %v359_v2 = vld [vmem:[%s774_s2] sm:$0xff]  ;;  %v18_v9 = vld [vmem:[%s776_s0 + $0x8] sm:$0xff]  ;;  %v19_v17 = vld [vmem:[%s776_s0 + $0x10] sm:$0xff] }
   0x2   :  { %v354_v1 = vshrl.u32 %v51_v0, 7  ;;  %v364_v3 = vld [vmem:[%s775_s3] sm:$0xff]  ;;  %v20_v18 = vld [vmem:[%s776_s0 + $0x18] sm:$0xff]  ;;  %v22_v28 = vld [vmem:[%s776_s0 + $0x28] sm:$0xff] }
   0x3   :  { %v17_v8 = vld [vmem:[%s776_s0] sm:$0xff]  ;;  %v198_v30 = vld [vmem:[%s777_s1 + $0x8] sm:$0xff]  ;;  %v23_v35 = vld [vmem:[%s776_s0 + $0x30] sm:$0xff] }
   0x4   :  { %v53_v4 = vsub.s32 0, %v354_v1  ;;  %v57_v5 = vsub.s32 1, %v354_v1  ;;  %v61_v6 = vsub.s32 2, %v354_v1  ;;  %v65_v7 = vsub.s32 3, %v354_v1  ;;  %v21_v23 = vld [vmem:[%s776_s0 + $0x20] sm:$0xff]  ;;  %v199_v38 = vld [vmem:[%s777_s1 + $0x10] sm:$0xff] }
   0x5   :  { %v69_v10 = vsub.s32 4, %v354_v1  ;;  %v73_v11 = vsub.s32 5, %v354_v1  ;;  %v77_v12 = vsub.s32 6, %v354_v1  ;;  %v197_v29 = vld [vmem:[%s777_s1] sm:$0xff]  ;;  %v200_v39 = vld [vmem:[%s777_s1 + $0x18] sm:$0xff]  ;;  %v202_v50 = vld [vmem:[%s777_s1 + $0x28] sm:$0xff] }
   0x6   :  { %v380_v13 = vrot.slane %v359_v2, %v53_v4  ;;  %v383_v14 = vrot.slane %v364_v3, %v53_v4  ;;  %v386_v15 = vrot.slane %v359_v2, %v57_v5  ;;  %v389_v16 = vrot.slane %v364_v3, %v57_v5  ;;  %v201_v44 = vld [vmem:[%s777_s1 + $0x20] sm:$0xff]  ;;  %v203_v55 = vld [vmem:[%s777_s1 + $0x30] sm:$0xff]  ;;  %v24_v62 = vld [vmem:[%s776_s0 + $0x38] sm:$0xff] }
   0x7   :  { %v398_v19 = vrot.slane %v359_v2, %v61_v6  ;;  %v401_v20 = vrot.slane %v364_v3, %v61_v6  ;;  %v404_v21 = vrot.slane %v359_v2, %v65_v7  ;;  %v407_v22 = vrot.slane %v364_v3, %v65_v7  ;;  %v25_v57 = vld [vmem:[%s776_s0 + $0x40] sm:$0xff]  ;;  %v26_v63 = vld [vmem:[%s776_s0 + $0x48] sm:$0xff]  ;;  %v27_v0 = vld [vmem:[%s776_s0 + $0x50] sm:$0xff] }
   0x8   :  { %v91_v24 = vmul.f32 %v380_v13, %v17_v8  ;;  %v92_v25 = vmul.f32 %v386_v15, %v18_v9  ;;  %v415_v26 = vrot.slane %v359_v2, %v69_v10  ;;  %v418_v27 = vrot.slane %v364_v3, %v69_v10  ;;  %v28_v7 = vld [vmem:[%s776_s0 + $0x58] sm:$0xff]  ;;  %v29_v8 = vld [vmem:[%s776_s0 + $0x60] sm:$0xff] }
   0x9   :  { %v93_v31 = vmul.f32 %v398_v19, %v19_v17  ;;  %v94_v32 = vmul.f32 %v404_v21, %v20_v18  ;;  %v432_v33 = vrot.slane %v359_v2, %v73_v11  ;;  %v435_v34 = vrot.slane %v364_v3, %v73_v11 }
   0xa   :  { %v165_v36 = vadd.f32 %v383_v14, %v91_v24  ;;  %v166_v37 = vadd.f32 %v389_v16, %v92_v25  ;;  %v95_v40 = vmul.f32 %v415_v26, %v21_v23  ;;  %v450_v41 = vrot.slane %v359_v2, %v77_v12  ;;  %v31_v25 = vld [vmem:[%s776_s0 + $0x70] sm:$0xff] }
   0xb   :  { %v167_v42 = vadd.f32 %v401_v20, %v93_v31  ;;  %v168_v43 = vadd.f32 %v407_v22, %v94_v32  ;;  %v96_v45 = vmul.f32 %v432_v33, %v22_v28  ;;  %v459_v46 = vrot.slane %v364_v3, %v77_v12  ;;  %v30_v12 = vld [vmem:[%s776_s0 + $0x68] sm:$0xff]  ;;  %v207_v32 = vld [vmem:[%s777_s1 + $0x50] sm:$0xff] }
   0xc   :  { %v229_v47 = vadd.f32 %v197_v29, %v165_v36  ;;  %v230_v48 = vadd.f32 %v198_v30, %v166_v37  ;;  %v169_v49 = vadd.f32 %v418_v27, %v95_v40  ;;  %v97_v51 = vmul.f32 %v450_v41, %v23_v35  ;;  %v204_v29 = vld [vmem:[%s777_s1 + $0x38] sm:$0xff]  ;;  %v206_v31 = vld [vmem:[%s777_s1 + $0x48] sm:$0xff] }
   0xd   :  { %v231_v52 = vadd.f32 %v199_v38, %v167_v42  ;;  %v232_v53 = vadd.f32 %v200_v39, %v168_v43  ;;  %v170_v54 = vadd.f32 %v435_v34, %v96_v45  ;;  %v81_v56 = vsub.s32 7, %v354_v1  ;;  %v208_v40 = vld [vmem:[%s777_s1 + $0x58] sm:$0xff]  ;;  %v209_v42 = vld [vmem:[%s777_s1 + $0x60] sm:$0xff] }
   0xe   :  { %v261_v58 = vmax.f32 %v229_v47, 0.0  ;;  %v262_v59 = vmax.f32 %v230_v48, 0.0  ;;  %v233_v60 = vadd.f32 %v201_v44, %v169_v49  ;;  %v171_v61 = vadd.f32 %v459_v46, %v97_v51  ;;  %v210_v48 = vld [vmem:[%s777_s1 + $0x68] sm:$0xff] }
   0xf   :  { %v263_v1 = vmax.f32 %v231_v52, 0.0  ;;  %v264_v4 = vmax.f32 %v232_v53, 0.0  ;;  %v234_v5 = vadd.f32 %v202_v50, %v170_v54  ;;  %v485_v6 = vrot.slane %v359_v2, %v81_v56  ;;  %v211_v54 = vld [vmem:[%s777_s1 + $0x70] sm:$0xff] }
  0x10   :  { %293 = vst [vmem:[%s778_s4] sm:$0xff] %v261_v58  ;;  %294 = vst [vmem:[%s778_s4 + $0x8] sm:$0xff] %v262_v59  ;;  %v265_v9 = vmax.f32 %v233_v60, 0.0  ;;  %v235_v10 = vadd.f32 %v203_v55, %v171_v61  ;;  %v500_v2 = vrot.slane %v364_v3, %v81_v56  ;;  %v99_v11 = vmul.f32 %v380_v13, %v25_v57  ;;  %v205_v3 = vld [vmem:[%s777_s1 + $0x40] sm:$0xff]  ;;  %v32_v55 = vld [vmem:[%s776_s0 + $0x78] sm:$0xff] }
  0x11   :  { %295 = vst [vmem:[%s778_s4 + $0x10] sm:$0xff] %v263_v1  ;;  %296 = vst [vmem:[%s778_s4 + $0x18] sm:$0xff] %v264_v4  ;;  %v266_v17 = vmax.f32 %v234_v5, 0.0  ;;  %v98_v18 = vmul.f32 %v485_v6, %v24_v62  ;;  %v100_v23 = vmul.f32 %v386_v15, %v26_v63  ;;  %v101_v24 = vmul.f32 %v398_v19, %v27_v0  ;;  %v33_v60 = vld [vmem:[%s776_s0 + $0x80] sm:$0xff]  ;;  %v34_v61 = vld [vmem:[%s776_s0 + $0x88] sm:$0xff] }
  0x12   :  { %297 = vst [vmem:[%s778_s4 + $0x20] sm:$0xff] %v265_v9  ;;  %v267_v28 = vmax.f32 %v235_v10, 0.0  ;;  %v173_v30 = vadd.f32 %v383_v14, %v99_v11  ;;  %v102_v35 = vmul.f32 %v404_v21, %v28_v7  ;;  %v103_v36 = vmul.f32 %v415_v26, %v29_v8  ;;  %v35_v62 = vld [vmem:[%s776_s0 + $0x90] sm:$0xff]  ;;  %v36_v5 = vld [vmem:[%s776_s0 + $0x98] sm:$0xff]  ;;  %v37_v7 = vld [vmem:[%s776_s0 + $0xa0] sm:$0xff] }
  0x13   :  { %298 = vst [vmem:[%s778_s4 + $0x28] sm:$0xff] %v266_v17  ;;  %v172_v37 = vadd.f32 %v500_v2, %v98_v18  ;;  %v174_v38 = vadd.f32 %v389_v16, %v100_v23  ;;  %v175_v39 = vadd.f32 %v401_v20, %v101_v24  ;;  %v104_v43 = vmul.f32 %v432_v33, %v30_v12  ;;  %v38_v12 = vld [vmem:[%s776_s0 + $0xa8] sm:$0xff]  ;;  %v212_v18 = vld [vmem:[%s777_s1 + $0x78] sm:$0xff] }
  0x14   :  { %299 = vst [vmem:[%s778_s4 + $0x30] sm:$0xff] %v267_v28  ;;  %v237_v44 = vadd.f32 %v205_v3, %v173_v30  ;;  %v176_v45 = vadd.f32 %v407_v22, %v102_v35  ;;  %v177_v47 = vadd.f32 %v418_v27, %v103_v36  ;;  %v105_v49 = vmul.f32 %v450_v41, %v31_v25  ;;  %v39_v25 = vld [vmem:[%s776_s0 + $0xb0] sm:$0xff]  ;;  %v213_v30 = vld [vmem:[%s777_s1 + $0x80] sm:$0xff] }
  0x15   :  { %v236_v50 = vadd.f32 %v204_v29, %v172_v37  ;;  %v238_v51 = vadd.f32 %v206_v31, %v174_v38  ;;  %v239_v52 = vadd.f32 %v207_v32, %v175_v39  ;;  %v178_v53 = vadd.f32 %v435_v34, %v104_v43  ;;  %v214_v31 = vld [vmem:[%s777_s1 + $0x88] sm:$0xff]  ;;  %v215_v32 = vld [vmem:[%s777_s1 + $0x90] sm:$0xff] }
  0x16   :  { %v269_v56 = vmax.f32 %v237_v44, 0.0  ;;  %v240_v57 = vadd.f32 %v208_v40, %v176_v45  ;;  %v241_v58 = vadd.f32 %v209_v42, %v177_v47  ;;  %v179_v59 = vadd.f32 %v459_v46, %v105_v49  ;;  %v216_v40 = vld [vmem:[%s777_s1 + $0x98] sm:$0xff]  ;;  %v217_v42 = vld [vmem:[%s777_s1 + $0xa0] sm:$0xff] }
  0x17   :  { %v268_v63 = vmax.f32 %v236_v50, 0.0  ;;  %v270_v0 = vmax.f32 %v238_v51, 0.0  ;;  %v271_v1 = vmax.f32 %v239_v52, 0.0  ;;  %v242_v4 = vadd.f32 %v210_v48, %v178_v53  ;;  %v218_v48 = vld [vmem:[%s777_s1 + $0xa8] sm:$0xff] }
  0x18   :  { %301 = vst [vmem:[%s778_s4 + $0x40] sm:$0xff] %v269_v56  ;;  %v272_v8 = vmax.f32 %v240_v57, 0.0  ;;  %v273_v9 = vmax.f32 %v241_v58, 0.0  ;;  %v243_v10 = vadd.f32 %v211_v54, %v179_v59  ;;  %v106_v11 = vmul.f32 %v485_v6, %v32_v55  ;;  %v219_v54 = vld [vmem:[%s777_s1 + $0xb0] sm:$0xff]  ;;  %v40_v55 = vld [vmem:[%s776_s0 + $0xb8] sm:$0xff] }
  0x19   :  { %300 = vst [vmem:[%s778_s4 + $0x38] sm:$0xff] %v268_v63  ;;  %302 = vst [vmem:[%s778_s4 + $0x48] sm:$0xff] %v270_v0  ;;  %v274_v17 = vmax.f32 %v242_v4, 0.0  ;;  %v107_v3 = vmul.f32 %v380_v13, %v33_v60  ;;  %v108_v23 = vmul.f32 %v386_v15, %v34_v61  ;;  %v109_v24 = vmul.f32 %v398_v19, %v35_v62  ;;  %v41_v60 = vld [vmem:[%s776_s0 + $0xc0] sm:$0xff]  ;;  %v42_v61 = vld [vmem:[%s776_s0 + $0xc8] sm:$0xff] }
  0x1a   :  { %303 = vst [vmem:[%s778_s4 + $0x50] sm:$0xff] %v271_v1  ;;  %304 = vst [vmem:[%s778_s4 + $0x58] sm:$0xff] %v272_v8  ;;  %v275_v28 = vmax.f32 %v243_v10, 0.0  ;;  %v180_v29 = vadd.f32 %v500_v2, %v106_v11  ;;  %v110_v35 = vmul.f32 %v404_v21, %v36_v5  ;;  %v111_v36 = vmul.f32 %v415_v26, %v37_v7  ;;  %v43_v62 = vld [vmem:[%s776_s0 + $0xd0] sm:$0xff]  ;;  %v44_v5 = vld [vmem:[%s776_s0 + $0xd8] sm:$0xff] }
  0x1b   :  { %305 = vst [vmem:[%s778_s4 + $0x60] sm:$0xff] %v273_v9  ;;  %306 = vst [vmem:[%s778_s4 + $0x68] sm:$0xff] %v274_v17  ;;  %v181_v37 = vadd.f32 %v383_v14, %v107_v3  ;;  %v182_v38 = vadd.f32 %v389_v16, %v108_v23  ;;  %v183_v39 = vadd.f32 %v401_v20, %v109_v24  ;;  %v45_v7 = vld [vmem:[%s776_s0 + $0xe0] sm:$0xff] }
  0x1c   :  { %v112_v43 = vmul.f32 %v432_v33, %v38_v12  ;;  %307 = vst [vmem:[%s778_s4 + $0x70] sm:$0xff] %v275_v28  ;;  %v244_v44 = vadd.f32 %v212_v18, %v180_v29  ;;  %v184_v45 = vadd.f32 %v407_v22, %v110_v35  ;;  %v185_v47 = vadd.f32 %v418_v27, %v111_v36  ;;  %v46_v12 = vld [vmem:[%s776_s0 + $0xe8] sm:$0xff]  ;;  %v220_v18 = vld [vmem:[%s777_s1 + $0xb8] sm:$0xff] }
  0x1d   :  { %v113_v49 = vmul.f32 %v450_v41, %v39_v25  ;;  %v245_v50 = vadd.f32 %v213_v30, %v181_v37  ;;  %v246_v51 = vadd.f32 %v214_v31, %v182_v38  ;;  %v247_v52 = vadd.f32 %v215_v32, %v183_v39  ;;  %v47_v25 = vld [vmem:[%s776_s0 + $0xf0] sm:$0xff]  ;;  %v224_v37 = vld [vmem:[%s777_s1 + $0xd8] sm:$0xff] }
  0x1e   :  { %v186_v53 = vadd.f32 %v435_v34, %v112_v43  ;;  %v276_v56 = vmax.f32 %v244_v44, 0.0  ;;  %v248_v57 = vadd.f32 %v216_v40, %v184_v45  ;;  %v249_v58 = vadd.f32 %v217_v42, %v185_v47  ;;  %v227_v44 = vld [vmem:[%s777_s1 + $0xf0] sm:$0xff] }
  0x1f   :  { %v187_v59 = vadd.f32 %v459_v46, %v113_v49  ;;  %v277_v63 = vmax.f32 %v245_v50, 0.0  ;;  %v278_v0 = vmax.f32 %v246_v51, 0.0  ;;  %v279_v1 = vmax.f32 %v247_v52, 0.0 }
  0x20   :  { %v250_v4 = vadd.f32 %v218_v48, %v186_v53  ;;  %308 = vst [vmem:[%s778_s4 + $0x78] sm:$0xff] %v276_v56  ;;  %v280_v8 = vmax.f32 %v248_v57, 0.0  ;;  %v281_v9 = vmax.f32 %v249_v58, 0.0  ;;  %v114_v11 = vmul.f32 %v485_v6, %v40_v55  ;;  %v228_v55 = vld [vmem:[%s777_s1 + $0xf8] sm:$0xff] }
  0x21   :  { %v251_v10 = vadd.f32 %v219_v54, %v187_v59  ;;  %309 = vst [vmem:[%s778_s4 + $0x80] sm:$0xff] %v277_v63  ;;  %310 = vst [vmem:[%s778_s4 + $0x88] sm:$0xff] %v278_v0  ;;  %v115_v3 = vmul.f32 %v380_v13, %v41_v60  ;;  %v116_v23 = vmul.f32 %v386_v15, %v42_v61  ;;  %v221_v13 = vld [vmem:[%s777_s1 + $0xc0] sm:$0xff]  ;;  %v222_v15 = vld [vmem:[%s777_s1 + $0xc8] sm:$0xff] }
  0x22   :  { %311 = vst [vmem:[%s778_s4 + $0x90] sm:$0xff] %v279_v1  ;;  %v282_v17 = vmax.f32 %v250_v4, 0.0  ;;  %v117_v24 = vmul.f32 %v398_v19, %v43_v62  ;;  %312 = vst [vmem:[%s778_s4 + $0x98] sm:$0xff] %v280_v8  ;;  %v188_v29 = vadd.f32 %v500_v2, %v114_v11  ;;  %v223_v19 = vld [vmem:[%s777_s1 + $0xd0] sm:$0xff]  ;;  %v118_v30 = vmul.f32 %v404_v21, %v44_v5  ;;  %v225_v21 = vld [vmem:[%s777_s1 + $0xe0] sm:$0xff] }
  0x23   :  { %313 = vst [vmem:[%s778_s4 + $0xa0] sm:$0xff] %v281_v9  ;;  %v283_v28 = vmax.f32 %v251_v10, 0.0  ;;  %v119_v31 = vmul.f32 %v415_v26, %v45_v7  ;;  %v189_v32 = vadd.f32 %v383_v14, %v115_v3  ;;  %v190_v35 = vadd.f32 %v389_v16, %v116_v23 }
  0x24   :  { %314 = vst [vmem:[%s778_s4 + $0xa8] sm:$0xff] %v282_v17  ;;  %v191_v36 = vadd.f32 %v401_v20, %v117_v24  ;;  %v120_v26 = vmul.f32 %v432_v33, %v46_v12  ;;  %v252_v38 = vadd.f32 %v220_v18, %v188_v29  ;;  %v192_v14 = vadd.f32 %v407_v22, %v118_v30  ;;  %v226_v20 = vld [vmem:[%s777_s1 + $0xe8] sm:$0xff]  ;;  %v48_v22 = vld [vmem:[%s776_s0 + $0xf8] sm:$0xff] }
  0x25   :  { %315 = vst [vmem:[%s778_s4 + $0xb0] sm:$0xff] %v283_v28  ;;  %v193_v16 = vadd.f32 %v418_v27, %v119_v31  ;;  %v121_v39 = vmul.f32 %v450_v41, %v47_v25  ;;  %v253_v40 = vadd.f32 %v221_v13, %v189_v32  ;;  %v254_v42 = vadd.f32 %v222_v15, %v190_v35 }
  0x26   :  { %v255_v43 = vadd.f32 %v223_v19, %v191_v36  ;;  %v194_v33 = vadd.f32 %v435_v34, %v120_v26  ;;  %v284_v27 = vmax.f32 %v252_v38, 0.0  ;;  %v256_v45 = vadd.f32 %v224_v37, %v192_v14 }
  0x27   :  { %v257_v47 = vadd.f32 %v225_v21, %v193_v16  ;;  %v195_v48 = vadd.f32 %v459_v46, %v121_v39  ;;  %v285_v49 = vmax.f32 %v253_v40, 0.0  ;;  %v286_v41 = vmax.f32 %v254_v42, 0.0 }
  0x28   :  { %v287_v50 = vmax.f32 %v255_v43, 0.0  ;;  %v258_v51 = vadd.f32 %v226_v20, %v194_v33  ;;  %316 = vst [vmem:[%s778_s4 + $0xb8] sm:$0xff] %v284_v27  ;;  %v288_v34 = vmax.f32 %v256_v45, 0.0  ;;  %v122_v54 = vmul.f32 %v485_v6, %v48_v22 }
  0x29   :  { %v289_v52 = vmax.f32 %v257_v47, 0.0  ;;  %v259_v53 = vadd.f32 %v227_v44, %v195_v48  ;;  %317 = vst [vmem:[%s778_s4 + $0xc0] sm:$0xff] %v285_v49  ;;  %318 = vst [vmem:[%s778_s4 + $0xc8] sm:$0xff] %v286_v41 }
  0x2a   :  { %319 = vst [vmem:[%s778_s4 + $0xd0] sm:$0xff] %v287_v50  ;;  %v290_v46 = vmax.f32 %v258_v51, 0.0  ;;  %320 = vst [vmem:[%s778_s4 + $0xd8] sm:$0xff] %v288_v34  ;;  %v196_v56 = vadd.f32 %v500_v2, %v122_v54 }
  0x2b   :  { %321 = vst [vmem:[%s778_s4 + $0xe0] sm:$0xff] %v289_v52  ;;  %v291_v6 = vmax.f32 %v259_v53, 0.0 }
  0x2c   :  { %322 = vst [vmem:[%s778_s4 + $0xe8] sm:$0xff] %v290_v46  ;;  %v260_v57 = vadd.f32 %v228_v55, %v196_v56 }
  0x2d   :  { %323 = vst [vmem:[%s778_s4 + $0xf0] sm:$0xff] %v291_v6 }
  0x2e   :  { %v292_v58 = vmax.f32 %v260_v57, 0.0 }
  0x30   :  { %324 = vst [vmem:[%s778_s4 + $0xf8] sm:$0xff] %v292_v58 }

// kernel: _lambda_.12
= control target key start
LH: loop header
LB: loop body
LE: loop exit
PB: predicated region body
PF: predicated region fallthrough
CT: control target
= control target key end

     0   :  { %s6005_s15 = smov 0   ;;  %s8467_s0 = inlined_call_operand.vmem [shape: f32[2,342,32], index: 0, kind: input, shape index: {}]   ;;  %s8468_s1 = inlined_call_operand.vmem [shape: bf16[3,3,32,32], index: 1, kind: input, shape index: {}]   ;;  %s8469_s2 = inlined_call_operand.vmem [shape: f32[2,288,32], index: 2, kind: output, shape index: {0}]   ;;  %s8470_s3 = inlined_call_operand.vmem [shape: f32[2,1,32], index: 3, kind: output, shape index: {1}]   ;;  %s8471_s4 = inlined_call_operand.vmem [shape: f32[2,1,32], index: 4, kind: output, shape index: {2}]  }
   0x1 LB: > { %s5069_s16 = sadd.s32 4294967295, %s5977_s15   ;;  %p5073_p0 = scmp.ge.s32.totalorder %s5977_s15, 1  ;;  %s5977_s15 = sphi %s6005_s15, %s15_s15  }
   0x2   : > { %p167_p1 = scmp.lt.s32.totalorder %s5977_s15, 3 }
   0x4   : > { %p168_p2 = pnand %p5073_p0, %p167_p1 }
   0x6   : > { %171 = sbr.rel (%p168_p2) target bundleno = 604 (0x25c), region = 28 }
   0xd   : > { %v5953_v0 = vld [vmem:[%s8468_s1] sm:$0xff]   ;;  %p199_p3 = scmp.lt.s32.totalorder %s5069_s16, 1  ;;  %v5954_v1 = vld [vmem:[%s8468_s1 + $0x8] sm:$0xff]   ;;  %v5955_v2 = vld [vmem:[%s8468_s1 + $0x10] sm:$0xff]   ;;  %vm216_vm0 = vcmask 261120  }
   0xe   : > { %5506 = vmatprep.subr.bf16.mxu0 %v5953_v0  ;;  %5866 = vmatprep.subr.bf16.mxu1 %v5953_v0  ;;  %v5956_v3 = vld [vmem:[%s8468_s1 + $0x20] sm:$0xff]   ;;  %v5957_v11 = vld [vmem:[%s8468_s1 + $0x18] sm:$0xff]   ;;  %v5958_v23 = vld [vmem:[%s8468_s1 + $0x28] sm:$0xff]  }
   0xf   : > { %s8623_s16 = smov (!%p199_p3, %s5069_s16), 1  ;;  %5507 = vmatpush3.bf16.msra.mxu0 %v5953_v0  ;;  %5868 = vmatpush3.bf16.msra.mxu1 %v5953_v0  ;;  %v6068_v32 = vld [vmem:[%s8468_s1 + $0x30] sm:$0xff]   ;;  %v6086_v46 = vld [vmem:[%s8468_s1 + $0x40] sm:$0xff]  }
  0x10   : > { %5508 = vmatprep.subr.bf16.mxu0 %v5954_v1  ;;  %5867 = vmatprep.subr.bf16.mxu1 %v5954_v1  ;;  %s5870_s23 = smul.u32 344, %s8623_s16  ;;  %s211_s13 = scalar_lea.vmem %s8470_s3, %s8623_s16 }
  0x11   : > { %s214_s18 = scalar_lea.vmem %s8471_s4, %s8623_s16 }
  0x12   : > { %s6031_s28 = scalar_lea.vmem %s8467_s0, %s5870_s23 }
  0x13   : > { %5509 = vmatpush3.bf16.msra.mxu0 %v5954_v1  ;;  %5869 = vmatpush3.bf16.msra.mxu1 %v5954_v1  ;;  %v253_v4 = vld [vmem:[%s6031_s28] sm:$0xff]  ;;  %v254_v5 = vld [vmem:[%s6031_s28 + $0x8] sm:$0xff]  ;;  %v255_v9 = vld [vmem:[%s6031_s28 + $0x10] sm:$0xff] }
  0x14   : > { %v273_v6 = vld [vmem:[%s6031_s28 + $0xa0] sm:$0xff]  ;;  %v289_v7 = vpack.c.bf16 %v254_v5, %v253_v4  ;;  %v274_v8 = vld [vmem:[%s6031_s28 + $0xa8] sm:$0xff]  ;;  %v256_v10 = vld [vmem:[%s6031_s28 + $0x18] sm:$0xff]  ;;  %5546 = vmatprep.subr.bf16.mxu1 %v5955_v2  ;;  %5586 = vmatprep.subr.bf16.mxu0 %v5956_v3 }
  0x15   : > { %v299_v12 = vpack.c.bf16 %v274_v8, %v273_v6  ;;  %v290_v13 = vpack.c.bf16 %v256_v10, %v255_v9  ;;  %v275_v14 = vld [vmem:[%s6031_s28 + $0xb0] sm:$0xff]  ;;  %v276_v15 = vld [vmem:[%s6031_s28 + $0xb8] sm:$0xff]  ;;  %v257_v16 = vld [vmem:[%s6031_s28 + $0x20] sm:$0xff] }
  0x16   : > { %5510 = vmatprep.mubr.msk.bf16.mxu0 %vm216_vm0, %v289_v7  ;;  %v300_v17 = vpack.c.bf16 %v276_v15, %v275_v14  ;;  %v258_v18 = vld [vmem:[%s6031_s28 + $0x28] sm:$0xff]  ;;  %v277_v19 = vld [vmem:[%s6031_s28 + $0xc0] sm:$0xff]  ;;  %v259_v24 = vld [vmem:[%s6031_s28 + $0x30] sm:$0xff] }
  0x17   : > { %v278_v20 = vld [vmem:[%s6031_s28 + $0xc8] sm:$0xff]  ;;  %5530 = vmatprep.mubr.msk.bf16.mxu1 %vm216_vm0, %v299_v12  ;;  %5511 = vmatmul.mubr.msk.bf16.vlgmr.msra.gmra.mrb[0].mxu0 %vm216_vm0, %v290_v13  ;;  %v291_v21 = vpack.c.bf16 %v258_v18, %v257_v16  ;;  %v260_v25 = vld [vmem:[%s6031_s28 + $0x38] sm:$0xff]  ;;  %v279_v26 = vld [vmem:[%s6031_s28 + $0xd0] sm:$0xff] }
  0x18   : > { %v301_v22 = vpack.c.bf16 %v278_v20, %v277_v19  ;;  %5531 = vmatmul.mubr.msk.bf16.vlgmr.msra.gmra.mrb[0].mxu1 %vm216_vm0, %v300_v17  ;;  %5587 = vmatpush3.bf16.msra.mxu0 %v5956_v3  ;;  %v280_v27 = vld [vmem:[%s6031_s28 + $0xd8] sm:$0xff]  ;;  %v261_v28 = vld [vmem:[%s6031_s28 + $0x40] sm:$0xff]  ;;  %v262_v29 = vld [vmem:[%s6031_s28 + $0x48] sm:$0xff]  ;;  %v292_v33 = vpack.c.bf16 %v260_v25, %v259_v24 }
  0x19   : > { %5547 = vmatpush3.bf16.msra.mxu1 %v5955_v2  ;;  %5514 = vmatprep.mubr.msk.bf16.mxu0 %vm216_vm0, %v291_v21  ;;  %v281_v30 = vld [vmem:[%s6031_s28 + $0xe0] sm:$0xff]  ;;  %v282_v31 = vld [vmem:[%s6031_s28 + $0xe8] sm:$0xff]  ;;  %v302_v34 = vpack.c.bf16 %v280_v27, %v279_v26  ;;  %v293_v35 = vpack.c.bf16 %v262_v29, %v261_v28  ;;  %v263_v37 = vld [vmem:[%s6031_s28 + $0x50] sm:$0xff] }
  0x1a   : > { %5534 = vmatprep.mubr.msk.bf16.mxu1 %vm216_vm0, %v301_v22  ;;  %5548 = vmatprep.subr.bf16.mxu1 %v5957_v11  ;;  %v303_v36 = vpack.c.bf16 %v282_v31, %v281_v30  ;;  %v264_v38 = vld [vmem:[%s6031_s28 + $0x58] sm:$0xff]  ;;  %v283_v39 = vld [vmem:[%s6031_s28 + $0xf0] sm:$0xff]  ;;  %v265_v41 = vld [vmem:[%s6031_s28 + $0x60] sm:$0xff] }
  0x1b   : > { %5588 = vmatprep.subr.bf16.mxu0 %v5958_v23  ;;  %v284_v40 = vld [vmem:[%s6031_s28 + $0xf8] sm:$0xff]  ;;  %v266_v42 = vld [vmem:[%s6031_s28 + $0x68] sm:$0xff]  ;;  %v285_v43 = vld [vmem:[%s6031_s28 + $0x100] sm:$0xff]  ;;  %v294_v45 = vpack.c.bf16 %v264_v38, %v263_v37 }
  0x1c   : > { %5589 = vmatpush3.bf16.msra.mxu0 %v5958_v23  ;;  %v286_v44 = vld [vmem:[%s6031_s28 + $0x108] sm:$0xff]  ;;  %v304_v47 = vpack.c.bf16 %v284_v40, %v283_v39  ;;  %v295_v48 = vpack.c.bf16 %v266_v42, %v265_v41  ;;  %v267_v50 = vld [vmem:[%s6031_s28 + $0x70] sm:$0xff]  ;;  %v268_v51 = vld [vmem:[%s6031_s28 + $0x78] sm:$0xff] }
  0x1d   : > { %5549 = vmatpush3.bf16.msra.mxu1 %v5957_v11  ;;  %v305_v49 = vpack.c.bf16 %v286_v44, %v285_v43  ;;  %5666 = vmatprep.subr.bf16.mxu0 %v6086_v46  ;;  %v287_v52 = vld [vmem:[%s6031_s28 + $0x110] sm:$0xff]  ;;  %v288_v53 = vld [vmem:[%s6031_s28 + $0x118] sm:$0xff]  ;;  %v269_v54 = vld [vmem:[%s6031_s28 + $0x80] sm:$0xff]  ;;  %v296_v58 = vpack.c.bf16 %v268_v51, %v267_v50 }
  0x1e   : > { %5626 = vmatprep.subr.bf16.mxu1 %v6068_v32  ;;  %v270_v55 = vld [vmem:[%s6031_s28 + $0x88] sm:$0xff]  ;;  %v306_v59 = vpack.c.bf16 %v288_v53, %v287_v52  ;;  %v271_v62 = vld [vmem:[%s6031_s28 + $0x90] sm:$0xff]  ;;  %v272_v63 = vld [vmem:[%s6031_s28 + $0x98] sm:$0xff] }
  0x1f   : > { %5515 = vmatmul.mubr.msk.bf16.gmra.mrb[4].mxu0 %vm216_vm0, %v292_v33  ;;  %v662_v56 = vld [vmem:[%s6031_s28 + $0x1] sm:$0xff]  ;;  %v663_v57 = vld [vmem:[%s6031_s28 + $0x9] sm:$0xff]  ;;  %v297_v60 = vpack.c.bf16 %v270_v55, %v269_v54  ;;  %v664_v0 = vld [vmem:[%s6031_s28 + $0x11] sm:$0xff]  ;;  %v298_v6 = vpack.c.bf16 %v272_v63, %v271_v62 }
  0x20   : > { %5535 = vmatmul.mubr.msk.bf16.gmra.mrb[4].mxu1 %vm216_vm0, %v302_v34  ;;  %5518 = vmatprep.mubr.msk.bf16.mxu0 %vm216_vm0, %v293_v35  ;;  %v698_v61 = vpack.c.bf16 %v663_v57, %v662_v56  ;;  %v665_v1 = vld [vmem:[%s6031_s28 + $0x19] sm:$0xff]  ;;  %v1072_v2 = vld [vmem:[%s6031_s28 + $0x2] sm:$0xff]  ;;  %v1073_v3 = vld [vmem:[%s6031_s28 + $0xa] sm:$0xff] }
  0x21   : > { %5538 = vmatprep.mubr.msk.bf16.mxu1 %vm216_vm0, %v303_v36  ;;  %v666_v4 = vld [vmem:[%s6031_s28 + $0x21] sm:$0xff]  ;;  %v667_v5 = vld [vmem:[%s6031_s28 + $0x29] sm:$0xff]  ;;  %v699_v7 = vpack.c.bf16 %v665_v1, %v664_v0  ;;  %v1108_v8 = vpack.c.bf16 %v1073_v3, %v1072_v2  ;;  %v5961_v10 = vld [vmem:[%s8468_s1 + $0x38] sm:$0xff]  }
  0x22   : > { %v700_v9 = vpack.c.bf16 %v667_v5, %v666_v4  ;;  %v668_v11 = vld [vmem:[%s6031_s28 + $0x31] sm:$0xff]  ;;  %v669_v12 = vld [vmem:[%s6031_s28 + $0x39] sm:$0xff]  ;;  %v670_v15 = vld [vmem:[%s6031_s28 + $0x41] sm:$0xff] }
  0x23   : > { %v1074_v13 = vld [vmem:[%s6031_s28 + $0x12] sm:$0xff]  ;;  %v1075_v14 = vld [vmem:[%s6031_s28 + $0x1a] sm:$0xff]  ;;  %v671_v16 = vld [vmem:[%s6031_s28 + $0x49] sm:$0xff]  ;;  %v701_v21 = vpack.c.bf16 %v669_v12, %v668_v11 }
  0x24   : > { %v1076_v17 = vld [vmem:[%s6031_s28 + $0x22] sm:$0xff]  ;;  %v1077_v18 = vld [vmem:[%s6031_s28 + $0x2a] sm:$0xff]  ;;  %v6134_v20 = vpack.c.bf16 %v1075_v14, %v1074_v13  ;;  %v702_v22 = vpack.c.bf16 %v671_v16, %v670_v15  ;;  %v673_v26 = vld [vmem:[%s6031_s28 + $0x59] sm:$0xff] }
  0x25   : > { %v6132_v19 = vld [vmem:[%s8468_s1 + $0x50] sm:$0xff]   ;;  %v6136_v23 = vpack.c.bf16 %v1077_v18, %v1076_v17  ;;  %v5962_v24 = vld [vmem:[%s8468_s1 + $0x48] sm:$0xff]   ;;  %v1079_v28 = vld [vmem:[%s6031_s28 + $0x3a] sm:$0xff] }
  0x26   : > { %v672_v25 = vld [vmem:[%s6031_s28 + $0x51] sm:$0xff]  ;;  %v1080_v29 = vld [vmem:[%s6031_s28 + $0x42] sm:$0xff]  ;;  %v1083_v40 = vld [vmem:[%s6031_s28 + $0x5a] sm:$0xff] }
  0x27   : > { %5519 = vmatmul.mubr.msk.bf16.gmra.mrb[8].mxu0 %vm216_vm0, %v294_v45  ;;  %v1078_v27 = vld [vmem:[%s6031_s28 + $0x32] sm:$0xff]  ;;  %v1081_v30 = vld [vmem:[%s6031_s28 + $0x4a] sm:$0xff]  ;;  %v6158_v31 = vld [vmem:[%s8468_s1 + $0x60] sm:$0xff]   ;;  %v703_v35 = vpack.c.bf16 %v673_v26, %v672_v25 }
  0x28   : > { %5539 = vmatmul.mubr.msk.bf16.gmra.mrb[8].mxu1 %vm216_vm0, %v304_v47  ;;  %5522 = vmatprep.mubr.msk.bf16.mxu0 %vm216_vm0, %v295_v48  ;;  %v675_v33 = vld [vmem:[%s6031_s28 + $0x69] sm:$0xff]  ;;  %v6162_v34 = vpack.c.bf16 %v1079_v28, %v1078_v27  ;;  %v6164_v36 = vpack.c.bf16 %v1081_v30, %v1080_v29  ;;  %v676_v38 = vld [vmem:[%s6031_s28 + $0x71] sm:$0xff]  ;;  %v677_v41 = vld [vmem:[%s6031_s28 + $0x79] sm:$0xff] }
  0x29   : > { %5542 = vmatprep.mubr.msk.bf16.mxu1 %vm216_vm0, %v305_v49  ;;  %v1082_v39 = vld [vmem:[%s6031_s28 + $0x52] sm:$0xff]  ;;  %v1084_v42 = vld [vmem:[%s6031_s28 + $0x62] sm:$0xff]  ;;  %v1085_v43 = vld [vmem:[%s6031_s28 + $0x6a] sm:$0xff]  ;;  %v705_v47 = vpack.c.bf16 %v677_v41, %v676_v38 }
  0x2a   : > { %v678_v44 = vld [vmem:[%s6031_s28 + $0x81] sm:$0xff]  ;;  %v679_v45 = vld [vmem:[%s6031_s28 + $0x89] sm:$0xff]  ;;  %v6183_v48 = vpack.c.bf16 %v1085_v43, %v1084_v42  ;;  %v680_v50 = vld [vmem:[%s6031_s28 + $0x91] sm:$0xff] }
  0x2b   : > { %v706_v49 = vpack.c.bf16 %v679_v45, %v678_v44  ;;  %v681_v51 = vld [vmem:[%s6031_s28 + $0x99] sm:$0xff]  ;;  %v1088_v54 = vld [vmem:[%s6031_s28 + $0x82] sm:$0xff]  ;;  %v1089_v55 = vld [vmem:[%s6031_s28 + $0x8a] sm:$0xff] }
  0x2c   : > { %v1086_v52 = vld [vmem:[%s6031_s28 + $0x72] sm:$0xff]  ;;  %v1087_v53 = vld [vmem:[%s6031_s28 + $0x7a] sm:$0xff]  ;;  %v683_v57 = vld [vmem:[%s6031_s28 + $0xa9] sm:$0xff] }
  0x2d   : > { %v682_v56 = vld [vmem:[%s6031_s28 + $0xa1] sm:$0xff]  ;;  %v684_v62 = vld [vmem:[%s6031_s28 + $0xb1] sm:$0xff]  ;;  %v685_v1 = vld [vmem:[%s6031_s28 + $0xb9] sm:$0xff] }
  0x2e   : > { %v1090_v63 = vld [vmem:[%s6031_s28 + $0x92] sm:$0xff]  ;;  %v1091_v0 = vld [vmem:[%s6031_s28 + $0x9a] sm:$0xff]  ;;  %v1092_v2 = vld [vmem:[%s6031_s28 + $0xa2] sm:$0xff] }
  0x2f   : > { %5523 = vmatmul.mubr.msk.bf16.gmra.mrb[12].mxu0 %vm216_vm0, %v296_v58  ;;  %v6199_v58 = vpack.c.bf16 %v1087_v53, %v1086_v52  ;;  %v1093_v3 = vld [vmem:[%s6031_s28 + $0xaa] sm:$0xff]  ;;  %v686_v4 = vld [vmem:[%s6031_s28 + $0xc1] sm:$0xff]  ;;  %v1094_v11 = vld [vmem:[%s6031_s28 + $0xb2] sm:$0xff] }
  0x30   : > { %5543 = vmatmul.mubr.msk.bf16.gmra.mrb[12].mxu1 %vm216_vm0, %v306_v59  ;;  %5526 = vmatprep.mubr.msk.bf16.mxu0 %vm216_vm0, %v297_v60  ;;  %v707_v59 = vpack.c.bf16 %v681_v51, %v680_v50  ;;  %v6201_v60 = vpack.c.bf16 %v1089_v55, %v1088_v54  ;;  %v687_v5 = vld [vmem:[%s6031_s28 + $0xc9] sm:$0xff]  ;;  %v1095_v12 = vld [vmem:[%s6031_s28 + $0xba] sm:$0xff]  ;;  %v692_v26 = vld [vmem:[%s6031_s28 + $0xf1] sm:$0xff] }
  0x31   : > { %5550 = vmatprep.mubr.msk.bf16.mxu1 %vm216_vm0, %v698_v61  ;;  %v708_v61 = vpack.c.bf16 %v683_v57, %v682_v56  ;;  %v689_v13 = vld [vmem:[%s6031_s28 + $0xd9] sm:$0xff]  ;;  %v1096_v14 = vld [vmem:[%s6031_s28 + $0xc2] sm:$0xff]  ;;  %v1097_v15 = vld [vmem:[%s6031_s28 + $0xca] sm:$0xff]  ;;  %v6235_v18 = vpack.c.bf16 %v1095_v12, %v1094_v11 }
  0x32   : > { %v690_v16 = vld [vmem:[%s6031_s28 + $0xe1] sm:$0xff]  ;;  %v691_v17 = vld [vmem:[%s6031_s28 + $0xe9] sm:$0xff]  ;;  %v1098_v27 = vld [vmem:[%s6031_s28 + $0xd2] sm:$0xff] }
  0x33   : > { %v712_v25 = vpack.c.bf16 %v691_v17, %v690_v16  ;;  %v1099_v28 = vld [vmem:[%s6031_s28 + $0xda] sm:$0xff]  ;;  %v1100_v30 = vld [vmem:[%s6031_s28 + $0xe2] sm:$0xff]  ;;  %v696_v41 = vld [vmem:[%s6031_s28 + $0x111] sm:$0xff] }
  0x34   : > { %v693_v29 = vld [vmem:[%s6031_s28 + $0xf9] sm:$0xff]  ;;  %v1104_v45 = vld [vmem:[%s6031_s28 + $0x102] sm:$0xff]  ;;  %v1911_v17 = vld [vmem:[%s6031_s28 + $0xab] sm:$0xff] }
  0x35   : > { %v713_v38 = vpack.c.bf16 %v693_v29, %v692_v26  ;;  %v1102_v42 = vld [vmem:[%s6031_s28 + $0xf2] sm:$0xff]  ;;  %v1103_v43 = vld [vmem:[%s6031_s28 + $0xfa] sm:$0xff] }
  0x36   : > { %v697_v44 = vld [vmem:[%s6031_s28 + $0x119] sm:$0xff] }
  0x37   : > { %5527 = vmatmul.mubr.msk.bf16.gmra.mrb[16].mxu0 %vm216_vm0, %v298_v6  ;;  %v6217_v6 = vpack.c.bf16 %v1091_v0, %v1090_v63  ;;  %v715_v50 = vpack.c.bf16 %v697_v44, %v696_v41  ;;  %v1106_v52 = vld [vmem:[%s6031_s28 + $0x112] sm:$0xff]  ;;  %v1107_v53 = vld [vmem:[%s6031_s28 + $0x11a] sm:$0xff] }
  0x38   : > { %5551 = vmatmul.mubr.msk.bf16.vlgmr.msra.gmra.mrb[16].mxu1 %vm216_vm0, %v699_v7  ;;  %5590 = vmatprep.mubr.msk.bf16.mxu0 %vm216_vm0, %v1108_v8  ;;  %v709_v7 = vpack.c.bf16 %v685_v1, %v684_v62  ;;  %v6219_v8 = vpack.c.bf16 %v1093_v3, %v1092_v2  ;;  %v1892_v54 = vld [vmem:[%s6031_s28 + $0x13] sm:$0xff]  ;;  %v1893_v55 = vld [vmem:[%s6031_s28 + $0x1b] sm:$0xff]  ;;  %v6356_v56 = vpack.c.bf16 %v1107_v53, %v1106_v52  ;;  %v1899_v2 = vld [vmem:[%s6031_s28 + $0x4b] sm:$0xff] }
  0x39   : > { %5627 = vmatpush3.bf16.msra.mxu1 %v6068_v32  ;;  %5554 = vmatprep.mubr.msk.bf16.mxu1 %vm216_vm0, %v700_v9  ;;  %v674_v32 = vld [vmem:[%s6031_s28 + $0x61] sm:$0xff]  ;;  %v710_v9 = vpack.c.bf16 %v687_v5, %v686_v4  ;;  %v1928_v57 = vpack.c.bf16 %v1893_v55, %v1892_v54  ;;  %v1896_v62 = vld [vmem:[%s6031_s28 + $0x33] sm:$0xff]  ;;  %v1923_v41 = vld [vmem:[%s6031_s28 + $0x10b] sm:$0xff] }
  0x3a   : > { %5628 = vmatprep.subr.bf16.mxu1 %v5961_v10  ;;  %v704_v37 = vpack.c.bf16 %v675_v33, %v674_v32  ;;  %v1101_v32 = vld [vmem:[%s6031_s28 + $0xea] sm:$0xff]  ;;  %v694_v33 = vld [vmem:[%s6031_s28 + $0x101] sm:$0xff]  ;;  %v1900_v3 = vld [vmem:[%s6031_s28 + $0x53] sm:$0xff] }
  0x3b   : > { %v1897_v63 = vld [vmem:[%s6031_s28 + $0x3b] sm:$0xff]  ;;  %v1926_v53 = vld [vmem:[%s6031_s28 + $0x123] sm:$0xff]  ;;  %v1927_v54 = vld [vmem:[%s6031_s28 + $0x12b] sm:$0xff] }
  0x3c   : > { %v1930_v1 = vpack.c.bf16 %v1897_v63, %v1896_v62  ;;  %v1901_v4 = vld [vmem:[%s6031_s28 + $0x5b] sm:$0xff]  ;;  %v2304_v55 = vld [vmem:[%s6031_s28 + $0x24] sm:$0xff] }
  0x3d   : > { %5629 = vmatpush3.bf16.msra.mxu1 %v5961_v10  ;;  %v688_v10 = vld [vmem:[%s6031_s28 + $0xd1] sm:$0xff]  ;;  %v6396_v5 = vld [vmem:[%s8468_s1 + $0x80] sm:$0xff]  }
  0x3e   : > { %5706 = vmatprep.subr.bf16.mxu1 %v6132_v19  ;;  %v1925_v44 = vld [vmem:[%s6031_s28 + $0x11b] sm:$0xff] }
  0x3f   : > { %5591 = vmatmul.mubr.msk.bf16.vlgmr.msra.gmra.mrb[20].mxu0 %vm216_vm0, %v6134_v20  ;;  %v5969_v63 = vld [vmem:[%s8468_s1 + $0x78] sm:$0xff]  }
  0x40   : > { %5555 = vmatmul.mubr.msk.bf16.gmra.mrb[20].mxu1 %vm216_vm0, %v701_v21  ;;  %5667 = vmatpush3.bf16.msra.mxu0 %v6086_v46  ;;  %v6181_v46 = vpack.c.bf16 %v1083_v40, %v1082_v39  ;;  %v711_v21 = vpack.c.bf16 %v689_v13, %v688_v10  ;;  %v6327_v39 = vpack.c.bf16 %v1101_v32, %v1100_v30  ;;  %v1905_v10 = vld [vmem:[%s6031_s28 + $0x7b] sm:$0xff]  ;;  %v1907_v13 = vld [vmem:[%s6031_s28 + $0x8b] sm:$0xff] }
  0x41   : > { %5558 = vmatprep.mubr.msk.bf16.mxu1 %vm216_vm0, %v702_v22  ;;  %5594 = vmatprep.mubr.msk.bf16.mxu0 %vm216_vm0, %v6136_v23  ;;  %v6237_v22 = vpack.c.bf16 %v1097_v15, %v1096_v14  ;;  %v1909_v14 = vld [vmem:[%s6031_s28 + $0x9b] sm:$0xff]  ;;  %v1919_v32 = vld [vmem:[%s6031_s28 + $0xeb] sm:$0xff] }
  0x42   : > { %5668 = vmatprep.subr.bf16.mxu0 %v5962_v24 }
  0x44   : > { %5669 = vmatpush3.bf16.msra.mxu0 %v5962_v24  ;;  %v8472_v24 = vmov 0.0  }
  0x45   : > { %5746 = vmatprep.subr.bf16.mxu0 %v6158_v31  ;;  %219 = vst.msk [vmem:[#allocation2 + $0x10] sm:$0xff] %vm216_vm0, %v8472_v24  ;;  %217 = vst.msk [vmem:[#allocation2] sm:$0xff] %vm216_vm0, %v8472_v24 }
  0x46   : > { %218 = vst.msk [vmem:[#allocation2 + $0x8] sm:$0xff] %vm216_vm0, %v8472_v24  ;;  %220 = vst.msk [vmem:[#allocation2 + $0x18] sm:$0xff] %vm216_vm0, %v8472_v24 }
  0x47   : > { %5595 = vmatmul.mubr.msk.bf16.gmra.mrb[24].mxu0 %vm216_vm0, %v6162_v34  ;;  %221 = vst.msk [vmem:[#allocation2 + $0x20] sm:$0xff] %vm216_vm0, %v8472_v24  ;;  %222 = vst.msk [vmem:[#allocation2 + $0x28] sm:$0xff] %vm216_vm0, %v8472_v24 }
  0x48   : > { %5559 = vmatmul.mubr.msk.bf16.gmra.mrb[24].mxu1 %vm216_vm0, %v703_v35  ;;  %5598 = vmatprep.mubr.msk.bf16.mxu0 %vm216_vm0, %v6164_v36  ;;  %223 = vst.msk [vmem:[#allocation2 + $0x30] sm:$0xff] %vm216_vm0, %v8472_v24  ;;  %224 = vst.msk [vmem:[#allocation2 + $0x38] sm:$0xff] %vm216_vm0, %v8472_v24  ;;  %v695_v35 = vld [vmem:[%s6031_s28 + $0x109] sm:$0xff] }
  0x49   : > { %5562 = vmatprep.mubr.msk.bf16.mxu1 %vm216_vm0, %v704_v37  ;;  %225 = vst.msk [vmem:[#allocation2 + $0x40] sm:$0xff] %vm216_vm0, %v8472_v24  ;;  %226 = vst.msk [vmem:[#allocation2 + $0x48] sm:$0xff] %vm216_vm0, %v8472_v24  ;;  %v6325_v37 = vpack.c.bf16 %v1099_v28, %v1098_v27  ;;  %v714_v40 = vpack.c.bf16 %v695_v35, %v694_v33  ;;  %v1915_v27 = vld [vmem:[%s6031_s28 + $0xcb] sm:$0xff]  ;;  %v1917_v28 = vld [vmem:[%s6031_s28 + $0xdb] sm:$0xff] }
  0x4a   : > { %227 = vst.msk [vmem:[#allocation2 + $0x50] sm:$0xff] %vm216_vm0, %v8472_v24  ;;  %228 = vst.msk [vmem:[#allocation2 + $0x58] sm:$0xff] %vm216_vm0, %v8472_v24  ;;  %v1920_v33 = vld [vmem:[%s6031_s28 + $0xf3] sm:$0xff]  ;;  %v1921_v35 = vld [vmem:[%s6031_s28 + $0xfb] sm:$0xff] }
  0x4b   : > { %229 = vst.msk [vmem:[#allocation2 + $0x60] sm:$0xff] %vm216_vm0, %v8472_v24  ;;  %230 = vst.msk [vmem:[#allocation2 + $0x68] sm:$0xff] %vm216_vm0, %v8472_v24 }
  0x4c   : > { %231 = vst.msk [vmem:[#allocation2 + $0x70] sm:$0xff] %vm216_vm0, %v8472_v24  ;;  %232 = vst.msk [vmem:[#allocation2 + $0x78] sm:$0xff] %vm216_vm0, %v8472_v24 }
  0x4d   : > { %233 = vst.msk [vmem:[#allocation2 + $0x80] sm:$0xff] %vm216_vm0, %v8472_v24  ;;  %234 = vst.msk [vmem:[#allocation2 + $0x88] sm:$0xff] %vm216_vm0, %v8472_v24 }
  0x4e   : > { %235 = vst.msk [vmem:[#allocation2 + $0x90] sm:$0xff] %vm216_vm0, %v8472_v24  ;;  %236 = vst.msk [vmem:[#allocation2 + $0x98] sm:$0xff] %vm216_vm0, %v8472_v24 }
  0x4f   : > { %5599 = vmatmul.mubr.msk.bf16.gmra.mrb[28].mxu0 %vm216_vm0, %v6181_v46  ;;  %237 = vst.msk [vmem:[#allocation2 + $0xa0] sm:$0xff] %vm216_vm0, %v8472_v24  ;;  %238 = vst.msk [vmem:[#allocation2 + $0xa8] sm:$0xff] %vm216_vm0, %v8472_v24 }
  0x50   : > { %5563 = vmatmul.mubr.msk.bf16.gmra.mrb[28].mxu1 %vm216_vm0, %v705_v47  ;;  %5602 = vmatprep.mubr.msk.bf16.mxu0 %vm216_vm0, %v6183_v48  ;;  %239 = vst.msk [vmem:[#allocation2 + $0xb0] sm:$0xff] %vm216_vm0, %v8472_v24  ;;  %240 = vst.msk [vmem:[#allocation2 + $0xb8] sm:$0xff] %vm216_vm0, %v8472_v24  ;;  %v1105_v47 = vld [vmem:[%s6031_s28 + $0x10a] sm:$0xff] }
  0x51   : > { %5566 = vmatprep.mubr.msk.bf16.mxu1 %vm216_vm0, %v706_v49  ;;  %241 = vst.msk [vmem:[#allocation2 + $0xc0] sm:$0xff] %vm216_vm0, %v8472_v24  ;;  %242 = vst.msk [vmem:[#allocation2 + $0xc8] sm:$0xff] %vm216_vm0, %v8472_v24  ;;  %v6341_v49 = vpack.c.bf16 %v1103_v43, %v1102_v42  ;;  %v6343_v51 = vpack.c.bf16 %v1105_v47, %v1104_v45  ;;  %v1517_v42 = vld [vmem:[%s6031_s28 + $0x12a] sm:$0xff]  ;;  %v1924_v43 = vld [vmem:[%s6031_s28 + $0x113] sm:$0xff] }
  0x52   : > { %243 = vst.msk [vmem:[#allocation2 + $0xd0] sm:$0xff] %vm216_vm0, %v8472_v24  ;;  %244 = vst.msk [vmem:[#allocation2 + $0xd8] sm:$0xff] %vm216_vm0, %v8472_v24  ;;  %v2302_v45 = vld [vmem:[%s6031_s28 + $0x14] sm:$0xff]  ;;  %v2303_v47 = vld [vmem:[%s6031_s28 + $0x1c] sm:$0xff] }
  0x53   : > { %245 = vst.msk [vmem:[#allocation2 + $0xe0] sm:$0xff] %vm216_vm0, %v8472_v24  ;;  %246 = vst.msk [vmem:[#allocation2 + $0xe8] sm:$0xff] %vm216_vm0, %v8472_v24  ;;  %v2338_v52 = vpack.c.bf16 %v2303_v47, %v2302_v45 }
  0x54   : > { %247 = vst.msk [vmem:[#allocation2 + $0xf0] sm:$0xff] %vm216_vm0, %v8472_v24  ;;  %248 = vst.msk [vmem:[#allocation2 + $0xf8] sm:$0xff] %vm216_vm0, %v8472_v24 }
  0x55   : > { %249 = vst.msk [vmem:[#allocation2 + $0x100] sm:$0xff] %vm216_vm0, %v8472_v24  ;;  %250 = vst.msk [vmem:[#allocation2 + $0x108] sm:$0xff] %vm216_vm0, %v8472_v24 }
  0x56   : > { %251 = vst.msk [vmem:[#allocation2 + $0x110] sm:$0xff] %vm216_vm0, %v8472_v24  ;;  %252 = vst.msk [vmem:[#allocation2 + $0x118] sm:$0xff] %vm216_vm0, %v8472_v24 }
  0x57   : > { %5603 = vmatmul.mubr.msk.bf16.gmra.mrb[32].mxu0 %vm216_vm0, %v6199_v58 }
  0x58   : > { %5567 = vmatmul.mubr.msk.bf16.gmra.mrb[32].mxu1 %vm216_vm0, %v707_v59  ;;  %5606 = vmatprep.mubr.msk.bf16.mxu0 %vm216_vm0, %v6201_v60  ;;  %v5965_v59 = vld [vmem:[%s8468_s1 + $0x58] sm:$0xff]  }
  0x59   : > { %5570 = vmatprep.mubr.msk.bf16.mxu1 %vm216_vm0, %v708_v61  ;;  %v1894_v61 = vld [vmem:[%s6031_s28 + $0x23] sm:$0xff] }
  0x5f   : > { %5607 = vmatmul.mubr.msk.bf16.gmra.mrb[36].mxu0 %vm216_vm0, %v6217_v6 }
  0x60   : > { %5571 = vmatmul.mubr.msk.bf16.gmra.mrb[36].mxu1 %vm216_vm0, %v709_v7  ;;  %5610 = vmatprep.mubr.msk.bf16.mxu0 %vm216_vm0, %v6219_v8  ;;  %v1903_v7 = vld [vmem:[%s6031_s28 + $0x6b] sm:$0xff] }
  0x61   : > { %5574 = vmatprep.mubr.msk.bf16.mxu1 %vm216_vm0, %v710_v9  ;;  %v1904_v9 = vld [vmem:[%s6031_s28 + $0x73] sm:$0xff] }
  0x62   : > { %v1934_v12 = vpack.c.bf16 %v1905_v10, %v1904_v9  ;;  %v2317_v10 = vld [vmem:[%s6031_s28 + $0x8c] sm:$0xff] }
  0x67   : > { %5611 = vmatmul.mubr.msk.bf16.gmra.mrb[40].mxu0 %vm216_vm0, %v6235_v18 }
  0x68   : > { %5575 = vmatmul.mubr.msk.bf16.gmra.mrb[40].mxu1 %vm216_vm0, %v711_v21  ;;  %5614 = vmatprep.mubr.msk.bf16.mxu0 %vm216_vm0, %v6237_v22  ;;  %v1913_v21 = vld [vmem:[%s6031_s28 + $0xbb] sm:$0xff] }
  0x69   : > { %5578 = vmatprep.mubr.msk.bf16.mxu1 %vm216_vm0, %v712_v25 }
  0x6f   : > { %5615 = vmatmul.mubr.msk.bf16.gmra.mrb[44].mxu0 %vm216_vm0, %v6325_v37 }
  0x70   : > { %5579 = vmatmul.mubr.msk.bf16.gmra.mrb[44].mxu1 %vm216_vm0, %v713_v38  ;;  %5618 = vmatprep.mubr.msk.bf16.mxu0 %vm216_vm0, %v6327_v39  ;;  %v1942_v38 = vpack.c.bf16 %v1921_v35, %v1920_v33  ;;  %v330_v35 = vld [vmem:[#allocation2 + $0xb8] sm:$0xff] }
  0x71   : > { %5582 = vmatprep.mubr.msk.bf16.mxu1 %vm216_vm0, %v714_v40  ;;  %v1922_v40 = vld [vmem:[%s6031_s28 + $0x103] sm:$0xff] }
  0x77   : > { %5619 = vmatmul.mubr.msk.bf16.gmra.mrb[48].mxu0 %vm216_vm0, %v6341_v49 }
  0x78   : > { %5583 = vmatmul.mubr.msk.bf16.gmra.mrb[48].mxu1 %vm216_vm0, %v715_v50  ;;  %5622 = vmatprep.mubr.msk.bf16.mxu0 %vm216_vm0, %v6343_v51 }
  0x79   : > { %5630 = vmatprep.mubr.msk.bf16.mxu1 %vm216_vm0, %v6134_v20  ;;  %v1895_v20 = vld [vmem:[%s6031_s28 + $0x2b] sm:$0xff] }
  0x7a   : > { %v1929_v0 = vpack.c.bf16 %v1895_v20, %v1894_v61  ;;  %v1945_v61 = vpack.c.bf16 %v1927_v54, %v1926_v53 }
  0x7f   : > { %5623 = vmatmul.mubr.msk.bf16.gmra.mrb[52].mxu0 %vm216_vm0, %v6356_v56 }
  0x80   : > { %5631 = vmatmul.mubr.msk.bf16.vlgmr.msra.gmra.mrb[52].mxu1 %vm216_vm0, %v6136_v23  ;;  %5670 = vmatprep.mubr.msk.bf16.mxu0 %vm216_vm0, %v1928_v57  ;;  %v6376_v23 = vld [vmem:[%s8468_s1 + $0x70] sm:$0xff]  }
  0x81   : > { %5707 = vmatpush3.bf16.msra.mxu1 %v6132_v19  ;;  %5634 = vmatprep.mubr.msk.bf16.mxu1 %vm216_vm0, %v6162_v34  ;;  %v5966_v19 = vld [vmem:[%s8468_s1 + $0x68] sm:$0xff]   ;;  %v2306_v57 = vld [vmem:[%s6031_s28 + $0x34] sm:$0xff] }
  0x82   : > { %5708 = vmatprep.subr.bf16.mxu1 %v5965_v59  ;;  %v1898_v34 = vld [vmem:[%s6031_s28 + $0x43] sm:$0xff] }
  0x85   : > { %5709 = vmatpush3.bf16.msra.mxu1 %v5965_v59  ;;  %v2307_v59 = vld [vmem:[%s6031_s28 + $0x3c] sm:$0xff] }
  0x86   : > { %5786 = vmatprep.subr.bf16.mxu1 %v6376_v23  ;;  %v2340_v62 = vpack.c.bf16 %v2307_v59, %v2306_v57  ;;  %v331_v57 = vld [vmem:[#allocation2 + $0xc0] sm:$0xff] }
  0x87   : > { %5671 = vmatmul.mubr.msk.bf16.vlgmr.msra.gmra.mrb[56].mxu0 %vm216_vm0, %v1929_v0  ;;  %v2308_v0 = vld [vmem:[%s6031_s28 + $0x44] sm:$0xff] }
  0x88   : > { %5635 = vmatmul.mubr.msk.bf16.gmra.mrb[56].mxu1 %vm216_vm0, %v6164_v36  ;;  %5747 = vmatpush3.bf16.msra.mxu0 %v6158_v31  ;;  %v1931_v31 = vpack.c.bf16 %v1899_v2, %v1898_v34  ;;  %v1932_v36 = vpack.c.bf16 %v1901_v4, %v1900_v3  ;;  %v2311_v34 = vld [vmem:[%s6031_s28 + $0x5c] sm:$0xff]  ;;  %v5970_v4 = vld [vmem:[%s8468_s1 + $0x88] sm:$0xff]  }
  0x89   : > { %5638 = vmatprep.mubr.msk.bf16.mxu1 %vm216_vm0, %v6181_v46  ;;  %5674 = vmatprep.mubr.msk.bf16.mxu0 %vm216_vm0, %v1930_v1  ;;  %v1902_v46 = vld [vmem:[%s6031_s28 + $0x63] sm:$0xff]  ;;  %v2309_v1 = vld [vmem:[%s6031_s28 + $0x4c] sm:$0xff] }
  0x8a   : > { %5748 = vmatprep.subr.bf16.mxu0 %v5966_v19  ;;  %v1933_v11 = vpack.c.bf16 %v1903_v7, %v1902_v46  ;;  %v2341_v2 = vpack.c.bf16 %v2309_v1, %v2308_v0  ;;  %v2315_v46 = vld [vmem:[%s6031_s28 + $0x7c] sm:$0xff]  ;;  %v2330_v0 = vld [vmem:[%s6031_s28 + $0xf4] sm:$0xff] }
  0x8b   : > { %v311_v59 = vld [vmem:[#allocation2 + $0x20] sm:$0xff] }
  0x8c   : > { %5749 = vmatpush3.bf16.msra.mxu0 %v5966_v19  ;;  %v2310_v19 = vld [vmem:[%s6031_s28 + $0x54] sm:$0xff]  ;;  %v2331_v1 = vld [vmem:[%s6031_s28 + $0xfc] sm:$0xff] }
  0x8d   : > { %5826 = vmatprep.subr.bf16.mxu0 %v6396_v5  ;;  %v2342_v3 = vpack.c.bf16 %v2311_v34, %v2310_v19 }
  0x8f   : > { %5675 = vmatmul.mubr.msk.bf16.gmra.mrb[60].mxu0 %vm216_vm0, %v1931_v31  ;;  %v2313_v31 = vld [vmem:[%s6031_s28 + $0x6c] sm:$0xff] }
  0x90   : > { %5639 = vmatmul.mubr.msk.bf16.gmra.mrb[60].mxu1 %vm216_vm0, %v6183_v48  ;;  %5678 = vmatprep.mubr.msk.bf16.mxu0 %vm216_vm0, %v1932_v36  ;;  %v1906_v48 = vld [vmem:[%s6031_s28 + $0x83] sm:$0xff]  ;;  %v2314_v36 = vld [vmem:[%s6031_s28 + $0x74] sm:$0xff] }
  0x91   : > { %5642 = vmatprep.mubr.msk.bf16.mxu1 %vm216_vm0, %v6199_v58  ;;  %v1908_v58 = vld [vmem:[%s6031_s28 + $0x93] sm:$0xff]  ;;  %v1935_v15 = vpack.c.bf16 %v1907_v13, %v1906_v48  ;;  %v2344_v9 = vpack.c.bf16 %v2315_v46, %v2314_v36 }
  0x92   : > { %v1936_v16 = vpack.c.bf16 %v1909_v14, %v1908_v58  ;;  %v2320_v58 = vld [vmem:[%s6031_s28 + $0xa4] sm:$0xff]  ;;  %v2321_v14 = vld [vmem:[%s6031_s28 + $0xac] sm:$0xff] }
  0x97   : > { %5679 = vmatmul.mubr.msk.bf16.gmra.mrb[64].mxu0 %vm216_vm0, %v1933_v11  ;;  %v2318_v11 = vld [vmem:[%s6031_s28 + $0x94] sm:$0xff] }
  0x98   : > { %5643 = vmatmul.mubr.msk.bf16.gmra.mrb[64].mxu1 %vm216_vm0, %v6201_v60  ;;  %5682 = vmatprep.mubr.msk.bf16.mxu0 %vm216_vm0, %v1934_v12  ;;  %v1910_v60 = vld [vmem:[%s6031_s28 + $0xa3] sm:$0xff] }
  0x99   : > { %5646 = vmatprep.mubr.msk.bf16.mxu1 %vm216_vm0, %v6217_v6  ;;  %v1912_v6 = vld [vmem:[%s6031_s28 + $0xb3] sm:$0xff]  ;;  %v1937_v25 = vpack.c.bf16 %v1911_v17, %v1910_v60  ;;  %v2319_v12 = vld [vmem:[%s6031_s28 + $0x9c] sm:$0xff]  ;;  %v2347_v60 = vpack.c.bf16 %v2321_v14, %v2320_v58 }
  0x9a   : > { %v1938_v26 = vpack.c.bf16 %v1913_v21, %v1912_v6  ;;  %v2346_v13 = vpack.c.bf16 %v2319_v12, %v2318_v11  ;;  %v309_v6 = vld [vmem:[#allocation2 + $0x10] sm:$0xff] }
  0x9b   : > { %v329_v21 = vld [vmem:[#allocation2 + $0xb0] sm:$0xff] }
  0x9f   : > { %5683 = vmatmul.mubr.msk.bf16.gmra.mrb[68].mxu0 %vm216_vm0, %v1935_v15  ;;  %v2322_v15 = vld [vmem:[%s6031_s28 + $0xb4] sm:$0xff] }
  0xa0   : > { %5647 = vmatmul.mubr.msk.bf16.gmra.mrb[68].mxu1 %vm216_vm0, %v6219_v8  ;;  %5686 = vmatprep.mubr.msk.bf16.mxu0 %vm216_vm0, %v1936_v16  ;;  %v1914_v8 = vld [vmem:[%s6031_s28 + $0xc3] sm:$0xff] }
  0xa1   : > { %5650 = vmatprep.mubr.msk.bf16.mxu1 %vm216_vm0, %v6235_v18  ;;  %v1916_v18 = vld [vmem:[%s6031_s28 + $0xd3] sm:$0xff]  ;;  %v1939_v29 = vpack.c.bf16 %v1915_v27, %v1914_v8  ;;  %v2323_v16 = vld [vmem:[%s6031_s28 + $0xbc] sm:$0xff]  ;;  %v2324_v8 = vld [vmem:[%s6031_s28 + $0xc4] sm:$0xff] }
  0xa2   : > { %v1940_v30 = vpack.c.bf16 %v1917_v28, %v1916_v18  ;;  %v2348_v17 = vpack.c.bf16 %v2323_v16, %v2322_v15  ;;  %v2325_v27 = vld [vmem:[%s6031_s28 + $0xcc] sm:$0xff]  ;;  %v310_v28 = vld [vmem:[#allocation2 + $0x18] sm:$0xff] }
  0xa3   : > { %v317_v16 = vld [vmem:[#allocation2 + $0x50] sm:$0xff] }
  0xa7   : > { %5687 = vmatmul.mubr.msk.bf16.gmra.mrb[72].mxu0 %vm216_vm0, %v1937_v25  ;;  %v327_v25 = vld [vmem:[#allocation2 + $0xa0] sm:$0xff] }
  0xa8   : > { %5651 = vmatmul.mubr.msk.bf16.gmra.mrb[72].mxu1 %vm216_vm0, %v6237_v22  ;;  %5690 = vmatprep.mubr.msk.bf16.mxu0 %vm216_vm0, %v1938_v26  ;;  %v1918_v22 = vld [vmem:[%s6031_s28 + $0xe3] sm:$0xff] }
  0xa9   : > { %5654 = vmatprep.mubr.msk.bf16.mxu1 %vm216_vm0, %v6325_v37  ;;  %v1941_v37 = vpack.c.bf16 %v1919_v32, %v1918_v22  ;;  %v307_v26 = vld [vmem:[#allocation2] sm:$0xff] }
  0xaf   : > { %5691 = vmatmul.mubr.msk.bf16.gmra.mrb[76].mxu0 %vm216_vm0, %v1939_v29  ;;  %v2326_v29 = vld [vmem:[%s6031_s28 + $0xd4] sm:$0xff] }
  0xb0   : > { %5655 = vmatmul.mubr.msk.bf16.gmra.mrb[76].mxu1 %vm216_vm0, %v6327_v39  ;;  %5694 = vmatprep.mubr.msk.bf16.mxu0 %vm216_vm0, %v1940_v30  ;;  %v1516_v39 = vld [vmem:[%s6031_s28 + $0x122] sm:$0xff] }
  0xb1   : > { %5658 = vmatprep.mubr.msk.bf16.mxu1 %vm216_vm0, %v6341_v49  ;;  %v1943_v49 = vpack.c.bf16 %v1923_v41, %v1922_v40  ;;  %v1535_v50 = vpack.c.bf16 %v1517_v42, %v1516_v39  ;;  %v2327_v30 = vld [vmem:[%s6031_s28 + $0xdc] sm:$0xff]  ;;  %v328_v42 = vld [vmem:[#allocation2 + $0xa8] sm:$0xff] }
  0xb7   : > { %5695 = vmatmul.mubr.msk.bf16.gmra.mrb[80].mxu0 %vm216_vm0, %v1941_v37  ;;  %v308_v37 = vld [vmem:[#allocation2 + $0x8] sm:$0xff] }
  0xb8   : > { %5659 = vmatmul.mubr.msk.bf16.gmra.mrb[80].mxu1 %vm216_vm0, %v6343_v51  ;;  %5698 = vmatprep.mubr.msk.bf16.mxu0 %vm216_vm0, %v1942_v38  ;;  %v1944_v51 = vpack.c.bf16 %v1925_v44, %v1924_v43  ;;  %v2349_v43 = vpack.c.bf16 %v2325_v27, %v2324_v8  ;;  %v318_v8 = vld [vmem:[#allocation2 + $0x58] sm:$0xff] }
  0xb9   : > { %5662 = vmatprep.mubr.msk.bf16.mxu1 %vm216_vm0, %v6356_v56  ;;  %v2305_v56 = vld [vmem:[%s6031_s28 + $0x2c] sm:$0xff]  ;;  %v2334_v27 = vld [vmem:[%s6031_s28 + $0x114] sm:$0xff] }
  0xba   : > { %v2339_v20 = vpack.c.bf16 %v2305_v56, %v2304_v55  ;;  %v313_v55 = vld [vmem:[#allocation2 + $0x30] sm:$0xff] }
  0xbb   : > { %v333_v56 = vld [vmem:[#allocation2 + $0xd0] sm:$0xff] }
  0xbf   : > { %5699 = vmatmul.mubr.msk.bf16.gmra.mrb[84].mxu0 %vm216_vm0, %v1943_v49 }
  0xc0   : > { %5663 = vmatmul.mubr.msk.bf16.gmra.mrb[84].mxu1 %vm216_vm0, %v1535_v50  ;;  %5702 = vmatprep.mubr.msk.bf16.mxu0 %vm216_vm0, %v1944_v51  ;;  %v2350_v50 = vpack.c.bf16 %v2327_v30, %v2326_v29 }
  0xc1   : > { %5710 = vmatprep.mubr.msk.bf16.mxu1 %vm216_vm0, %v2338_v52 }
  0xc7   : > { %5703 = vmatmul.mubr.msk.bf16.gmra.mrb[88].mxu0 %vm216_vm0, %v1945_v61  ;;  %v2328_v61 = vld [vmem:[%s6031_s28 + $0xe4] sm:$0xff] }
  0xc8   : > { %5711 = vmatmul.mubr.msk.bf16.vlgmr.msra.gmra.mrb[88].mxu1 %vm216_vm0, %v2339_v20  ;;  %5750 = vmatprep.mubr.msk.bf16.mxu0 %vm216_vm0, %v2339_v20  ;;  %v2329_v20 = vld [vmem:[%s6031_s28 + $0xec] sm:$0xff] }
  0xc9   : > { %5787 = vmatpush3.bf16.msra.mxu1 %v6376_v23  ;;  %5714 = vmatprep.mubr.msk.bf16.mxu1 %vm216_vm0, %v2340_v62  ;;  %v2312_v23 = vld [vmem:[%s6031_s28 + $0x64] sm:$0xff] }
  0xca   : > { %5788 = vmatprep.subr.bf16.mxu1 %v5969_v63  ;;  %v2343_v7 = vpack.c.bf16 %v2313_v31, %v2312_v23 }
  0xcd   : > { %5789 = vmatpush3.bf16.msra.mxu1 %v5969_v63  ;;  %v314_v63 = vld [vmem:[#allocation2 + $0x38] sm:$0xff] }
  0xcf   : > { %5751 = vmatmul.mubr.msk.bf16.vlgmr.msra.gmra.mrb[92].mxu0 %vm216_vm0, %v2340_v62 }
  0xd0   : > { %5715 = vmatmul.mubr.msk.bf16.gmra.mrb[92].mxu1 %vm216_vm0, %v2341_v2  ;;  %5827 = vmatpush3.bf16.msra.mxu0 %v6396_v5  ;;  %v2316_v5 = vld [vmem:[%s6031_s28 + $0x84] sm:$0xff] }
  0xd1   : > { %5718 = vmatprep.mubr.msk.bf16.mxu1 %vm216_vm0, %v2342_v3  ;;  %5754 = vmatprep.mubr.msk.bf16.mxu0 %vm216_vm0, %v2341_v2  ;;  %v2345_v48 = vpack.c.bf16 %v2317_v10, %v2316_v5 }
  0xd2   : > { %5828 = vmatprep.subr.bf16.mxu0 %v5970_v4 }
  0xd4   : > { %5829 = vmatpush3.bf16.msra.mxu0 %v5970_v4  ;;  %v312_v4 = vld [vmem:[#allocation2 + $0x28] sm:$0xff] }
  0xd7   : > { %5755 = vmatmul.mubr.msk.bf16.gmra.mrb[96].mxu0 %vm216_vm0, %v2342_v3  ;;  %v334_v3 = vld [vmem:[#allocation2 + $0xd8] sm:$0xff] }
  0xd8   : > { %5719 = vmatmul.mubr.msk.bf16.gmra.mrb[96].mxu1 %vm216_vm0, %v2343_v7  ;;  %5758 = vmatprep.mubr.msk.bf16.mxu0 %vm216_vm0, %v2343_v7  ;;  %v332_v7 = vld [vmem:[#allocation2 + $0xc8] sm:$0xff] }
  0xd9   : > { %5722 = vmatprep.mubr.msk.bf16.mxu1 %vm216_vm0, %v2344_v9 }
  0xdf   : > { %5759 = vmatmul.mubr.msk.bf16.gmra.mrb[100].mxu0 %vm216_vm0, %v2344_v9  ;;  %v2351_v9 = vpack.c.bf16 %v2329_v20, %v2328_v61  ;;  %v322_v61 = vld [vmem:[#allocation2 + $0x78] sm:$0xff]  ;;  %v3122_v20 = vld [vmem:[%s6031_s28 + $0x25] sm:$0xff] }
  0xe0   : > { %5723 = vmatmul.mubr.msk.bf16.gmra.mrb[100].mxu1 %vm216_vm0, %v2345_v48  ;;  %5762 = vmatprep.mubr.msk.bf16.mxu0 %vm216_vm0, %v2345_v48  ;;  %v2352_v48 = vpack.c.bf16 %v2331_v1, %v2330_v0 }
  0xe1   : > { %5726 = vmatprep.mubr.msk.bf16.mxu1 %vm216_vm0, %v2346_v13 }
  0xe7   : > { %5763 = vmatmul.mubr.msk.bf16.gmra.mrb[104].mxu0 %vm216_vm0, %v2346_v13 }
  0xe8   : > { %5727 = vmatmul.mubr.msk.bf16.gmra.mrb[104].mxu1 %vm216_vm0, %v2347_v60  ;;  %5766 = vmatprep.mubr.msk.bf16.mxu0 %vm216_vm0, %v2347_v60  ;;  %v337_v60 = vld [vmem:[#allocation2 + $0xf0] sm:$0xff] }
  0xe9   : > { %5730 = vmatprep.mubr.msk.bf16.mxu1 %vm216_vm0, %v2348_v17 }
  0xea   : > { %v5512_v18 = vpop.f32.mrb[0].mxu0 }
  0xeb   : > { %v592_v22 = vadd.f32 %v5512_v18, %v309_v6  ;;  %v5532_v32 = vpop.f32.mrb[0].mxu1  ;;  %v447_v33 = vpop.f32.mrb[1].mxu0  ;;  %v315_v6 = vld [vmem:[#allocation2 + $0x40] sm:$0xff] }
  0xec   : > { %v612_v38 = vadd.f32 %v5532_v32, %v329_v21  ;;  %v590_v39 = vadd.f32 %v447_v33, %v307_v26  ;;  %v527_v40 = vpop.f32.mrb[1].mxu1  ;;  %v5513_v41 = vpop.f32.mrb[2].mxu0  ;;  %v2332_v21 = vld [vmem:[%s6031_s28 + $0x104] sm:$0xff]  ;;  %v2335_v18 = vld [vmem:[%s6031_s28 + $0x11c] sm:$0xff] }
  0xed   : > { %628 = vst.msk [vmem:[#allocation2 + $0x10] sm:$0xff] %vm216_vm0, %v592_v22  ;;  %v610_v44 = vadd.f32 %v527_v40, %v327_v25  ;;  %v593_v45 = vadd.f32 %v5513_v41, %v310_v28  ;;  %v5533_v47 = vpop.f32.mrb[2].mxu1  ;;  %v450_v49 = vpop.f32.mrb[3].mxu0  ;;  %v2333_v25 = vld [vmem:[%s6031_s28 + $0x10c] sm:$0xff]  ;;  %v338_v22 = vld [vmem:[#allocation2 + $0xf8] sm:$0xff] }
  0xee   : > { %648 = vst.msk [vmem:[#allocation2 + $0xb0] sm:$0xff] %vm216_vm0, %v612_v38  ;;  %626 = vst.msk [vmem:[#allocation2] sm:$0xff] %vm216_vm0, %v590_v39  ;;  %v613_v51 = vadd.f32 %v5533_v47, %v330_v35  ;;  %v591_v52 = vadd.f32 %v450_v49, %v308_v37  ;;  %v530_v53 = vpop.f32.mrb[3].mxu1  ;;  %v316_v32 = vld [vmem:[#allocation2 + $0x48] sm:$0xff]  ;;  %v2353_v40 = vpack.c.bf16 %v2333_v25, %v2332_v21 }
  0xef   : > { %646 = vst.msk [vmem:[#allocation2 + $0xa0] sm:$0xff] %vm216_vm0, %v610_v44  ;;  %629 = vst.msk [vmem:[#allocation2 + $0x18] sm:$0xff] %vm216_vm0, %v593_v45  ;;  %v611_v54 = vadd.f32 %v530_v53, %v328_v42  ;;  %5767 = vmatmul.mubr.msk.bf16.gmra.mrb[108].mxu0 %vm216_vm0, %v2348_v17  ;;  %v335_v17 = vld [vmem:[#allocation2 + $0xe0] sm:$0xff]  ;;  %v336_v39 = vld [vmem:[#allocation2 + $0xe8] sm:$0xff]  ;;  %v2354_v45 = vpack.c.bf16 %v2335_v18, %v2334_v27 }
  0xf0   : > { %649 = vst.msk [vmem:[#allocation2 + $0xb8] sm:$0xff] %vm216_vm0, %v613_v51  ;;  %627 = vst.msk [vmem:[#allocation2 + $0x8] sm:$0xff] %vm216_vm0, %v591_v52  ;;  %5731 = vmatmul.mubr.msk.bf16.gmra.mrb[108].mxu1 %vm216_vm0, %v2349_v43  ;;  %5770 = vmatprep.mubr.msk.bf16.mxu0 %vm216_vm0, %v2349_v43  ;;  %v321_v52 = vld [vmem:[#allocation2 + $0x70] sm:$0xff] }
  0xf1   : > { %647 = vst.msk [vmem:[#allocation2 + $0xa8] sm:$0xff] %vm216_vm0, %v611_v54  ;;  %5734 = vmatprep.mubr.msk.bf16.mxu1 %vm216_vm0, %v2350_v50  ;;  %v341_v53 = vld [vmem:[#allocation2 + $0x110] sm:$0xff]  ;;  %v339_v54 = vld [vmem:[#allocation2 + $0x100] sm:$0xff] }
  0xf2   : > { %v5516_v62 = vpop.f32.mrb[4].mxu0  ;;  %v3533_v21 = vld [vmem:[%s6031_s28 + $0x2e] sm:$0xff] }
  0xf3   : > { %v596_v19 = vadd.f32 %v5516_v62, %v313_v55  ;;  %v5536_v34 = vpop.f32.mrb[4].mxu1  ;;  %v463_v2 = vpop.f32.mrb[5].mxu0  ;;  %v319_v55 = vld [vmem:[#allocation2 + $0x60] sm:$0xff]  ;;  %v3123_v62 = vld [vmem:[%s6031_s28 + $0x2d] sm:$0xff] }
  0xf4   : > { %v616_v23 = vadd.f32 %v5536_v34, %v333_v56  ;;  %v594_v31 = vadd.f32 %v463_v2, %v311_v59  ;;  %v543_v36 = vpop.f32.mrb[5].mxu1  ;;  %v5517_v46 = vpop.f32.mrb[6].mxu0  ;;  %v2336_v56 = vld [vmem:[%s6031_s28 + $0x124] sm:$0xff]  ;;  %v3127_v27 = vld [vmem:[%s6031_s28 + $0x4d] sm:$0xff] }
  0xf5   : > { %632 = vst.msk [vmem:[#allocation2 + $0x30] sm:$0xff] %vm216_vm0, %v596_v19  ;;  %v614_v5 = vadd.f32 %v543_v36, %v331_v57  ;;  %v597_v10 = vadd.f32 %v5517_v46, %v314_v63  ;;  %v5537_v11 = vpop.f32.mrb[6].mxu1  ;;  %v466_v12 = vpop.f32.mrb[7].mxu0  ;;  %v2337_v57 = vld [vmem:[%s6031_s28 + $0x12c] sm:$0xff]  ;;  %v342_v19 = vld [vmem:[#allocation2 + $0x118] sm:$0xff] }
  0xf6   : > { %652 = vst.msk [vmem:[#allocation2 + $0xd0] sm:$0xff] %vm216_vm0, %v616_v23  ;;  %630 = vst.msk [vmem:[#allocation2 + $0x20] sm:$0xff] %vm216_vm0, %v594_v31  ;;  %v617_v13 = vadd.f32 %v5537_v11, %v334_v3  ;;  %v595_v58 = vadd.f32 %v466_v12, %v312_v4  ;;  %v546_v14 = vpop.f32.mrb[7].mxu1  ;;  %v320_v34 = vld [vmem:[#allocation2 + $0x68] sm:$0xff]  ;;  %v2355_v36 = vpack.c.bf16 %v2337_v57, %v2336_v56  ;;  %v3534_v56 = vld [vmem:[%s6031_s28 + $0x36] sm:$0xff] }
  0xf7   : > { %650 = vst.msk [vmem:[#allocation2 + $0xc0] sm:$0xff] %vm216_vm0, %v614_v5  ;;  %633 = vst.msk [vmem:[#allocation2 + $0x38] sm:$0xff] %vm216_vm0, %v597_v10  ;;  %v615_v15 = vadd.f32 %v546_v14, %v332_v7  ;;  %5771 = vmatmul.mubr.msk.bf16.gmra.mrb[112].mxu0 %vm216_vm0, %v2350_v50  ;;  %v340_v31 = vld [vmem:[#allocation2 + $0x108] sm:$0xff]  ;;  %v3158_v10 = vpack.c.bf16 %v3123_v62, %v3122_v20  ;;  %v323_v14 = vld [vmem:[#allocation2 + $0x80] sm:$0xff] }
  0xf8   : > { %653 = vst.msk [vmem:[#allocation2 + $0xd8] sm:$0xff] %vm216_vm0, %v617_v13  ;;  %631 = vst.msk [vmem:[#allocation2 + $0x28] sm:$0xff] %vm216_vm0, %v595_v58  ;;  %5735 = vmatmul.mubr.msk.bf16.gmra.mrb[112].mxu1 %vm216_vm0, %v2351_v9  ;;  %5774 = vmatprep.mubr.msk.bf16.mxu0 %vm216_vm0, %v2351_v9  ;;  %v325_v58 = vld [vmem:[#allocation2 + $0x90] sm:$0xff]  ;;  %v3535_v57 = vld [vmem:[%s6031_s28 + $0x3e] sm:$0xff] }
  0xf9   : > { %651 = vst.msk [vmem:[#allocation2 + $0xc8] sm:$0xff] %vm216_vm0, %v615_v15  ;;  %5738 = vmatprep.mubr.msk.bf16.mxu1 %vm216_vm0, %v2352_v48  ;;  %v2746_v15 = vld [vmem:[%s6031_s28 + $0x134] sm:$0xff] }
  0xfa   : > { %v5520_v26 = vpop.f32.mrb[8].mxu0  ;;  %v3537_v20 = vld [vmem:[%s6031_s28 + $0x4e] sm:$0xff] }
  0xfb   : > { %v600_v28 = vadd.f32 %v5520_v26, %v317_v16  ;;  %v5540_v29 = vpop.f32.mrb[8].mxu1  ;;  %v479_v30 = vpop.f32.mrb[9].mxu0  ;;  %v2747_v16 = vld [vmem:[%s6031_s28 + $0x13c] sm:$0xff] }
  0xfc   : > { %v620_v33 = vadd.f32 %v5540_v29, %v337_v60  ;;  %v598_v35 = vadd.f32 %v479_v30, %v315_v6  ;;  %v559_v37 = vpop.f32.mrb[9].mxu1  ;;  %v5521_v38 = vpop.f32.mrb[10].mxu0  ;;  %v3124_v60 = vld [vmem:[%s6031_s28 + $0x35] sm:$0xff]  ;;  %v3532_v6 = vld [vmem:[%s6031_s28 + $0x26] sm:$0xff] }
  0xfd   : > { %636 = vst.msk [vmem:[#allocation2 + $0x50] sm:$0xff] %vm216_vm0, %v600_v28  ;;  %v618_v41 = vadd.f32 %v559_v37, %v335_v17  ;;  %v601_v42 = vadd.f32 %v5521_v38, %v318_v8  ;;  %v5541_v43 = vpop.f32.mrb[10].mxu1  ;;  %v482_v44 = vpop.f32.mrb[11].mxu0  ;;  %v3125_v17 = vld [vmem:[%s6031_s28 + $0x3d] sm:$0xff]  ;;  %v3126_v8 = vld [vmem:[%s6031_s28 + $0x45] sm:$0xff]  ;;  %v718_v28 = vld [vmem:[#allocation2 + $0x10] sm:$0xff] }
  0xfe   : > { %656 = vst.msk [vmem:[#allocation2 + $0xf0] sm:$0xff] %vm216_vm0, %v620_v33  ;;  %634 = vst.msk [vmem:[#allocation2 + $0x40] sm:$0xff] %vm216_vm0, %v598_v35  ;;  %v621_v47 = vadd.f32 %v5541_v43, %v338_v22  ;;  %v599_v49 = vadd.f32 %v482_v44, %v316_v32  ;;  %v562_v50 = vpop.f32.mrb[11].mxu1  ;;  %v326_v26 = vld [vmem:[#allocation2 + $0x98] sm:$0xff]  ;;  %v324_v22 = vld [vmem:[#allocation2 + $0x88] sm:$0xff]  ;;  %v2765_v32 = vpack.c.bf16 %v2747_v16, %v2746_v15 }
  0xff   : > { %654 = vst.msk [vmem:[#allocation2 + $0xe0] sm:$0xff] %vm216_vm0, %v618_v41  ;;  %637 = vst.msk [vmem:[#allocation2 + $0x58] sm:$0xff] %vm216_vm0, %v601_v42  ;;  %v619_v51 = vadd.f32 %v562_v50, %v336_v39  ;;  %5775 = vmatmul.mubr.msk.bf16.gmra.mrb[116].mxu0 %vm216_vm0, %v2352_v48  ;;  %v716_v37 = vld [vmem:[#allocation2] sm:$0xff]  ;;  %v3568_v41 = vpack.c.bf16 %v3533_v21, %v3532_v6  ;;  %v719_v44 = vld [vmem:[#allocation2 + $0x18] sm:$0xff] }
 0x100   : > { %657 = vst.msk [vmem:[#allocation2 + $0xf8] sm:$0xff] %vm216_vm0, %v621_v47  ;;  %635 = vst.msk [vmem:[#allocation2 + $0x48] sm:$0xff] %vm216_vm0, %v599_v49  ;;  %5739 = vmatmul.mubr.msk.bf16.gmra.mrb[116].mxu1 %vm216_vm0, %v2353_v40  ;;  %5778 = vmatprep.mubr.msk.bf16.mxu0 %vm216_vm0, %v2353_v40  ;;  %v3159_v40 = vpack.c.bf16 %v3125_v17, %v3124_v60  ;;  %v3160_v49 = vpack.c.bf16 %v3127_v27, %v3126_v8  ;;  %v3132_v6 = vld [vmem:[%s6031_s28 + $0x75] sm:$0xff]  ;;  %v3539_v8 = vld [vmem:[%s6031_s28 + $0x5e] sm:$0xff] }
 0x101   : > { %655 = vst.msk [vmem:[#allocation2 + $0xe8] sm:$0xff] %vm216_vm0, %v619_v51  ;;  %5742 = vmatprep.mubr.msk.bf16.mxu1 %vm216_vm0, %v2354_v45 }
 0x102   : > { %v5524_v59 = vpop.f32.mrb[12].mxu0 }
 0x103   : > { %v604_v63 = vadd.f32 %v5524_v59, %v321_v52  ;;  %v5544_v0 = vpop.f32.mrb[12].mxu1  ;;  %v495_v1 = vpop.f32.mrb[13].mxu0  ;;  %v717_v52 = vld [vmem:[#allocation2 + $0x8] sm:$0xff]  ;;  %v3129_v59 = vld [vmem:[%s6031_s28 + $0x5d] sm:$0xff] }
 0x104   : > { %v624_v2 = vadd.f32 %v5544_v0, %v341_v53  ;;  %v602_v3 = vadd.f32 %v495_v1, %v319_v55  ;;  %v575_v4 = vpop.f32.mrb[13].mxu1  ;;  %v5525_v23 = vpop.f32.mrb[14].mxu0  ;;  %v3128_v55 = vld [vmem:[%s6031_s28 + $0x55] sm:$0xff]  ;;  %v3131_v0 = vld [vmem:[%s6031_s28 + $0x6d] sm:$0xff] }
 0x105   : > { %640 = vst.msk [vmem:[#allocation2 + $0x70] sm:$0xff] %vm216_vm0, %v604_v63  ;;  %v622_v46 = vadd.f32 %v575_v4, %v339_v54  ;;  %v605_v7 = vadd.f32 %v5525_v23, %v322_v61  ;;  %v5545_v9 = vpop.f32.mrb[14].mxu1  ;;  %v498_v5 = vpop.f32.mrb[15].mxu0  ;;  %v3536_v61 = vld [vmem:[%s6031_s28 + $0x46] sm:$0xff]  ;;  %v722_v1 = vld [vmem:[#allocation2 + $0x30] sm:$0xff] }
 0x106   : > { %660 = vst.msk [vmem:[#allocation2 + $0x110] sm:$0xff] %vm216_vm0, %v624_v2  ;;  %638 = vst.msk [vmem:[#allocation2 + $0x60] sm:$0xff] %vm216_vm0, %v602_v3  ;;  %v625_v11 = vadd.f32 %v5545_v9, %v342_v19  ;;  %v603_v12 = vadd.f32 %v498_v5, %v320_v34  ;;  %v578_v48 = vpop.f32.mrb[15].mxu1  ;;  %v3130_v63 = vld [vmem:[%s6031_s28 + $0x65] sm:$0xff]  ;;  %v3569_v2 = vpack.c.bf16 %v3535_v57, %v3534_v56  ;;  %v723_v5 = vld [vmem:[#allocation2 + $0x38] sm:$0xff] }
 0x107   : > { %658 = vst.msk [vmem:[#allocation2 + $0x100] sm:$0xff] %vm216_vm0, %v622_v46  ;;  %641 = vst.msk [vmem:[#allocation2 + $0x78] sm:$0xff] %vm216_vm0, %v605_v7  ;;  %v623_v13 = vadd.f32 %v578_v48, %v340_v31  ;;  %5779 = vmatmul.mubr.msk.bf16.gmra.mrb[120].mxu0 %vm216_vm0, %v2354_v45  ;;  %v720_v4 = vld [vmem:[#allocation2 + $0x20] sm:$0xff]  ;;  %v3570_v46 = vpack.c.bf16 %v3537_v20, %v3536_v61  ;;  %v725_v56 = vld [vmem:[#allocation2 + $0x48] sm:$0xff] }
 0x108   : > { %661 = vst.msk [vmem:[#allocation2 + $0x118] sm:$0xff] %vm216_vm0, %v625_v11  ;;  %639 = vst.msk [vmem:[#allocation2 + $0x68] sm:$0xff] %vm216_vm0, %v603_v12  ;;  %5743 = vmatmul.mubr.msk.bf16.gmra.mrb[120].mxu1 %vm216_vm0, %v2355_v36  ;;  %5782 = vmatprep.mubr.msk.bf16.mxu0 %vm216_vm0, %v2355_v36  ;;  %v3161_v36 = vpack.c.bf16 %v3129_v59, %v3128_v55  ;;  %v3162_v12 = vpack.c.bf16 %v3131_v0, %v3130_v63 }
 0x109   : > { %659 = vst.msk [vmem:[#allocation2 + $0x108] sm:$0xff] %vm216_vm0, %v623_v13  ;;  %5790 = vmatprep.mubr.msk.bf16.mxu1 %vm216_vm0, %v3158_v10 }
 0x10a   : > { %v5528_v25 = vpop.f32.mrb[16].mxu0 }
 0x10b   : > { %v608_v18 = vadd.f32 %v5528_v25, %v325_v58  ;;  %v5552_v29 = vpop.f32.mrb[16].mxu1  ;;  %v511_v30 = vpop.f32.mrb[17].mxu0 }
 0x10c   : > { %v1002_v33 = vadd.f32 %v5552_v29, %v718_v28  ;;  %v606_v35 = vadd.f32 %v511_v30, %v323_v14  ;;  %v857_v38 = vpop.f32.mrb[17].mxu1  ;;  %v5529_v39 = vpop.f32.mrb[18].mxu0  ;;  %v721_v14 = vld [vmem:[#allocation2 + $0x28] sm:$0xff] }
 0x10d   : > { %644 = vst.msk [vmem:[#allocation2 + $0x90] sm:$0xff] %vm216_vm0, %v608_v18  ;;  %v1000_v42 = vadd.f32 %v857_v38, %v716_v37  ;;  %v609_v43 = vadd.f32 %v5529_v39, %v326_v26  ;;  %v5553_v45 = vpop.f32.mrb[18].mxu1  ;;  %v514_v47 = vpop.f32.mrb[19].mxu0  ;;  %v3538_v26 = vld [vmem:[%s6031_s28 + $0x56] sm:$0xff]  ;;  %v3540_v28 = vld [vmem:[%s6031_s28 + $0x66] sm:$0xff]  ;;  %v3541_v29 = vld [vmem:[%s6031_s28 + $0x6e] sm:$0xff] }
 0x10e   : > { %1038 = vst.msk [vmem:[#allocation2 + $0x10] sm:$0xff] %vm216_vm0, %v1002_v33  ;;  %642 = vst.msk [vmem:[#allocation2 + $0x80] sm:$0xff] %vm216_vm0, %v606_v35  ;;  %v1003_v50 = vadd.f32 %v5553_v45, %v719_v44  ;;  %v607_v51 = vadd.f32 %v514_v47, %v324_v22  ;;  %v860_v53 = vpop.f32.mrb[19].mxu1  ;;  %v3133_v18 = vld [vmem:[%s6031_s28 + $0x7d] sm:$0xff]  ;;  %v3134_v22 = vld [vmem:[%s6031_s28 + $0x85] sm:$0xff]  ;;  %v3571_v38 = vpack.c.bf16 %v3539_v8, %v3538_v26 }
 0x10f   : > { %1036 = vst.msk [vmem:[#allocation2] sm:$0xff] %vm216_vm0, %v1000_v42  ;;  %645 = vst.msk [vmem:[#allocation2 + $0x98] sm:$0xff] %vm216_vm0, %v609_v43  ;;  %v1001_v54 = vadd.f32 %v860_v53, %v717_v52  ;;  %5783 = vmatmul.mubr.msk.bf16.gmra.mrb[124].mxu0 %vm216_vm0, %v2765_v32  ;;  %v3135_v32 = vld [vmem:[%s6031_s28 + $0x8d] sm:$0xff]  ;;  %v3163_v43 = vpack.c.bf16 %v3133_v18, %v3132_v6  ;;  %v3572_v44 = vpack.c.bf16 %v3541_v29, %v3540_v28 }
 0x110   : > { %1039 = vst.msk [vmem:[#allocation2 + $0x18] sm:$0xff] %vm216_vm0, %v1003_v50  ;;  %643 = vst.msk [vmem:[#allocation2 + $0x88] sm:$0xff] %vm216_vm0, %v607_v51  ;;  %5791 = vmatmul.mubr.msk.bf16.vlgmr.msra.gmra.mrb[124].mxu1 %vm216_vm0, %v3159_v40  ;;  %5830 = vmatprep.mubr.msk.bf16.mxu0 %vm216_vm0, %v3568_v41  ;;  %v726_v33 = vld [vmem:[#allocation2 + $0x50] sm:$0xff]  ;;  %v724_v40 = vld [vmem:[#allocation2 + $0x40] sm:$0xff]  ;;  %v3164_v52 = vpack.c.bf16 %v3135_v32, %v3134_v22 }
 0x111   : > { %1037 = vst.msk [vmem:[#allocation2 + $0x8] sm:$0xff] %vm216_vm0, %v1001_v54  ;;  %5794 = vmatprep.mubr.msk.bf16.mxu1 %vm216_vm0, %v3160_v49  ;;  %v727_v49 = vld [vmem:[#allocation2 + $0x58] sm:$0xff]  ;;  %v729_v8 = vld [vmem:[#allocation2 + $0x68] sm:$0xff] }
 0x112   : > { %v5592_v62 = vpop.f32.mrb[20].mxu0 }
 0x113   : > { %v5556_v19 = vpop.f32.mrb[20].mxu1  ;;  %v1267_v34 = vpop.f32.mrb[21].mxu0 }
 0x114   : > { %v1006_v3 = vadd.f32 %v5556_v19, %v722_v1  ;;  %v873_v23 = vpop.f32.mrb[21].mxu1  ;;  %v5593_v31 = vpop.f32.mrb[22].mxu0  ;;  %v3542_v1 = vld [vmem:[%s6031_s28 + $0x76] sm:$0xff]  ;;  %v3543_v19 = vld [vmem:[%s6031_s28 + $0x7e] sm:$0xff] }
 0x115   : > { %v1128_v7 = vld [vmem:[#allocation2 + $0x10] sm:$0xff]  ;;  %v1004_v9 = vadd.f32 %v873_v23, %v720_v4  ;;  %v5557_v10 = vpop.f32.mrb[22].mxu1  ;;  %v1270_v11 = vpop.f32.mrb[23].mxu0 }
 0x116   : > { %1042 = vst.msk [vmem:[#allocation2 + $0x30] sm:$0xff] %vm216_vm0, %v1006_v3  ;;  %v1412_v48 = vadd.f32 %v5592_v62, %v1128_v7  ;;  %v1126_v13 = vld [vmem:[#allocation2] sm:$0xff]  ;;  %v1007_v58 = vadd.f32 %v5557_v10, %v723_v5  ;;  %v876_v15 = vpop.f32.mrb[23].mxu1  ;;  %v3136_v62 = vld [vmem:[%s6031_s28 + $0x95] sm:$0xff]  ;;  %v3573_v5 = vpack.c.bf16 %v3543_v19, %v3542_v1 }
 0x117   : > { %1040 = vst.msk [vmem:[#allocation2 + $0x20] sm:$0xff] %vm216_vm0, %v1004_v9  ;;  %v1410_v16 = vadd.f32 %v1267_v34, %v1126_v13  ;;  %v1129_v60 = vld [vmem:[#allocation2 + $0x18] sm:$0xff]  ;;  %v1005_v17 = vadd.f32 %v876_v15, %v721_v14  ;;  %5831 = vmatmul.mubr.msk.bf16.vlgmr.msra.gmra.mrb[128].mxu0 %vm216_vm0, %v3569_v2  ;;  %v3544_v3 = vld [vmem:[%s6031_s28 + $0x86] sm:$0xff]  ;;  %v3545_v4 = vld [vmem:[%s6031_s28 + $0x8e] sm:$0xff] }
 0x118   : > { %1448 = vst.msk [vmem:[#allocation2 + $0x10] sm:$0xff] %vm216_vm0, %v1412_v48  ;;  %1043 = vst.msk [vmem:[#allocation2 + $0x38] sm:$0xff] %vm216_vm0, %v1007_v58  ;;  %v1413_v21 = vadd.f32 %v5593_v31, %v1129_v60  ;;  %v1127_v25 = vld [vmem:[#allocation2 + $0x8] sm:$0xff]  ;;  %5795 = vmatmul.mubr.msk.bf16.gmra.mrb[128].mxu1 %vm216_vm0, %v3161_v36  ;;  %5834 = vmatprep.mubr.msk.bf16.mxu0 %vm216_vm0, %v3570_v46  ;;  %v3137_v2 = vld [vmem:[%s6031_s28 + $0x9d] sm:$0xff]  ;;  %v3574_v58 = vpack.c.bf16 %v3545_v4, %v3544_v3 }
 0x119   : > { %1446 = vst.msk [vmem:[#allocation2] sm:$0xff] %vm216_vm0, %v1410_v16  ;;  %1041 = vst.msk [vmem:[#allocation2 + $0x28] sm:$0xff] %vm216_vm0, %v1005_v17  ;;  %v1411_v27 = vadd.f32 %v1270_v11, %v1127_v25  ;;  %5798 = vmatprep.mubr.msk.bf16.mxu1 %vm216_vm0, %v3162_v12  ;;  %v3138_v31 = vld [vmem:[%s6031_s28 + $0xa5] sm:$0xff]  ;;  %v3139_v36 = vld [vmem:[%s6031_s28 + $0xad] sm:$0xff]  ;;  %v3165_v13 = vpack.c.bf16 %v3137_v2, %v3136_v62 }
 0x11a   : > { %1449 = vst.msk [vmem:[#allocation2 + $0x18] sm:$0xff] %vm216_vm0, %v1413_v21  ;;  %v5596_v30 = vpop.f32.mrb[24].mxu0  ;;  %v730_v46 = vld [vmem:[#allocation2 + $0x70] sm:$0xff]  ;;  %v728_v11 = vld [vmem:[#allocation2 + $0x60] sm:$0xff]  ;;  %v731_v16 = vld [vmem:[#allocation2 + $0x78] sm:$0xff]  ;;  %v3166_v6 = vpack.c.bf16 %v3139_v36, %v3138_v31 }
 0x11b   : > { %1447 = vst.msk [vmem:[#allocation2 + $0x8] sm:$0xff] %vm216_vm0, %v1411_v27  ;;  %v5560_v35 = vpop.f32.mrb[24].mxu1  ;;  %v1283_v37 = vpop.f32.mrb[25].mxu0  ;;  %v733_v19 = vld [vmem:[#allocation2 + $0x88] sm:$0xff] }
 0x11c   : > { %v1010_v39 = vadd.f32 %v5560_v35, %v726_v33  ;;  %v889_v41 = vpop.f32.mrb[25].mxu1  ;;  %v5597_v42 = vpop.f32.mrb[26].mxu0  ;;  %v3546_v33 = vld [vmem:[%s6031_s28 + $0x96] sm:$0xff]  ;;  %v3547_v35 = vld [vmem:[%s6031_s28 + $0x9e] sm:$0xff] }
 0x11d   : > { %v1132_v45 = vld [vmem:[#allocation2 + $0x30] sm:$0xff]  ;;  %v1008_v47 = vadd.f32 %v889_v41, %v724_v40  ;;  %v5561_v50 = vpop.f32.mrb[26].mxu1  ;;  %v1286_v51 = vpop.f32.mrb[27].mxu0 }
 0x11e   : > { %1046 = vst.msk [vmem:[#allocation2 + $0x50] sm:$0xff] %vm216_vm0, %v1010_v39  ;;  %v1416_v53 = vadd.f32 %v5596_v30, %v1132_v45  ;;  %v1130_v54 = vld [vmem:[#allocation2 + $0x20] sm:$0xff]  ;;  %v1011_v55 = vadd.f32 %v5561_v50, %v727_v49  ;;  %v892_v57 = vpop.f32.mrb[27].mxu1  ;;  %v3140_v30 = vld [vmem:[%s6031_s28 + $0xb5] sm:$0xff]  ;;  %v3575_v49 = vpack.c.bf16 %v3547_v35, %v3546_v33  ;;  %v737_v35 = vld [vmem:[#allocation2 + $0xa8] sm:$0xff] }
 0x11f   : > { %1044 = vst.msk [vmem:[#allocation2 + $0x40] sm:$0xff] %vm216_vm0, %v1008_v47  ;;  %v1414_v59 = vadd.f32 %v1283_v37, %v1130_v54  ;;  %v1133_v61 = vld [vmem:[#allocation2 + $0x38] sm:$0xff]  ;;  %v1009_v20 = vadd.f32 %v892_v57, %v725_v56  ;;  %5835 = vmatmul.mubr.msk.bf16.gmra.mrb[132].mxu0 %vm216_vm0, %v3571_v38  ;;  %v3548_v39 = vld [vmem:[%s6031_s28 + $0xa6] sm:$0xff]  ;;  %v3549_v40 = vld [vmem:[%s6031_s28 + $0xae] sm:$0xff] }
 0x120   : > { %1452 = vst.msk [vmem:[#allocation2 + $0x30] sm:$0xff] %vm216_vm0, %v1416_v53  ;;  %1047 = vst.msk [vmem:[#allocation2 + $0x58] sm:$0xff] %vm216_vm0, %v1011_v55  ;;  %v1417_v63 = vadd.f32 %v5597_v42, %v1133_v61  ;;  %v1131_v0 = vld [vmem:[#allocation2 + $0x28] sm:$0xff]  ;;  %5799 = vmatmul.mubr.msk.bf16.gmra.mrb[132].mxu1 %vm216_vm0, %v3163_v43  ;;  %5838 = vmatprep.mubr.msk.bf16.mxu0 %vm216_vm0, %v3572_v44  ;;  %v3141_v38 = vld [vmem:[%s6031_s28 + $0xbd] sm:$0xff]  ;;  %v3576_v55 = vpack.c.bf16 %v3549_v40, %v3548_v39 }
 0x121   : > { %1450 = vst.msk [vmem:[#allocation2 + $0x20] sm:$0xff] %vm216_vm0, %v1414_v59  ;;  %1045 = vst.msk [vmem:[#allocation2 + $0x48] sm:$0xff] %vm216_vm0, %v1009_v20  ;;  %v1415_v34 = vadd.f32 %v1286_v51, %v1131_v0  ;;  %5802 = vmatprep.mubr.msk.bf16.mxu1 %vm216_vm0, %v3164_v52  ;;  %v3142_v42 = vld [vmem:[%s6031_s28 + $0xc5] sm:$0xff]  ;;  %v3143_v43 = vld [vmem:[%s6031_s28 + $0xcd] sm:$0xff]  ;;  %v3167_v54 = vpack.c.bf16 %v3141_v38, %v3140_v30 }
 0x122   : > { %1453 = vst.msk [vmem:[#allocation2 + $0x38] sm:$0xff] %vm216_vm0, %v1417_v63  ;;  %v5600_v23 = vpop.f32.mrb[28].mxu0  ;;  %v734_v44 = vld [vmem:[#allocation2 + $0x90] sm:$0xff]  ;;  %v732_v51 = vld [vmem:[#allocation2 + $0x80] sm:$0xff]  ;;  %v735_v59 = vld [vmem:[#allocation2 + $0x98] sm:$0xff]  ;;  %v3168_v62 = vpack.c.bf16 %v3143_v43, %v3142_v42 }
 0x123   : > { %1451 = vst.msk [vmem:[#allocation2 + $0x28] sm:$0xff] %vm216_vm0, %v1415_v34  ;;  %v5564_v7 = vpop.f32.mrb[28].mxu1  ;;  %v1299_v9 = vpop.f32.mrb[29].mxu0 }
 0x124   : > { %v1014_v10 = vadd.f32 %v5564_v7, %v730_v46  ;;  %v905_v12 = vpop.f32.mrb[29].mxu1  ;;  %v5601_v48 = vpop.f32.mrb[30].mxu0  ;;  %v3550_v46 = vld [vmem:[%s6031_s28 + $0xb6] sm:$0xff]  ;;  %v3551_v7 = vld [vmem:[%s6031_s28 + $0xbe] sm:$0xff] }
 0x125   : > { %v1136_v14 = vld [vmem:[#allocation2 + $0x50] sm:$0xff]  ;;  %v1012_v15 = vadd.f32 %v905_v12, %v728_v11  ;;  %v5565_v60 = vpop.f32.mrb[30].mxu1  ;;  %v1302_v17 = vpop.f32.mrb[31].mxu0 }
 0x126   : > { %1050 = vst.msk [vmem:[#allocation2 + $0x70] sm:$0xff] %vm216_vm0, %v1014_v10  ;;  %v1420_v21 = vadd.f32 %v5600_v23, %v1136_v14  ;;  %v1134_v25 = vld [vmem:[#allocation2 + $0x40] sm:$0xff]  ;;  %v1015_v26 = vadd.f32 %v5565_v60, %v731_v16  ;;  %v908_v27 = vpop.f32.mrb[31].mxu1  ;;  %v3144_v23 = vld [vmem:[%s6031_s28 + $0xd5] sm:$0xff]  ;;  %v3577_v16 = vpack.c.bf16 %v3551_v7, %v3550_v46  ;;  %v741_v7 = vld [vmem:[#allocation2 + $0xc8] sm:$0xff] }
 0x127   : > { %1048 = vst.msk [vmem:[#allocation2 + $0x60] sm:$0xff] %vm216_vm0, %v1012_v15  ;;  %v1418_v18 = vadd.f32 %v1299_v9, %v1134_v25  ;;  %v1137_v28 = vld [vmem:[#allocation2 + $0x58] sm:$0xff]  ;;  %v1013_v29 = vadd.f32 %v908_v27, %v729_v8  ;;  %5839 = vmatmul.mubr.msk.bf16.gmra.mrb[136].mxu0 %vm216_vm0, %v3573_v5  ;;  %v3552_v10 = vld [vmem:[%s6031_s28 + $0xc6] sm:$0xff]  ;;  %v3553_v11 = vld [vmem:[%s6031_s28 + $0xce] sm:$0xff] }
 0x128   : > { %1456 = vst.msk [vmem:[#allocation2 + $0x50] sm:$0xff] %vm216_vm0, %v1420_v21  ;;  %1051 = vst.msk [vmem:[#allocation2 + $0x78] sm:$0xff] %vm216_vm0, %v1015_v26  ;;  %v1421_v22 = vadd.f32 %v5601_v48, %v1137_v28  ;;  %v1135_v32 = vld [vmem:[#allocation2 + $0x48] sm:$0xff]  ;;  %5803 = vmatmul.mubr.msk.bf16.gmra.mrb[136].mxu1 %vm216_vm0, %v3165_v13  ;;  %5842 = vmatprep.mubr.msk.bf16.mxu0 %vm216_vm0, %v3574_v58  ;;  %v3145_v5 = vld [vmem:[%s6031_s28 + $0xdd] sm:$0xff]  ;;  %v3578_v26 = vpack.c.bf16 %v3553_v11, %v3552_v10 }
 0x129   : > { %1454 = vst.msk [vmem:[#allocation2 + $0x40] sm:$0xff] %vm216_vm0, %v1418_v18  ;;  %1049 = vst.msk [vmem:[#allocation2 + $0x68] sm:$0xff] %vm216_vm0, %v1013_v29  ;;  %v1419_v37 = vadd.f32 %v1302_v17, %v1135_v32  ;;  %5806 = vmatprep.mubr.msk.bf16.mxu1 %vm216_vm0, %v3166_v6  ;;  %v3146_v48 = vld [vmem:[%s6031_s28 + $0xe5] sm:$0xff]  ;;  %v3147_v13 = vld [vmem:[%s6031_s28 + $0xed] sm:$0xff]  ;;  %v3169_v25 = vpack.c.bf16 %v3145_v5, %v3144_v23 }
 0x12a   : > { %1457 = vst.msk [vmem:[#allocation2 + $0x58] sm:$0xff] %vm216_vm0, %v1421_v22  ;;  %v5604_v41 = vpop.f32.mrb[32].mxu0  ;;  %v738_v58 = vld [vmem:[#allocation2 + $0xb0] sm:$0xff]  ;;  %v736_v17 = vld [vmem:[#allocation2 + $0xa0] sm:$0xff]  ;;  %v739_v18 = vld [vmem:[#allocation2 + $0xb8] sm:$0xff]  ;;  %v3170_v30 = vpack.c.bf16 %v3147_v13, %v3146_v48 }
 0x12b   : > { %1455 = vst.msk [vmem:[#allocation2 + $0x48] sm:$0xff] %vm216_vm0, %v1419_v37  ;;  %v5568_v45 = vpop.f32.mrb[32].mxu1  ;;  %v1315_v47 = vpop.f32.mrb[33].mxu0 }
 0x12c   : > { %v1018_v50 = vadd.f32 %v5568_v45, %v734_v44  ;;  %v921_v52 = vpop.f32.mrb[33].mxu1  ;;  %v5605_v53 = vpop.f32.mrb[34].mxu0  ;;  %v3554_v44 = vld [vmem:[%s6031_s28 + $0xd6] sm:$0xff]  ;;  %v3555_v45 = vld [vmem:[%s6031_s28 + $0xde] sm:$0xff] }
 0x12d   : > { %v1140_v56 = vld [vmem:[#allocation2 + $0x70] sm:$0xff]  ;;  %v1016_v57 = vadd.f32 %v921_v52, %v732_v51  ;;  %v5569_v61 = vpop.f32.mrb[34].mxu1  ;;  %v1318_v20 = vpop.f32.mrb[35].mxu0 }
 0x12e   : > { %1054 = vst.msk [vmem:[#allocation2 + $0x90] sm:$0xff] %vm216_vm0, %v1018_v50  ;;  %v1424_v63 = vadd.f32 %v5604_v41, %v1140_v56  ;;  %v1138_v0 = vld [vmem:[#allocation2 + $0x60] sm:$0xff]  ;;  %v1019_v1 = vadd.f32 %v5569_v61, %v735_v59  ;;  %v924_v34 = vpop.f32.mrb[35].mxu1  ;;  %v3148_v41 = vld [vmem:[%s6031_s28 + $0xf5] sm:$0xff]  ;;  %v3579_v59 = vpack.c.bf16 %v3555_v45, %v3554_v44  ;;  %v745_v45 = vld [vmem:[#allocation2 + $0xe8] sm:$0xff] }
 0x12f   : > { %1052 = vst.msk [vmem:[#allocation2 + $0x80] sm:$0xff] %vm216_vm0, %v1016_v57  ;;  %v1422_v2 = vadd.f32 %v1315_v47, %v1138_v0  ;;  %v1141_v3 = vld [vmem:[#allocation2 + $0x78] sm:$0xff]  ;;  %v1017_v4 = vadd.f32 %v924_v34, %v733_v19  ;;  %5843 = vmatmul.mubr.msk.bf16.gmra.mrb[140].mxu0 %vm216_vm0, %v3575_v49  ;;  %v3556_v50 = vld [vmem:[%s6031_s28 + $0xe6] sm:$0xff]  ;;  %v3557_v51 = vld [vmem:[%s6031_s28 + $0xee] sm:$0xff] }
 0x130   : > { %1460 = vst.msk [vmem:[#allocation2 + $0x70] sm:$0xff] %vm216_vm0, %v1424_v63  ;;  %1055 = vst.msk [vmem:[#allocation2 + $0x98] sm:$0xff] %vm216_vm0, %v1019_v1  ;;  %v1425_v31 = vadd.f32 %v5605_v53, %v1141_v3  ;;  %v1139_v36 = vld [vmem:[#allocation2 + $0x68] sm:$0xff]  ;;  %5807 = vmatmul.mubr.msk.bf16.gmra.mrb[140].mxu1 %vm216_vm0, %v3167_v54  ;;  %5846 = vmatprep.mubr.msk.bf16.mxu0 %vm216_vm0, %v3576_v55  ;;  %v3149_v49 = vld [vmem:[%s6031_s28 + $0xfd] sm:$0xff]  ;;  %v3580_v1 = vpack.c.bf16 %v3557_v51, %v3556_v50 }
 0x131   : > { %1458 = vst.msk [vmem:[#allocation2 + $0x60] sm:$0xff] %vm216_vm0, %v1422_v2  ;;  %1053 = vst.msk [vmem:[#allocation2 + $0x88] sm:$0xff] %vm216_vm0, %v1017_v4  ;;  %v1423_v9 = vadd.f32 %v1318_v20, %v1139_v36  ;;  %5810 = vmatprep.mubr.msk.bf16.mxu1 %vm216_vm0, %v3168_v62  ;;  %v3150_v53 = vld [vmem:[%s6031_s28 + $0x105] sm:$0xff]  ;;  %v3151_v54 = vld [vmem:[%s6031_s28 + $0x10d] sm:$0xff]  ;;  %v3171_v0 = vpack.c.bf16 %v3149_v49, %v3148_v41 }
 0x132   : > { %1461 = vst.msk [vmem:[#allocation2 + $0x78] sm:$0xff] %vm216_vm0, %v1425_v31  ;;  %v5608_v12 = vpop.f32.mrb[36].mxu0  ;;  %v742_v55 = vld [vmem:[#allocation2 + $0xd0] sm:$0xff]  ;;  %v740_v20 = vld [vmem:[#allocation2 + $0xc0] sm:$0xff]  ;;  %v743_v2 = vld [vmem:[#allocation2 + $0xd8] sm:$0xff]  ;;  %v3172_v23 = vpack.c.bf16 %v3151_v54, %v3150_v53 }
 0x133   : > { %1459 = vst.msk [vmem:[#allocation2 + $0x68] sm:$0xff] %vm216_vm0, %v1423_v9  ;;  %v5572_v14 = vpop.f32.mrb[36].mxu1  ;;  %v1331_v15 = vpop.f32.mrb[37].mxu0 }
 0x134   : > { %v1022_v60 = vadd.f32 %v5572_v14, %v738_v58  ;;  %v937_v6 = vpop.f32.mrb[37].mxu1  ;;  %v5609_v21 = vpop.f32.mrb[38].mxu0  ;;  %v3558_v58 = vld [vmem:[%s6031_s28 + $0xf6] sm:$0xff]  ;;  %v3559_v14 = vld [vmem:[%s6031_s28 + $0xfe] sm:$0xff] }
 0x135   : > { %v1144_v8 = vld [vmem:[#allocation2 + $0x90] sm:$0xff]  ;;  %v1020_v27 = vadd.f32 %v937_v6, %v736_v17  ;;  %v5573_v28 = vpop.f32.mrb[38].mxu1  ;;  %v1334_v29 = vpop.f32.mrb[39].mxu0 }
 0x136   : > { %1058 = vst.msk [vmem:[#allocation2 + $0xb0] sm:$0xff] %vm216_vm0, %v1022_v60  ;;  %v1428_v22 = vadd.f32 %v5608_v12, %v1144_v8  ;;  %v1142_v32 = vld [vmem:[#allocation2 + $0x80] sm:$0xff]  ;;  %v1023_v33 = vadd.f32 %v5573_v28, %v739_v18  ;;  %v940_v37 = vpop.f32.mrb[39].mxu1  ;;  %v3152_v12 = vld [vmem:[%s6031_s28 + $0x115] sm:$0xff]  ;;  %v3581_v18 = vpack.c.bf16 %v3559_v14, %v3558_v58 }
 0x137   : > { %1056 = vst.msk [vmem:[#allocation2 + $0xa0] sm:$0xff] %vm216_vm0, %v1020_v27  ;;  %v1426_v38 = vadd.f32 %v1331_v15, %v1142_v32  ;;  %v1145_v39 = vld [vmem:[#allocation2 + $0x98] sm:$0xff]  ;;  %v1021_v40 = vadd.f32 %v940_v37, %v737_v35  ;;  %5847 = vmatmul.mubr.msk.bf16.gmra.mrb[144].mxu0 %vm216_vm0, %v3577_v16  ;;  %v3560_v60 = vld [vmem:[%s6031_s28 + $0x106] sm:$0xff]  ;;  %v3561_v17 = vld [vmem:[%s6031_s28 + $0x10e] sm:$0xff] }
 0x138   : > { %1464 = vst.msk [vmem:[#allocation2 + $0x90] sm:$0xff] %vm216_vm0, %v1428_v22  ;;  %1059 = vst.msk [vmem:[#allocation2 + $0xb8] sm:$0xff] %vm216_vm0, %v1023_v33  ;;  %v1429_v42 = vadd.f32 %v5609_v21, %v1145_v39  ;;  %v1143_v43 = vld [vmem:[#allocation2 + $0x88] sm:$0xff]  ;;  %5811 = vmatmul.mubr.msk.bf16.gmra.mrb[144].mxu1 %vm216_vm0, %v3169_v25  ;;  %5850 = vmatprep.mubr.msk.bf16.mxu0 %vm216_vm0, %v3578_v26  ;;  %v3153_v16 = vld [vmem:[%s6031_s28 + $0x11d] sm:$0xff]  ;;  %v3582_v33 = vpack.c.bf16 %v3561_v17, %v3560_v60 }
 0x139   : > { %1462 = vst.msk [vmem:[#allocation2 + $0x80] sm:$0xff] %vm216_vm0, %v1426_v38  ;;  %1057 = vst.msk [vmem:[#allocation2 + $0xa8] sm:$0xff] %vm216_vm0, %v1021_v40  ;;  %v1427_v47 = vadd.f32 %v1334_v29, %v1143_v43  ;;  %5814 = vmatprep.mubr.msk.bf16.mxu1 %vm216_vm0, %v3170_v30  ;;  %v3154_v21 = vld [vmem:[%s6031_s28 + $0x125] sm:$0xff]  ;;  %v3155_v25 = vld [vmem:[%s6031_s28 + $0x12d] sm:$0xff]  ;;  %v3173_v32 = vpack.c.bf16 %v3153_v16, %v3152_v12 }
 0x13a   : > { %1465 = vst.msk [vmem:[#allocation2 + $0x98] sm:$0xff] %vm216_vm0, %v1429_v42  ;;  %v5612_v52 = vpop.f32.mrb[40].mxu0  ;;  %v746_v26 = vld [vmem:[#allocation2 + $0xf0] sm:$0xff]  ;;  %v744_v29 = vld [vmem:[#allocation2 + $0xe0] sm:$0xff]  ;;  %v747_v38 = vld [vmem:[#allocation2 + $0xf8] sm:$0xff]  ;;  %v3174_v41 = vpack.c.bf16 %v3155_v25, %v3154_v21 }
 0x13b   : > { %1463 = vst.msk [vmem:[#allocation2 + $0x88] sm:$0xff] %vm216_vm0, %v1427_v47  ;;  %v5576_v56 = vpop.f32.mrb[40].mxu1  ;;  %v1347_v57 = vpop.f32.mrb[41].mxu0  ;;  %v3566_v17 = vld [vmem:[%s6031_s28 + $0x136] sm:$0xff] }
 0x13c   : > { %v1026_v61 = vadd.f32 %v5576_v56, %v742_v55  ;;  %v953_v62 = vpop.f32.mrb[41].mxu1  ;;  %v5613_v63 = vpop.f32.mrb[42].mxu0  ;;  %v3562_v55 = vld [vmem:[%s6031_s28 + $0x116] sm:$0xff]  ;;  %v3563_v56 = vld [vmem:[%s6031_s28 + $0x11e] sm:$0xff] }
 0x13d   : > { %v1148_v19 = vld [vmem:[#allocation2 + $0xb0] sm:$0xff]  ;;  %v1024_v34 = vadd.f32 %v953_v62, %v740_v20  ;;  %v5577_v3 = vpop.f32.mrb[42].mxu1  ;;  %v1350_v4 = vpop.f32.mrb[43].mxu0 }
 0x13e   : > { %1062 = vst.msk [vmem:[#allocation2 + $0xd0] sm:$0xff] %vm216_vm0, %v1026_v61  ;;  %v1432_v31 = vadd.f32 %v5612_v52, %v1148_v19  ;;  %v1146_v36 = vld [vmem:[#allocation2 + $0xa0] sm:$0xff]  ;;  %v1027_v46 = vadd.f32 %v5577_v3, %v743_v2  ;;  %v956_v9 = vpop.f32.mrb[43].mxu1  ;;  %v3156_v52 = vld [vmem:[%s6031_s28 + $0x135] sm:$0xff]  ;;  %v3583_v19 = vpack.c.bf16 %v3563_v56, %v3562_v55 }
 0x13f   : > { %1060 = vst.msk [vmem:[#allocation2 + $0xc0] sm:$0xff] %vm216_vm0, %v1024_v34  ;;  %v1430_v5 = vadd.f32 %v1347_v57, %v1146_v36  ;;  %v1149_v10 = vld [vmem:[#allocation2 + $0xb8] sm:$0xff]  ;;  %v1025_v11 = vadd.f32 %v956_v9, %v741_v7  ;;  %5851 = vmatmul.mubr.msk.bf16.gmra.mrb[148].mxu0 %vm216_vm0, %v3579_v59  ;;  %v3564_v61 = vld [vmem:[%s6031_s28 + $0x126] sm:$0xff]  ;;  %v3565_v20 = vld [vmem:[%s6031_s28 + $0x12e] sm:$0xff] }
 0x140   : > { %1468 = vst.msk [vmem:[#allocation2 + $0xb0] sm:$0xff] %vm216_vm0, %v1432_v31  ;;  %1063 = vst.msk [vmem:[#allocation2 + $0xd8] sm:$0xff] %vm216_vm0, %v1027_v46  ;;  %v1433_v48 = vadd.f32 %v5613_v63, %v1149_v10  ;;  %v1147_v13 = vld [vmem:[#allocation2 + $0xa8] sm:$0xff]  ;;  %5815 = vmatmul.mubr.msk.bf16.gmra.mrb[148].mxu1 %vm216_vm0, %v3171_v0  ;;  %5854 = vmatprep.mubr.msk.bf16.mxu0 %vm216_vm0, %v3580_v1  ;;  %v3157_v59 = vld [vmem:[%s6031_s28 + $0x13d] sm:$0xff]  ;;  %v3584_v31 = vpack.c.bf16 %v3565_v20, %v3564_v61 }
 0x141   : > { %1466 = vst.msk [vmem:[#allocation2 + $0xa0] sm:$0xff] %vm216_vm0, %v1430_v5  ;;  %1061 = vst.msk [vmem:[#allocation2 + $0xc8] sm:$0xff] %vm216_vm0, %v1025_v11  ;;  %v1431_v15 = vadd.f32 %v1350_v4, %v1147_v13  ;;  %5818 = vmatprep.mubr.msk.bf16.mxu1 %vm216_vm0, %v3172_v23  ;;  %v750_v63 = vld [vmem:[#allocation2 + $0x110] sm:$0xff]  ;;  %v748_v2 = vld [vmem:[#allocation2 + $0x100] sm:$0xff]  ;;  %v3175_v23 = vpack.c.bf16 %v3157_v59, %v3156_v52 }
 0x142   : > { %1469 = vst.msk [vmem:[#allocation2 + $0xb8] sm:$0xff] %vm216_vm0, %v1433_v48  ;;  %v5616_v6 = vpop.f32.mrb[44].mxu0  ;;  %v751_v7 = vld [vmem:[#allocation2 + $0x118] sm:$0xff]  ;;  %v749_v48 = vld [vmem:[#allocation2 + $0x108] sm:$0xff] }
 0x143   : > { %1467 = vst.msk [vmem:[#allocation2 + $0xa8] sm:$0xff] %vm216_vm0, %v1431_v15  ;;  %v5580_v8 = vpop.f32.mrb[44].mxu1  ;;  %v1363_v27 = vpop.f32.mrb[45].mxu0 }
 0x144   : > { %v1030_v28 = vadd.f32 %v5580_v8, %v746_v26  ;;  %v969_v30 = vpop.f32.mrb[45].mxu1  ;;  %v5617_v22 = vpop.f32.mrb[46].mxu0  ;;  %v1538_v26 = vld [vmem:[#allocation2 + $0x10] sm:$0xff] }
 0x145   : > { %v1152_v35 = vld [vmem:[#allocation2 + $0xd0] sm:$0xff]  ;;  %v1028_v37 = vadd.f32 %v969_v30, %v744_v29  ;;  %v5581_v39 = vpop.f32.mrb[46].mxu1  ;;  %v1366_v40 = vpop.f32.mrb[47].mxu0  ;;  %v1536_v29 = vld [vmem:[#allocation2] sm:$0xff] }
 0x146   : > { %1066 = vst.msk [vmem:[#allocation2 + $0xf0] sm:$0xff] %vm216_vm0, %v1030_v28  ;;  %v1436_v42 = vadd.f32 %v5616_v6, %v1152_v35  ;;  %v1150_v43 = vld [vmem:[#allocation2 + $0xc0] sm:$0xff]  ;;  %v1031_v44 = vadd.f32 %v5581_v39, %v747_v38  ;;  %v972_v47 = vpop.f32.mrb[47].mxu1  ;;  %v1539_v35 = vld [vmem:[#allocation2 + $0x18] sm:$0xff] }
 0x147   : > { %1064 = vst.msk [vmem:[#allocation2 + $0xe0] sm:$0xff] %vm216_vm0, %v1028_v37  ;;  %v1434_v49 = vadd.f32 %v1363_v27, %v1150_v43  ;;  %v1153_v50 = vld [vmem:[#allocation2 + $0xd8] sm:$0xff]  ;;  %v1029_v51 = vadd.f32 %v972_v47, %v745_v45  ;;  %5855 = vmatmul.mubr.msk.bf16.gmra.mrb[152].mxu0 %vm216_vm0, %v3581_v18 }
 0x148   : > { %1472 = vst.msk [vmem:[#allocation2 + $0xd0] sm:$0xff] %vm216_vm0, %v1436_v42  ;;  %1067 = vst.msk [vmem:[#allocation2 + $0xf8] sm:$0xff] %vm216_vm0, %v1031_v44  ;;  %v1437_v53 = vadd.f32 %v5617_v22, %v1153_v50  ;;  %v1151_v54 = vld [vmem:[#allocation2 + $0xc8] sm:$0xff]  ;;  %5819 = vmatmul.mubr.msk.bf16.gmra.mrb[152].mxu1 %vm216_vm0, %v3173_v32  ;;  %5858 = vmatprep.mubr.msk.bf16.mxu0 %vm216_vm0, %v3582_v33  ;;  %v3567_v6 = vld [vmem:[%s6031_s28 + $0x13e] sm:$0xff]  ;;  %s5871_s28 = smul.u32 288, %s8623_s16 }
 0x149   : > { %1470 = vst.msk [vmem:[#allocation2 + $0xc0] sm:$0xff] %vm216_vm0, %v1434_v49  ;;  %1065 = vst.msk [vmem:[#allocation2 + $0xe8] sm:$0xff] %vm216_vm0, %v1029_v51  ;;  %v1435_v57 = vadd.f32 %v1366_v40, %v1151_v54  ;;  %5822 = vmatprep.mubr.msk.bf16.mxu1 %vm216_vm0, %v3174_v41  ;;  %v3585_v18 = vpack.c.bf16 %v3567_v6, %v3566_v17  ;;  %v1537_v42 = vld [vmem:[#allocation2 + $0x8] sm:$0xff]  ;;  %v1547_v17 = vld [vmem:[#allocation2 + $0x58] sm:$0xff] }
 0x14a   : > { %1473 = vst.msk [vmem:[#allocation2 + $0xd8] sm:$0xff] %vm216_vm0, %v1437_v53  ;;  %v5620_v62 = vpop.f32.mrb[48].mxu0  ;;  %v1542_v53 = vld [vmem:[#allocation2 + $0x30] sm:$0xff]  ;;  %s8019_s10 = scalar_lea.vmem %s8469_s2, %s5871_s28 }
 0x14b   : > { %1471 = vst.msk [vmem:[#allocation2 + $0xc8] sm:$0xff] %vm216_vm0, %v1435_v57  ;;  %v5584_v0 = vpop.f32.mrb[48].mxu1  ;;  %v1379_v1 = vpop.f32.mrb[49].mxu0  ;;  %v1540_v57 = vld [vmem:[#allocation2 + $0x20] sm:$0xff] }
 0x14c   : > { %v1034_v34 = vadd.f32 %v5584_v0, %v750_v63  ;;  %v985_v3 = vpop.f32.mrb[49].mxu1  ;;  %v5621_v4 = vpop.f32.mrb[50].mxu0  ;;  %v1543_v63 = vld [vmem:[#allocation2 + $0x38] sm:$0xff] }
 0x14d   : > { %v1156_v36 = vld [vmem:[#allocation2 + $0xf0] sm:$0xff]  ;;  %v1032_v46 = vadd.f32 %v985_v3, %v748_v2  ;;  %v5585_v9 = vpop.f32.mrb[50].mxu1  ;;  %v1382_v5 = vpop.f32.mrb[51].mxu0  ;;  %v1541_v3 = vld [vmem:[#allocation2 + $0x28] sm:$0xff] }
 0x14e   : > { %1070 = vst.msk [vmem:[#allocation2 + $0x110] sm:$0xff] %vm216_vm0, %v1034_v34  ;;  %v1440_v10 = vadd.f32 %v5620_v62, %v1156_v36  ;;  %v1154_v11 = vld [vmem:[#allocation2 + $0xe0] sm:$0xff]  ;;  %v1035_v12 = vadd.f32 %v5585_v9, %v751_v7  ;;  %v988_v13 = vpop.f32.mrb[51].mxu1 }
 0x14f   : > { %1068 = vst.msk [vmem:[#allocation2 + $0x100] sm:$0xff] %vm216_vm0, %v1032_v46  ;;  %v1438_v58 = vadd.f32 %v1379_v1, %v1154_v11  ;;  %v1157_v14 = vld [vmem:[#allocation2 + $0xf8] sm:$0xff]  ;;  %v1033_v15 = vadd.f32 %v988_v13, %v749_v48  ;;  %5859 = vmatmul.mubr.msk.bf16.gmra.mrb[156].mxu0 %vm216_vm0, %v3583_v19  ;;  %v4014_v48 = vlaneseq }
 0x150   : > { %1476 = vst.msk [vmem:[#allocation2 + $0xf0] sm:$0xff] %vm216_vm0, %v1440_v10  ;;  %1071 = vst.msk [vmem:[#allocation2 + $0x118] sm:$0xff] %vm216_vm0, %v1035_v12  ;;  %v1441_v16 = vadd.f32 %v5621_v4, %v1157_v14  ;;  %v1155_v60 = vld [vmem:[#allocation2 + $0xe8] sm:$0xff]  ;;  %5823 = vmatmul.mubr.msk.bf16.gmra.mrb[156].mxu1 %vm216_vm0, %v3175_v23  ;;  %5862 = vmatprep.mubr.msk.bf16.mxu0 %vm216_vm0, %v3584_v31  ;;  %v1546_v10 = vld [vmem:[#allocation2 + $0x50] sm:$0xff] }
 0x151   : > { %1474 = vst.msk [vmem:[#allocation2 + $0xe0] sm:$0xff] %vm216_vm0, %v1438_v58  ;;  %1069 = vst.msk [vmem:[#allocation2 + $0x108] sm:$0xff] %vm216_vm0, %v1033_v15  ;;  %v1439_v21 = vadd.f32 %v1382_v5, %v1155_v60  ;;  %v1544_v58 = vld [vmem:[#allocation2 + $0x40] sm:$0xff] }
 0x152   : > { %1477 = vst.msk [vmem:[#allocation2 + $0xf8] sm:$0xff] %vm216_vm0, %v1441_v16  ;;  %v5624_v25 = vpop.f32.mrb[52].mxu0 }
 0x153   : > { %1475 = vst.msk [vmem:[#allocation2 + $0xe8] sm:$0xff] %vm216_vm0, %v1439_v21  ;;  %v5632_v8 = vpop.f32.mrb[52].mxu1  ;;  %v1395_v27 = vpop.f32.mrb[53].mxu0 }
 0x154   : > { %v1822_v28 = vadd.f32 %v5632_v8, %v1538_v26  ;;  %v1677_v30 = vpop.f32.mrb[53].mxu1  ;;  %v5625_v22 = vpop.f32.mrb[54].mxu0 }
 0x155   : > { %v1160_v32 = vld [vmem:[#allocation2 + $0x110] sm:$0xff]  ;;  %v1820_v33 = vadd.f32 %v1677_v30, %v1536_v29  ;;  %v5633_v37 = vpop.f32.mrb[54].mxu1  ;;  %v1398_v38 = vpop.f32.mrb[55].mxu0 }
 0x156   : > { %v1444_v39 = vadd.f32 %v5624_v25, %v1160_v32  ;;  %1858 = vst.msk [vmem:[#allocation2 + $0x10] sm:$0xff] %vm216_vm0, %v1822_v28  ;;  %v1158_v40 = vld [vmem:[#allocation2 + $0x100] sm:$0xff]  ;;  %v1823_v41 = vadd.f32 %v5633_v37, %v1539_v35  ;;  %v1680_v43 = vpop.f32.mrb[55].mxu1  ;;  %v6777_v25 = vshrl.u32 %v4014_v48, 7 }
 0x157   : > { %v1442_v44 = vadd.f32 %v1395_v27, %v1158_v40  ;;  %1856 = vst.msk [vmem:[#allocation2] sm:$0xff] %vm216_vm0, %v1820_v33  ;;  %v1161_v45 = vld [vmem:[#allocation2 + $0x118] sm:$0xff]  ;;  %v1821_v47 = vadd.f32 %v1680_v43, %v1537_v42  ;;  %5863 = vmatmul.mubr.msk.bf16.gmra.mrb[160].mxu0 %vm216_vm0, %v3585_v18  ;;  %v1545_v18 = vld [vmem:[#allocation2 + $0x48] sm:$0xff] }
 0x158   : > { %1480 = vst.msk [vmem:[#allocation2 + $0x110] sm:$0xff] %vm216_vm0, %v1444_v39  ;;  %v1445_v49 = vadd.f32 %v5625_v22, %v1161_v45  ;;  %1859 = vst.msk [vmem:[#allocation2 + $0x18] sm:$0xff] %vm216_vm0, %v1823_v41  ;;  %v1159_v50 = vld [vmem:[#allocation2 + $0x108] sm:$0xff]  ;;  %v6782_v32 = vadd.s32 16, %v6777_v25  ;;  %v1550_v39 = vld [vmem:[#allocation2 + $0x70] sm:$0xff] }
 0x159   : > { %1478 = vst.msk [vmem:[#allocation2 + $0x100] sm:$0xff] %vm216_vm0, %v1442_v44  ;;  %v1443_v51 = vadd.f32 %v1398_v38, %v1159_v50  ;;  %1857 = vst.msk [vmem:[#allocation2 + $0x8] sm:$0xff] %vm216_vm0, %v1821_v47  ;;  %v6795_v44 = vadd.s32 24, %v6777_v25  ;;  %v1548_v47 = vld [vmem:[#allocation2 + $0x60] sm:$0xff] }
 0x15a   : > { %1481 = vst.msk [vmem:[#allocation2 + $0x118] sm:$0xff] %vm216_vm0, %v1445_v49  ;;  %v5672_v52 = vpop.f32.mrb[56].mxu0  ;;  %v6791_v42 = vmul.u32.u64.low 3817748708, %v6782_v32  ;;  %v6792_v43 = vmul.u32.u64.high 3817748708, %v6782_v32, %v6791_v42 }
 0x15b   : > { %1479 = vst.msk [vmem:[#allocation2 + $0x108] sm:$0xff] %vm216_vm0, %v1443_v51  ;;  %v5636_v54 = vpop.f32.mrb[56].mxu1  ;;  %v2087_v55 = vpop.f32.mrb[57].mxu0  ;;  %v6798_v51 = vadd.s32 8, %v6777_v25 }
 0x15c   : > { %v1826_v56 = vadd.f32 %v5636_v54, %v1542_v53  ;;  %v1693_v59 = vpop.f32.mrb[57].mxu1  ;;  %v5673_v61 = vpop.f32.mrb[58].mxu0  ;;  %v1551_v54 = vld [vmem:[#allocation2 + $0x78] sm:$0xff] }
 0x15d   : > { %v1948_v20 = vld [vmem:[#allocation2 + $0x10] sm:$0xff]  ;;  %v1824_v62 = vadd.f32 %v1693_v59, %v1540_v57  ;;  %v5637_v0 = vpop.f32.mrb[58].mxu1  ;;  %v2090_v1 = vpop.f32.mrb[59].mxu0 }
 0x15e   : > { %1862 = vst.msk [vmem:[#allocation2 + $0x30] sm:$0xff] %vm216_vm0, %v1826_v56  ;;  %v2232_v19 = vadd.f32 %v5672_v52, %v1948_v20  ;;  %v1946_v34 = vld [vmem:[#allocation2] sm:$0xff]  ;;  %v1827_v2 = vadd.f32 %v5637_v0, %v1543_v63  ;;  %v1696_v4 = vpop.f32.mrb[59].mxu1  ;;  %v1549_v20 = vld [vmem:[#allocation2 + $0x68] sm:$0xff]  ;;  %v6802_v63 = vmul.u32.u64.low 3817748708, %v6777_v25  ;;  %v6803_v0 = vmul.u32.u64.high 3817748708, %v6777_v25, %v6802_v63 }
 0x15f   : > { %1860 = vst.msk [vmem:[#allocation2 + $0x20] sm:$0xff] %vm216_vm0, %v1824_v62  ;;  %v2230_v23 = vadd.f32 %v2087_v55, %v1946_v34  ;;  %v1949_v31 = vld [vmem:[#allocation2 + $0x18] sm:$0xff]  ;;  %v1825_v36 = vadd.f32 %v1696_v4, %v1541_v3 }
 0x160   : > { %2268 = vst.msk [vmem:[#allocation2 + $0x10] sm:$0xff] %vm216_vm0, %v2232_v19  ;;  %1863 = vst.msk [vmem:[#allocation2 + $0x38] sm:$0xff] %vm216_vm0, %v1827_v2  ;;  %v2233_v46 = vadd.f32 %v5673_v61, %v1949_v31  ;;  %v1947_v7 = vld [vmem:[#allocation2 + $0x8] sm:$0xff]  ;;  %v6807_v2 = vmul.u32.u64.low 3817748708, %v6795_v44  ;;  %v6808_v3 = vmul.u32.u64.high 3817748708, %v6795_v44, %v6807_v2 }
 0x161   : > { %2266 = vst.msk [vmem:[#allocation2] sm:$0xff] %vm216_vm0, %v2230_v23  ;;  %1861 = vst.msk [vmem:[#allocation2 + $0x28] sm:$0xff] %vm216_vm0, %v1825_v36  ;;  %v2231_v9 = vadd.f32 %v2090_v1, %v1947_v7  ;;  %v6813_v31 = vmul.u32.u64.low 3817748708, %v6798_v51  ;;  %v6814_v36 = vmul.u32.u64.high 3817748708, %v6798_v51, %v6813_v31 }
 0x162   : > { %2269 = vst.msk [vmem:[#allocation2 + $0x18] sm:$0xff] %vm216_vm0, %v2233_v46  ;;  %v5676_v5 = vpop.f32.mrb[60].mxu0  ;;  %v6817_v46 = vadd.s32 48, %v6777_v25 }
 0x163   : > { %2267 = vst.msk [vmem:[#allocation2 + $0x8] sm:$0xff] %vm216_vm0, %v2231_v9  ;;  %v5640_v11 = vpop.f32.mrb[60].mxu1  ;;  %v2103_v12 = vpop.f32.mrb[61].mxu0  ;;  %v4068_v42 = vshrl.u32 %v6814_v36, 4  ;;  %v1557_v36 = vld [vmem:[#allocation2 + $0xa8] sm:$0xff] }
 0x164   : > { %v1830_v13 = vadd.f32 %v5640_v11, %v1546_v10  ;;  %v1709_v14 = vpop.f32.mrb[61].mxu1  ;;  %v5677_v15 = vpop.f32.mrb[62].mxu0  ;;  %v1554_v11 = vld [vmem:[#allocation2 + $0x90] sm:$0xff] }
 0x165   : > { %v1952_v16 = vld [vmem:[#allocation2 + $0x30] sm:$0xff]  ;;  %v1828_v60 = vadd.f32 %v1709_v14, %v1544_v58  ;;  %v5641_v6 = vpop.f32.mrb[62].mxu1  ;;  %v2106_v21 = vpop.f32.mrb[63].mxu0  ;;  %v1552_v14 = vld [vmem:[#allocation2 + $0x80] sm:$0xff]  ;;  %v4069_v63 = vmul.u32 18, %v4068_v42 }
 0x166   : > { %1866 = vst.msk [vmem:[#allocation2 + $0x50] sm:$0xff] %vm216_vm0, %v1830_v13  ;;  %v2236_v26 = vadd.f32 %v5676_v5, %v1952_v16  ;;  %v1950_v8 = vld [vmem:[#allocation2 + $0x20] sm:$0xff]  ;;  %v1831_v27 = vadd.f32 %v5641_v6, %v1547_v17  ;;  %v1712_v28 = vpop.f32.mrb[63].mxu1  ;;  %v6823_v5 = vmul.u32.u64.low 3817748708, %v6817_v46  ;;  %v6824_v10 = vmul.u32.u64.high 3817748708, %v6817_v46, %v6823_v5  ;;  %v1555_v6 = vld [vmem:[#allocation2 + $0x98] sm:$0xff] }
 0x167   : > { %1864 = vst.msk [vmem:[#allocation2 + $0x40] sm:$0xff] %vm216_vm0, %v1828_v60  ;;  %v2234_v29 = vadd.f32 %v2103_v12, %v1950_v8  ;;  %v1953_v30 = vld [vmem:[#allocation2 + $0x38] sm:$0xff]  ;;  %v1829_v22 = vadd.f32 %v1712_v28, %v1545_v18  ;;  %v4079_v13 = vshrl.u32 %v6792_v43, 4  ;;  %v6829_v8 = vadd.s32 32, %v6777_v25 }
 0x168   : > { %2272 = vst.msk [vmem:[#allocation2 + $0x30] sm:$0xff] %vm216_vm0, %v2236_v26  ;;  %1867 = vst.msk [vmem:[#allocation2 + $0x58] sm:$0xff] %vm216_vm0, %v1831_v27  ;;  %v2237_v33 = vadd.f32 %v5677_v15, %v1953_v30  ;;  %v1951_v35 = vld [vmem:[#allocation2 + $0x28] sm:$0xff] }
 0x169   : > { %2270 = vst.msk [vmem:[#allocation2 + $0x20] sm:$0xff] %vm216_vm0, %v2234_v29  ;;  %1865 = vst.msk [vmem:[#allocation2 + $0x48] sm:$0xff] %vm216_vm0, %v1829_v22  ;;  %v2235_v37 = vadd.f32 %v2106_v21, %v1951_v35  ;;  %v1553_v29 = vld [vmem:[#allocation2 + $0x88] sm:$0xff]  ;;  %v4057_v22 = vshrl.u32 %v6803_v0, 4 }
 0x16a   : > { %2273 = vst.msk [vmem:[#allocation2 + $0x38] sm:$0xff] %vm216_vm0, %v2237_v33  ;;  %v5680_v38 = vpop.f32.mrb[64].mxu0 }
 0x16b   : > { %2271 = vst.msk [vmem:[#allocation2 + $0x28] sm:$0xff] %vm216_vm0, %v2235_v37  ;;  %v5644_v40 = vpop.f32.mrb[64].mxu1  ;;  %v2119_v41 = vpop.f32.mrb[65].mxu0 }
 0x16c   : > { %v1834_v45 = vadd.f32 %v5644_v40, %v1550_v39  ;;  %v1725_v49 = vpop.f32.mrb[65].mxu1  ;;  %v5681_v50 = vpop.f32.mrb[66].mxu0  ;;  %v4090_v39 = vshrl.u32 %v6808_v3, 4 }
 0x16d   : > { %v1956_v52 = vld [vmem:[#allocation2 + $0x50] sm:$0xff]  ;;  %v1832_v53 = vadd.f32 %v1725_v49, %v1548_v47  ;;  %v5645_v55 = vpop.f32.mrb[66].mxu1  ;;  %v2122_v56 = vpop.f32.mrb[67].mxu0  ;;  %v6842_v47 = vmul.u32.u64.low 3817748708, %v6829_v8  ;;  %v6843_v49 = vmul.u32.u64.high 3817748708, %v6829_v8, %v6842_v47 }
 0x16e   : > { %1870 = vst.msk [vmem:[#allocation2 + $0x70] sm:$0xff] %vm216_vm0, %v1834_v45  ;;  %v2240_v57 = vadd.f32 %v5680_v38, %v1956_v52  ;;  %v1954_v59 = vld [vmem:[#allocation2 + $0x40] sm:$0xff]  ;;  %v1835_v61 = vadd.f32 %v5645_v55, %v1551_v54  ;;  %v1728_v62 = vpop.f32.mrb[67].mxu1  ;;  %v4080_v38 = vmul.u32 18, %v4079_v13  ;;  %v4123_v45 = vshrl.u32 %v6824_v10, 4  ;;  %v1558_v52 = vld [vmem:[#allocation2 + $0xb0] sm:$0xff] }
 0x16f   : > { %1868 = vst.msk [vmem:[#allocation2 + $0x60] sm:$0xff] %vm216_vm0, %v1832_v53  ;;  %v2238_v1 = vadd.f32 %v2119_v41, %v1954_v59  ;;  %v1957_v19 = vld [vmem:[#allocation2 + $0x58] sm:$0xff]  ;;  %v1833_v34 = vadd.f32 %v1728_v62, %v1549_v20 }
 0x170   : > { %2276 = vst.msk [vmem:[#allocation2 + $0x50] sm:$0xff] %vm216_vm0, %v2240_v57  ;;  %1871 = vst.msk [vmem:[#allocation2 + $0x78] sm:$0xff] %vm216_vm0, %v1835_v61  ;;  %v2241_v4 = vadd.f32 %v5681_v50, %v1957_v19  ;;  %v1955_v23 = vld [vmem:[#allocation2 + $0x48] sm:$0xff]  ;;  %v6848_v55 = vsub.s32 %v6782_v32, %v4080_v38  ;;  %v4091_v57 = vmul.u32 18, %v4090_v39  ;;  %v1556_v61 = vld [vmem:[#allocation2 + $0xa0] sm:$0xff]  ;;  %v4124_v0 = vmul.u32 18, %v4123_v45 }
 0x171   : > { %2274 = vst.msk [vmem:[#allocation2 + $0x40] sm:$0xff] %vm216_vm0, %v2238_v1  ;;  %1869 = vst.msk [vmem:[#allocation2 + $0x68] sm:$0xff] %vm216_vm0, %v1833_v34  ;;  %v2239_v7 = vadd.f32 %v2122_v56, %v1955_v23  ;;  %v4058_v56 = vmul.u32 18, %v4057_v22  ;;  %v1559_v34 = vld [vmem:[#allocation2 + $0xb8] sm:$0xff] }
 0x172   : > { %2277 = vst.msk [vmem:[#allocation2 + $0x58] sm:$0xff] %vm216_vm0, %v2241_v4  ;;  %v5684_v9 = vpop.f32.mrb[68].mxu0  ;;  %v6851_v4 = vadd.s32 56, %v6777_v25  ;;  %vm4449_vm1 = vcmp.ne.s32.totalorder %v6848_v55, 0  ;;  %vm4485_vm2 = vcmp.lt.s32.totalorder %v6848_v55, 0 }
 0x173   : > { %2275 = vst.msk [vmem:[#allocation2 + $0x48] sm:$0xff] %vm216_vm0, %v2239_v7  ;;  %v5648_v12 = vpop.f32.mrb[68].mxu1  ;;  %v2135_v48 = vpop.f32.mrb[69].mxu0  ;;  %vm6903_vm8 = vmand %vm4485_vm2, %vm4449_vm1 }
 0x174   : > { %v1838_v58 = vadd.f32 %v5648_v12, %v1554_v11  ;;  %v1741_v15 = vpop.f32.mrb[69].mxu1  ;;  %v5685_v16 = vpop.f32.mrb[70].mxu0  ;;  %v6860_v12 = vsub.s32 %v6777_v25, %v4058_v56 }
 0x175   : > { %v1960_v60 = vld [vmem:[#allocation2 + $0x70] sm:$0xff]  ;;  %v1836_v17 = vadd.f32 %v1741_v15, %v1552_v14  ;;  %v5649_v21 = vpop.f32.mrb[70].mxu1  ;;  %v2138_v26 = vpop.f32.mrb[71].mxu0  ;;  %v6868_v14 = vsub.s32 %v6798_v51, %v4069_v63  ;;  %v6871_v15 = vsub.s32 %v6817_v46, %v4124_v0  ;;  %v1560_v51 = vld [vmem:[#allocation2 + $0xc0] sm:$0xff] }
 0x176   : > { %1874 = vst.msk [vmem:[#allocation2 + $0x90] sm:$0xff] %vm216_vm0, %v1838_v58  ;;  %v2244_v27 = vadd.f32 %v5684_v9, %v1960_v60  ;;  %v1958_v18 = vld [vmem:[#allocation2 + $0x60] sm:$0xff]  ;;  %v1839_v28 = vadd.f32 %v5649_v21, %v1555_v6  ;;  %v1744_v30 = vpop.f32.mrb[71].mxu1  ;;  %v6855_v9 = vadd.s32 40, %v6777_v25  ;;  %v6865_v58 = vsub.s32 %v6795_v44, %v4091_v57  ;;  %v1562_v60 = vld [vmem:[#allocation2 + $0xd0] sm:$0xff] }
 0x177   : > { %1872 = vst.msk [vmem:[#allocation2 + $0x80] sm:$0xff] %vm216_vm0, %v1836_v17  ;;  %v2242_v33 = vadd.f32 %v2135_v48, %v1958_v18  ;;  %v1961_v35 = vld [vmem:[#allocation2 + $0x78] sm:$0xff]  ;;  %v1837_v37 = vadd.f32 %v1744_v30, %v1553_v29  ;;  %v4101_v17 = vshrl.u32 %v6843_v49, 4  ;;  %v4557_v29 = vadd.s32 18, %v6848_v55 }
 0x178   : > { %2280 = vst.msk [vmem:[#allocation2 + $0x70] sm:$0xff] %vm216_vm0, %v2244_v27  ;;  %1875 = vst.msk [vmem:[#allocation2 + $0x98] sm:$0xff] %vm216_vm0, %v1839_v28  ;;  %v2245_v40 = vadd.f32 %v5685_v16, %v1961_v35  ;;  %v1959_v41 = vld [vmem:[#allocation2 + $0x68] sm:$0xff]  ;;  %v6877_v6 = vmul.u32.u64.low 3817748708, %v6851_v4  ;;  %v6878_v21 = vmul.u32.u64.high 3817748708, %v6851_v4, %v6877_v6  ;;  %v6887_v27 = vadd.s32 80, %v6777_v25 }
 0x179   : > { %2278 = vst.msk [vmem:[#allocation2 + $0x60] sm:$0xff] %vm216_vm0, %v2242_v33  ;;  %1873 = vst.msk [vmem:[#allocation2 + $0x88] sm:$0xff] %vm216_vm0, %v1837_v37  ;;  %v2243_v43 = vadd.f32 %v2138_v26, %v1959_v41  ;;  %v6883_v46 = vmul.u32.u64.low 3817748708, %v6855_v9  ;;  %v6884_v26 = vmul.u32.u64.high 3817748708, %v6855_v9, %v6883_v46  ;;  %vm4447_vm3 = vcmp.ne.s32.totalorder %v6860_v12, 0  ;;  %v1563_v35 = vld [vmem:[#allocation2 + $0xd8] sm:$0xff] }
 0x17a   : > { %2281 = vst.msk [vmem:[#allocation2 + $0x78] sm:$0xff] %vm216_vm0, %v2245_v40  ;;  %v5688_v50 = vpop.f32.mrb[72].mxu0  ;;  %vm4483_vm4 = vcmp.lt.s32.totalorder %v6860_v12, 0  ;;  %v6894_v30 = vadd.s32 18, %v6860_v12  ;;  %vm4450_vm5 = vcmp.ne.s32.totalorder %v6865_v58, 0  ;;  %vm4486_vm6 = vcmp.lt.s32.totalorder %v6865_v58, 0 }
 0x17b   : > { %2279 = vst.msk [vmem:[#allocation2 + $0x68] sm:$0xff] %vm216_vm0, %v2243_v43  ;;  %v5652_v53 = vpop.f32.mrb[72].mxu1  ;;  %v2151_v54 = vpop.f32.mrb[73].mxu0  ;;  %vm4448_vm7 = vcmp.ne.s32.totalorder %v6868_v14, 0  ;;  %vm4484_vm9 = vcmp.lt.s32.totalorder %v6868_v14, 0  ;;  %vm4453_vm10 = vcmp.ne.s32.totalorder %v6871_v15, 0  ;;  %vm6919_vm11 = vmand %vm4483_vm4, %vm4447_vm3  ;;  %v4593_v0 = vsel %vm6903_vm8, %v4557_v29, %v6848_v55 }
 0x17c   : > { %v1842_v59 = vadd.f32 %v5652_v53, %v1558_v52  ;;  %v1757_v20 = vpop.f32.mrb[73].mxu1  ;;  %v5689_v62 = vpop.f32.mrb[74].mxu0  ;;  %v4102_v43 = vmul.u32 18, %v4101_v17  ;;  %vm4489_vm12 = vcmp.lt.s32.totalorder %v6871_v15, 0  ;;  %vm6934_vm13 = vmand %vm4486_vm6, %vm4450_vm5  ;;  %vm6971_vm1 = vcmp.lt.s32.totalorder %v4593_v0, 16  ;;  %v1571_v55 = vld [vmem:[#allocation2 + $0x118] sm:$0xff] }
 0x17d   : > { %v1964_v1 = vld [vmem:[#allocation2 + $0x90] sm:$0xff]  ;;  %v1840_v19 = vadd.f32 %v1757_v20, %v1556_v61  ;;  %v5653_v2 = vpop.f32.mrb[74].mxu1  ;;  %v2154_v3 = vpop.f32.mrb[75].mxu0  ;;  %v4134_v20 = vshrl.u32 %v6878_v21, 4  ;;  %vm6948_vm14 = vmand %vm4484_vm9, %vm4448_vm7 }
 0x17e   : > { %1878 = vst.msk [vmem:[#allocation2 + $0xb0] sm:$0xff] %vm216_vm0, %v1842_v59  ;;  %v2248_v32 = vadd.f32 %v5688_v50, %v1964_v1  ;;  %v1962_v23 = vld [vmem:[#allocation2 + $0x80] sm:$0xff]  ;;  %v1843_v31 = vadd.f32 %v5653_v2, %v1559_v34  ;;  %v1760_v7 = vpop.f32.mrb[75].mxu1  ;;  %v1561_v50 = vld [vmem:[#allocation2 + $0xc8] sm:$0xff]  ;;  %v4112_v34 = vshrl.u32 %v6884_v26, 4  ;;  %vm6963_vm15 = vmand %vm4489_vm12, %vm4453_vm10 }
 0x17f   : > { %1876 = vst.msk [vmem:[#allocation2 + $0xa0] sm:$0xff] %vm216_vm0, %v1840_v19  ;;  %v2246_v5 = vadd.f32 %v2151_v54, %v1962_v23  ;;  %v1965_v10 = vld [vmem:[#allocation2 + $0x98] sm:$0xff]  ;;  %v1841_v11 = vadd.f32 %v1760_v7, %v1557_v36  ;;  %v6911_v53 = vmul.u32.u64.low 3817748708, %v6887_v27  ;;  %v6912_v54 = vmul.u32.u64.high 3817748708, %v6887_v27, %v6911_v53  ;;  %v1566_v7 = vld [vmem:[#allocation2 + $0xf0] sm:$0xff] }
 0x180   : > { %2284 = vst.msk [vmem:[#allocation2 + $0x90] sm:$0xff] %vm216_vm0, %v2248_v32  ;;  %1879 = vst.msk [vmem:[#allocation2 + $0xb8] sm:$0xff] %vm216_vm0, %v1843_v31  ;;  %v2249_v48 = vadd.f32 %v5689_v62, %v1965_v10  ;;  %v1963_v13 = vld [vmem:[#allocation2 + $0x88] sm:$0xff]  ;;  %v6939_v19 = vadd.s32 18, %v6865_v58  ;;  %v6956_v32 = vadd.s32 18, %v6871_v15  ;;  %v6968_v36 = vsub.s32 %v6829_v8, %v4102_v43  ;;  %v1567_v26 = vld [vmem:[#allocation2 + $0xf8] sm:$0xff] }
 0x181   : > { %2282 = vst.msk [vmem:[#allocation2 + $0x80] sm:$0xff] %vm216_vm0, %v2246_v5  ;;  %1877 = vst.msk [vmem:[#allocation2 + $0xa8] sm:$0xff] %vm216_vm0, %v1841_v11  ;;  %v2247_v16 = vadd.f32 %v2154_v3, %v1963_v13  ;;  %v6953_v3 = vadd.s32 18, %v6868_v14  ;;  %v4135_v13 = vmul.u32 18, %v4134_v20  ;;  %v4113_v21 = vmul.u32 18, %v4112_v34  ;;  %v1568_v53 = vld [vmem:[#allocation2 + $0x100] sm:$0xff] }
 0x182   : > { %2285 = vst.msk [vmem:[#allocation2 + $0x98] sm:$0xff] %vm216_vm0, %v2249_v48  ;;  %v5692_v44 = vpop.f32.mrb[76].mxu0  ;;  %v4591_v48 = vsel %vm6919_vm11, %v6894_v30, %v6860_v12  ;;  %v4594_v6 = vsel %vm6934_vm13, %v6939_v19, %v6865_v58  ;;  %v4597_v29 = vsel %vm6963_vm15, %v6956_v32, %v6871_v15  ;;  %v6995_v58 = vadd.s32 88, %v6777_v25 }
 0x183   : > { %2283 = vst.msk [vmem:[#allocation2 + $0x88] sm:$0xff] %vm216_vm0, %v2247_v16  ;;  %v5656_v18 = vpop.f32.mrb[76].mxu1  ;;  %v2167_v28 = vpop.f32.mrb[77].mxu0  ;;  %v4592_v12 = vsel %vm6948_vm14, %v6953_v3, %v6868_v14  ;;  %vm4451_vm2 = vcmp.ne.s32.totalorder %v6968_v36, 0  ;;  %vm4487_vm3 = vcmp.lt.s32.totalorder %v6968_v36, 0  ;;  %v7003_v15 = vsub.s32 %v6851_v4, %v4135_v13  ;;  %v1570_v4 = vld [vmem:[#allocation2 + $0x110] sm:$0xff] }
 0x184   : > { %v1846_v22 = vadd.f32 %v5656_v18, %v1562_v60  ;;  %v1773_v33 = vpop.f32.mrb[77].mxu1  ;;  %v5693_v37 = vpop.f32.mrb[78].mxu0  ;;  %v1564_v60 = vld [vmem:[#allocation2 + $0xe0] sm:$0xff]  ;;  %v7008_v43 = vsub.s32 %v6855_v9, %v4113_v21  ;;  %vm7025_vm4 = vcmp.lt.s32.totalorder %v4591_v48, 16  ;;  %vm7029_vm5 = vcmp.lt.s32.totalorder %v4594_v6, 16  ;;  %vm7047_vm8 = vmand %vm4487_vm3, %vm4451_vm2 }
 0x185   : > { %v1968_v38 = vld [vmem:[#allocation2 + $0xb0] sm:$0xff]  ;;  %v1844_v39 = vadd.f32 %v1773_v33, %v1560_v51  ;;  %v5657_v40 = vpop.f32.mrb[78].mxu1  ;;  %v2170_v41 = vpop.f32.mrb[79].mxu0  ;;  %vm7035_vm6 = vcmp.lt.s32.totalorder %v4592_v12, 16  ;;  %vm7039_vm7 = vcmp.lt.s32.totalorder %v4597_v29, 16  ;;  %vm4454_vm9 = vcmp.ne.s32.totalorder %v7003_v15, 0 }
 0x186   : > { %1882 = vst.msk [vmem:[#allocation2 + $0xd0] sm:$0xff] %vm216_vm0, %v1846_v22  ;;  %v2252_v45 = vadd.f32 %v5692_v44, %v1968_v38  ;;  %v1966_v47 = vld [vmem:[#allocation2 + $0xa0] sm:$0xff]  ;;  %v1847_v49 = vadd.f32 %v5657_v40, %v1563_v35  ;;  %v1776_v52 = vpop.f32.mrb[79].mxu1  ;;  %v6984_v44 = vadd.s32 64, %v6777_v25  ;;  %v1565_v35 = vld [vmem:[#allocation2 + $0xe8] sm:$0xff]  ;;  %v4167_v38 = vshrl.u32 %v6912_v54, 4 }
 0x187   : > { %1880 = vst.msk [vmem:[#allocation2 + $0xc0] sm:$0xff] %vm216_vm0, %v1844_v39  ;;  %v2250_v56 = vadd.f32 %v2167_v28, %v1966_v47  ;;  %v1969_v57 = vld [vmem:[#allocation2 + $0xb8] sm:$0xff]  ;;  %v1845_v59 = vadd.f32 %v1776_v52, %v1561_v50  ;;  %v7019_v50 = vsel %vm6971_vm1, 1.0, %v8472_v24  ;;  %v7022_v52 = vadd.s32 72, %v6777_v25 }
 0x188   : > { %2288 = vst.msk [vmem:[#allocation2 + $0xb0] sm:$0xff] %vm216_vm0, %v2252_v45  ;;  %1883 = vst.msk [vmem:[#allocation2 + $0xd8] sm:$0xff] %vm216_vm0, %v1847_v49  ;;  %v2253_v62 = vadd.f32 %v5693_v37, %v1969_v57  ;;  %v1967_v63 = vld [vmem:[#allocation2 + $0xa8] sm:$0xff]  ;;  %v7011_v45 = vmul.u32.u64.low 3817748708, %v6984_v44  ;;  %v7012_v47 = vmul.u32.u64.high 3817748708, %v6984_v44, %v7011_v45  ;;  %v4559_v57 = vadd.s32 18, %v6968_v36 }
 0x189   : > { %2286 = vst.msk [vmem:[#allocation2 + $0xa0] sm:$0xff] %vm216_vm0, %v2250_v56  ;;  %1881 = vst.msk [vmem:[#allocation2 + $0xc8] sm:$0xff] %vm216_vm0, %v1845_v59  ;;  %v2251_v2 = vadd.f32 %v2170_v41, %v1967_v63  ;;  %v4168_v59 = vmul.u32 18, %v4167_v38  ;;  %v7052_v1 = vmul.u32.u64.low 3817748708, %v6995_v58  ;;  %v7053_v19 = vmul.u32.u64.high 3817748708, %v6995_v58, %v7052_v1  ;;  %v2356_v45 = vld [vmem:[#allocation2] sm:$0xff] }
 0x18a   : > { %2289 = vst.msk [vmem:[#allocation2 + $0xb8] sm:$0xff] %vm216_vm0, %v2253_v62  ;;  %v5696_v23 = vpop.f32.mrb[80].mxu0  ;;  %vm4490_vm10 = vcmp.lt.s32.totalorder %v7003_v15, 0  ;;  %vm4452_vm11 = vcmp.ne.s32.totalorder %v7008_v43, 0  ;;  %vm4488_vm12 = vcmp.lt.s32.totalorder %v7008_v43, 0  ;;  %v4145_v29 = vshrl.u32 %v7012_v47, 4 }
 0x18b   : > { %2287 = vst.msk [vmem:[#allocation2 + $0xa8] sm:$0xff] %vm216_vm0, %v2251_v2  ;;  %v5660_v5 = vpop.f32.mrb[80].mxu1  ;;  %v2183_v10 = vpop.f32.mrb[81].mxu0  ;;  %vm7075_vm13 = vmand %vm4490_vm10, %vm4454_vm9  ;;  %v7202_v12 = vadd.s32 152, %v6777_v25 }
 0x18c   : > { %v1850_v16 = vadd.f32 %v5660_v5, %v1566_v7  ;;  %v1789_v17 = vpop.f32.mrb[81].mxu1  ;;  %v5697_v8 = vpop.f32.mrb[82].mxu0  ;;  %vm7092_vm14 = vmand %vm4488_vm12, %vm4452_vm11 }
 0x18d   : > { %v1972_v51 = vld [vmem:[#allocation2 + $0xd0] sm:$0xff]  ;;  %v1848_v46 = vadd.f32 %v1789_v17, %v1564_v60  ;;  %v5661_v18 = vpop.f32.mrb[82].mxu1  ;;  %v2186_v28 = vpop.f32.mrb[83].mxu0  ;;  %v4595_v17 = vsel %vm7047_vm8, %v4559_v57, %v6968_v36  ;;  %v4560_v36 = vadd.s32 18, %v7008_v43  ;;  %v2359_v57 = vld [vmem:[#allocation2 + $0x18] sm:$0xff] }
 0x18e   : > { %1886 = vst.msk [vmem:[#allocation2 + $0xf0] sm:$0xff] %vm216_vm0, %v1850_v16  ;;  %v2256_v30 = vadd.f32 %v5696_v23, %v1972_v51  ;;  %v1970_v22 = vld [vmem:[#allocation2 + $0xc0] sm:$0xff]  ;;  %v1851_v33 = vadd.f32 %v5661_v18, %v1567_v26  ;;  %v1792_v37 = vpop.f32.mrb[83].mxu1  ;;  %v1569_v16 = vld [vmem:[#allocation2 + $0x108] sm:$0xff]  ;;  %v4562_v26 = vadd.s32 18, %v7003_v15  ;;  %vm7121_vm15 = vcmp.lt.s32.totalorder %v4595_v17, 16 }
 0x18f   : > { %1884 = vst.msk [vmem:[#allocation2 + $0xe0] sm:$0xff] %vm216_vm0, %v1848_v46  ;;  %v2254_v14 = vadd.f32 %v2183_v10, %v1970_v22  ;;  %v1973_v39 = vld [vmem:[#allocation2 + $0xd8] sm:$0xff]  ;;  %v1849_v40 = vadd.f32 %v1792_v37, %v1565_v35  ;;  %v7060_v5 = vmul.u32.u64.low 3817748708, %v7022_v52  ;;  %v7061_v10 = vmul.u32.u64.high 3817748708, %v7022_v52, %v7060_v5 }
 0x190   : > { %2292 = vst.msk [vmem:[#allocation2 + $0xd0] sm:$0xff] %vm216_vm0, %v2256_v30  ;;  %1887 = vst.msk [vmem:[#allocation2 + $0xf8] sm:$0xff] %vm216_vm0, %v1851_v33  ;;  %v2257_v41 = vadd.f32 %v5697_v8, %v1973_v39  ;;  %v1971_v42 = vld [vmem:[#allocation2 + $0xc8] sm:$0xff]  ;;  %v7068_v8 = vsub.s32 %v6887_v27, %v4168_v59  ;;  %v7098_v30 = vadd.s32 112, %v6777_v25  ;;  %v7105_v33 = vsel %vm7029_vm5, 1.0, %v8472_v24 }
 0x191   : > { %2290 = vst.msk [vmem:[#allocation2 + $0xc0] sm:$0xff] %vm216_vm0, %v2254_v14  ;;  %1885 = vst.msk [vmem:[#allocation2 + $0xe8] sm:$0xff] %vm216_vm0, %v1849_v40  ;;  %v2255_v49 = vadd.f32 %v2186_v28, %v1971_v42  ;;  %v7086_v28 = vsel %vm7025_vm4, 1.0, %v8472_v24  ;;  %v7110_v35 = vsel %vm7035_vm6, 1.0, %v8472_v24  ;;  %v7113_v37 = vadd.s32 96, %v6777_v25  ;;  %v2358_v40 = vld [vmem:[#allocation2 + $0x10] sm:$0xff] }
 0x192   : > { %2293 = vst.msk [vmem:[#allocation2 + $0xd8] sm:$0xff] %vm216_vm0, %v2257_v41  ;;  %v5700_v9 = vpop.f32.mrb[84].mxu0  ;;  %v7119_v14 = vsel %vm7039_vm7, 1.0, %v8472_v24  ;;  %vm4457_vm1 = vcmp.ne.s32.totalorder %v7068_v8, 0  ;;  %vm4493_vm2 = vcmp.lt.s32.totalorder %v7068_v8, 0  ;;  %v4598_v47 = vsel %vm7075_vm13, %v4562_v26, %v7003_v15 }
 0x193   : > { %2291 = vst.msk [vmem:[#allocation2 + $0xc8] sm:$0xff] %vm216_vm0, %v2255_v49  ;;  %v5664_v61 = vpop.f32.mrb[84].mxu1  ;;  %v2199_v20 = vpop.f32.mrb[85].mxu0  ;;  %v4596_v49 = vsel %vm7092_vm14, %v4560_v36, %v7008_v43  ;;  %v4146_v59 = vmul.u32 18, %v4145_v29  ;;  %vm7144_vm3 = vmand %vm4493_vm2, %vm4457_vm1  ;;  %v4156_v1 = vshrl.u32 %v7061_v10, 4  ;;  %vm7154_vm4 = vcmp.lt.s32.totalorder %v4598_v47, 16 }
 0x194   : > { %v1854_v34 = vadd.f32 %v5664_v61, %v1570_v4  ;;  %v1805_v2 = vpop.f32.mrb[85].mxu1  ;;  %v5701_v3 = vpop.f32.mrb[86].mxu0  ;;  %v4565_v4 = vadd.s32 18, %v7068_v8  ;;  %vm7162_vm5 = vcmp.lt.s32.totalorder %v4596_v49, 16  ;;  %v7171_v17 = vsel %vm7121_vm15, 1.0, %v8472_v24  ;;  %v2362_v29 = vld [vmem:[#allocation2 + $0x30] sm:$0xff] }
 0x195   : > { %v1976_v32 = vld [vmem:[#allocation2 + $0xf0] sm:$0xff]  ;;  %v1852_v23 = vadd.f32 %v1805_v2, %v1568_v53  ;;  %v5665_v31 = vpop.f32.mrb[86].mxu1  ;;  %v2202_v7 = vpop.f32.mrb[87].mxu0  ;;  %v4157_v46 = vmul.u32 18, %v4156_v1  ;;  %v7182_v26 = vadd.s32 104, %v6777_v25  ;;  %v7185_v36 = vadd.s32 144, %v6777_v25 }
 0x196   : > { %1890 = vst.msk [vmem:[#allocation2 + $0x110] sm:$0xff] %vm216_vm0, %v1854_v34  ;;  %v2260_v11 = vadd.f32 %v5700_v9, %v1976_v32  ;;  %v1974_v48 = vld [vmem:[#allocation2 + $0xe0] sm:$0xff]  ;;  %v1855_v13 = vadd.f32 %v5665_v31, %v1571_v55  ;;  %v1808_v60 = vpop.f32.mrb[87].mxu1  ;;  %v4178_v9 = vshrl.u32 %v7053_v19, 4  ;;  %v2357_v32 = vld [vmem:[#allocation2 + $0x8] sm:$0xff]  ;;  %v7280_v39 = vadd.s32 160, %v6777_v25 }
 0x197   : > { %1888 = vst.msk [vmem:[#allocation2 + $0x100] sm:$0xff] %vm216_vm0, %v1852_v23  ;;  %v2258_v6 = vadd.f32 %v2199_v20, %v1974_v48  ;;  %v1977_v21 = vld [vmem:[#allocation2 + $0xf8] sm:$0xff]  ;;  %v1853_v51 = vadd.f32 %v1808_v60, %v1569_v16  ;;  %v7137_v61 = vmul.u32.u64.low 3817748708, %v7098_v30  ;;  %v7138_v20 = vmul.u32.u64.high 3817748708, %v7098_v30, %v7137_v61  ;;  %v2360_v47 = vld [vmem:[#allocation2 + $0x20] sm:$0xff]  ;;  %v2361_v43 = vld [vmem:[#allocation2 + $0x28] sm:$0xff] }
 0x198   : > { %2296 = vst.msk [vmem:[#allocation2 + $0xf0] sm:$0xff] %vm216_vm0, %v2260_v11  ;;  %1891 = vst.msk [vmem:[#allocation2 + $0x118] sm:$0xff] %vm216_vm0, %v1855_v13  ;;  %v2261_v27 = vadd.f32 %v5701_v3, %v1977_v21  ;;  %v1975_v18 = vld [vmem:[#allocation2 + $0xe8] sm:$0xff]  ;;  %v7150_v19 = vmul.u32.u64.low 3817748708, %v7113_v37  ;;  %v7151_v34 = vmul.u32.u64.high 3817748708, %v7113_v37, %v7150_v19  ;;  %v4179_v13 = vmul.u32 18, %v4178_v9 }
 0x199   : > { %2294 = vst.msk [vmem:[#allocation2 + $0xe0] sm:$0xff] %vm216_vm0, %v2258_v6  ;;  %1889 = vst.msk [vmem:[#allocation2 + $0x108] sm:$0xff] %vm216_vm0, %v1853_v51  ;;  %v2259_v22 = vadd.f32 %v2202_v7, %v1975_v18  ;;  %v7159_v7 = vadd.s32 120, %v6777_v25  ;;  %v4601_v6 = vsel %vm7144_vm3, %v4565_v4, %v7068_v8  ;;  %v7177_v21 = vsub.s32 %v6984_v44, %v4146_v59 }
 0x19a   : > { %2297 = vst.msk [vmem:[#allocation2 + $0xf8] sm:$0xff] %vm216_vm0, %v2261_v27  ;;  %v5704_v38 = vpop.f32.mrb[88].mxu0  ;;  %v7191_v44 = vsel %vm7154_vm4, 1.0, %v8472_v24  ;;  %v7196_v8 = vsel %vm7162_vm5, 1.0, %v8472_v24  ;;  %v7199_v18 = vadd.s32 128, %v6777_v25  ;;  %vm7205_vm6 = vcmp.lt.s32.totalorder %v4601_v6, 16 }
 0x19b   : > { %2295 = vst.msk [vmem:[#allocation2 + $0xe8] sm:$0xff] %vm216_vm0, %v2259_v22  ;;  %v5712_v41 = vpop.f32.mrb[88].mxu1  ;;  %v2215_v42 = vpop.f32.mrb[89].mxu0  ;;  %vm4455_vm7 = vcmp.ne.s32.totalorder %v7177_v21, 0  ;;  %vm4491_vm8 = vcmp.lt.s32.totalorder %v7177_v21, 0  ;;  %v4211_v9 = vshrl.u32 %v7138_v20, 4  ;;  %v7221_v61 = vsub.s32 %v7022_v52, %v4157_v46 }
 0x19c   : > { %v2642_v53 = vadd.f32 %v5712_v41, %v2358_v40  ;;  %v2497_v54 = vpop.f32.mrb[89].mxu1  ;;  %v5705_v56 = vpop.f32.mrb[90].mxu0  ;;  %v7210_v40 = vsub.s32 %v6995_v58, %v4179_v13  ;;  %v4563_v59 = vadd.s32 18, %v7177_v21  ;;  %vm7234_vm9 = vmand %vm4491_vm8, %vm4455_vm7 }
 0x19d   : > { %v1980_v62 = vld [vmem:[#allocation2 + $0x110] sm:$0xff]  ;;  %v2640_v63 = vadd.f32 %v2497_v54, %v2356_v45  ;;  %v5713_v15 = vpop.f32.mrb[90].mxu1  ;;  %v2218_v0 = vpop.f32.mrb[91].mxu0  ;;  %v7226_v20 = vmul.u32.u64.low 3817748708, %v7182_v26  ;;  %v7227_v19 = vmul.u32.u64.high 3817748708, %v7182_v26, %v7226_v20  ;;  %vm4456_vm13 = vcmp.ne.s32.totalorder %v7221_v61, 0 }
 0x19e   : > { %v2264_v2 = vadd.f32 %v5704_v38, %v1980_v62  ;;  %2678 = vst.msk [vmem:[#allocation2 + $0x10] sm:$0xff] %vm216_vm0, %v2642_v53  ;;  %v1978_v55 = vld [vmem:[#allocation2 + $0x100] sm:$0xff]  ;;  %v2643_v3 = vadd.f32 %v5713_v15, %v2359_v57  ;;  %v2500_v23 = vpop.f32.mrb[91].mxu1  ;;  %v4189_v62 = vshrl.u32 %v7151_v34, 4  ;;  %vm4458_vm10 = vcmp.ne.s32.totalorder %v7210_v40, 0 }
 0x19f   : > { %v2262_v5 = vadd.f32 %v2215_v42, %v1978_v55  ;;  %2676 = vst.msk [vmem:[#allocation2] sm:$0xff] %vm216_vm0, %v2640_v63  ;;  %v1981_v10 = vld [vmem:[#allocation2 + $0x118] sm:$0xff]  ;;  %v2641_v11 = vadd.f32 %v2500_v23, %v2357_v32  ;;  %v7213_v41 = vmul.u32.u64.low 3817748708, %v7159_v7  ;;  %v7214_v42 = vmul.u32.u64.high 3817748708, %v7159_v7, %v7213_v41 }
 0x1a0   : > { %2300 = vst.msk [vmem:[#allocation2 + $0x110] sm:$0xff] %vm216_vm0, %v2264_v2  ;;  %v2265_v16 = vadd.f32 %v5705_v56, %v1981_v10  ;;  %2679 = vst.msk [vmem:[#allocation2 + $0x18] sm:$0xff] %vm216_vm0, %v2643_v3  ;;  %v1979_v60 = vld [vmem:[#allocation2 + $0x108] sm:$0xff]  ;;  %v2363_v56 = vld [vmem:[#allocation2 + $0x38] sm:$0xff]  ;;  %vm4494_vm11 = vcmp.lt.s32.totalorder %v7210_v40, 0  ;;  %v7245_v23 = vsel %vm7205_vm6, 1.0, %v8472_v24  ;;  %v4599_v6 = vsel %vm7234_vm9, %v4563_v59, %v7177_v21 }
 0x1a1   : > { %2298 = vst.msk [vmem:[#allocation2 + $0x100] sm:$0xff] %vm216_vm0, %v2262_v5  ;;  %v2263_v51 = vadd.f32 %v2218_v0, %v1979_v60  ;;  %2677 = vst.msk [vmem:[#allocation2 + $0x8] sm:$0xff] %vm216_vm0, %v2641_v11  ;;  %v7248_v31 = vadd.s32 18, %v7210_v40  ;;  %v4212_v5 = vmul.u32 18, %v4211_v9  ;;  %v4222_v11 = vshrl.u32 %v7214_v42, 4  ;;  %v2364_v42 = vld [vmem:[#allocation2 + $0x40] sm:$0xff] }
 0x1a2   : > { %2301 = vst.msk [vmem:[#allocation2 + $0x118] sm:$0xff] %vm216_vm0, %v2265_v16  ;;  %v5752_v27 = vpop.f32.mrb[92].mxu0  ;;  %v7254_v48 = vmul.u32.u64.low 3817748708, %v7185_v36  ;;  %v7255_v13 = vmul.u32.u64.high 3817748708, %v7185_v36, %v7254_v48  ;;  %v2366_v16 = vld [vmem:[#allocation2 + $0x50] sm:$0xff]  ;;  %vm7265_vm12 = vmand %vm4494_vm11, %vm4458_vm10  ;;  %vm4492_vm14 = vcmp.lt.s32.totalorder %v7221_v61, 0 }
 0x1a3   : > { %2299 = vst.msk [vmem:[#allocation2 + $0x108] sm:$0xff] %vm216_vm0, %v2263_v51  ;;  %v5716_v22 = vpop.f32.mrb[92].mxu1  ;;  %v2907_v38 = vpop.f32.mrb[93].mxu0  ;;  %v4190_v46 = vmul.u32 18, %v4189_v62  ;;  %v7274_v21 = vadd.s32 136, %v6777_v25  ;;  %vm7289_vm15 = vcmp.lt.s32.totalorder %v4599_v6, 16  ;;  %v4602_v62 = vsel %vm7265_vm12, %v7248_v31, %v7210_v40  ;;  %vm7301_vm1 = vmand %vm4492_vm14, %vm4456_vm13 }
 0x1a4   : > { %v2646_v45 = vadd.f32 %v5716_v22, %v2362_v29  ;;  %v2513_v49 = vpop.f32.mrb[93].mxu1  ;;  %v5753_v4 = vpop.f32.mrb[94].mxu0  ;;  %v4564_v22 = vadd.s32 18, %v7221_v61  ;;  %v4200_v40 = vshrl.u32 %v7227_v19, 4  ;;  %v4255_v48 = vshrl.u32 %v7255_v13, 4 }
 0x1a5   : > { %v2768_v53 = vld [vmem:[#allocation2 + $0x10] sm:$0xff]  ;;  %v2644_v54 = vadd.f32 %v2513_v49, %v2360_v47  ;;  %v5717_v57 = vpop.f32.mrb[94].mxu1  ;;  %v2910_v58 = vpop.f32.mrb[95].mxu0  ;;  %v7283_v49 = vsub.s32 %v7098_v30, %v4212_v5  ;;  %v7339_v13 = vsel %vm7289_vm15, 1.0, %v8472_v24  ;;  %vm7341_vm6 = vcmp.lt.s32.totalorder %v4602_v62, 16 }
 0x1a6   : > { %2682 = vst.msk [vmem:[#allocation2 + $0x30] sm:$0xff] %vm216_vm0, %v2646_v45  ;;  %v3052_v63 = vadd.f32 %v5752_v27, %v2768_v53  ;;  %v2766_v15 = vld [vmem:[#allocation2] sm:$0xff]  ;;  %v2647_v0 = vadd.f32 %v5717_v57, %v2363_v56  ;;  %v2516_v1 = vpop.f32.mrb[95].mxu1  ;;  %v2367_v56 = vld [vmem:[#allocation2 + $0x58] sm:$0xff]  ;;  %v4201_v51 = vmul.u32 18, %v4200_v40 }
 0x1a7   : > { %2680 = vst.msk [vmem:[#allocation2 + $0x20] sm:$0xff] %vm216_vm0, %v2644_v54  ;;  %v3050_v2 = vadd.f32 %v2907_v38, %v2766_v15  ;;  %v2769_v55 = vld [vmem:[#allocation2 + $0x18] sm:$0xff]  ;;  %v2645_v3 = vadd.f32 %v2516_v1, %v2361_v43  ;;  %v7277_v38 = vadd.s32 176, %v6777_v25  ;;  %v2365_v1 = vld [vmem:[#allocation2 + $0x48] sm:$0xff]  ;;  %vm4461_vm2 = vcmp.ne.s32.totalorder %v7283_v49, 0 }
 0x1a8   : > { %3088 = vst.msk [vmem:[#allocation2 + $0x10] sm:$0xff] %vm216_vm0, %v3052_v63  ;;  %2683 = vst.msk [vmem:[#allocation2 + $0x38] sm:$0xff] %vm216_vm0, %v2647_v0  ;;  %v3053_v34 = vadd.f32 %v5753_v4, %v2769_v55  ;;  %v2767_v32 = vld [vmem:[#allocation2 + $0x8] sm:$0xff]  ;;  %v7286_v4 = vmul.u32.u64.low 3817748708, %v7199_v18  ;;  %v7287_v9 = vmul.u32.u64.high 3817748708, %v7199_v18, %v7286_v4  ;;  %v4223_v63 = vmul.u32 18, %v4222_v11 }
 0x1a9   : > { %3086 = vst.msk [vmem:[#allocation2] sm:$0xff] %vm216_vm0, %v3050_v2  ;;  %2681 = vst.msk [vmem:[#allocation2 + $0x28] sm:$0xff] %vm216_vm0, %v2645_v3  ;;  %v3051_v10 = vadd.f32 %v2910_v58, %v2767_v32  ;;  %v7307_v2 = vsub.s32 %v7113_v37, %v4190_v46  ;;  %v4600_v37 = vsel %vm7301_vm1, %v4564_v22, %v7221_v61  ;;  %vm4497_vm3 = vcmp.lt.s32.totalorder %v7283_v49, 0 }
 0x1aa   : > { %3089 = vst.msk [vmem:[#allocation2 + $0x18] sm:$0xff] %vm216_vm0, %v3053_v34  ;;  %v5756_v60 = vpop.f32.mrb[96].mxu0  ;;  %v7312_v34 = vmul.u32.u64.low 3817748708, %v7202_v12  ;;  %v7313_v32 = vmul.u32.u64.high 3817748708, %v7202_v12, %v7312_v34  ;;  %v7325_v11 = vsub.s32 %v7159_v7, %v4223_v63  ;;  %v4569_v6 = vadd.s32 18, %v7283_v49  ;;  %vm7353_vm8 = vmand %vm4497_vm3, %vm4461_vm2 }
 0x1ab   : > { %3087 = vst.msk [vmem:[#allocation2 + $0x8] sm:$0xff] %vm216_vm0, %v3051_v10  ;;  %v5720_v27 = vpop.f32.mrb[96].mxu1  ;;  %v2923_v29 = vpop.f32.mrb[97].mxu0  ;;  %v2370_v10 = vld [vmem:[#allocation2 + $0x70] sm:$0xff]  ;;  %vm4459_vm4 = vcmp.ne.s32.totalorder %v7307_v2, 0  ;;  %vm4495_vm5 = vcmp.lt.s32.totalorder %v7307_v2, 0  ;;  %v7378_v40 = vsub.s32 %v7182_v26, %v4201_v51 }
 0x1ac   : > { %v2650_v41 = vadd.f32 %v5720_v27, %v2366_v16  ;;  %v2529_v45 = vpop.f32.mrb[97].mxu1  ;;  %v5757_v47 = vpop.f32.mrb[98].mxu0  ;;  %v7329_v16 = vadd.s32 184, %v6777_v25  ;;  %vm7345_vm7 = vcmp.lt.s32.totalorder %v4600_v37, 16  ;;  %vm7367_vm9 = vmand %vm4495_vm5, %vm4459_vm4  ;;  %vm4462_vm10 = vcmp.ne.s32.totalorder %v7325_v11, 0  ;;  %v2378_v27 = vld [vmem:[#allocation2 + $0xb0] sm:$0xff] }
 0x1ad   : > { %v2772_v53 = vld [vmem:[#allocation2 + $0x30] sm:$0xff]  ;;  %v2648_v54 = vadd.f32 %v2529_v45, %v2364_v42  ;;  %v5721_v57 = vpop.f32.mrb[98].mxu1  ;;  %v2926_v58 = vpop.f32.mrb[99].mxu0  ;;  %vm4498_vm11 = vcmp.lt.s32.totalorder %v7325_v11, 0  ;;  %v7382_v34 = vadd.s32 18, %v7325_v11  ;;  %v7390_v26 = vsel %vm7341_vm6, 1.0, %v8472_v24 }
 0x1ae   : > { %2686 = vst.msk [vmem:[#allocation2 + $0x50] sm:$0xff] %vm216_vm0, %v2650_v41  ;;  %v3056_v15 = vadd.f32 %v5756_v60, %v2772_v53  ;;  %v2770_v0 = vld [vmem:[#allocation2 + $0x20] sm:$0xff]  ;;  %v2651_v43 = vadd.f32 %v5721_v57, %v2367_v56  ;;  %v2532_v20 = vpop.f32.mrb[99].mxu1  ;;  %v4567_v41 = vadd.s32 18, %v7307_v2  ;;  %v4233_v53 = vshrl.u32 %v7287_v9, 4  ;;  %vm7399_vm12 = vmand %vm4498_vm11, %vm4462_vm10 }
 0x1af   : > { %2684 = vst.msk [vmem:[#allocation2 + $0x40] sm:$0xff] %vm216_vm0, %v2648_v54  ;;  %v3054_v55 = vadd.f32 %v2923_v29, %v2770_v0  ;;  %v2773_v3 = vld [vmem:[#allocation2 + $0x38] sm:$0xff]  ;;  %v2649_v52 = vadd.f32 %v2532_v20, %v2365_v1  ;;  %v2368_v60 = vld [vmem:[#allocation2 + $0x60] sm:$0xff]  ;;  %v7360_v54 = vmul.u32.u64.low 3817748708, %v7274_v21  ;;  %v7361_v56 = vmul.u32.u64.high 3817748708, %v7274_v21, %v7360_v54 }
 0x1b0   : > { %3092 = vst.msk [vmem:[#allocation2 + $0x30] sm:$0xff] %vm216_vm0, %v3056_v15  ;;  %2687 = vst.msk [vmem:[#allocation2 + $0x58] sm:$0xff] %vm216_vm0, %v2651_v43  ;;  %v3057_v31 = vadd.f32 %v5757_v47, %v2773_v3  ;;  %v2771_v5 = vld [vmem:[#allocation2 + $0x28] sm:$0xff]  ;;  %v2371_v47 = vld [vmem:[#allocation2 + $0x78] sm:$0xff]  ;;  %v4256_v9 = vmul.u32 18, %v4255_v48  ;;  %v4605_v20 = vsel %vm7353_vm8, %v4569_v6, %v7283_v49  ;;  %v4603_v49 = vsel %vm7367_vm9, %v4567_v41, %v7307_v2 }
 0x1b1   : > { %3090 = vst.msk [vmem:[#allocation2 + $0x20] sm:$0xff] %vm216_vm0, %v3054_v55  ;;  %2685 = vst.msk [vmem:[#allocation2 + $0x48] sm:$0xff] %vm216_vm0, %v2649_v52  ;;  %v3055_v19 = vadd.f32 %v2926_v58, %v2771_v5  ;;  %v2369_v43 = vld [vmem:[#allocation2 + $0x68] sm:$0xff]  ;;  %v7408_v48 = vsel %vm7345_vm7, 1.0, %v8472_v24  ;;  %vm7417_vm13 = vcmp.lt.s32.totalorder %v4605_v20, 16  ;;  %vm4460_vm14 = vcmp.ne.s32.totalorder %v7378_v40, 0 }
 0x1b2   : > { %3093 = vst.msk [vmem:[#allocation2 + $0x38] sm:$0xff] %vm216_vm0, %v3057_v31  ;;  %v5760_v61 = vpop.f32.mrb[100].mxu0  ;;  %v4266_v31 = vshrl.u32 %v7313_v32, 4  ;;  %v7411_v2 = vsub.s32 %v7185_v36, %v4256_v9  ;;  %vm4496_vm15 = vcmp.lt.s32.totalorder %v7378_v40, 0  ;;  %v7424_v51 = vadd.s32 208, %v6777_v25  ;;  %v2374_v36 = vld [vmem:[#allocation2 + $0x90] sm:$0xff] }
 0x1b3   : > { %3091 = vst.msk [vmem:[#allocation2 + $0x28] sm:$0xff] %vm216_vm0, %v3055_v19  ;;  %v5724_v7 = vpop.f32.mrb[100].mxu1  ;;  %v2939_v46 = vpop.f32.mrb[101].mxu0  ;;  %v4234_v19 = vmul.u32 18, %v4233_v53  ;;  %vm7427_vm1 = vcmp.lt.s32.totalorder %v4603_v49, 16  ;;  %v4606_v29 = vsel %vm7399_vm12, %v7382_v34, %v7325_v11  ;;  %v4568_v22 = vadd.s32 18, %v7378_v40  ;;  %vm7447_vm2 = vmand %vm4496_vm15, %vm4460_vm14 }
 0x1b4   : > { %v2654_v42 = vadd.f32 %v5724_v7, %v2370_v10  ;;  %v2545_v45 = vpop.f32.mrb[101].mxu1  ;;  %v5761_v4 = vpop.f32.mrb[102].mxu0  ;;  %v4267_v41 = vmul.u32 18, %v4266_v31  ;;  %vm4465_vm3 = vcmp.ne.s32.totalorder %v7411_v2, 0  ;;  %vm4501_vm4 = vcmp.lt.s32.totalorder %v7411_v2, 0  ;;  %v2379_v11 = vld [vmem:[#allocation2 + $0xb8] sm:$0xff] }
 0x1b5   : > { %v2776_v57 = vld [vmem:[#allocation2 + $0x50] sm:$0xff]  ;;  %v2652_v58 = vadd.f32 %v2545_v45, %v2368_v60  ;;  %v5725_v59 = vpop.f32.mrb[102].mxu1  ;;  %v2942_v62 = vpop.f32.mrb[103].mxu0  ;;  %v2372_v45 = vld [vmem:[#allocation2 + $0x80] sm:$0xff]  ;;  %v7437_v54 = vsub.s32 %v7199_v18, %v4234_v19  ;;  %v4244_v18 = vshrl.u32 %v7361_v56, 4  ;;  %v7461_v31 = vadd.s32 18, %v7411_v2  ;;  %vm7475_vm5 = vmand %vm4501_vm4, %vm4465_vm3 }
 0x1b6   : > { %2690 = vst.msk [vmem:[#allocation2 + $0x70] sm:$0xff] %vm216_vm0, %v2654_v42  ;;  %v3060_v63 = vadd.f32 %v5760_v61, %v2776_v57  ;;  %v2774_v15 = vld [vmem:[#allocation2 + $0x40] sm:$0xff]  ;;  %v2655_v0 = vadd.f32 %v5725_v59, %v2371_v47  ;;  %v2548_v1 = vpop.f32.mrb[103].mxu1  ;;  %v7414_v61 = vadd.s32 168, %v6777_v25  ;;  %v7464_v56 = vsub.s32 %v7202_v12, %v4267_v41 }
 0x1b7   : > { %2688 = vst.msk [vmem:[#allocation2 + $0x60] sm:$0xff] %vm216_vm0, %v2652_v58  ;;  %v3058_v55 = vadd.f32 %v2939_v46, %v2774_v15  ;;  %v2777_v3 = vld [vmem:[#allocation2 + $0x58] sm:$0xff]  ;;  %v2653_v52 = vadd.f32 %v2548_v1, %v2369_v43  ;;  %v7440_v57 = vmul.u32.u64.low 3817748708, %v7277_v38  ;;  %v7441_v58 = vmul.u32.u64.high 3817748708, %v7277_v38, %v7440_v57  ;;  %v2373_v43 = vld [vmem:[#allocation2 + $0x88] sm:$0xff] }
 0x1b8   : > { %3096 = vst.msk [vmem:[#allocation2 + $0x50] sm:$0xff] %vm216_vm0, %v3060_v63  ;;  %2691 = vst.msk [vmem:[#allocation2 + $0x78] sm:$0xff] %vm216_vm0, %v2655_v0  ;;  %v3061_v5 = vadd.f32 %v5761_v4, %v2777_v3  ;;  %v2775_v37 = vld [vmem:[#allocation2 + $0x48] sm:$0xff]  ;;  %v2375_v4 = vld [vmem:[#allocation2 + $0x98] sm:$0xff]  ;;  %v4604_v49 = vsel %vm7447_vm2, %v4568_v22, %v7378_v40  ;;  %vm4463_vm6 = vcmp.ne.s32.totalorder %v7437_v54, 0  ;;  %vm4499_vm7 = vcmp.lt.s32.totalorder %v7437_v54, 0 }
 0x1b9   : > { %3094 = vst.msk [vmem:[#allocation2 + $0x40] sm:$0xff] %vm216_vm0, %v3058_v55  ;;  %2689 = vst.msk [vmem:[#allocation2 + $0x68] sm:$0xff] %vm216_vm0, %v2653_v52  ;;  %v3059_v10 = vadd.f32 %v2942_v62, %v2775_v37  ;;  %v7456_v20 = vmul.u32.u64.low 3817748708, %v7280_v39  ;;  %v7457_v55 = vmul.u32.u64.high 3817748708, %v7280_v39, %v7456_v20  ;;  %v7486_v40 = vsel %vm7417_vm13, 1.0, %v8472_v24 }
 0x1ba   : > { %3097 = vst.msk [vmem:[#allocation2 + $0x58] sm:$0xff] %vm216_vm0, %v3061_v5  ;;  %v5764_v60 = vpop.f32.mrb[104].mxu0  ;;  %v7491_v19 = vsel %vm7427_vm1, 1.0, %v8472_v24  ;;  %v7502_v6 = vadd.s32 200, %v6777_v25  ;;  %vm7505_vm8 = vcmp.lt.s32.totalorder %v4606_v29, 16  ;;  %vm7509_vm9 = vcmp.lt.s32.totalorder %v4604_v49, 16  ;;  %vm7521_vm10 = vmand %vm4499_vm7, %vm4463_vm6 }
 0x1bb   : > { %3095 = vst.msk [vmem:[#allocation2 + $0x48] sm:$0xff] %vm216_vm0, %v3059_v10  ;;  %v5728_v7 = vpop.f32.mrb[104].mxu1  ;;  %v2955_v46 = vpop.f32.mrb[105].mxu0  ;;  %v4245_v10 = vmul.u32 18, %v4244_v18  ;;  %vm4466_vm11 = vcmp.ne.s32.totalorder %v7464_v56, 0  ;;  %vm4502_vm12 = vcmp.lt.s32.totalorder %v7464_v56, 0 }
 0x1bc   : > { %v2658_v42 = vadd.f32 %v5728_v7, %v2374_v36  ;;  %v2561_v47 = vpop.f32.mrb[105].mxu1  ;;  %v5765_v53 = vpop.f32.mrb[106].mxu0  ;;  %v4571_v36 = vadd.s32 18, %v7437_v54  ;;  %v7496_v7 = vadd.s32 192, %v6777_v25  ;;  %vm7563_vm14 = vmand %vm4502_vm12, %vm4466_vm11 }
 0x1bd   : > { %v2780_v59 = vld [vmem:[#allocation2 + $0x70] sm:$0xff]  ;;  %v2656_v62 = vadd.f32 %v2561_v47, %v2372_v45  ;;  %v5729_v30 = vpop.f32.mrb[106].mxu1  ;;  %v2958_v9 = vpop.f32.mrb[107].mxu0  ;;  %v4609_v47 = vsel %vm7475_vm5, %v7461_v31, %v7411_v2  ;;  %v4299_v2 = vshrl.u32 %v7441_v58, 4  ;;  %v4277_v31 = vshrl.u32 %v7457_v55, 4 }
 0x1be   : > { %2694 = vst.msk [vmem:[#allocation2 + $0x90] sm:$0xff] %vm216_vm0, %v2658_v42  ;;  %v3064_v63 = vadd.f32 %v5764_v60, %v2780_v59  ;;  %v2778_v15 = vld [vmem:[#allocation2 + $0x60] sm:$0xff]  ;;  %v2659_v0 = vadd.f32 %v5729_v30, %v2375_v4  ;;  %v2564_v1 = vpop.f32.mrb[107].mxu1  ;;  %v4607_v58 = vsel %vm7521_vm10, %v4571_v36, %v7437_v54  ;;  %v7553_v54 = vsel %vm7505_vm8, 1.0, %v8472_v24 }
 0x1bf   : > { %2692 = vst.msk [vmem:[#allocation2 + $0x80] sm:$0xff] %vm216_vm0, %v2656_v62  ;;  %v3062_v3 = vadd.f32 %v2955_v46, %v2778_v15  ;;  %v2781_v52 = vld [vmem:[#allocation2 + $0x78] sm:$0xff]  ;;  %v2657_v34 = vadd.f32 %v2564_v1, %v2373_v43  ;;  %v7499_v46 = vadd.s32 216, %v6777_v25  ;;  %v7528_v62 = vadd.s32 18, %v7464_v56 }
 0x1c0   : > { %3100 = vst.msk [vmem:[#allocation2 + $0x70] sm:$0xff] %vm216_vm0, %v3064_v63  ;;  %2695 = vst.msk [vmem:[#allocation2 + $0x98] sm:$0xff] %vm216_vm0, %v2659_v0  ;;  %v3065_v5 = vadd.f32 %v5765_v53, %v2781_v52  ;;  %v2779_v37 = vld [vmem:[#allocation2 + $0x68] sm:$0xff]  ;;  %v2376_v53 = vld [vmem:[#allocation2 + $0xa0] sm:$0xff]  ;;  %v7532_v15 = vsub.s32 %v7274_v21, %v4245_v10  ;;  %v7535_v0 = vmul.u32.u64.low 3817748708, %v7329_v16  ;;  %v7536_v43 = vmul.u32.u64.high 3817748708, %v7329_v16, %v7535_v0 }
 0x1c1   : > { %3098 = vst.msk [vmem:[#allocation2 + $0x60] sm:$0xff] %vm216_vm0, %v3062_v3  ;;  %2693 = vst.msk [vmem:[#allocation2 + $0x88] sm:$0xff] %vm216_vm0, %v2657_v34  ;;  %v3063_v12 = vadd.f32 %v2958_v9, %v2779_v37  ;;  %v2377_v52 = vld [vmem:[#allocation2 + $0xa8] sm:$0xff]  ;;  %v7545_v49 = vmul.u32.u64.low 3817748708, %v7414_v61  ;;  %v7546_v32 = vmul.u32.u64.high 3817748708, %v7414_v61, %v7545_v49  ;;  %vm7555_vm13 = vcmp.lt.s32.totalorder %v4609_v47, 16 }
 0x1c2   : > { %3101 = vst.msk [vmem:[#allocation2 + $0x78] sm:$0xff] %vm216_vm0, %v3065_v5  ;;  %v5768_v60 = vpop.f32.mrb[108].mxu0  ;;  %v4300_v36 = vmul.u32 18, %v4299_v2  ;;  %vm7569_vm15 = vcmp.lt.s32.totalorder %v4607_v58, 16  ;;  %vm4464_vm1 = vcmp.ne.s32.totalorder %v7532_v15, 0  ;;  %vm4500_vm2 = vcmp.lt.s32.totalorder %v7532_v15, 0 }
 0x1c3   : > { %3099 = vst.msk [vmem:[#allocation2 + $0x68] sm:$0xff] %vm216_vm0, %v3063_v12  ;;  %v5732_v22 = vpop.f32.mrb[108].mxu1  ;;  %v2971_v41 = vpop.f32.mrb[109].mxu0  ;;  %v7579_v42 = vsel %vm7509_vm9, 1.0, %v8472_v24  ;;  %v4278_v47 = vmul.u32 18, %v4277_v31  ;;  %v7589_v2 = vsel %vm7555_vm13, 1.0, %v8472_v24  ;;  %v4610_v45 = vsel %vm7563_vm14, %v7528_v62, %v7464_v56  ;;  %vm7608_vm3 = vmand %vm4500_vm2, %vm4464_vm1 }
 0x1c4   : > { %v2662_v29 = vadd.f32 %v5732_v22, %v2378_v27  ;;  %v2577_v57 = vpop.f32.mrb[109].mxu1  ;;  %v5769_v59 = vpop.f32.mrb[110].mxu0  ;;  %v2383_v0 = vld [vmem:[#allocation2 + $0xd8] sm:$0xff]  ;;  %v7613_v62 = vsub.s32 %v7277_v38, %v4300_v36  ;;  %v2381_v38 = vld [vmem:[#allocation2 + $0xc8] sm:$0xff]  ;;  %vm7624_vm4 = vcmp.lt.s32.totalorder %v4610_v45, 16  ;;  %v2386_v45 = vld [vmem:[#allocation2 + $0xf0] sm:$0xff] }
 0x1c5   : > { %v2784_v30 = vld [vmem:[#allocation2 + $0x90] sm:$0xff]  ;;  %v2660_v9 = vadd.f32 %v2577_v57, %v2376_v53  ;;  %v5733_v18 = vpop.f32.mrb[110].mxu1  ;;  %v2974_v63 = vpop.f32.mrb[111].mxu0  ;;  %v7629_v36 = vsub.s32 %v7280_v39, %v4278_v47  ;;  %v7640_v39 = vmul.u32.u64.low 3817748708, %v7499_v46  ;;  %v7641_v47 = vmul.u32.u64.high 3817748708, %v7499_v46, %v7640_v39 }
 0x1c6   : > { %2698 = vst.msk [vmem:[#allocation2 + $0xb0] sm:$0xff] %vm216_vm0, %v2662_v29  ;;  %v3068_v1 = vadd.f32 %v5768_v60, %v2784_v30  ;;  %v2782_v20 = vld [vmem:[#allocation2 + $0x80] sm:$0xff]  ;;  %v2663_v3 = vadd.f32 %v5733_v18, %v2379_v11  ;;  %v2580_v34 = vpop.f32.mrb[111].mxu1  ;;  %v7582_v4 = vmul.u32.u64.low 3817748708, %v7424_v51  ;;  %v7583_v29 = vmul.u32.u64.high 3817748708, %v7424_v51, %v7582_v4  ;;  %v2382_v53 = vld [vmem:[#allocation2 + $0xd0] sm:$0xff] }
 0x1c7   : > { %2696 = vst.msk [vmem:[#allocation2 + $0xa0] sm:$0xff] %vm216_vm0, %v2660_v9  ;;  %v3066_v21 = vadd.f32 %v2971_v41, %v2782_v20  ;;  %v2785_v5 = vld [vmem:[#allocation2 + $0x98] sm:$0xff]  ;;  %v2661_v37 = vadd.f32 %v2580_v34, %v2377_v52  ;;  %v4572_v30 = vadd.s32 18, %v7532_v15  ;;  %v7597_v9 = vadd.s32 240, %v6777_v25  ;;  %v2380_v18 = vld [vmem:[#allocation2 + $0xc0] sm:$0xff] }
 0x1c8   : > { %3104 = vst.msk [vmem:[#allocation2 + $0x90] sm:$0xff] %vm216_vm0, %v3068_v1  ;;  %2699 = vst.msk [vmem:[#allocation2 + $0xb8] sm:$0xff] %vm216_vm0, %v2663_v3  ;;  %v3069_v12 = vadd.f32 %v5769_v59, %v2785_v5  ;;  %v2783_v10 = vld [vmem:[#allocation2 + $0x88] sm:$0xff]  ;;  %v7602_v20 = vsel %vm7569_vm15, 1.0, %v8472_v24  ;;  %v7616_v3 = vadd.s32 224, %v6777_v25  ;;  %v4288_v4 = vshrl.u32 %v7546_v32, 4 }
 0x1c9   : > { %3102 = vst.msk [vmem:[#allocation2 + $0x80] sm:$0xff] %vm216_vm0, %v3066_v21  ;;  %2697 = vst.msk [vmem:[#allocation2 + $0xa8] sm:$0xff] %vm216_vm0, %v2661_v37  ;;  %v3067_v27 = vadd.f32 %v2974_v63, %v2783_v10  ;;  %v4310_v21 = vshrl.u32 %v7536_v43, 4  ;;  %v7620_v5 = vmul.u32.u64.low 3817748708, %v7496_v7  ;;  %v7621_v37 = vmul.u32.u64.high 3817748708, %v7496_v7, %v7620_v5  ;;  %v2387_v60 = vld [vmem:[#allocation2 + $0xf8] sm:$0xff] }
 0x1ca   : > { %3105 = vst.msk [vmem:[#allocation2 + $0x98] sm:$0xff] %vm216_vm0, %v3069_v12  ;;  %v5772_v41 = vpop.f32.mrb[112].mxu0  ;;  %vm4469_vm5 = vcmp.ne.s32.totalorder %v7613_v62, 0  ;;  %vm4505_vm6 = vcmp.lt.s32.totalorder %v7613_v62, 0  ;;  %v4343_v32 = vshrl.u32 %v7583_v29, 4  ;;  %vm4467_vm7 = vcmp.ne.s32.totalorder %v7629_v36, 0 }
 0x1cb   : > { %3103 = vst.msk [vmem:[#allocation2 + $0x88] sm:$0xff] %vm216_vm0, %v3067_v27  ;;  %v5736_v57 = vpop.f32.mrb[112].mxu1  ;;  %v2987_v59 = vpop.f32.mrb[113].mxu0  ;;  %vm4503_vm8 = vcmp.lt.s32.totalorder %v7629_v36, 0  ;;  %v4289_v56 = vmul.u32 18, %v4288_v4  ;;  %vm7671_vm10 = vmand %vm4505_vm6, %vm4469_vm5 }
 0x1cc   : > { %v2666_v11 = vadd.f32 %v5736_v57, %v2382_v53  ;;  %v2593_v63 = vpop.f32.mrb[113].mxu1  ;;  %v5773_v1 = vpop.f32.mrb[114].mxu0  ;;  %vm7684_vm11 = vmand %vm4503_vm8, %vm4467_vm7  ;;  %v4344_v4 = vmul.u32 18, %v4343_v32 }
 0x1cd   : > { %v2788_v52 = vld [vmem:[#allocation2 + $0xb0] sm:$0xff]  ;;  %v2664_v34 = vadd.f32 %v2593_v63, %v2380_v18  ;;  %v5737_v58 = vpop.f32.mrb[114].mxu1  ;;  %v2990_v31 = vpop.f32.mrb[115].mxu0  ;;  %v7656_v18 = vadd.s32 248, %v6777_v25  ;;  %v7704_v32 = vsub.s32 %v7414_v61, %v4289_v56 }
 0x1ce   : > { %2702 = vst.msk [vmem:[#allocation2 + $0xd0] sm:$0xff] %vm216_vm0, %v2666_v11  ;;  %v3072_v49 = vadd.f32 %v5772_v41, %v2788_v52  ;;  %v2786_v12 = vld [vmem:[#allocation2 + $0xa0] sm:$0xff]  ;;  %v2667_v10 = vadd.f32 %v5737_v58, %v2383_v0  ;;  %v2596_v55 = vpop.f32.mrb[115].mxu1  ;;  %v4608_v41 = vsel %vm7608_vm3, %v4572_v30, %v7532_v15  ;;  %v4311_v15 = vmul.u32 18, %v4310_v21 }
 0x1cf   : > { %2700 = vst.msk [vmem:[#allocation2 + $0xc0] sm:$0xff] %vm216_vm0, %v2664_v34  ;;  %v3070_v43 = vadd.f32 %v2987_v59, %v2786_v12  ;;  %v2789_v27 = vld [vmem:[#allocation2 + $0xb8] sm:$0xff]  ;;  %v2665_v22 = vadd.f32 %v2596_v55, %v2381_v38  ;;  %v7651_v11 = vsel %vm7624_vm4, 1.0, %v8472_v24  ;;  %vm7659_vm9 = vcmp.lt.s32.totalorder %v4608_v41, 16  ;;  %v2384_v58 = vld [vmem:[#allocation2 + $0xe0] sm:$0xff] }
 0x1d0   : > { %3108 = vst.msk [vmem:[#allocation2 + $0xb0] sm:$0xff] %vm216_vm0, %v3072_v49  ;;  %2703 = vst.msk [vmem:[#allocation2 + $0xd8] sm:$0xff] %vm216_vm0, %v2667_v10  ;;  %v3073_v53 = vadd.f32 %v5773_v1, %v2789_v27  ;;  %v2787_v57 = vld [vmem:[#allocation2 + $0xa8] sm:$0xff]  ;;  %v4577_v1 = vadd.s32 18, %v7613_v62  ;;  %v7665_v52 = vadd.s32 232, %v6777_v25  ;;  %v4575_v49 = vadd.s32 18, %v7629_v36 }
 0x1d1   : > { %3106 = vst.msk [vmem:[#allocation2 + $0xa0] sm:$0xff] %vm216_vm0, %v3070_v43  ;;  %2701 = vst.msk [vmem:[#allocation2 + $0xc8] sm:$0xff] %vm216_vm0, %v2665_v22  ;;  %v3071_v59 = vadd.f32 %v2990_v31, %v2787_v57  ;;  %v7677_v12 = vmul.u32.u64.low 3817748708, %v7502_v6  ;;  %v7678_v10 = vmul.u32.u64.high 3817748708, %v7502_v6, %v7677_v12  ;;  %v7689_v41 = vsub.s32 %v7329_v16, %v4311_v15 }
 0x1d2   : > { %3109 = vst.msk [vmem:[#allocation2 + $0xb8] sm:$0xff] %vm216_vm0, %v3073_v53  ;;  %v5776_v30 = vpop.f32.mrb[116].mxu0  ;;  %v4321_v53 = vshrl.u32 %v7621_v37, 4  ;;  %v8558_v15 = vmov 0.0   ;;  %v4354_v0 = vshrl.u32 %v7641_v47, 4  ;;  %v7718_v56 = vsub.s32 %v7424_v51, %v4344_v4 }
 0x1d3   : > { %3107 = vst.msk [vmem:[#allocation2 + $0xa8] sm:$0xff] %vm216_vm0, %v3071_v59  ;;  %v5740_v63 = vpop.f32.mrb[116].mxu1  ;;  %v3003_v29 = vpop.f32.mrb[117].mxu0  ;;  %v7701_v37 = vsel %vm7659_vm9, 1.0, %v8558_v15  ;;  %vm4470_vm12 = vcmp.ne.s32.totalorder %v7689_v41, 0  ;;  %vm4506_vm13 = vcmp.lt.s32.totalorder %v7689_v41, 0 }
 0x1d4   : > { %v2670_v34 = vadd.f32 %v5740_v63, %v2386_v45  ;;  %v2609_v31 = vpop.f32.mrb[117].mxu1  ;;  %v5777_v21 = vpop.f32.mrb[118].mxu0  ;;  %v2385_v45 = vld [vmem:[#allocation2 + $0xe8] sm:$0xff]  ;;  %v7730_v47 = vadd.s32 280, %v6777_v25  ;;  %vm4468_vm1 = vcmp.ne.s32.totalorder %v7704_v32, 0  ;;  %vm4504_vm2 = vcmp.lt.s32.totalorder %v7704_v32, 0  ;;  %vm7751_vm3 = vmand %vm4506_vm13, %vm4470_vm12 }
 0x1d5   : > { %v2792_v38 = vld [vmem:[#allocation2 + $0xd0] sm:$0xff]  ;;  %v2668_v55 = vadd.f32 %v2609_v31, %v2384_v58  ;;  %v5741_v43 = vpop.f32.mrb[118].mxu1  ;;  %v3006_v27 = vpop.f32.mrb[119].mxu0  ;;  %v7694_v58 = vmul.u32.u64.low 3817748708, %v7597_v9  ;;  %v7695_v31 = vmul.u32.u64.high 3817748708, %v7597_v9, %v7694_v58  ;;  %v7744_v4 = vadd.s32 18, %v7689_v41  ;;  %vm7767_vm5 = vmand %vm4504_vm2, %vm4468_vm1 }
 0x1d6   : > { %2706 = vst.msk [vmem:[#allocation2 + $0xf0] sm:$0xff] %vm216_vm0, %v2670_v34  ;;  %v3076_v57 = vadd.f32 %v5776_v30, %v2792_v38  ;;  %v2790_v39 = vld [vmem:[#allocation2 + $0xc0] sm:$0xff]  ;;  %v2671_v59 = vadd.f32 %v5741_v43, %v2387_v60  ;;  %v2612_v63 = vpop.f32.mrb[119].mxu1  ;;  %v4611_v38 = vsel %vm7684_vm11, %v4575_v49, %v7629_v36  ;;  %v7727_v36 = vadd.s32 256, %v6777_v25 }
 0x1d7   : > { %2704 = vst.msk [vmem:[#allocation2 + $0xe0] sm:$0xff] %vm216_vm0, %v2668_v55  ;;  %v3074_v12 = vadd.f32 %v3003_v29, %v2790_v39  ;;  %v2793_v24 = vld [vmem:[#allocation2 + $0xd8] sm:$0xff]  ;;  %v2669_v16 = vadd.f32 %v2612_v63, %v2385_v45  ;;  %v4613_v29 = vsel %vm7671_vm10, %v4577_v1, %v7613_v62  ;;  %v2390_v62 = vld [vmem:[#allocation2 + $0x110] sm:$0xff]  ;;  %vm7737_vm15 = vcmp.lt.s32.totalorder %v4611_v38, 16  ;;  %v2388_v43 = vld [vmem:[#allocation2 + $0x100] sm:$0xff] }
 0x1d8   : > { %3112 = vst.msk [vmem:[#allocation2 + $0xd0] sm:$0xff] %vm216_vm0, %v3076_v57  ;;  %2707 = vst.msk [vmem:[#allocation2 + $0xf8] sm:$0xff] %vm216_vm0, %v2671_v59  ;;  %v3077_v30 = vadd.f32 %v5777_v21, %v2793_v24  ;;  %v2791_v34 = vld [vmem:[#allocation2 + $0xc8] sm:$0xff]  ;;  %v4322_v24 = vmul.u32 18, %v4321_v53  ;;  %v7721_v21 = vadd.s32 272, %v6777_v25  ;;  %vm7733_vm14 = vcmp.lt.s32.totalorder %v4613_v29, 16 }
 0x1d9   : > { %3110 = vst.msk [vmem:[#allocation2 + $0xc0] sm:$0xff] %vm216_vm0, %v3074_v12  ;;  %2705 = vst.msk [vmem:[#allocation2 + $0xe8] sm:$0xff] %vm216_vm0, %v2669_v16  ;;  %v3075_v61 = vadd.f32 %v3006_v27, %v2791_v34  ;;  %v4355_v53 = vmul.u32 18, %v4354_v0  ;;  %v4332_v57 = vshrl.u32 %v7678_v10, 4  ;;  %v2391_v45 = vld [vmem:[#allocation2 + $0x118] sm:$0xff]  ;;  %v7756_v16 = vadd.s32 18, %v7704_v32 }
 0x1da   : > { %3113 = vst.msk [vmem:[#allocation2 + $0xd8] sm:$0xff] %vm216_vm0, %v3077_v30  ;;  %v5780_v1 = vpop.f32.mrb[120].mxu0  ;;  %vm4473_vm4 = vcmp.ne.s32.totalorder %v7718_v56, 0  ;;  %v7760_v10 = vsub.s32 %v7496_v7, %v4322_v24  ;;  %v2389_v38 = vld [vmem:[#allocation2 + $0x108] sm:$0xff]  ;;  %vm4509_vm6 = vcmp.lt.s32.totalorder %v7718_v56, 0  ;;  %v4387_v7 = vshrl.u32 %v7695_v31, 4 }
 0x1db   : > { %3111 = vst.msk [vmem:[#allocation2 + $0xc8] sm:$0xff] %vm216_vm0, %v3075_v61  ;;  %v5744_v51 = vpop.f32.mrb[120].mxu1  ;;  %v3019_v5 = vpop.f32.mrb[121].mxu0  ;;  %v7785_v31 = vadd.s32 18, %v7718_v56  ;;  %vm7809_vm7 = vmand %vm4509_vm6, %vm4473_vm4 }
 0x1dc   : > { %v2674_v60 = vadd.f32 %v5744_v51, %v2390_v62  ;;  %v2625_v27 = vpop.f32.mrb[121].mxu1  ;;  %v5781_v22 = vpop.f32.mrb[122].mxu0  ;;  %v7777_v51 = vsel %vm7733_vm14, 1.0, %v8558_v15  ;;  %vm4471_vm8 = vcmp.ne.s32.totalorder %v7760_v10, 0  ;;  %vm4507_vm9 = vcmp.lt.s32.totalorder %v7760_v10, 0 }
 0x1dd   : > { %v2796_v39 = vld [vmem:[#allocation2 + $0xf0] sm:$0xff]  ;;  %v2672_v59 = vadd.f32 %v2625_v27, %v2388_v43  ;;  %v5745_v63 = vpop.f32.mrb[122].mxu1  ;;  %v3022_v58 = vpop.f32.mrb[123].mxu0  ;;  %vm7846_vm12 = vmand %vm4507_vm9, %vm4471_vm8 }
 0x1de   : > { %2710 = vst.msk [vmem:[#allocation2 + $0x110] sm:$0xff] %vm216_vm0, %v2674_v60  ;;  %v3080_v30 = vadd.f32 %v5780_v1, %v2796_v39  ;;  %v2794_v34 = vld [vmem:[#allocation2 + $0xe0] sm:$0xff]  ;;  %v2675_v29 = vadd.f32 %v5745_v63, %v2391_v45  ;;  %v2628_v0 = vpop.f32.mrb[123].mxu1  ;;  %v7780_v60 = vadd.s32 264, %v6777_v25  ;;  %v4333_v39 = vmul.u32 18, %v4332_v57  ;;  %v3178_v57 = vld [vmem:[#allocation2 + $0x10] sm:$0xff] }
 0x1df   : > { %2708 = vst.msk [vmem:[#allocation2 + $0x100] sm:$0xff] %vm216_vm0, %v2672_v59  ;;  %v3078_v24 = vadd.f32 %v3019_v5, %v2794_v34  ;;  %v2797_v62 = vld [vmem:[#allocation2 + $0xf8] sm:$0xff]  ;;  %v2673_v1 = vadd.f32 %v2628_v0, %v2389_v38  ;;  %v7788_v5 = vsub.s32 %v7499_v46, %v4355_v53  ;;  %v7795_v25 = vsel %vm7737_vm15, 1.0, %v8558_v15 }
 0x1e0   : > { %3116 = vst.msk [vmem:[#allocation2 + $0xf0] sm:$0xff] %vm216_vm0, %v3080_v30  ;;  %2711 = vst.msk [vmem:[#allocation2 + $0x118] sm:$0xff] %vm216_vm0, %v2675_v29  ;;  %v3081_v43 = vadd.f32 %v5781_v22, %v2797_v62  ;;  %v2795_v27 = vld [vmem:[#allocation2 + $0xe8] sm:$0xff]  ;;  %v4614_v22 = vsel %vm7751_vm3, %v7744_v4, %v7689_v41  ;;  %v4612_v46 = vsel %vm7767_vm5, %v7756_v16, %v7704_v32  ;;  %v4388_v41 = vmul.u32 18, %v4387_v7  ;;  %v3176_v30 = vld [vmem:[#allocation2] sm:$0xff] }
 0x1e1   : > { %3114 = vst.msk [vmem:[#allocation2 + $0xe0] sm:$0xff] %vm216_vm0, %v3078_v24  ;;  %2709 = vst.msk [vmem:[#allocation2 + $0x108] sm:$0xff] %vm216_vm0, %v2673_v1  ;;  %v3079_v49 = vadd.f32 %v3022_v58, %v2795_v27  ;;  %v7816_v4 = vmul.u32.u64.low 3817748708, %v7616_v3  ;;  %v7817_v59 = vmul.u32.u64.high 3817748708, %v7616_v3, %v7816_v4  ;;  %v7822_v63 = vadd.s32 18, %v7760_v10  ;;  %v3179_v38 = vld [vmem:[#allocation2 + $0x18] sm:$0xff] }
 0x1e2   : > { %3117 = vst.msk [vmem:[#allocation2 + $0xf8] sm:$0xff] %vm216_vm0, %v3081_v43  ;;  %v5784_v55 = vpop.f32.mrb[124].mxu0  ;;  %v7825_v58 = vmul.u32.u64.low 3817748708, %v7656_v18  ;;  %v7826_v12 = vmul.u32.u64.high 3817748708, %v7656_v18, %v7825_v58  ;;  %v4617_v0 = vsel %vm7809_vm7, %v7785_v31, %v7718_v56  ;;  %vm4474_vm10 = vcmp.ne.s32.totalorder %v7788_v5, 0  ;;  %v3177_v31 = vld [vmem:[#allocation2 + $0x8] sm:$0xff] }
 0x1e3   : > { %3115 = vst.msk [vmem:[#allocation2 + $0xe8] sm:$0xff] %vm216_vm0, %v3079_v49  ;;  %v5792_v32 = vpop.f32.mrb[124].mxu1  ;;  %v3035_v45 = vpop.f32.mrb[125].mxu0  ;;  %v7834_v61 = vsub.s32 %v7502_v6, %v4333_v39  ;;  %vm4510_vm11 = vcmp.lt.s32.totalorder %v7788_v5, 0  ;;  %v7838_v43 = vmul.u32.u64.low 3817748708, %v7665_v52  ;;  %v7839_v27 = vmul.u32.u64.high 3817748708, %v7665_v52, %v7838_v43 }
 0x1e4   : > { %v3462_v16 = vadd.f32 %v5792_v32, %v3178_v57  ;;  %v3317_v34 = vpop.f32.mrb[125].mxu1  ;;  %v5785_v29 = vpop.f32.mrb[126].mxu0  ;;  %v7851_v39 = vsub.s32 %v7597_v9, %v4388_v41  ;;  %v4365_v4 = vshrl.u32 %v7817_v59, 4  ;;  %vm7861_vm13 = vcmp.lt.s32.totalorder %v4614_v22, 16  ;;  %vm7885_vm3 = vmand %vm4510_vm11, %vm4474_vm10  ;;  %v3183_v6 = vld [vmem:[#allocation2 + $0x38] sm:$0xff] }
 0x1e5   : > { %v2800_v7 = vld [vmem:[#allocation2 + $0x110] sm:$0xff]  ;;  %v3460_v24 = vadd.f32 %v3317_v34, %v3176_v30  ;;  %v5793_v62 = vpop.f32.mrb[126].mxu1  ;;  %v3038_v1 = vpop.f32.mrb[127].mxu0  ;;  %v4398_v30 = vshrl.u32 %v7826_v12, 4  ;;  %vm7865_vm14 = vcmp.lt.s32.totalorder %v4612_v46, 16  ;;  %vm4472_vm15 = vcmp.ne.s32.totalorder %v7834_v61, 0 }
 0x1e6   : > { %v3084_v49 = vadd.f32 %v5784_v55, %v2800_v7  ;;  %3498 = vst.msk [vmem:[#allocation2 + $0x10] sm:$0xff] %vm216_vm0, %v3462_v16  ;;  %v2798_v53 = vld [vmem:[#allocation2 + $0x100] sm:$0xff]  ;;  %v3463_v56 = vadd.f32 %v5793_v62, %v3179_v38  ;;  %v3320_v57 = vpop.f32.mrb[127].mxu1  ;;  %v7856_v16 = vadd.s32 18, %v7788_v5  ;;  %vm4508_vm1 = vcmp.lt.s32.totalorder %v7834_v61, 0 }
 0x1e7   : > { %v3082_v55 = vadd.f32 %v3035_v45, %v2798_v53  ;;  %3496 = vst.msk [vmem:[#allocation2] sm:$0xff] %vm216_vm0, %v3460_v24  ;;  %v2801_v32 = vld [vmem:[#allocation2 + $0x118] sm:$0xff]  ;;  %v3461_v58 = vadd.f32 %v3320_v57, %v3177_v31  ;;  %v4366_v59 = vmul.u32 18, %v4365_v4  ;;  %vm7873_vm2 = vcmp.lt.s32.totalorder %v4617_v0, 16  ;;  %vm7902_vm6 = vmand %vm4508_vm1, %vm4472_vm15  ;;  %v3180_v31 = vld [vmem:[#allocation2 + $0x20] sm:$0xff] }
 0x1e8   : > { %3120 = vst.msk [vmem:[#allocation2 + $0x110] sm:$0xff] %vm216_vm0, %v3084_v49  ;;  %v3085_v34 = vadd.f32 %v5785_v29, %v2801_v32  ;;  %3499 = vst.msk [vmem:[#allocation2 + $0x18] sm:$0xff] %vm216_vm0, %v3463_v56  ;;  %v2799_v38 = vld [vmem:[#allocation2 + $0x108] sm:$0xff]  ;;  %v4615_v22 = vsel %vm7846_vm12, %v7822_v63, %v7760_v10  ;;  %v4399_v29 = vmul.u32 18, %v4398_v30  ;;  %v4376_v7 = vshrl.u32 %v7839_v27, 4  ;;  %v3182_v63 = vld [vmem:[#allocation2 + $0x30] sm:$0xff] }
 0x1e9   : > { %3118 = vst.msk [vmem:[#allocation2 + $0x100] sm:$0xff] %vm216_vm0, %v3082_v55  ;;  %v3083_v45 = vadd.f32 %v3038_v1, %v2799_v38  ;;  %3497 = vst.msk [vmem:[#allocation2 + $0x8] sm:$0xff] %vm216_vm0, %v3461_v58  ;;  %v4580_v24 = vadd.s32 18, %v7834_v61  ;;  %vm4477_vm4 = vcmp.ne.s32.totalorder %v7851_v39, 0  ;;  %vm4513_vm5 = vcmp.lt.s32.totalorder %v7851_v39, 0 }
 0x1ea   : > { %3121 = vst.msk [vmem:[#allocation2 + $0x118] sm:$0xff] %vm216_vm0, %v3085_v34  ;;  %v5832_v0 = vpop.f32.mrb[128].mxu0  ;;  %v7895_v10 = vsub.s32 %v7616_v3, %v4366_v59  ;;  %v7907_v27 = vsub.s32 %v7656_v18, %v4399_v29  ;;  %v4377_v49 = vmul.u32 18, %v4376_v7  ;;  %v4618_v55 = vsel %vm7885_vm3, %v7856_v16, %v7788_v5  ;;  %v3181_v5 = vld [vmem:[#allocation2 + $0x28] sm:$0xff]  ;;  %vm7930_vm11 = vmand %vm4513_vm5, %vm4477_vm4  ;;  %v3187_v29 = vld [vmem:[#allocation2 + $0x58] sm:$0xff] }
 0x1eb   : > { %3119 = vst.msk [vmem:[#allocation2 + $0x108] sm:$0xff] %vm216_vm0, %v3083_v45  ;;  %v5796_v62 = vpop.f32.mrb[128].mxu1  ;;  %v3727_v1 = vpop.f32.mrb[129].mxu0  ;;  %v7910_v3 = vmul.u32.u64.low 3817748708, %v7721_v21  ;;  %v7911_v53 = vmul.u32.u64.high 3817748708, %v7721_v21, %v7910_v3  ;;  %v4585_v34 = vadd.s32 18, %v7851_v39  ;;  %v4616_v46 = vsel %vm7902_vm6, %v4580_v24, %v7834_v61 }
 0x1ec   : > { %v3466_v56 = vadd.f32 %v5796_v62, %v3182_v63  ;;  %v3333_v57 = vpop.f32.mrb[129].mxu1  ;;  %v5833_v4 = vpop.f32.mrb[130].mxu0  ;;  %vm4475_vm7 = vcmp.ne.s32.totalorder %v7895_v10, 0  ;;  %vm4511_vm8 = vcmp.lt.s32.totalorder %v7895_v10, 0  ;;  %vm4478_vm9 = vcmp.ne.s32.totalorder %v7907_v27, 0 }
 0x1ed   : > { %v3588_v18 = vld [vmem:[#allocation2 + $0x10] sm:$0xff]  ;;  %v3464_v32 = vadd.f32 %v3333_v57, %v3180_v31  ;;  %v5797_v58 = vpop.f32.mrb[130].mxu1  ;;  %v3730_v30 = vpop.f32.mrb[131].mxu0  ;;  %vm4514_vm10 = vcmp.lt.s32.totalorder %v7907_v27, 0  ;;  %v7935_v7 = vsub.s32 %v7665_v52, %v4377_v49  ;;  %vm7942_vm12 = vmand %vm4511_vm8, %vm4475_vm7  ;;  %v4583_v24 = vadd.s32 18, %v7895_v10 }
 0x1ee   : > { %3502 = vst.msk [vmem:[#allocation2 + $0x30] sm:$0xff] %vm216_vm0, %v3466_v56  ;;  %v3872_v38 = vadd.f32 %v5832_v0, %v3588_v18  ;;  %v3586_v59 = vld [vmem:[#allocation2] sm:$0xff]  ;;  %v3467_v45 = vadd.f32 %v5797_v58, %v3183_v6  ;;  %v3336_v16 = vpop.f32.mrb[131].mxu1  ;;  %v4586_v43 = vadd.s32 18, %v7907_v27  ;;  %vm7950_vm15 = vcmp.lt.s32.totalorder %v4615_v22, 16  ;;  %vm7958_vm1 = vmand %vm4514_vm10, %vm4478_vm9  ;;  %v3186_v58 = vld [vmem:[#allocation2 + $0x50] sm:$0xff] }
 0x1ef   : > { %3500 = vst.msk [vmem:[#allocation2 + $0x20] sm:$0xff] %vm216_vm0, %v3464_v32  ;;  %v3870_v0 = vadd.f32 %v3727_v1, %v3586_v59  ;;  %v3589_v63 = vld [vmem:[#allocation2 + $0x18] sm:$0xff]  ;;  %v3465_v62 = vadd.f32 %v3336_v16, %v3181_v5  ;;  %v7963_v56 = vmul.u32.u64.low 3817748708, %v7727_v36  ;;  %v7964_v31 = vmul.u32.u64.high 3817748708, %v7727_v36, %v7963_v56 }
 0x1f0   : > { %3908 = vst.msk [vmem:[#allocation2 + $0x10] sm:$0xff] %vm216_vm0, %v3872_v38  ;;  %3503 = vst.msk [vmem:[#allocation2 + $0x38] sm:$0xff] %vm216_vm0, %v3467_v45  ;;  %v3873_v52 = vadd.f32 %v5833_v4, %v3589_v63  ;;  %v3587_v1 = vld [vmem:[#allocation2 + $0x8] sm:$0xff]  ;;  %vm7969_vm3 = vcmp.lt.s32.totalorder %v4618_v55, 16  ;;  %vm7973_vm4 = vcmp.lt.s32.totalorder %v4616_v46, 16  ;;  %v4621_v4 = vsel %vm7930_vm11, %v4585_v34, %v7851_v39  ;;  %v3184_v38 = vld [vmem:[#allocation2 + $0x40] sm:$0xff] }
 0x1f1   : > { %3906 = vst.msk [vmem:[#allocation2] sm:$0xff] %vm216_vm0, %v3870_v0  ;;  %3501 = vst.msk [vmem:[#allocation2 + $0x28] sm:$0xff] %vm216_vm0, %v3465_v62  ;;  %v3871_v22 = vadd.f32 %v3730_v30, %v3587_v1  ;;  %vm4476_vm5 = vcmp.ne.s32.totalorder %v7935_v7, 0  ;;  %vm4512_vm6 = vcmp.lt.s32.totalorder %v7935_v7, 0  ;;  %v7991_v39 = vsel %vm7861_vm13, 1.0, %v8558_v15  ;;  %v3185_v56 = vld [vmem:[#allocation2 + $0x48] sm:$0xff] }
 0x1f2   : > { %3909 = vst.msk [vmem:[#allocation2 + $0x18] sm:$0xff] %vm216_vm0, %v3873_v52  ;;  %v5836_v18 = vpop.f32.mrb[132].mxu0  ;;  %v7984_v55 = vmul.u32.u64.low 3817748708, %v7730_v47  ;;  %v7985_v32 = vmul.u32.u64.high 3817748708, %v7730_v47, %v7984_v55  ;;  %v7996_v34 = vsel %vm7865_vm14, 1.0, %v8558_v15  ;;  %v4619_v45 = vsel %vm7942_vm12, %v4583_v24, %v7895_v10  ;;  %vm8040_vm14 = vmand %vm4512_vm6, %vm4476_vm5 }
 0x1f3   : > { %3907 = vst.msk [vmem:[#allocation2 + $0x8] sm:$0xff] %vm216_vm0, %v3871_v22  ;;  %v5800_v30 = vpop.f32.mrb[132].mxu1  ;;  %v3743_v59 = vpop.f32.mrb[133].mxu0  ;;  %v4622_v5 = vsel %vm7958_vm1, %v4586_v43, %v7907_v27  ;;  %v8007_v9 = vsel %vm7873_vm2, 1.0, %v8558_v15  ;;  %vm8009_vm13 = vcmp.lt.s32.totalorder %v4621_v4, 16  ;;  %v4584_v63 = vadd.s32 18, %v7935_v7 }
 0x1f4   : > { %v3470_v16 = vadd.f32 %v5800_v30, %v3186_v58  ;;  %v3349_v46 = vpop.f32.mrb[133].mxu1  ;;  %v5837_v0 = vpop.f32.mrb[134].mxu0  ;;  %v8024_v12 = vsel %vm7950_vm15, 1.0, %v8558_v15  ;;  %v8029_v24 = vsel %vm7969_vm3, 1.0, %v8558_v15  ;;  %v8034_v43 = vsel %vm7973_vm4, 1.0, %v8558_v15 }
 0x1f5   : > { %v3592_v10 = vld [vmem:[#allocation2 + $0x30] sm:$0xff]  ;;  %v3468_v27 = vadd.f32 %v3349_v46, %v3184_v38  ;;  %v5801_v62 = vpop.f32.mrb[134].mxu1  ;;  %v3746_v61 = vpop.f32.mrb[135].mxu0  ;;  %vm8045_vm2 = vcmp.lt.s32.totalorder %v4619_v45, 16  ;;  %vm8049_vm7 = vcmp.lt.s32.totalorder %v4622_v5, 16  ;;  %v4431_v38 = vshrl.u32 %v7911_v53, 4 }
 0x1f6   : > { %3506 = vst.msk [vmem:[#allocation2 + $0x50] sm:$0xff] %vm216_vm0, %v3470_v16  ;;  %v3876_v1 = vadd.f32 %v5836_v18, %v3592_v10  ;;  %v3590_v49 = vld [vmem:[#allocation2 + $0x20] sm:$0xff]  ;;  %v3471_v3 = vadd.f32 %v5801_v62, %v3187_v29  ;;  %v3352_v22 = vpop.f32.mrb[135].mxu1  ;;  %v8057_v18 = vsel %vm8009_vm13, 1.0, %v8558_v15  ;;  %v4620_v46 = vsel %vm8040_vm14, %v4584_v63, %v7935_v7 }
 0x1f7   : > { %v3944_v4 = vld [vmem:[#allocation2 + $0x10] sm:$0xff]  ;;  %3504 = vst.msk [vmem:[#allocation2 + $0x40] sm:$0xff] %vm216_vm0, %v3468_v27  ;;  %v3874_v55 = vadd.f32 %v3743_v59, %v3590_v49  ;;  %v3593_v58 = vld [vmem:[#allocation2 + $0x38] sm:$0xff]  ;;  %v3469_v30 = vadd.f32 %v3352_v22, %v3185_v56  ;;  %8601 = vst [vmem:[#allocation3_spill] sm:$0xff] %v8057_v18  ;;  %v4409_v29 = vshrl.u32 %v7964_v31, 4  ;;  %v8082_v7 = vsel %vm8049_vm7, 1.0, %v8558_v15 }
 0x1f8   : > { %3980 = vst.msk [vmem:[%s8019_s10 + $0x10] sm:$0xff] %vm216_vm0, %v3944_v4  ;;  %v4737_v45 = vmul.f32 %v7019_v50, %v3944_v4  ;;  %v3942_v5 = vld [vmem:[#allocation2] sm:$0xff]  ;;  %3912 = vst.msk [vmem:[#allocation2 + $0x30] sm:$0xff] %vm216_vm0, %v3876_v1  ;;  %v3877_v59 = vadd.f32 %v5837_v0, %v3593_v58  ;;  %v3591_v16 = vld [vmem:[#allocation2 + $0x28] sm:$0xff]  ;;  %v8077_v0 = vsel %vm8045_vm2, 1.0, %v8558_v15  ;;  %vm8098_vm8 = vcmp.lt.s32.totalorder %v4620_v46, 16 }
 0x1f9   : > { %3507 = vst.msk [vmem:[#allocation2 + $0x58] sm:$0xff] %vm216_vm0, %v3471_v3  ;;  %3978 = vst.msk [vmem:[%s8019_s10] sm:$0xff] %vm216_vm0, %v3942_v5  ;;  %v4735_v53 = vmul.f32 %v7086_v28, %v3942_v5  ;;  %v3945_v50 = vld [vmem:[#allocation2 + $0x18] sm:$0xff]  ;;  %v3875_v41 = vadd.f32 %v3746_v61, %v3591_v16  ;;  %v8090_v27 = vmul.u32.u64.low 3817748708, %v7780_v60  ;;  %v8091_v62 = vmul.u32.u64.high 3817748708, %v7780_v60, %v8090_v27  ;;  %v3190_v1 = vld [vmem:[#allocation2 + $0x70] sm:$0xff] }
 0x1fa   : > { %3910 = vst.msk [vmem:[#allocation2 + $0x20] sm:$0xff] %vm216_vm0, %v3874_v55  ;;  %3505 = vst.msk [vmem:[#allocation2 + $0x48] sm:$0xff] %vm216_vm0, %v3469_v30  ;;  %v4738_v28 = vmul.f32 %v7105_v33, %v3945_v50  ;;  %v3943_v31 = vld [vmem:[#allocation2 + $0x8] sm:$0xff]  ;;  %v5840_v63 = vpop.f32.mrb[136].mxu0  ;;  %v8102_v56 = vmul.u32 18, %v4431_v38  ;;  %v4774_v22 = vsel %vm216_vm0, %v4737_v45, 0.0  ;;  %v4852_v57 = vmul.f32 %v4737_v45, %v3944_v4 }
 0x1fb   : > { %8602 = vst [vmem:[#allocation4_spill] sm:$0xff] %v8077_v0  ;;  %8603 = vst [vmem:[#allocation5_spill] sm:$0xff] %v8082_v7  ;;  %v4850_v61 = vmul.f32 %v4735_v53, %v3942_v5  ;;  %v4736_v52 = vmul.f32 %v7110_v35, %v3943_v31  ;;  %v5804_v33 = vpop.f32.mrb[136].mxu1  ;;  %v3759_v49 = vpop.f32.mrb[137].mxu0  ;;  %v3188_v55 = vld [vmem:[#allocation2 + $0x60] sm:$0xff]  ;;  %v8105_v5 = vmul.u32 18, %v4409_v29 }
 0x1fc   : > { %3981 = vst.msk [vmem:[%s8019_s10 + $0x18] sm:$0xff] %vm216_vm0, %v3945_v50  ;;  %3913 = vst.msk [vmem:[#allocation2 + $0x38] sm:$0xff] %vm216_vm0, %v3877_v59  ;;  %v3474_v6 = vadd.f32 %v5804_v33, %v3190_v1  ;;  %v3365_v58 = vpop.f32.mrb[137].mxu1  ;;  %v5841_v30 = vpop.f32.mrb[138].mxu0  ;;  %v4771_v35 = vsel %vm216_vm0, %v4735_v53, 0.0  ;;  %v3191_v27 = vld [vmem:[#allocation2 + $0x78] sm:$0xff]  ;;  %v4853_v7 = vmul.f32 %v4738_v28, %v3945_v50 }
 0x1fd   : > { %3979 = vst.msk [vmem:[%s8019_s10 + $0x8] sm:$0xff] %vm216_vm0, %v3943_v31  ;;  %3911 = vst.msk [vmem:[#allocation2 + $0x28] sm:$0xff] %vm216_vm0, %v3875_v41  ;;  %v4772_v59 = vsel %vm216_vm0, %v4736_v52, 0.0  ;;  %v4851_v16 = vmul.f32 %v4736_v52, %v3943_v31  ;;  %v3596_v46 = vld [vmem:[#allocation2 + $0x50] sm:$0xff]  ;;  %v3472_v41 = vadd.f32 %v3365_v58, %v3188_v55  ;;  %v5805_v10 = vpop.f32.mrb[138].mxu1  ;;  %v3762_v38 = vpop.f32.mrb[139].mxu0 }
 0x1fe   : > { %v4773_v18 = vadd.f32 %v4772_v59, %v4771_v35  ;;  %3510 = vst.msk [vmem:[#allocation2 + $0x70] sm:$0xff] %vm216_vm0, %v3474_v6  ;;  %v3880_v4 = vadd.f32 %v5840_v63, %v3596_v46  ;;  %v3594_v45 = vld [vmem:[#allocation2 + $0x40] sm:$0xff]  ;;  %v3475_v1 = vadd.f32 %v5805_v10, %v3191_v27  ;;  %v3189_v29 = vld [vmem:[#allocation2 + $0x68] sm:$0xff]  ;;  %v3368_v33 = vpop.f32.mrb[139].mxu1  ;;  %v4886_v53 = vsel %vm216_vm0, %v4850_v61, 0.0 }
 0x1ff   : > { %v4887_v0 = vsel %vm216_vm0, %v4851_v16, 0.0  ;;  %v3948_v31 = vld [vmem:[#allocation2 + $0x30] sm:$0xff]  ;;  %3508 = vst.msk [vmem:[#allocation2 + $0x60] sm:$0xff] %vm216_vm0, %v3472_v41  ;;  %v3878_v52 = vadd.f32 %v3759_v49, %v3594_v45  ;;  %v3473_v50 = vadd.f32 %v3368_v33, %v3189_v29  ;;  %v4889_v59 = vsel %vm216_vm0, %v4852_v57, 0.0 }
 0x200   : > { %v3597_v55 = vld [vmem:[#allocation2 + $0x58] sm:$0xff]  ;;  %v4775_v58 = vadd.f32 %v4774_v22, %v4773_v18  ;;  %v4888_v35 = vadd.f32 %v4887_v0, %v4886_v53  ;;  %3984 = vst.msk [vmem:[%s8019_s10 + $0x30] sm:$0xff] %vm216_vm0, %v3948_v31  ;;  %v4741_v63 = vmul.f32 %v7119_v14, %v3948_v31  ;;  %3916 = vst.msk [vmem:[#allocation2 + $0x50] sm:$0xff] %vm216_vm0, %v3880_v4  ;;  %v4776_v49 = vsel %vm216_vm0, %v4738_v28, 0.0 }
 0x201   : > { %v3946_v10 = vld [vmem:[#allocation2 + $0x20] sm:$0xff]  ;;  %3511 = vst.msk [vmem:[#allocation2 + $0x78] sm:$0xff] %vm216_vm0, %v3475_v1  ;;  %v3881_v61 = vadd.f32 %v5841_v30, %v3597_v55  ;;  %v3595_v6 = vld [vmem:[#allocation2 + $0x48] sm:$0xff]  ;;  %3914 = vst.msk [vmem:[#allocation2 + $0x40] sm:$0xff] %vm216_vm0, %v3878_v52  ;;  %v4891_v22 = vsel %vm216_vm0, %v4853_v7, 0.0 }
 0x202   : > { %3982 = vst.msk [vmem:[%s8019_s10 + $0x20] sm:$0xff] %vm216_vm0, %v3946_v10  ;;  %v4739_v18 = vmul.f32 %v7171_v17, %v3946_v10  ;;  %3509 = vst.msk [vmem:[#allocation2 + $0x68] sm:$0xff] %vm216_vm0, %v3473_v50  ;;  %v3879_v14 = vadd.f32 %v3762_v38, %v3595_v6  ;;  %v4890_v16 = vadd.f32 %v4889_v59, %v4888_v35  ;;  %v5844_v28 = vpop.f32.mrb[140].mxu0  ;;  %v8132_v17 = vsel %vm8098_vm8, 1.0, %v8558_v15  ;;  %v3194_v38 = vld [vmem:[#allocation2 + $0x90] sm:$0xff] }
 0x203   : > { %v3949_v0 = vld [vmem:[#allocation2 + $0x38] sm:$0xff]  ;;  %v4777_v30 = vadd.f32 %v4776_v49, %v4775_v58  ;;  %3917 = vst.msk [vmem:[#allocation2 + $0x58] sm:$0xff] %vm216_vm0, %v3881_v61  ;;  %v5808_v4 = vpop.f32.mrb[140].mxu1  ;;  %v3775_v45 = vpop.f32.mrb[141].mxu0  ;;  %v4782_v1 = vsel %vm216_vm0, %v4741_v63, 0.0  ;;  %v4856_v55 = vmul.f32 %v4741_v63, %v3948_v31 }
 0x204   : > { %3985 = vst.msk [vmem:[%s8019_s10 + $0x38] sm:$0xff] %vm216_vm0, %v3949_v0  ;;  %v3947_v57 = vld [vmem:[#allocation2 + $0x28] sm:$0xff]  ;;  %v4778_v46 = vsel %vm216_vm0, %v4739_v18, 0.0  ;;  %v4854_v41 = vmul.f32 %v4739_v18, %v3946_v10  ;;  %v4742_v27 = vmul.f32 %v7191_v44, %v3949_v0  ;;  %3915 = vst.msk [vmem:[#allocation2 + $0x48] sm:$0xff] %vm216_vm0, %v3879_v14  ;;  %v4892_v3 = vadd.f32 %v4891_v22, %v4890_v16  ;;  %v3381_v53 = vpop.f32.mrb[141].mxu1  ;;  %v5845_v52 = vpop.f32.mrb[142].mxu0 }
 0x205   : > { %3983 = vst.msk [vmem:[%s8019_s10 + $0x28] sm:$0xff] %vm216_vm0, %v3947_v57  ;;  %v4740_v7 = vmul.f32 %v7196_v8, %v3947_v57  ;;  %v4779_v29 = vadd.f32 %v4778_v46, %v4777_v30  ;;  %v3478_v33 = vadd.f32 %v5808_v4, %v3194_v38  ;;  %v3600_v8 = vld [vmem:[#allocation2 + $0x70] sm:$0xff]  ;;  %v5809_v35 = vpop.f32.mrb[142].mxu1  ;;  %v3778_v10 = vpop.f32.mrb[143].mxu0  ;;  %v3192_v18 = vld [vmem:[#allocation2 + $0x80] sm:$0xff]  ;;  %v3195_v22 = vld [vmem:[#allocation2 + $0x98] sm:$0xff] }
 0x206   : > { %v4893_v50 = vsel %vm216_vm0, %v4854_v41, 0.0  ;;  %v4784_v44 = vsel %vm216_vm0, %v4742_v27, 0.0  ;;  %v3884_v49 = vadd.f32 %v5844_v28, %v3600_v8  ;;  %v3598_v14 = vld [vmem:[#allocation2 + $0x60] sm:$0xff]  ;;  %v3384_v31 = vpop.f32.mrb[143].mxu1  ;;  %v4857_v63 = vmul.f32 %v4742_v27, %v3949_v0 }
 0x207   : > { %v4780_v58 = vsel %vm216_vm0, %v4740_v7, 0.0  ;;  %v4894_v61 = vadd.f32 %v4893_v50, %v4892_v3  ;;  %v4855_v59 = vmul.f32 %v4740_v7, %v3947_v57  ;;  %3514 = vst.msk [vmem:[#allocation2 + $0x90] sm:$0xff] %vm216_vm0, %v3478_v33  ;;  %v3952_v16 = vld [vmem:[#allocation2 + $0x50] sm:$0xff]  ;;  %v3476_v30 = vadd.f32 %v3381_v53, %v3192_v18 }
 0x208   : > { %v4781_v6 = vadd.f32 %v4780_v58, %v4779_v29  ;;  %v3882_v46 = vadd.f32 %v3775_v45, %v3598_v14  ;;  %v3479_v41 = vadd.f32 %v5809_v35, %v3195_v22  ;;  %v3601_v38 = vld [vmem:[#allocation2 + $0x78] sm:$0xff]  ;;  %3988 = vst.msk [vmem:[%s8019_s10 + $0x50] sm:$0xff] %vm216_vm0, %v3952_v16  ;;  %v4745_v57 = vmul.f32 %v7245_v23, %v3952_v16  ;;  %v3950_v7 = vld [vmem:[#allocation2 + $0x40] sm:$0xff]  ;;  %v3193_v29 = vld [vmem:[#allocation2 + $0x88] sm:$0xff] }
 0x209   : > { %v4895_v3 = vsel %vm216_vm0, %v4855_v59, 0.0  ;;  %3920 = vst.msk [vmem:[#allocation2 + $0x70] sm:$0xff] %vm216_vm0, %v3884_v49  ;;  %v3885_v28 = vadd.f32 %v5845_v52, %v3601_v38  ;;  %v3599_v0 = vld [vmem:[#allocation2 + $0x68] sm:$0xff]  ;;  %3986 = vst.msk [vmem:[%s8019_s10 + $0x40] sm:$0xff] %vm216_vm0, %v3950_v7  ;;  %v4743_v45 = vmul.f32 %v7339_v13, %v3950_v7  ;;  %v3477_v23 = vadd.f32 %v3384_v31, %v3193_v29  ;;  %v3199_v29 = vld [vmem:[#allocation2 + $0xb8] sm:$0xff] }
 0x20a   : > { %v4783_v4 = vadd.f32 %v4782_v1, %v4781_v6  ;;  %v4896_v27 = vadd.f32 %v4895_v3, %v4894_v61  ;;  %v3953_v33 = vld [vmem:[#allocation2 + $0x58] sm:$0xff]  ;;  %3512 = vst.msk [vmem:[#allocation2 + $0x80] sm:$0xff] %vm216_vm0, %v3476_v30  ;;  %3918 = vst.msk [vmem:[#allocation2 + $0x60] sm:$0xff] %vm216_vm0, %v3882_v46  ;;  %v3883_v1 = vadd.f32 %v3778_v10, %v3599_v0  ;;  %v4897_v53 = vsel %vm216_vm0, %v4856_v55, 0.0  ;;  %v5848_v13 = vpop.f32.mrb[144].mxu0 }
 0x20b   : > { %3515 = vst.msk [vmem:[#allocation2 + $0x98] sm:$0xff] %vm216_vm0, %v3479_v41  ;;  %3989 = vst.msk [vmem:[%s8019_s10 + $0x58] sm:$0xff] %vm216_vm0, %v3953_v33  ;;  %v4746_v50 = vmul.f32 %v7390_v26, %v3953_v33  ;;  %v3951_v58 = vld [vmem:[#allocation2 + $0x48] sm:$0xff]  ;;  %v8606_v8 = vshrl.u32 %v7985_v32, 4  ;;  %v4786_v6 = vsel %vm216_vm0, %v4743_v45, 0.0  ;;  %v4858_v59 = vmul.f32 %v4743_v45, %v3950_v7  ;;  %v5812_v26 = vpop.f32.mrb[144].mxu1 }
 0x20c   : > { %v4785_v52 = vadd.f32 %v4784_v44, %v4783_v4  ;;  %3921 = vst.msk [vmem:[#allocation2 + $0x78] sm:$0xff] %vm216_vm0, %v3885_v28  ;;  %v4898_v61 = vadd.f32 %v4897_v53, %v4896_v27  ;;  %3987 = vst.msk [vmem:[%s8019_s10 + $0x48] sm:$0xff] %vm216_vm0, %v3951_v58  ;;  %v4744_v55 = vmul.f32 %v7408_v48, %v3951_v58  ;;  %v3791_v44 = vpop.f32.mrb[145].mxu0  ;;  %v4899_v10 = vsel %vm216_vm0, %v4857_v63, 0.0  ;;  %v3397_v14 = vpop.f32.mrb[145].mxu1  ;;  %v3198_v41 = vld [vmem:[#allocation2 + $0xb0] sm:$0xff] }
 0x20d   : > { %v8163_v35 = vmul.u32 18, %v8606_v8  ;;  %3513 = vst.msk [vmem:[#allocation2 + $0x88] sm:$0xff] %vm216_vm0, %v3477_v23  ;;  %3919 = vst.msk [vmem:[#allocation2 + $0x68] sm:$0xff] %vm216_vm0, %v3883_v1  ;;  %v4790_v32 = vsel %vm216_vm0, %v4745_v57, 0.0  ;;  %v4860_v49 = vmul.f32 %v4745_v57, %v3952_v16  ;;  %v5849_v22 = vpop.f32.mrb[146].mxu0  ;;  %v4901_v30 = vsel %vm216_vm0, %v4858_v59, 0.0 }
 0x20e   : > { %v4787_v18 = vadd.f32 %v4786_v6, %v4785_v52  ;;  %v4900_v31 = vadd.f32 %v4899_v10, %v4898_v61  ;;  %v4788_v46 = vsel %vm216_vm0, %v4744_v55, 0.0  ;;  %v4859_v48 = vmul.f32 %v4744_v55, %v3951_v58  ;;  %v3604_v38 = vld [vmem:[#allocation2 + $0x90] sm:$0xff]  ;;  %v5813_v4 = vpop.f32.mrb[146].mxu1  ;;  %v8175_v3 = vpop.f32.mrb[147].mxu0  ;;  %v3196_v57 = vld [vmem:[#allocation2 + $0xa0] sm:$0xff]  ;;  %v3197_v52 = vld [vmem:[#allocation2 + $0xa8] sm:$0xff] }
 0x20f   : > { %v4792_v63 = vsel %vm216_vm0, %v4746_v50, 0.0  ;;  %v3482_v28 = vadd.f32 %v5812_v26, %v3198_v41  ;;  %v3888_v16 = vadd.f32 %v5848_v13, %v3604_v38  ;;  %v3400_v0 = vpop.f32.mrb[147].mxu1  ;;  %v3480_v1 = vadd.f32 %v3397_v14, %v3196_v57  ;;  %v3202_v57 = vld [vmem:[#allocation2 + $0xd0] sm:$0xff] }
 0x210   : > { %v4789_v7 = vadd.f32 %v4788_v46, %v4787_v18  ;;  %v4902_v27 = vadd.f32 %v4901_v30, %v4900_v31  ;;  %v4903_v45 = vsel %vm216_vm0, %v4859_v48, 0.0  ;;  %v3956_v23 = vld [vmem:[#allocation2 + $0x70] sm:$0xff]  ;;  %v3483_v53 = vadd.f32 %v5813_v4, %v3199_v29 }
 0x211   : > { %v4861_v58 = vmul.f32 %v4746_v50, %v3953_v33  ;;  %3992 = vst.msk [vmem:[%s8019_s10 + $0x70] sm:$0xff] %vm216_vm0, %v3956_v23  ;;  %v4749_v61 = vmul.f32 %v7486_v40, %v3956_v23  ;;  %v3954_v6 = vld [vmem:[#allocation2 + $0x60] sm:$0xff]  ;;  %3518 = vst.msk [vmem:[#allocation2 + $0xb0] sm:$0xff] %vm216_vm0, %v3482_v28  ;;  %v3481_v55 = vadd.f32 %v3400_v0, %v3197_v52 }
 0x212   : > { %v4791_v8 = vadd.f32 %v4790_v32, %v4789_v7  ;;  %3924 = vst.msk [vmem:[#allocation2 + $0x90] sm:$0xff] %vm216_vm0, %v3888_v16  ;;  %v3602_v13 = vld [vmem:[#allocation2 + $0x80] sm:$0xff]  ;;  %v3605_v59 = vld [vmem:[#allocation2 + $0x98] sm:$0xff]  ;;  %v4904_v26 = vadd.f32 %v4903_v45, %v4902_v27  ;;  %3990 = vst.msk [vmem:[%s8019_s10 + $0x60] sm:$0xff] %vm216_vm0, %v3954_v6  ;;  %v4747_v10 = vmul.f32 %v7491_v19, %v3954_v6  ;;  %v4905_v32 = vsel %vm216_vm0, %v4860_v49, 0.0  ;;  %v5852_v31 = vpop.f32.mrb[148].mxu0 }
 0x213   : > { %v3957_v33 = vld [vmem:[#allocation2 + $0x78] sm:$0xff]  ;;  %3516 = vst.msk [vmem:[#allocation2 + $0xa0] sm:$0xff] %vm216_vm0, %v3480_v1  ;;  %v3886_v50 = vadd.f32 %v3791_v44, %v3602_v13  ;;  %3519 = vst.msk [vmem:[#allocation2 + $0xb8] sm:$0xff] %vm216_vm0, %v3483_v53  ;;  %v3889_v40 = vadd.f32 %v5849_v22, %v3605_v59  ;;  %v8195_v19 = vsub.s32 %v7721_v21, %v8102_v56  ;;  %v5816_v41 = vpop.f32.mrb[148].mxu1  ;;  %v3807_v21 = vpop.f32.mrb[149].mxu0  ;;  %v4907_v56 = vsel %vm216_vm0, %v4861_v58, 0.0 }
 0x214   : > { %v4793_v18 = vadd.f32 %v4792_v63, %v4791_v8  ;;  %3993 = vst.msk [vmem:[%s8019_s10 + $0x78] sm:$0xff] %vm216_vm0, %v3957_v33  ;;  %v3955_v14 = vld [vmem:[#allocation2 + $0x68] sm:$0xff]  ;;  %3517 = vst.msk [vmem:[#allocation2 + $0xa8] sm:$0xff] %vm216_vm0, %v3481_v55  ;;  %v8199_v30 = vsub.s32 %v7727_v36, %v8105_v5  ;;  %v4906_v44 = vadd.f32 %v4905_v32, %v4904_v26  ;;  %v4794_v22 = vsel %vm216_vm0, %v4747_v10, 0.0  ;;  %v3413_v4 = vpop.f32.mrb[149].mxu1  ;;  %v5853_v63 = vpop.f32.mrb[150].mxu0 }
 0x215   : > { %v4862_v46 = vmul.f32 %v4747_v10, %v3954_v6  ;;  %3991 = vst.msk [vmem:[%s8019_s10 + $0x68] sm:$0xff] %vm216_vm0, %v3955_v14  ;;  %v4748_v49 = vmul.f32 %v7579_v42, %v3955_v14  ;;  %3922 = vst.msk [vmem:[#allocation2 + $0x80] sm:$0xff] %vm216_vm0, %v3886_v50  ;;  %v3603_v48 = vld [vmem:[#allocation2 + $0x88] sm:$0xff]  ;;  %v4798_v36 = vsel %vm216_vm0, %v4749_v61, 0.0  ;;  %v4750_v38 = vmul.f32 %v7553_v54, %v3957_v33  ;;  %v5817_v29 = vpop.f32.mrb[150].mxu1  ;;  %v3810_v0 = vpop.f32.mrb[151].mxu0 }
 0x216   : > { %3925 = vst.msk [vmem:[#allocation2 + $0x98] sm:$0xff] %vm216_vm0, %v3889_v40  ;;  %v4795_v5 = vadd.f32 %v4794_v22, %v4793_v18  ;;  %v4908_v7 = vadd.f32 %v4907_v56, %v4906_v44  ;;  %v4864_v27 = vmul.f32 %v4749_v61, %v3956_v23  ;;  %v3887_v1 = vadd.f32 %v8175_v3, %v3603_v48  ;;  %v3200_v52 = vld [vmem:[#allocation2 + $0xc0] sm:$0xff]  ;;  %v3203_v58 = vld [vmem:[#allocation2 + $0xd8] sm:$0xff]  ;;  %v3416_v54 = vpop.f32.mrb[151].mxu1  ;;  %v3201_v10 = vld [vmem:[#allocation2 + $0xc8] sm:$0xff] }
 0x217   : > { %v4909_v28 = vsel %vm216_vm0, %v4862_v46, 0.0  ;;  %v4796_v42 = vsel %vm216_vm0, %v4748_v49, 0.0  ;;  %v4863_v16 = vmul.f32 %v4748_v49, %v3955_v14  ;;  %v3486_v53 = vadd.f32 %v5816_v41, %v3202_v57 }
 0x218   : > { %v4797_v45 = vadd.f32 %v4796_v42, %v4795_v5  ;;  %v4910_v8 = vadd.f32 %v4909_v28, %v4908_v7  ;;  %v3608_v59 = vld [vmem:[#allocation2 + $0xb0] sm:$0xff]  ;;  %v3484_v55 = vadd.f32 %v3413_v4, %v3200_v52  ;;  %v3487_v26 = vadd.f32 %v5817_v29, %v3203_v58  ;;  %3923 = vst.msk [vmem:[#allocation2 + $0x88] sm:$0xff] %vm216_vm0, %v3887_v1 }
 0x219   : > { %v4911_v6 = vsel %vm216_vm0, %v4863_v16, 0.0  ;;  %v8214_v13 = vld [vmem:[#allocation2 + $0x90] sm:$0xff]  ;;  %v4865_v50 = vmul.f32 %v4750_v38, %v3957_v33  ;;  %3522 = vst.msk [vmem:[#allocation2 + $0xd0] sm:$0xff] %vm216_vm0, %v3486_v53  ;;  %v3892_v3 = vadd.f32 %v5852_v31, %v3608_v59  ;;  %v3485_v32 = vadd.f32 %v3416_v54, %v3201_v10  ;;  %v3205_v54 = vld [vmem:[#allocation2 + $0xe8] sm:$0xff] }
 0x21a   : > { %v4799_v40 = vadd.f32 %v4798_v36, %v4797_v45  ;;  %3996 = vst.msk [vmem:[%s8019_s10 + $0x90] sm:$0xff] %vm216_vm0, %v8214_v13  ;;  %v3606_v23 = vld [vmem:[#allocation2 + $0xa0] sm:$0xff]  ;;  %v3609_v61 = vld [vmem:[#allocation2 + $0xb8] sm:$0xff]  ;;  %v4912_v18 = vadd.f32 %v4911_v6, %v4910_v8  ;;  %3520 = vst.msk [vmem:[#allocation2 + $0xc0] sm:$0xff] %vm216_vm0, %v3484_v55  ;;  %vm4481_vm9 = vcmp.ne.s32.totalorder %v8195_v19, 0  ;;  %v4913_v22 = vsel %vm216_vm0, %v4864_v27, 0.0 }
 0x21b   : > { %v3890_v14 = vadd.f32 %v3807_v21, %v3606_v23  ;;  %3523 = vst.msk [vmem:[#allocation2 + $0xd8] sm:$0xff] %vm216_vm0, %v3487_v26  ;;  %v3893_v33 = vadd.f32 %v5853_v63, %v3609_v61  ;;  %v3607_v44 = vld [vmem:[#allocation2 + $0xa8] sm:$0xff]  ;;  %v4800_v46 = vsel %vm216_vm0, %v4750_v38, 0.0  ;;  %3928 = vst.msk [vmem:[#allocation2 + $0xb0] sm:$0xff] %vm216_vm0, %v3892_v3  ;;  %v5856_v41 = vpop.f32.mrb[152].mxu0  ;;  %vm4517_vm10 = vcmp.lt.s32.totalorder %v8195_v19, 0 }
 0x21c   : > { %v3958_v31 = vld [vmem:[#allocation2 + $0x80] sm:$0xff]  ;;  %3521 = vst.msk [vmem:[#allocation2 + $0xc8] sm:$0xff] %vm216_vm0, %v3485_v32  ;;  %v3891_v48 = vadd.f32 %v3810_v0, %v3607_v44  ;;  %v4914_v21 = vadd.f32 %v4913_v22, %v4912_v18  ;;  %v4801_v36 = vadd.f32 %v4800_v46, %v4799_v40  ;;  %v3206_v5 = vld [vmem:[#allocation2 + $0xf0] sm:$0xff]  ;;  %v5820_v38 = vpop.f32.mrb[152].mxu1  ;;  %v3823_v4 = vpop.f32.mrb[153].mxu0  ;;  %v8240_v63 = vadd.s32 18, %v8195_v19  ;;  %vm8256_vm15 = vmand %vm4517_vm10, %vm4481_vm9 }
 0x21d   : > { %v8226_v49 = vld [vmem:[#allocation2 + $0x98] sm:$0xff]  ;;  %3994 = vst.msk [vmem:[%s8019_s10 + $0x80] sm:$0xff] %vm216_vm0, %v3958_v31  ;;  %v4751_v56 = vmul.f32 %v7602_v20, %v3958_v31  ;;  %3926 = vst.msk [vmem:[#allocation2 + $0xa0] sm:$0xff] %vm216_vm0, %v3890_v14  ;;  %v4915_v7 = vsel %vm216_vm0, %v4865_v50, 0.0  ;;  %v4753_v28 = vmul.f32 %v7589_v2, %v8214_v13  ;;  %v3490_v20 = vadd.f32 %v5820_v38, %v3206_v5  ;;  %v3429_v42 = vpop.f32.mrb[153].mxu1  ;;  %v5857_v16 = vpop.f32.mrb[154].mxu0 }
 0x21e   : > { %3997 = vst.msk [vmem:[%s8019_s10 + $0x98] sm:$0xff] %vm216_vm0, %v8226_v49  ;;  %3929 = vst.msk [vmem:[#allocation2 + $0xb8] sm:$0xff] %vm216_vm0, %v3893_v33  ;;  %vm4479_vm11 = vcmp.ne.s32.totalorder %v8199_v30, 0  ;;  %v4916_v0 = vadd.f32 %v4915_v7, %v4914_v21  ;;  %v3204_v27 = vld [vmem:[#allocation2 + $0xe0] sm:$0xff]  ;;  %v3207_v45 = vld [vmem:[#allocation2 + $0xf8] sm:$0xff]  ;;  %v5821_v1 = vpop.f32.mrb[154].mxu1  ;;  %v4754_v2 = vmul.f32 %v7651_v11, %v8226_v49  ;;  %v8262_v59 = vsub.s32 %v7730_v47, %v8163_v35 }
 0x21f   : > { %3927 = vst.msk [vmem:[#allocation2 + $0xa8] sm:$0xff] %vm216_vm0, %v3891_v48  ;;  %v4802_v57 = vsel %vm216_vm0, %v4751_v56, 0.0  ;;  %v4866_v29 = vmul.f32 %v4751_v56, %v3958_v31  ;;  %v3826_v53 = vpop.f32.mrb[155].mxu0  ;;  %vm4515_vm12 = vcmp.lt.s32.totalorder %v8199_v30, 0  ;;  %3526 = vst.msk [vmem:[#allocation2 + $0xf0] sm:$0xff] %vm216_vm0, %v3490_v20  ;;  %v3488_v52 = vadd.f32 %v3429_v42, %v3204_v27  ;;  %v3432_v8 = vpop.f32.mrb[155].mxu1 }
 0x220   : > { %v3491_v58 = vadd.f32 %v5821_v1, %v3207_v45  ;;  %v4803_v55 = vadd.f32 %v4802_v57, %v4801_v36  ;;  %v3959_v26 = vld [vmem:[#allocation2 + $0x88] sm:$0xff]  ;;  %v3612_v10 = vld [vmem:[#allocation2 + $0xd0] sm:$0xff]  ;;  %v3489_v50 = vadd.f32 %v3432_v8, %v3205_v54  ;;  %v8266_v40 = vadd.s32 18, %v8199_v30  ;;  %vm8278_vm1 = vmand %vm4515_vm12, %vm4479_vm11 }
 0x221   : > { %v4917_v11 = vsel %vm216_vm0, %v4866_v29, 0.0  ;;  %v4868_v3 = vmul.f32 %v4753_v28, %v8214_v13  ;;  %3995 = vst.msk [vmem:[%s8019_s10 + $0x88] sm:$0xff] %vm216_vm0, %v3959_v26  ;;  %v4752_v23 = vmul.f32 %v7701_v37, %v3959_v26  ;;  %v3896_v61 = vadd.f32 %v5856_v41, %v3612_v10  ;;  %3524 = vst.msk [vmem:[#allocation2 + $0xe0] sm:$0xff] %vm216_vm0, %v3488_v52  ;;  %v3610_v47 = vld [vmem:[#allocation2 + $0xc0] sm:$0xff]  ;;  %v3210_v8 = vld [vmem:[#allocation2 + $0x110] sm:$0xff] }
 0x222   : > { %3527 = vst.msk [vmem:[#allocation2 + $0xf8] sm:$0xff] %vm216_vm0, %v3491_v58  ;;  %v3613_v35 = vld [vmem:[#allocation2 + $0xd8] sm:$0xff]  ;;  %v4420_v13 = vshrl.u32 %v8091_v62, 4  ;;  %v4918_v18 = vadd.f32 %v4917_v11, %v4916_v0  ;;  %v3964_v37 = vld [vmem:[#allocation2 + $0xb0] sm:$0xff]  ;;  %v3894_v14 = vadd.f32 %v3823_v4, %v3610_v47  ;;  %3525 = vst.msk [vmem:[#allocation2 + $0xe8] sm:$0xff] %vm216_vm0, %v3489_v50  ;;  %v4625_v22 = vsel %vm8256_vm15, %v8240_v63, %v8195_v19  ;;  %v5860_v56 = vpop.f32.mrb[156].mxu0 }
 0x223   : > { %v3897_v33 = vadd.f32 %v5857_v16, %v3613_v35  ;;  %v3611_v44 = vld [vmem:[#allocation2 + $0xc8] sm:$0xff]  ;;  %v4869_v46 = vmul.f32 %v4754_v2, %v8226_v49  ;;  %v4804_v31 = vsel %vm216_vm0, %v4752_v23, 0.0  ;;  %v4867_v48 = vmul.f32 %v4752_v23, %v3959_v26  ;;  %4000 = vst.msk [vmem:[%s8019_s10 + $0xb0] sm:$0xff] %vm216_vm0, %v3964_v37  ;;  %3932 = vst.msk [vmem:[#allocation2 + $0xd0] sm:$0xff] %vm216_vm0, %v3896_v61  ;;  %v5824_v4 = vpop.f32.mrb[156].mxu1  ;;  %v3839_v7 = vpop.f32.mrb[157].mxu0 }
 0x224   : > { %v3962_v62 = vld [vmem:[#allocation2 + $0xa0] sm:$0xff]  ;;  %v3895_v21 = vadd.f32 %v3826_v53, %v3611_v44  ;;  %v4806_v36 = vsel %vm216_vm0, %v4753_v28, 0.0  ;;  %v4805_v5 = vadd.f32 %v4804_v31, %v4803_v55  ;;  %3930 = vst.msk [vmem:[#allocation2 + $0xc0] sm:$0xff] %vm216_vm0, %v3894_v14  ;;  %v4623_v28 = vsel %vm8278_vm1, %v8266_v40, %v8199_v30  ;;  %v3445_v57 = vpop.f32.mrb[157].mxu1  ;;  %v5861_v29 = vpop.f32.mrb[158].mxu0  ;;  %v8615_v32 = vld [vmem:[#allocation4_spill] sm:$0xff] }
 0x225   : > { %v8292_v41 = vld [vmem:[#allocation2 + $0xb8] sm:$0xff]  ;;  %3998 = vst.msk [vmem:[%s8019_s10 + $0xa0] sm:$0xff] %vm216_vm0, %v3962_v62  ;;  %v4755_v49 = vmul.f32 %v7795_v25, %v3962_v62  ;;  %3933 = vst.msk [vmem:[#allocation2 + $0xd8] sm:$0xff] %vm216_vm0, %v3897_v33  ;;  %v4921_v20 = vsel %vm216_vm0, %v4868_v3, 0.0  ;;  %v4808_v42 = vsel %vm216_vm0, %v4754_v2, 0.0  ;;  %v4919_v25 = vsel %vm216_vm0, %v4867_v48, 0.0 }
 0x226   : > { %4001 = vst.msk [vmem:[%s8019_s10 + $0xb8] sm:$0xff] %vm216_vm0, %v8292_v41  ;;  %v3963_v38 = vld [vmem:[#allocation2 + $0xa8] sm:$0xff]  ;;  %3931 = vst.msk [vmem:[#allocation2 + $0xc8] sm:$0xff] %vm216_vm0, %v3895_v21  ;;  %v4807_v0 = vadd.f32 %v4806_v36, %v4805_v5  ;;  %v4920_v27 = vadd.f32 %v4919_v25, %v4918_v18  ;;  %v4757_v45 = vmul.f32 %v7777_v51, %v3964_v37  ;;  %v3616_v53 = vld [vmem:[#allocation2 + $0xf0] sm:$0xff]  ;;  %v5825_v52 = vpop.f32.mrb[158].mxu1  ;;  %v3842_v58 = vpop.f32.mrb[159].mxu0 }
 0x227   : > { %3999 = vst.msk [vmem:[%s8019_s10 + $0xa8] sm:$0xff] %vm216_vm0, %v3963_v38  ;;  %v4756_v16 = vmul.f32 %v7996_v34, %v3963_v38  ;;  %v4870_v1 = vmul.f32 %v4755_v49, %v3962_v62  ;;  %vm4482_vm3 = vcmp.ne.s32.totalorder %v8262_v59, 0  ;;  %vm4518_vm4 = vcmp.lt.s32.totalorder %v8262_v59, 0  ;;  %v3448_v55 = vpop.f32.mrb[159].mxu1  ;;  %v3208_v3 = vld [vmem:[#allocation2 + $0x100] sm:$0xff]  ;;  %v3211_v33 = vld [vmem:[#allocation2 + $0x118] sm:$0xff] }
 0x228   : > { %v4923_v2 = vsel %vm216_vm0, %v4869_v46, 0.0  ;;  %v4810_v34 = vsel %vm216_vm0, %v4755_v49, 0.0  ;;  %v4758_v54 = vmul.f32 %v7991_v39, %v8292_v41  ;;  %v4421_v11 = vmul.u32 18, %v4420_v13  ;;  %v3614_v23 = vld [vmem:[#allocation2 + $0xe0] sm:$0xff]  ;;  %v3209_v48 = vld [vmem:[#allocation2 + $0x108] sm:$0xff]  ;;  %vm8363_vm5 = vmand %vm4518_vm4, %vm4482_vm3 }
 0x229   : > { %v4922_v26 = vadd.f32 %v4921_v20, %v4920_v27  ;;  %v4809_v51 = vadd.f32 %v4808_v42, %v4807_v0  ;;  %v4812_v10 = vsel %vm216_vm0, %v4756_v16, 0.0  ;;  %v4871_v50 = vmul.f32 %v4756_v16, %v3963_v38  ;;  %v3617_v61 = vld [vmem:[#allocation2 + $0xf8] sm:$0xff]  ;;  %v3615_v62 = vld [vmem:[#allocation2 + $0xe8] sm:$0xff] }
 0x22a   : > { %v4925_v47 = vsel %vm216_vm0, %v4870_v1, 0.0  ;;  %v3494_v35 = vadd.f32 %v5824_v4, %v3210_v8  ;;  %v3900_v18 = vadd.f32 %v5860_v56, %v3616_v53  ;;  %v3492_v14 = vadd.f32 %v3445_v57, %v3208_v3  ;;  %v3968_v31 = vld [vmem:[#allocation2 + $0xd0] sm:$0xff]  ;;  %v5864_v38 = vpop.f32.mrb[160].mxu0 }
 0x22b   : > { %v4872_v44 = vmul.f32 %v4757_v45, %v3964_v37  ;;  %v4811_v39 = vadd.f32 %v4810_v34, %v4809_v51  ;;  %v4924_v46 = vadd.f32 %v4923_v2, %v4922_v26  ;;  %v3898_v13 = vadd.f32 %v3839_v7, %v3614_v23  ;;  %4004 = vst.msk [vmem:[%s8019_s10 + $0xd0] sm:$0xff] %vm216_vm0, %v3968_v31  ;;  %v3966_v36 = vld [vmem:[#allocation2 + $0xc0] sm:$0xff]  ;;  %v3855_v16 = vpop.f32.mrb[161].mxu0 }
 0x22c   : > { %v4927_v21 = vsel %vm216_vm0, %v4871_v50, 0.0  ;;  %v3969_v5 = vld [vmem:[#allocation2 + $0xd8] sm:$0xff]  ;;  %3530 = vst.msk [vmem:[#allocation2 + $0x110] sm:$0xff] %vm216_vm0, %v3494_v35  ;;  %3936 = vst.msk [vmem:[#allocation2 + $0xf0] sm:$0xff] %vm216_vm0, %v3900_v18  ;;  %v3495_v37 = vadd.f32 %v5825_v52, %v3211_v33  ;;  %v3901_v56 = vadd.f32 %v5861_v29, %v3617_v61  ;;  %v3493_v49 = vadd.f32 %v3448_v55, %v3209_v48  ;;  %v5865_v27 = vpop.f32.mrb[162].mxu0 }
 0x22d   : > { %3528 = vst.msk [vmem:[#allocation2 + $0x100] sm:$0xff] %vm216_vm0, %v3492_v14  ;;  %v4814_v4 = vsel %vm216_vm0, %v4757_v45, 0.0  ;;  %v4926_v7 = vadd.f32 %v4925_v47, %v4924_v46  ;;  %v4813_v20 = vadd.f32 %v4812_v10, %v4811_v39  ;;  %4002 = vst.msk [vmem:[%s8019_s10 + $0xc0] sm:$0xff] %vm216_vm0, %v3966_v36  ;;  %v4759_v42 = vmul.f32 %v8024_v12, %v3966_v36  ;;  %v3967_v25 = vld [vmem:[#allocation2 + $0xc8] sm:$0xff] }
 0x22e   : > { %4005 = vst.msk [vmem:[%s8019_s10 + $0xd8] sm:$0xff] %vm216_vm0, %v3969_v5  ;;  %3934 = vst.msk [vmem:[#allocation2 + $0xe0] sm:$0xff] %vm216_vm0, %v3898_v13  ;;  %v4873_v57 = vmul.f32 %v4758_v54, %v8292_v41  ;;  %v4761_v29 = vmul.f32 %v8007_v9, %v3968_v31  ;;  %v4760_v0 = vmul.f32 %v8034_v43, %v3967_v25  ;;  %v3858_v41 = vpop.f32.mrb[163].mxu0  ;;  %v4929_v9 = vsel %vm216_vm0, %v4872_v44, 0.0 }
 0x22f   : > { %4003 = vst.msk [vmem:[%s8019_s10 + $0xc8] sm:$0xff] %vm216_vm0, %v3967_v25  ;;  %3531 = vst.msk [vmem:[#allocation2 + $0x118] sm:$0xff] %vm216_vm0, %v3495_v37  ;;  %v3899_v12 = vadd.f32 %v3842_v58, %v3615_v62  ;;  %v4815_v45 = vadd.f32 %v4814_v4, %v4813_v20  ;;  %v4928_v1 = vadd.f32 %v4927_v21, %v4926_v7  ;;  %v4816_v2 = vsel %vm216_vm0, %v4758_v54, 0.0  ;;  %v8616_v4 = vld [vmem:[#allocation3_spill] sm:$0xff] }
 0x230   : > { %3937 = vst.msk [vmem:[#allocation2 + $0xf8] sm:$0xff] %vm216_vm0, %v3901_v56  ;;  %3529 = vst.msk [vmem:[#allocation2 + $0x108] sm:$0xff] %vm216_vm0, %v3493_v49  ;;  %v4874_v53 = vmul.f32 %v4759_v42, %v3966_v36  ;;  %v4762_v52 = vmul.f32 %v8029_v24, %v3969_v5  ;;  %v4818_v43 = vsel %vm216_vm0, %v4759_v42, 0.0  ;;  %v8351_v34 = vsub.s32 %v7780_v60, %v4421_v11 }
 0x231   : > { %3935 = vst.msk [vmem:[#allocation2 + $0xe8] sm:$0xff] %vm216_vm0, %v3899_v12  ;;  %v4930_v8 = vadd.f32 %v4929_v9, %v4928_v1  ;;  %v4817_v58 = vadd.f32 %v4816_v2, %v4815_v45  ;;  %v4875_v55 = vmul.f32 %v4760_v0, %v3967_v25  ;;  %v8354_v26 = vadd.s32 18, %v8262_v59  ;;  %v8619_v12 = vld [vmem:[#allocation5_spill] sm:$0xff] }
 0x232   : > { %v4931_v24 = vsel %vm216_vm0, %v4873_v57, 0.0  ;;  %v4876_v51 = vmul.f32 %v4761_v29, %v3968_v31  ;;  %v4933_v10 = vsel %vm216_vm0, %v4874_v53, 0.0  ;;  %v4820_v54 = vsel %vm216_vm0, %v4760_v0, 0.0 }
 0x233   : > { %v4819_v11 = vadd.f32 %v4818_v43, %v4817_v58  ;;  %v4932_v50 = vadd.f32 %v4931_v24, %v4930_v8  ;;  %v4877_v3 = vmul.f32 %v4762_v52, %v3969_v5  ;;  %v3972_v23 = vld [vmem:[#allocation2 + $0xf0] sm:$0xff]  ;;  %vm8372_vm6 = vcmp.lt.s32.totalorder %v4623_v28, 16 }
 0x234   : > { %v3620_v61 = vld [vmem:[#allocation2 + $0x110] sm:$0xff]  ;;  %v3618_v47 = vld [vmem:[#allocation2 + $0x100] sm:$0xff]  ;;  %v4935_v18 = vsel %vm216_vm0, %v4875_v55, 0.0  ;;  %4008 = vst.msk [vmem:[%s8019_s10 + $0xf0] sm:$0xff] %vm216_vm0, %v3972_v23  ;;  %vm4480_vm13 = vcmp.ne.s32.totalorder %v8351_v34, 0  ;;  %vm4516_vm14 = vcmp.lt.s32.totalorder %v8351_v34, 0  ;;  %v4626_v62 = vsel %vm8363_vm5, %v8354_v26, %v8262_v59 }
 0x235   : > { %v3970_v14 = vld [vmem:[#allocation2 + $0xe0] sm:$0xff]  ;;  %v3904_v33 = vadd.f32 %v5864_v38, %v3620_v61  ;;  %v3902_v44 = vadd.f32 %v3855_v16, %v3618_v47  ;;  %v4934_v39 = vadd.f32 %v4933_v10, %v4932_v50  ;;  %v4821_v46 = vadd.f32 %v4820_v54, %v4819_v11  ;;  %vm8406_vm2 = vmand %vm4516_vm14, %vm4480_vm13 }
 0x236   : > { %4006 = vst.msk [vmem:[%s8019_s10 + $0xe0] sm:$0xff] %vm216_vm0, %v3970_v14  ;;  %v4763_v30 = vmul.f32 %v8615_v32, %v3970_v14  ;;  %v3621_v28 = vld [vmem:[#allocation2 + $0x118] sm:$0xff]  ;;  %v4822_v31 = vsel %vm216_vm0, %v4761_v29, 0.0  ;;  %v4937_v13 = vsel %vm216_vm0, %v4876_v51, 0.0  ;;  %v4588_v49 = vadd.s32 18, %v8351_v34 }
 0x237   : > { %v3973_v40 = vld [vmem:[#allocation2 + $0xf8] sm:$0xff]  ;;  %3940 = vst.msk [vmem:[#allocation2 + $0x110] sm:$0xff] %vm216_vm0, %v3904_v33  ;;  %3938 = vst.msk [vmem:[#allocation2 + $0x100] sm:$0xff] %vm216_vm0, %v3902_v44  ;;  %v3905_v48 = vadd.f32 %v5865_v27, %v3621_v28  ;;  %v3619_v21 = vld [vmem:[#allocation2 + $0x108] sm:$0xff]  ;;  %v4823_v36 = vadd.f32 %v4822_v31, %v4821_v46  ;;  %v4936_v5 = vadd.f32 %v4935_v18, %v4934_v39  ;;  %v4824_v38 = vsel %vm216_vm0, %v4762_v52, 0.0 }
 0x238   : > { %4009 = vst.msk [vmem:[%s8019_s10 + $0xf8] sm:$0xff] %vm216_vm0, %v3973_v40  ;;  %v4878_v37 = vmul.f32 %v4763_v30, %v3970_v14  ;;  %v3971_v56 = vld [vmem:[#allocation2 + $0xe8] sm:$0xff]  ;;  %v4765_v7 = vmul.f32 %v8616_v4, %v3972_v23  ;;  %v4826_v20 = vsel %vm216_vm0, %v4763_v30, 0.0  ;;  %v4939_v25 = vsel %vm216_vm0, %v4877_v3, 0.0 }
 0x239   : > { %4007 = vst.msk [vmem:[%s8019_s10 + $0xe8] sm:$0xff] %vm216_vm0, %v3971_v56  ;;  %v4764_v42 = vmul.f32 %v8132_v17, %v3971_v56  ;;  %3941 = vst.msk [vmem:[#allocation2 + $0x118] sm:$0xff] %vm216_vm0, %v3905_v48  ;;  %v4938_v16 = vadd.f32 %v4937_v13, %v4936_v5  ;;  %v4825_v57 = vadd.f32 %v4824_v38, %v4823_v36  ;;  %v5320_v52 = vsel %vm8372_vm6, 1.0, %v8558_v15 }
 0x23a   : > { %v3903_v29 = vadd.f32 %v3858_v41, %v3619_v21  ;;  %v4941_v0 = vsel %vm216_vm0, %v4878_v37, 0.0  ;;  %v4766_v27 = vmul.f32 %v8619_v12, %v3973_v40  ;;  %v4624_v41 = vsel %vm8406_vm2, %v4588_v49, %v8351_v34 }
 0x23b   : > { %v4828_v17 = vsel %vm216_vm0, %v4764_v42, 0.0  ;;  %v4879_v45 = vmul.f32 %v4764_v42, %v3971_v56  ;;  %v4827_v1 = vadd.f32 %v4826_v20, %v4825_v57  ;;  %v4940_v53 = vadd.f32 %v4939_v25, %v4938_v16 }
 0x23c   : > { %3939 = vst.msk [vmem:[#allocation2 + $0x108] sm:$0xff] %vm216_vm0, %v3903_v29  ;;  %v4880_v9 = vmul.f32 %v4765_v7, %v3972_v23  ;;  %vm4661_vm7 = vcmp.lt.s32.totalorder %v4625_v22, 16  ;;  %vm8427_vm8 = vcmp.lt.s32.totalorder %v4626_v62, 16  ;;  %v4830_v34 = vsel %vm216_vm0, %v4765_v7, 0.0 }
 0x23d   : > { %v4943_v2 = vsel %vm216_vm0, %v4879_v45, 0.0  ;;  %v4942_v43 = vadd.f32 %v4941_v0, %v4940_v53  ;;  %v4829_v8 = vadd.f32 %v4828_v17, %v4827_v1  ;;  %v4881_v24 = vmul.f32 %v4766_v27, %v3973_v40 }
 0x23e   : > { %v3976_v58 = vld [vmem:[#allocation2 + $0x110] sm:$0xff]  ;;  %v3974_v55 = vld [vmem:[#allocation2 + $0x100] sm:$0xff]  ;;  %vm4660_vm9 = vcmp.lt.s32.totalorder %v4624_v41, 16  ;;  %v5322_v22 = vsel %vm4661_vm7, 1.0, %v8558_v15  ;;  %v4945_v10 = vsel %vm216_vm0, %v4880_v9, 0.0  ;;  %v4832_v54 = vsel %vm216_vm0, %v4766_v27, 0.0 }
 0x23f   : > { %4012 = vst.msk [vmem:[%s8019_s10 + $0x110] sm:$0xff] %vm216_vm0, %v3976_v58  ;;  %4010 = vst.msk [vmem:[%s8019_s10 + $0x100] sm:$0xff] %vm216_vm0, %v3974_v55  ;;  %v4767_v6 = vmul.f32 %v5320_v52, %v3974_v55  ;;  %v4831_v19 = vadd.f32 %v4830_v34, %v4829_v8  ;;  %v4944_v63 = vadd.f32 %v4943_v2, %v4942_v43  ;;  %v5323_v23 = vsel %vm8427_vm8, 1.0, %v8558_v15 }
 0x240   : > { %v3977_v51 = vld [vmem:[#allocation2 + $0x118] sm:$0xff]  ;;  %v5321_v61 = vsel %vm4660_vm9, 1.0, %v8558_v15  ;;  %v4947_v47 = vsel %vm216_vm0, %v4881_v24, 0.0  ;;  %v4769_v35 = vmul.f32 %v5322_v22, %v3976_v58  ;;  %vm4848_vm10 = vcmask 253952  }
 0x241   : > { %v4834_v60 = vsel %vm216_vm0, %v4767_v6, 0.0  ;;  %v4882_v11 = vmul.f32 %v4767_v6, %v3974_v55  ;;  %4013 = vst.msk [vmem:[%s8019_s10 + $0x118] sm:$0xff] %vm216_vm0, %v3977_v51  ;;  %v4946_v50 = vadd.f32 %v4945_v10, %v4944_v63  ;;  %v4833_v3 = vadd.f32 %v4832_v54, %v4831_v19 }
 0x242   : > { %v4770_v39 = vmul.f32 %v5323_v23, %v3977_v51  ;;  %v4884_v30 = vmul.f32 %v4769_v35, %v3976_v58  ;;  %v4838_v15 = vsel %vm216_vm0, %v4769_v35, 0.0 }
 0x243   : > { %v4949_v18 = vsel %vm216_vm0, %v4882_v11, 0.0  ;;  %v3975_v14 = vld [vmem:[#allocation2 + $0x108] sm:$0xff]  ;;  %v4835_v33 = vadd.f32 %v4834_v60, %v4833_v3  ;;  %v4948_v44 = vadd.f32 %v4947_v47, %v4946_v50 }
 0x244   : > { %4011 = vst.msk [vmem:[%s8019_s10 + $0x108] sm:$0xff] %vm216_vm0, %v3975_v14  ;;  %v4768_v46 = vmul.f32 %v5321_v61, %v3975_v14  ;;  %v4885_v13 = vmul.f32 %v4770_v39, %v3977_v51  ;;  %v4953_v36 = vsel %vm216_vm0, %v4884_v30, 0.0  ;;  %v4840_v5 = vsel %vm216_vm0, %v4770_v39, 0.0 }
 0x245   : > { %v4950_v32 = vadd.f32 %v4949_v18, %v4948_v44 }
 0x246   : > { %v4836_v40 = vsel %vm216_vm0, %v4768_v46, 0.0  ;;  %v4883_v28 = vmul.f32 %v4768_v46, %v3975_v14  ;;  %v4955_v49 = vsel %vm216_vm0, %v4885_v13, 0.0 }
 0x247   : > { %v4837_v31 = vadd.f32 %v4836_v40, %v4835_v33 }
 0x248   : > { %v4951_v48 = vsel %vm216_vm0, %v4883_v28, 0.0 }
 0x249   : > { %v4839_v62 = vadd.f32 %v4838_v15, %v4837_v31  ;;  %v4952_v21 = vadd.f32 %v4951_v48, %v4950_v32 }
 0x24b   : > { %v4841_v37 = vadd.f32 %v4840_v5, %v4839_v62  ;;  %v4954_v56 = vadd.f32 %v4953_v36, %v4952_v21 }
 0x24d   : > { %v4842_v38 = vrot.slane %v4841_v37, 4  ;;  %v4956_v4 = vadd.f32 %v4955_v49, %v4954_v56 }
 0x24f   : > { %v4843_v7 = vadd.f32 %v4842_v38, %v4841_v37  ;;  %v4957_v20 = vrot.slane %v4956_v4, 4 }
 0x251   : > { %v4844_v42 = vrot.slane %v4843_v7, 2  ;;  %v4958_v59 = vadd.f32 %v4957_v20, %v4956_v4 }
 0x253   : > { %v4845_v25 = vadd.f32 %v4844_v42, %v4843_v7  ;;  %v4959_v16 = vrot.slane %v4958_v59, 2 }
 0x255   : > { %v4846_v57 = vrot.slane %v4845_v25, 1  ;;  %v4960_v29 = vadd.f32 %v4959_v16, %v4958_v59 }
 0x257   : > { %v4847_v0 = vadd.f32 %v4846_v57, %v4845_v25  ;;  %v4961_v12 = vrot.slane %v4960_v29, 1 }
 0x259   : > { %4849 = vst.msk [vmem:[%s211_s13] sm:$0x1] %vm4848_vm10, %v4847_v0  ;;  %v4962_v27 = vadd.f32 %v4961_v12, %v4960_v29 }
 0x25b   : > { %4963 = vst.msk [vmem:[%s214_s18] sm:$0x1] %vm4848_vm10, %v4962_v27 }
 0x25c PF: > { %s15_s15 = sadd.s32 1, %s5977_s15  }
 0x25d   : > { %p12_p4 = scmp.ge.s32.totalorder %s15_s15, 4  }
 0x25f   :  { %14 = sbr.rel (!%p12_p4) target bundleno = 1 (0x1), region = 90 }

</bundles_post_ra>
